<compile_context>
chip_gen: v7x
topology: tpu7x:2x2x1
jax: 0.10.0
libtpu: 0.0.40
codegen_flags: <defaults>
</compile_context>

<pallas_src>
import functools

import jax
import jax.numpy as jnp
from jax.experimental import pallas as pl
from jax.experimental.pallas import tpu as pltpu


def _round_up(n, m):
    return ((n + m - 1) // m) * m


def _vmem_limit(step_bytes):
    """Scoped VMEM limit sized from the actual per-step working set."""
    need = int(2.0 * step_bytes) + (8 << 20)
    return max(32 << 20, min(need, 100 << 20))


# --------------------------------------------------------------------------
# Pallas kernels
# --------------------------------------------------------------------------
def _input_proj_kernel(x_ref, w_ref, b_ref, out_ref, *, taps, guard, mp_pad,
                       per_tap):
    # x_ref  : (1, cin_p, npad)  bf16 guarded, zero-halo padded-flat frame
    # w_ref  : bf16; per-tap (ntaps, 4*hid_p, cin_p) or concat (4*hid_p, ntaps*cin_p)
    # b_ref  : (4*hid_p, 1) f32
    # out_ref: (1, 4*hid_p, mp_pad) bf16  = conv_x(x_t) + bias
    x = x_ref[0]
    if per_tap:
        acc = jnp.zeros(out_ref.shape[1:], jnp.float32)
        for k, d in enumerate(taps):
            acc = acc + jnp.dot(w_ref[k], x[:, guard + d: guard + d + mp_pad],
                                preferred_element_type=jnp.float32)
    else:
        xcol = jnp.concatenate(
            [x[:, guard + d: guard + d + mp_pad] for d in taps], axis=0)
        acc = jnp.dot(w_ref[...], xcol, preferred_element_type=jnp.float32)
    out_ref[0] = (acc + b_ref[...]).astype(out_ref.dtype)


def _recurrent_kernel(xw_ref, wh_ref, mask_ref, hout_ref, cout_ref, hpad_ref,
                      *, hid_p, taps, guard, mp_pad, per_tap):
    # xw_ref  : (1, 4*hid_p, mp_pad) bf16   precomputed conv_x(x_t) + bias
    # wh_ref  : bf16; per-tap (ntaps, 4*hid_p, hid_p) or concat (4*hid_p, ntaps*hid_p)
    # mask_ref: (1, mp_pad) f32             1 at interior pixels, 0 at halos/pad
    # hout_ref: (1, hid_p, npad) bf16       h_t in guarded padded-flat layout
    # cout_ref: (hid_p, mp_pad) f32         resident carry across t; final c
    # hpad_ref: (hid_p, npad) f32           VMEM scratch carrying padded h
    t = pl.program_id(0)

    @pl.when(t == 0)
    def _init():
        hpad_ref[...] = jnp.zeros_like(hpad_ref)   # zero guards + halos once
        cout_ref[...] = jnp.zeros_like(cout_ref)

    h_bf = hpad_ref[...].astype(jnp.bfloat16)      # one cast per step

    acc = xw_ref[0].astype(jnp.float32)
    if per_tap:
        # 9 accumulating matmuls (K = hid_p each): no (9*hid_p, Mp) im2col temp.
        for k, d in enumerate(taps):
            acc = acc + jnp.dot(wh_ref[k],
                                h_bf[:, guard + d: guard + d + mp_pad],
                                preferred_element_type=jnp.float32)
    else:
        hcol = jnp.concatenate(
            [h_bf[:, guard + d: guard + d + mp_pad] for d in taps], axis=0)
        acc = acc + jnp.dot(wh_ref[...], hcol,
                            preferred_element_type=jnp.float32)

    # Gate order matches torch.split(combined_conv, hidden_dim, dim=1);
    # rows are grouped with stride hid_p, so these slices are sublane-aligned.
    i = jax.nn.sigmoid(acc[0 * hid_p:1 * hid_p, :])
    f = jax.nn.sigmoid(acc[1 * hid_p:2 * hid_p, :])
    o = jax.nn.sigmoid(acc[2 * hid_p:3 * hid_p, :])
    g = jnp.tanh(acc[3 * hid_p:4 * hid_p, :])

    # NOTE: c accumulates nonzero values at image-halo / padding columns over
    # time.  This is benign: halo c is never read when computing interior h
    # (elementwise update) and only interior columns are ever extracted.
    c_new = f * cout_ref[...] + i * g
    h_new = o * jnp.tanh(c_new) * mask_ref[...]    # keep halos/pad exactly 0

    cout_ref[...] = c_new
    hpad_ref[:, guard:guard + mp_pad] = h_new      # guard is 128-aligned
    hout_ref[0] = hpad_ref[...].astype(hout_ref.dtype)


# --------------------------------------------------------------------------
# Per-layer driver
# --------------------------------------------------------------------------
def _conv_lstm_layer(xin, wx_mat, wh_mat, b_col, mask, *, hid_p, geom,
                     per_tap_x, per_tap_h):
    """xin: (T, cin_p, npad) bf16 guarded padded-flat frames.
    Returns (h_all (T, hid_p, npad) bf16, c_last (hid_p, mp_pad) f32)."""
    T, cin_p, npad = xin.shape
    guard, mp_pad, taps = geom["guard"], geom["mp_pad"], geom["taps"]
    ntaps = len(taps)
    fourh_p = 4 * hid_p

    # ---- input-branch projection for all frames (off the recurrent path) ----
    ip_flops = 2 * fourh_p * ntaps * cin_p * mp_pad * T
    ip_bytes = (xin.size * 2 + wx_mat.size * 2 + b_col.size * 4
                + T * fourh_p * mp_pad * 2)
    ip_step_bytes = (2 * cin_p * npad * 2 + 2 * fourh_p * mp_pad * 2
                     + wx_mat.size * 2 + fourh_p * mp_pad * 4
                     + ntaps * cin_p * mp_pad * 2)
    xw = pl.pallas_call(
        functools.partial(_input_proj_kernel, taps=taps, guard=guard,
                          mp_pad=mp_pad, per_tap=per_tap_x),
        out_shape=jax.ShapeDtypeStruct((T, fourh_p, mp_pad), jnp.bfloat16),
        grid=(T,),
        in_specs=[
            pl.BlockSpec((1, cin_p, npad), lambda t: (t, 0, 0)),
            pl.BlockSpec(wx_mat.shape, lambda t: (0,) * wx_mat.ndim),
            pl.BlockSpec((fourh_p, 1), lambda t: (0, 0)),
        ],
        out_specs=pl.BlockSpec((1, fourh_p, mp_pad), lambda t: (t, 0, 0)),
        compiler_params=pltpu.CompilerParams(
            dimension_semantics=("parallel",),
            vmem_limit_bytes=_vmem_limit(ip_step_bytes)),
        cost_estimate=pl.CostEstimate(flops=ip_flops, transcendentals=0,
                                      bytes_accessed=ip_bytes),
    )(xin, wx_mat, b_col)

    # ---- recurrence: single pallas_call over time, state carried in VMEM ----
    rec_flops = 2 * fourh_p * ntaps * hid_p * mp_pad * T
    rec_trans = 5 * hid_p * mp_pad * T             # 3 sigmoid + 2 tanh / step
    rec_bytes = (T * fourh_p * mp_pad * 2 + T * hid_p * npad * 2
                 + wh_mat.size * 2 + hid_p * mp_pad * 4 + mask.size * 4)
    rec_step_bytes = (
        2 * fourh_p * mp_pad * 2          # xw block, double buffered (bf16)
        + 2 * hid_p * npad * 2            # hout block, double buffered (bf16)
        + hid_p * mp_pad * 4              # resident cout (f32)
        + hid_p * npad * 4                # hpad scratch (f32)
        + wh_mat.size * 2 + mask.size * 4
        + fourh_p * mp_pad * 4            # acc temp (f32)
        + ntaps * hid_p * mp_pad * 2      # tap slices / im2col (bf16)
        + 6 * hid_p * mp_pad * 4)         # gate / state temps (f32)
    h_all, c_last = pl.pallas_call(
        functools.partial(_recurrent_kernel, hid_p=hid_p, taps=taps,
                          guard=guard, mp_pad=mp_pad, per_tap=per_tap_h),
        out_shape=(
            jax.ShapeDtypeStruct((T, hid_p, npad), jnp.bfloat16),
            jax.ShapeDtypeStruct((hid_p, mp_pad), jnp.float32),
        ),
        grid=(T,),
        in_specs=[
            pl.BlockSpec((1, fourh_p, mp_pad), lambda t: (t, 0, 0)),
            pl.BlockSpec(wh_mat.shape, lambda t: (0,) * wh_mat.ndim),
            pl.BlockSpec((1, mp_pad), lambda t: (0, 0)),
        ],
        out_specs=[
            pl.BlockSpec((1, hid_p, npad), lambda t: (t, 0, 0)),
            pl.BlockSpec((hid_p, mp_pad), lambda t: (0, 0)),
        ],
        scratch_shapes=[pltpu.VMEM((hid_p, npad), jnp.float32)],
        compiler_params=pltpu.CompilerParams(
            dimension_semantics=("arbitrary",),
            vmem_limit_bytes=_vmem_limit(rec_step_bytes)),
        cost_estimate=pl.CostEstimate(flops=rec_flops,
                                      transcendentals=rec_trans,
                                      bytes_accessed=rec_bytes),
    )(xw, wh_mat, mask)
    return h_all, c_last


# --------------------------------------------------------------------------
# Layout helpers (one-time XLA ops per layer, nothing per timestep)
# --------------------------------------------------------------------------
def _make_geometry(B, H, W, KH, KW):
    ph, pw = KH // 2, KW // 2
    Hp, Wp = H + 2 * ph, W + 2 * pw
    mp = B * Hp * Wp
    mp_pad = _round_up(mp, 128)                    # lane-dense output width
    taps = tuple((dy - ph) * Wp + (dx - pw)
                 for dy in range(KH) for dx in range(KW))
    guard = _round_up(max(0, -min(taps)), 128)     # 128-aligned interior start
    right = max(0, max(taps))
    npad = _round_up(guard + mp_pad + right, 128)
    m2d = jnp.zeros((Hp, Wp), jnp.float32).at[ph:ph + H, pw:pw + W].set(1.0)
    mask = jnp.pad(jnp.tile(m2d.reshape(1, Hp * Wp), (1, B)),
                   ((0, 0), (0, mp_pad - mp)))     # (1, mp_pad)
    return dict(ph=ph, pw=pw, Hp=Hp, Wp=Wp, mp=mp, mp_pad=mp_pad, guard=guard,
                npad=npad, taps=taps, mask=mask, B=B, H=H, W=W)


def _nchw_to_flat(x_btchw, cin_p, geom):
    """(B, T, C, H, W) -> (T, cin_p, npad) bf16 guarded, zero-halo padded-flat."""
    B, T, C, H, W = x_btchw.shape
    ph, pw = geom["ph"], geom["pw"]
    mp, guard, npad = geom["mp"], geom["guard"], geom["npad"]
    xp = jnp.pad(x_btchw,
                 ((0, 0), (0, 0), (0, cin_p - C), (ph, ph), (pw, pw)))
    xp = jnp.transpose(xp, (1, 2, 0, 3, 4)).reshape(T, cin_p, mp)
    xp = jnp.pad(xp, ((0, 0), (0, 0), (guard, npad - mp - guard)))
    return xp.astype(jnp.bfloat16)


def _flat_state_to_nchw(s_flat, geom):
    """(C, mp) -> (B, C, H, W) interior."""
    B, H, W = geom["B"], geom["H"], geom["W"]
    Hp, Wp, ph, pw = geom["Hp"], geom["Wp"], geom["ph"], geom["pw"]
    C = s_flat.shape[0]
    s = s_flat.reshape(C, B, Hp, Wp)[:, :, ph:ph + H, pw:pw + W]
    return jnp.transpose(s, (1, 0, 2, 3))


def _hall_to_btchw(h_all, hid, geom):
    """(T, hid_p, npad) -> (B, T, hid, H, W) interior."""
    B, H, W = geom["B"], geom["H"], geom["W"]
    Hp, Wp, ph, pw = geom["Hp"], geom["Wp"], geom["ph"], geom["pw"]
    guard, mp = geom["guard"], geom["mp"]
    T = h_all.shape[0]
    h = h_all[:, :hid, guard:guard + mp].reshape(T, hid, B, Hp, Wp)
    h = h[:, :, :, ph:ph + H, pw:pw + W]
    return jnp.transpose(h, (2, 0, 1, 3, 4))


def _prep_weights(w_oihw, bias, cin, hid, cin_p, hid_p, KH, KW,
                  per_tap_x, per_tap_h):
    """Split PyTorch Conv2d weight (4h, cin+hid, KH, KW) into bf16 matmul forms
    with gate rows regrouped at stride hid_p (sublane-aligned gate slices)."""
    w = w_oihw.reshape(4, hid, cin + hid, KH, KW)
    w = jnp.pad(w, ((0, 0), (0, hid_p - hid), (0, 0), (0, 0), (0, 0)))
    b_col = jnp.pad(bias.reshape(4, hid),
                    ((0, 0), (0, hid_p - hid))).reshape(4 * hid_p, 1)
    w_x = jnp.pad(w[:, :, :cin],
                  ((0, 0), (0, 0), (0, cin_p - cin), (0, 0), (0, 0)))
    w_h = jnp.pad(w[:, :, cin:],
                  ((0, 0), (0, 0), (0, hid_p - hid), (0, 0), (0, 0)))

    def concat_form(wb, cpad):     # (4, hid_p, cpad, KH, KW) -> (4h_p, taps*cpad)
        wb = jnp.transpose(wb, (0, 1, 3, 4, 2))
        return wb.reshape(4 * hid_p, KH * KW * cpad).astype(jnp.bfloat16)

    def tap_form(wb, cpad):        # (4, hid_p, cpad, KH, KW) -> (taps, 4h_p, cpad)
        wb = jnp.transpose(wb, (3, 4, 0, 1, 2))
        return wb.reshape(KH * KW, 4 * hid_p, cpad).astype(jnp.bfloat16)

    wx_mat = tap_form(w_x, cin_p) if per_tap_x else concat_form(w_x, cin_p)
    wh_mat = tap_form(w_h, hid_p) if per_tap_h else concat_form(w_h, hid_p)
    return wx_mat, wh_mat, b_col


# --------------------------------------------------------------------------
# Public forward (mirrors ConvLSTM.forward with zero-initialized states)
# --------------------------------------------------------------------------
def convlstm_forward(x, params, batch_first=False):
    """x: (t, b, c, h, w) if not batch_first else (b, t, c, h, w).
    params: list of (w_oihw, bias), w_oihw = Conv2d weight (4*hid, c+hid, KH, KW).
    Returns (layer_output, last_state_list) with PyTorch layouts."""
    if not batch_first:
        x = jnp.transpose(x, (1, 0, 2, 3, 4))                 # (b, t, c, h, w)
    B, T, C, H, W = x.shape

    cur_nchw = x            # (B, T, Cin, H, W); only used when fast path misses
    cur_flat = None         # previous layer's guarded padded-flat h_all (bf16)
    cur_geom = None
    cur_hid = None
    last_state_list = []

    for (w_oihw, bias) in params:
        fourh, cin_tot, KH, KW = w_oihw.shape
        hid = fourh // 4
        cin = cin_tot - hid
        cin_p = _round_up(max(cin, 1), 8)
        hid_p = _round_up(hid, 8)
        per_tap_x = cin_p >= 32
        per_tap_h = hid_p >= 32

        geom = _make_geometry(B, H, W, KH, KW)
        wx_mat, wh_mat, b_col = _prep_weights(
            w_oihw, bias, cin, hid, cin_p, hid_p, KH, KW, per_tap_x, per_tap_h)

        # Fast path: previous layer's output already has this layer's guarded
        # padded-flat layout (hid_p == cin_p by construction) -> no relayout.
        if (cur_flat is not None
                and cur_flat.shape == (T, cin_p, geom["npad"])
                and cur_geom["guard"] == geom["guard"]
                and cur_geom["mp_pad"] == geom["mp_pad"]
                and cur_geom["Hp"] == geom["Hp"]
                and cur_geom["Wp"] == geom["Wp"]):
            xin = cur_flat
        else:
            if cur_nchw is None:
                cur_nchw = _hall_to_btchw(cur_flat, cur_hid, cur_geom)
            xin = _nchw_to_flat(cur_nchw, cin_p, geom)

        h_all, c_last = _conv_lstm_layer(
            xin, wx_mat, wh_mat, b_col, geom["mask"], hid_p=hid_p, geom=geom,
            per_tap_x=per_tap_x, per_tap_h=per_tap_h)

        g0, mpv = geom["guard"], geom["mp"]
        h_last_flat = h_all[T - 1, :hid, g0:g0 + mpv].astype(jnp.float32)
        c_last_flat = c_last[:hid, :mpv]
        last_state_list.append((_flat_state_to_nchw(h_last_flat, geom),
                                _flat_state_to_nchw(c_last_flat, geom)))

        cur_flat, cur_geom, cur_hid, cur_nchw = h_all, geom, hid, None

    layer_output = _hall_to_btchw(cur_flat, cur_hid, cur_geom)
    layer_output = layer_output.astype(jnp.float32)            # (B,T,c,H,W)
    if not batch_first:
        layer_output = jnp.transpose(layer_output, (1, 0, 2, 3, 4))
        layer_output = layer_output[2:3]                       # t == 2 slice
    return layer_output, last_state_list


# --------------------------------------------------------------------------
# Pure-JAX reference (for correctness check)
# --------------------------------------------------------------------------
def _ref_cell(x_nhwc, h, c, w_hwio, bias):
    combined = jnp.concatenate([x_nhwc, h], axis=-1)
    conv = jax.lax.conv_general_dilated(
        combined, w_hwio, window_strides=(1, 1), padding="SAME",
        dimension_numbers=("NHWC", "HWIO", "NHWC"),
        precision=jax.lax.Precision.HIGHEST) + bias
    hid = h.shape[-1]
    i = jax.nn.sigmoid(conv[..., 0 * hid:1 * hid])
    f = jax.nn.sigmoid(conv[..., 1 * hid:2 * hid])
    o = jax.nn.sigmoid(conv[..., 2 * hid:3 * hid])
    g = jnp.tanh(conv[..., 3 * hid:4 * hid])
    c_new = f * c + i * g
    h_new = o * jnp.tanh(c_new)
    return h_new, c_new


def _ref_forward(x, params, batch_first=False):
    if not batch_first:
        x = jnp.transpose(x, (1, 0, 2, 3, 4))
    B, T, C, H, W = x.shape
    cur = jnp.transpose(x, (0, 1, 3, 4, 2))                   # (B, T, H, W, C)
    last_states = []
    for (w_oihw, bias) in params:
        hid = w_oihw.shape[0] // 4
        w_hwio = jnp.transpose(w_oihw, (2, 3, 1, 0))
        h = jnp.zeros((B, H, W, hid), jnp.float32)
        c = jnp.zeros((B, H, W, hid), jnp.float32)
        outs = []
        for t in range(T):
            h, c = _ref_cell(cur[:, t], h, c, w_hwio, bias)
            outs.append(h)
        cur = jnp.stack(outs, axis=1)
        last_states.append((jnp.transpose(h, (0, 3, 1, 2)),
                            jnp.transpose(c, (0, 3, 1, 2))))
    out = jnp.transpose(cur, (0, 1, 4, 2, 3))
    if not batch_first:
        out = jnp.transpose(out, (1, 0, 2, 3, 4))[2:3]
    return out, last_states


if __name__ == "__main__":
    # seq >= 3 required for the module's hard-coded [2:3] slice.
    # hidden_dims chosen so layer 0 exercises the per-tap matmul path (hid=32)
    # and layer 1 the fused-im2col path (hid=8), plus the inter-layer fast path.
    T, B, C, H, W = 8, 2, 4, 16, 16
    hidden_dims = [32, 8]
    kernel_size = (3, 3)

    key = jax.random.PRNGKey(0)
    params = []
    in_dim = C
    for hid in hidden_dims:
        cin_tot = in_dim + hid
        key, kw, kb = jax.random.split(key, 3)
        scale = 1.0 / jnp.sqrt(
            jnp.float32(cin_tot * kernel_size[0] * kernel_size[1]))
        w = jax.random.normal(
            kw, (4 * hid, cin_tot, kernel_size[0], kernel_size[1]),
            jnp.float32) * scale
        b = jax.random.normal(kb, (4 * hid,), jnp.float32) * scale
        params.append((w, b))
        in_dim = hid

    key, kx = jax.random.split(key)
    # batch_first=False -> input is (t, b, c, h, w), NCHW frames.
    x = jax.random.normal(kx, (T, B, C, H, W), jnp.float32)

    fwd = jax.jit(functools.partial(convlstm_forward, batch_first=False))
    layer_output, last_states = fwd(x, params)
    layer_output = jax.block_until_ready(layer_output)
    jax.tree_util.tree_map(jax.block_until_ready, last_states)

    # Sanity checks: shapes + numerics vs pure-JAX f32 reference.
    assert layer_output.shape == (1, B, hidden_dims[-1], H, W)
    assert last_states[0][0].shape == (B, hidden_dims[0], H, W)
    assert last_states[1][1].shape == (B, hidden_dims[1], H, W)

    ref_out, ref_states = _ref_forward(x, params, batch_first=False)
    # bf16 matmul operands + bf16 xw / h streams (f32 accumulate & carries):
    # tolerance relaxed accordingly.
    assert jnp.allclose(layer_output, ref_out, atol=2e-2, rtol=2e-2)
    for (h_k, c_k), (h_r, c_r) in zip(last_states, ref_states):
        assert h_k.shape == h_r.shape and c_k.shape == c_r.shape
        assert jnp.allclose(h_k, h_r, atol=2e-2, rtol=2e-2)
        assert jnp.allclose(c_k, c_r, atol=2e-2, rtol=2e-2)

    print("KERNEL_OK")
</pallas_src>

<mosaic_0001>
module attributes {stable_mosaic.version = 11 : i64} {
  func.func @_input_proj_kernel(%arg0: i32, %arg1: memref<1x8x1024xbf16, #tpu.memory_space<vmem>>, %arg2: memref<128x72xbf16, #tpu.memory_space<vmem>>, %arg3: memref<128x1xf32, #tpu.memory_space<vmem>>, %arg4: memref<1x128x768xbf16, #tpu.memory_space<vmem>>) attributes {dimension_semantics = [#tpu.dimension_semantics<parallel>], iteration_bounds = array<i64: 8>, scalar_prefetch = 0 : i64, scratch_operands = 0 : i64, tpu.core_type = #tpu.core_type<tc>, window_params = [{transform_indices = @transform_0, window_bounds = array<i64: 1, 8, 1024>}, {pipeline_mode = #tpu.pipeline_mode<synchronous>, transform_indices = @transform_1, window_bounds = array<i64: 128, 72>}, {pipeline_mode = #tpu.pipeline_mode<synchronous>, transform_indices = @transform_2, window_bounds = array<i64: 128, 1>}, {transform_indices = @transform_3, window_bounds = array<i64: 1, 128, 768>}]} {
    %c0 = arith.constant 0 : index
    %c0_0 = arith.constant 0 : index
    %c0_1 = arith.constant 0 : index
    %0 = vector.load %arg1[%c0, %c0_0, %c0_1] : memref<1x8x1024xbf16, #tpu.memory_space<vmem>>, vector<1x8x1024xbf16>
    %1 = vector.shape_cast %0 : vector<1x8x1024xbf16> to vector<8x1024xbf16>
    %2 = vector.extract_strided_slice %1 {offsets = [0, 109], sizes = [8, 768], strides = [1, 1]} : vector<8x1024xbf16> to vector<8x768xbf16>
    %3 = vector.extract_strided_slice %1 {offsets = [0, 110], sizes = [8, 768], strides = [1, 1]} : vector<8x1024xbf16> to vector<8x768xbf16>
    %4 = vector.extract_strided_slice %1 {offsets = [0, 111], sizes = [8, 768], strides = [1, 1]} : vector<8x1024xbf16> to vector<8x768xbf16>
    %5 = vector.extract_strided_slice %1 {offsets = [0, 127], sizes = [8, 768], strides = [1, 1]} : vector<8x1024xbf16> to vector<8x768xbf16>
    %6 = vector.extract_strided_slice %1 {offsets = [0, 128], sizes = [8, 768], strides = [1, 1]} : vector<8x1024xbf16> to vector<8x768xbf16>
    %7 = vector.extract_strided_slice %1 {offsets = [0, 129], sizes = [8, 768], strides = [1, 1]} : vector<8x1024xbf16> to vector<8x768xbf16>
    %8 = vector.extract_strided_slice %1 {offsets = [0, 145], sizes = [8, 768], strides = [1, 1]} : vector<8x1024xbf16> to vector<8x768xbf16>
    %9 = vector.extract_strided_slice %1 {offsets = [0, 146], sizes = [8, 768], strides = [1, 1]} : vector<8x1024xbf16> to vector<8x768xbf16>
    %10 = vector.extract_strided_slice %1 {offsets = [0, 147], sizes = [8, 768], strides = [1, 1]} : vector<8x1024xbf16> to vector<8x768xbf16>
    %11 = tpu.concatenate %2, %3, %4, %5, %6, %7, %8, %9, %10 in 0 : vector<8x768xbf16>, vector<8x768xbf16>, vector<8x768xbf16>, vector<8x768xbf16>, vector<8x768xbf16>, vector<8x768xbf16>, vector<8x768xbf16>, vector<8x768xbf16>, vector<8x768xbf16> -> vector<72x768xbf16>
    %c0_2 = arith.constant 0 : index
    %c0_3 = arith.constant 0 : index
    %12 = vector.load %arg2[%c0_2, %c0_3] : memref<128x72xbf16, #tpu.memory_space<vmem>>, vector<128x72xbf16>
    %cst = arith.constant dense<0.000000e+00> : vector<128x768xf32>
    %13 = tpu.matmul %12, %11, %cst {dimension_numbers = #tpu.dot_dimension_numbers<[1], [0], [0], [1], [0, 0, 1, 1], [], []>} : vector<128x72xbf16>, vector<72x768xbf16>, vector<128x768xf32> -> vector<128x768xf32>
    %c0_4 = arith.constant 0 : index
    %c0_5 = arith.constant 0 : index
    %14 = vector.load %arg3[%c0_4, %c0_5] : memref<128x1xf32, #tpu.memory_space<vmem>>, vector<128x1xf32>
    %15 = vector.broadcast %14 : vector<128x1xf32> to vector<128x768xf32>
    %16 = arith.addf %13, %15 : vector<128x768xf32>
    %17 = arith.truncf %16 : vector<128x768xf32> to vector<128x768xbf16>
    %c0_6 = arith.constant 0 : index
    %c0_7 = arith.constant 0 : index
    %c0_8 = arith.constant 0 : index
    %18 = vector.load %arg4[%c0_6, %c0_7, %c0_8] : memref<1x128x768xbf16, #tpu.memory_space<vmem>>, vector<1x128x768xbf16>
    %19 = vector.shape_cast %18 : vector<1x128x768xbf16> to vector<128x768xbf16>
    %20 = vector.shape_cast %17 : vector<128x768xbf16> to vector<1x128x768xbf16>
    tpu.vector_store %arg4[%c0_6, %c0_7, %c0_8], %20 {strides = array<i32>} : memref<1x128x768xbf16, #tpu.memory_space<vmem>>, vector<1x128x768xbf16>,
    return
  }
  func.func @transform_0(%arg0: i32) -> (i32, i32, i32) {
    %c0_i32 = arith.constant 0 : i32
    %c0_i32_0 = arith.constant 0 : i32
    %c0_i32_1 = arith.constant 0 : i32
    return %arg0, %c0_i32, %c0_i32_0 : i32, i32, i32
  }
  func.func @transform_1(%arg0: i32) -> (i32, i32) {
    %c0_i32 = arith.constant 0 : i32
    %c0_i32_0 = arith.constant 0 : i32
    %c0_i32_1 = arith.constant 0 : i32
    return %c0_i32, %c0_i32_0 : i32, i32
  }
  func.func @transform_2(%arg0: i32) -> (i32, i32) {
    %c0_i32 = arith.constant 0 : i32
    %c0_i32_0 = arith.constant 0 : i32
    %c0_i32_1 = arith.constant 0 : i32
    return %c0_i32, %c0_i32_0 : i32, i32
  }
  func.func @transform_3(%arg0: i32) -> (i32, i32, i32) {
    %c0_i32 = arith.constant 0 : i32
    %c0_i32_0 = arith.constant 0 : i32
    %c0_i32_1 = arith.constant 0 : i32
    return %arg0, %c0_i32, %c0_i32_0 : i32, i32, i32
  }
}

module attributes {stable_mosaic.version = 11 : i64} {
  func.func @_recurrent_kernel(%arg0: i32, %arg1: memref<1x128x768xbf16, #tpu.memory_space<vmem>>, %arg2: memref<9x128x32xbf16, #tpu.memory_space<vmem>>, %arg3: memref<1x768xf32, #tpu.memory_space<vmem>>, %arg4: memref<1x32x1024xbf16, #tpu.memory_space<vmem>>, %arg5: memref<32x768xf32, #tpu.memory_space<vmem>>, %arg6: memref<32x1024xf32, #tpu.memory_space<vmem>>) attributes {dimension_semantics = [#tpu.dimension_semantics<arbitrary>], iteration_bounds = array<i64: 8>, scalar_prefetch = 0 : i64, scratch_operands = 1 : i64, tpu.core_type = #tpu.core_type<tc>, window_params = [{transform_indices = @transform_0, window_bounds = array<i64: 1, 128, 768>}, {pipeline_mode = #tpu.pipeline_mode<synchronous>, transform_indices = @transform_1, window_bounds = array<i64: 9, 128, 32>}, {pipeline_mode = #tpu.pipeline_mode<synchronous>, transform_indices = @transform_2, window_bounds = array<i64: 1, 768>}, {transform_indices = @transform_3, window_bounds = array<i64: 1, 32, 1024>}, {pipeline_mode = #tpu.pipeline_mode<synchronous>, transform_indices = @transform_4, window_bounds = array<i64: 32, 768>}]} {
    %c0_i32 = arith.constant 0 : i32
    %0 = arith.cmpi eq, %arg0, %c0_i32 : i32
    %1 = arith.extui %0 : i1 to i32
    %c0_i32_0 = arith.constant 0 : i32
    %2 = arith.cmpi ne, %1, %c0_i32_0 : i32
    scf.if %2 {
      %cst_47 = arith.constant 0.000000e+00 : f32
      %89 = vector.broadcast %cst_47 : f32 to vector<32x1024xf32>
      %c0_48 = arith.constant 0 : index
      %c0_49 = arith.constant 0 : index
      %90 = vector.load %arg6[%c0_48, %c0_49] : memref<32x1024xf32, #tpu.memory_space<vmem>>, vector<32x1024xf32>
      tpu.vector_store %arg6[%c0_48, %c0_49], %89 {strides = array<i32>} : memref<32x1024xf32, #tpu.memory_space<vmem>>, vector<32x1024xf32>,
      %cst_50 = arith.constant 0.000000e+00 : f32
      %91 = vector.broadcast %cst_50 : f32 to vector<32x768xf32>
      %c0_51 = arith.constant 0 : index
      %c0_52 = arith.constant 0 : index
      %92 = vector.load %arg5[%c0_51, %c0_52] : memref<32x768xf32, #tpu.memory_space<vmem>>, vector<32x768xf32>
      tpu.vector_store %arg5[%c0_51, %c0_52], %91 {strides = array<i32>} : memref<32x768xf32, #tpu.memory_space<vmem>>, vector<32x768xf32>,
    } else {
    }
    %c0 = arith.constant 0 : index
    %c0_1 = arith.constant 0 : index
    %3 = vector.load %arg6[%c0, %c0_1] : memref<32x1024xf32, #tpu.memory_space<vmem>>, vector<32x1024xf32>
    %4 = arith.truncf %3 : vector<32x1024xf32> to vector<32x1024xbf16>
    %c0_2 = arith.constant 0 : index
    %c0_3 = arith.constant 0 : index
    %c0_4 = arith.constant 0 : index
    %5 = vector.load %arg1[%c0_2, %c0_3, %c0_4] : memref<1x128x768xbf16, #tpu.memory_space<vmem>>, vector<1x128x768xbf16>
    %6 = vector.shape_cast %5 : vector<1x128x768xbf16> to vector<128x768xbf16>
    %7 = arith.extf %6 : vector<128x768xbf16> to vector<128x768xf32>
    %c0_5 = arith.constant 0 : index
    %c0_6 = arith.constant 0 : index
    %c0_7 = arith.constant 0 : index
    %8 = vector.load %arg2[%c0_5, %c0_6, %c0_7] : memref<9x128x32xbf16, #tpu.memory_space<vmem>>, vector<1x128x32xbf16>
    %9 = vector.shape_cast %8 : vector<1x128x32xbf16> to vector<128x32xbf16>
    %10 = vector.extract_strided_slice %4 {offsets = [0, 109], sizes = [32, 768], strides = [1, 1]} : vector<32x1024xbf16> to vector<32x768xbf16>
    %cst = arith.constant dense<0.000000e+00> : vector<128x768xf32>
    %11 = tpu.matmul %9, %10, %cst {dimension_numbers = #tpu.dot_dimension_numbers<[1], [0], [0], [1], [0, 0, 1, 1], [], []>} : vector<128x32xbf16>, vector<32x768xbf16>, vector<128x768xf32> -> vector<128x768xf32>
    %12 = arith.addf %7, %11 : vector<128x768xf32>
    %c1 = arith.constant 1 : index
    %c0_8 = arith.constant 0 : index
    %c0_9 = arith.constant 0 : index
    %13 = vector.load %arg2[%c1, %c0_8, %c0_9] : memref<9x128x32xbf16, #tpu.memory_space<vmem>>, vector<1x128x32xbf16>
    %14 = vector.shape_cast %13 : vector<1x128x32xbf16> to vector<128x32xbf16>
    %15 = vector.extract_strided_slice %4 {offsets = [0, 110], sizes = [32, 768], strides = [1, 1]} : vector<32x1024xbf16> to vector<32x768xbf16>
    %cst_10 = arith.constant dense<0.000000e+00> : vector<128x768xf32>
    %16 = tpu.matmul %14, %15, %cst_10 {dimension_numbers = #tpu.dot_dimension_numbers<[1], [0], [0], [1], [0, 0, 1, 1], [], []>} : vector<128x32xbf16>, vector<32x768xbf16>, vector<128x768xf32> -> vector<128x768xf32>
    %17 = arith.addf %12, %16 : vector<128x768xf32>
    %c2 = arith.constant 2 : index
    %c0_11 = arith.constant 0 : index
    %c0_12 = arith.constant 0 : index
    %18 = vector.load %arg2[%c2, %c0_11, %c0_12] : memref<9x128x32xbf16, #tpu.memory_space<vmem>>, vector<1x128x32xbf16>
    %19 = vector.shape_cast %18 : vector<1x128x32xbf16> to vector<128x32xbf16>
    %20 = vector.extract_strided_slice %4 {offsets = [0, 111], sizes = [32, 768], strides = [1, 1]} : vector<32x1024xbf16> to vector<32x768xbf16>
    %cst_13 = arith.constant dense<0.000000e+00> : vector<128x768xf32>
    %21 = tpu.matmul %19, %20, %cst_13 {dimension_numbers = #tpu.dot_dimension_numbers<[1], [0], [0], [1], [0, 0, 1, 1], [], []>} : vector<128x32xbf16>, vector<32x768xbf16>, vector<128x768xf32> -> vector<128x768xf32>
    %22 = arith.addf %17, %21 : vector<128x768xf32>
    %c3 = arith.constant 3 : index
    %c0_14 = arith.constant 0 : index
    %c0_15 = arith.constant 0 : index
    %23 = vector.load %arg2[%c3, %c0_14, %c0_15] : memref<9x128x32xbf16, #tpu.memory_space<vmem>>, vector<1x128x32xbf16>
    %24 = vector.shape_cast %23 : vector<1x128x32xbf16> to vector<128x32xbf16>
    %25 = vector.extract_strided_slice %4 {offsets = [0, 127], sizes = [32, 768], strides = [1, 1]} : vector<32x1024xbf16> to vector<32x768xbf16>
    %cst_16 = arith.constant dense<0.000000e+00> : vector<128x768xf32>
    %26 = tpu.matmul %24, %25, %cst_16 {dimension_numbers = #tpu.dot_dimension_numbers<[1], [0], [0], [1], [0, 0, 1, 1], [], []>} : vector<128x32xbf16>, vector<32x768xbf16>, vector<128x768xf32> -> vector<128x768xf32>
    %27 = arith.addf %22, %26 : vector<128x768xf32>
    %c4 = arith.constant 4 : index
    %c0_17 = arith.constant 0 : index
    %c0_18 = arith.constant 0 : index
    %28 = vector.load %arg2[%c4, %c0_17, %c0_18] : memref<9x128x32xbf16, #tpu.memory_space<vmem>>, vector<1x128x32xbf16>
    %29 = vector.shape_cast %28 : vector<1x128x32xbf16> to vector<128x32xbf16>
    %30 = vector.extract_strided_slice %4 {offsets = [0, 128], sizes = [32, 768], strides = [1, 1]} : vector<32x1024xbf16> to vector<32x768xbf16>
    %cst_19 = arith.constant dense<0.000000e+00> : vector<128x768xf32>
    %31 = tpu.matmul %29, %30, %cst_19 {dimension_numbers = #tpu.dot_dimension_numbers<[1], [0], [0], [1], [0, 0, 1, 1], [], []>} : vector<128x32xbf16>, vector<32x768xbf16>, vector<128x768xf32> -> vector<128x768xf32>
    %32 = arith.addf %27, %31 : vector<128x768xf32>
    %c5 = arith.constant 5 : index
    %c0_20 = arith.constant 0 : index
    %c0_21 = arith.constant 0 : index
    %33 = vector.load %arg2[%c5, %c0_20, %c0_21] : memref<9x128x32xbf16, #tpu.memory_space<vmem>>, vector<1x128x32xbf16>
    %34 = vector.shape_cast %33 : vector<1x128x32xbf16> to vector<128x32xbf16>
    %35 = vector.extract_strided_slice %4 {offsets = [0, 129], sizes = [32, 768], strides = [1, 1]} : vector<32x1024xbf16> to vector<32x768xbf16>
    %cst_22 = arith.constant dense<0.000000e+00> : vector<128x768xf32>
    %36 = tpu.matmul %34, %35, %cst_22 {dimension_numbers = #tpu.dot_dimension_numbers<[1], [0], [0], [1], [0, 0, 1, 1], [], []>} : vector<128x32xbf16>, vector<32x768xbf16>, vector<128x768xf32> -> vector<128x768xf32>
    %37 = arith.addf %32, %36 : vector<128x768xf32>
    %c6 = arith.constant 6 : index
    %c0_23 = arith.constant 0 : index
    %c0_24 = arith.constant 0 : index
    %38 = vector.load %arg2[%c6, %c0_23, %c0_24] : memref<9x128x32xbf16, #tpu.memory_space<vmem>>, vector<1x128x32xbf16>
    %39 = vector.shape_cast %38 : vector<1x128x32xbf16> to vector<128x32xbf16>
    %40 = vector.extract_strided_slice %4 {offsets = [0, 145], sizes = [32, 768], strides = [1, 1]} : vector<32x1024xbf16> to vector<32x768xbf16>
    %cst_25 = arith.constant dense<0.000000e+00> : vector<128x768xf32>
    %41 = tpu.matmul %39, %40, %cst_25 {dimension_numbers = #tpu.dot_dimension_numbers<[1], [0], [0], [1], [0, 0, 1, 1], [], []>} : vector<128x32xbf16>, vector<32x768xbf16>, vector<128x768xf32> -> vector<128x768xf32>
    %42 = arith.addf %37, %41 : vector<128x768xf32>
    %c7 = arith.constant 7 : index
    %c0_26 = arith.constant 0 : index
    %c0_27 = arith.constant 0 : index
    %43 = vector.load %arg2[%c7, %c0_26, %c0_27] : memref<9x128x32xbf16, #tpu.memory_space<vmem>>, vector<1x128x32xbf16>
    %44 = vector.shape_cast %43 : vector<1x128x32xbf16> to vector<128x32xbf16>
    %45 = vector.extract_strided_slice %4 {offsets = [0, 146], sizes = [32, 768], strides = [1, 1]} : vector<32x1024xbf16> to vector<32x768xbf16>
    %cst_28 = arith.constant dense<0.000000e+00> : vector<128x768xf32>
    %46 = tpu.matmul %44, %45, %cst_28 {dimension_numbers = #tpu.dot_dimension_numbers<[1], [0], [0], [1], [0, 0, 1, 1], [], []>} : vector<128x32xbf16>, vector<32x768xbf16>, vector<128x768xf32> -> vector<128x768xf32>
    %47 = arith.addf %42, %46 : vector<128x768xf32>
    %c8 = arith.constant 8 : index
    %c0_29 = arith.constant 0 : index
    %c0_30 = arith.constant 0 : index
    %48 = vector.load %arg2[%c8, %c0_29, %c0_30] : memref<9x128x32xbf16, #tpu.memory_space<vmem>>, vector<1x128x32xbf16>
    %49 = vector.shape_cast %48 : vector<1x128x32xbf16> to vector<128x32xbf16>
    %50 = vector.extract_strided_slice %4 {offsets = [0, 147], sizes = [32, 768], strides = [1, 1]} : vector<32x1024xbf16> to vector<32x768xbf16>
    %cst_31 = arith.constant dense<0.000000e+00> : vector<128x768xf32>
    %51 = tpu.matmul %49, %50, %cst_31 {dimension_numbers = #tpu.dot_dimension_numbers<[1], [0], [0], [1], [0, 0, 1, 1], [], []>} : vector<128x32xbf16>, vector<32x768xbf16>, vector<128x768xf32> -> vector<128x768xf32>
    %52 = arith.addf %47, %51 : vector<128x768xf32>
    %53 = vector.extract_strided_slice %52 {offsets = [0, 0], sizes = [32, 768], strides = [1, 1]} : vector<128x768xf32> to vector<32x768xf32>
    %54 = arith.negf %53 : vector<32x768xf32>
    %55 = math.exp %54 : vector<32x768xf32>
    %cst_32 = arith.constant 1.000000e+00 : f32
    %56 = vector.broadcast %cst_32 : f32 to vector<32x768xf32>
    %57 = arith.addf %56, %55 : vector<32x768xf32>
    %58 = arith.divf %56, %57 : vector<32x768xf32>
    %59 = vector.extract_strided_slice %52 {offsets = [32, 0], sizes = [32, 768], strides = [1, 1]} : vector<128x768xf32> to vector<32x768xf32>
    %60 = arith.negf %59 : vector<32x768xf32>
    %61 = math.exp %60 : vector<32x768xf32>
    %cst_33 = arith.constant 1.000000e+00 : f32
    %62 = vector.broadcast %cst_33 : f32 to vector<32x768xf32>
    %63 = arith.addf %62, %61 : vector<32x768xf32>
    %64 = arith.divf %62, %63 : vector<32x768xf32>
    %65 = vector.extract_strided_slice %52 {offsets = [64, 0], sizes = [32, 768], strides = [1, 1]} : vector<128x768xf32> to vector<32x768xf32>
    %66 = arith.negf %65 : vector<32x768xf32>
    %67 = math.exp %66 : vector<32x768xf32>
    %cst_34 = arith.constant 1.000000e+00 : f32
    %68 = vector.broadcast %cst_34 : f32 to vector<32x768xf32>
    %69 = arith.addf %68, %67 : vector<32x768xf32>
    %70 = arith.divf %68, %69 : vector<32x768xf32>
    %71 = vector.extract_strided_slice %52 {offsets = [96, 0], sizes = [32, 768], strides = [1, 1]} : vector<128x768xf32> to vector<32x768xf32>
    %72 = math.tanh %71 : vector<32x768xf32>
    %c0_35 = arith.constant 0 : index
    %c0_36 = arith.constant 0 : index
    %73 = vector.load %arg5[%c0_35, %c0_36] : memref<32x768xf32, #tpu.memory_space<vmem>>, vector<32x768xf32>
    %74 = arith.mulf %64, %73 : vector<32x768xf32>
    %75 = arith.mulf %58, %72 : vector<32x768xf32>
    %76 = arith.addf %74, %75 : vector<32x768xf32>
    %77 = math.tanh %76 : vector<32x768xf32>
    %78 = arith.mulf %70, %77 : vector<32x768xf32>
    %c0_37 = arith.constant 0 : index
    %c0_38 = arith.constant 0 : index
    %79 = vector.load %arg3[%c0_37, %c0_38] : memref<1x768xf32, #tpu.memory_space<vmem>>, vector<1x768xf32>
    %80 = vector.broadcast %79 : vector<1x768xf32> to vector<32x768xf32>
    %81 = arith.mulf %78, %80 : vector<32x768xf32>
    %c0_39 = arith.constant 0 : index
    %c0_40 = arith.constant 0 : index
    %82 = vector.load %arg5[%c0_39, %c0_40] : memref<32x768xf32, #tpu.memory_space<vmem>>, vector<32x768xf32>
    tpu.vector_store %arg5[%c0_39, %c0_40], %76 {strides = array<i32>} : memref<32x768xf32, #tpu.memory_space<vmem>>, vector<32x768xf32>,
    %c0_41 = arith.constant 0 : index
    %c128 = arith.constant 128 : index
    %83 = vector.load %arg6[%c0_41, %c128] : memref<32x1024xf32, #tpu.memory_space<vmem>>, vector<32x768xf32>
    tpu.vector_store %arg6[%c0_41, %c128], %81 {strides = array<i32>} : memref<32x1024xf32, #tpu.memory_space<vmem>>, vector<32x768xf32>,
    %c0_42 = arith.constant 0 : index
    %c0_43 = arith.constant 0 : index
    %84 = vector.load %arg6[%c0_42, %c0_43] : memref<32x1024xf32, #tpu.memory_space<vmem>>, vector<32x1024xf32>
    %85 = arith.truncf %84 : vector<32x1024xf32> to vector<32x1024xbf16>
    %c0_44 = arith.constant 0 : index
    %c0_45 = arith.constant 0 : index
    %c0_46 = arith.constant 0 : index
    %86 = vector.load %arg4[%c0_44, %c0_45, %c0_46] : memref<1x32x1024xbf16, #tpu.memory_space<vmem>>, vector<1x32x1024xbf16>
    %87 = vector.shape_cast %86 : vector<1x32x1024xbf16> to vector<32x1024xbf16>
    %88 = vector.shape_cast %85 : vector<32x1024xbf16> to vector<1x32x1024xbf16>
    tpu.vector_store %arg4[%c0_44, %c0_45, %c0_46], %88 {strides = array<i32>} : memref<1x32x1024xbf16, #tpu.memory_space<vmem>>, vector<1x32x1024xbf16>,
    return
  }
  func.func @transform_0(%arg0: i32) -> (i32, i32, i32) {
    %c0_i32 = arith.constant 0 : i32
    %c0_i32_0 = arith.constant 0 : i32
    %c0_i32_1 = arith.constant 0 : i32
    return %arg0, %c0_i32, %c0_i32_0 : i32, i32, i32
  }
  func.func @transform_1(%arg0: i32) -> (i32, i32, i32) {
    %c0_i32 = arith.constant 0 : i32
    %c0_i32_0 = arith.constant 0 : i32
    %c0_i32_1 = arith.constant 0 : i32
    %c0_i32_2 = arith.constant 0 : i32
    return %c0_i32, %c0_i32_0, %c0_i32_1 : i32, i32, i32
  }
  func.func @transform_2(%arg0: i32) -> (i32, i32) {
    %c0_i32 = arith.constant 0 : i32
    %c0_i32_0 = arith.constant 0 : i32
    %c0_i32_1 = arith.constant 0 : i32
    return %c0_i32, %c0_i32_0 : i32, i32
  }
  func.func @transform_3(%arg0: i32) -> (i32, i32, i32) {
    %c0_i32 = arith.constant 0 : i32
    %c0_i32_0 = arith.constant 0 : i32
    %c0_i32_1 = arith.constant 0 : i32
    return %arg0, %c0_i32, %c0_i32_0 : i32, i32, i32
  }
  func.func @transform_4(%arg0: i32) -> (i32, i32) {
    %c0_i32 = arith.constant 0 : i32
    %c0_i32_0 = arith.constant 0 : i32
    %c0_i32_1 = arith.constant 0 : i32
    return %c0_i32, %c0_i32_0 : i32, i32
  }
}

module attributes {stable_mosaic.version = 11 : i64} {
  func.func @_input_proj_kernel(%arg0: i32, %arg1: memref<1x32x1024xbf16, #tpu.memory_space<vmem>>, %arg2: memref<9x32x32xbf16, #tpu.memory_space<vmem>>, %arg3: memref<32x1xf32, #tpu.memory_space<vmem>>, %arg4: memref<1x32x768xbf16, #tpu.memory_space<vmem>>) attributes {dimension_semantics = [#tpu.dimension_semantics<parallel>], iteration_bounds = array<i64: 8>, scalar_prefetch = 0 : i64, scratch_operands = 0 : i64, tpu.core_type = #tpu.core_type<tc>, window_params = [{transform_indices = @transform_0, window_bounds = array<i64: 1, 32, 1024>}, {pipeline_mode = #tpu.pipeline_mode<synchronous>, transform_indices = @transform_1, window_bounds = array<i64: 9, 32, 32>}, {pipeline_mode = #tpu.pipeline_mode<synchronous>, transform_indices = @transform_2, window_bounds = array<i64: 32, 1>}, {transform_indices = @transform_3, window_bounds = array<i64: 1, 32, 768>}]} {
    %c0 = arith.constant 0 : index
    %c0_0 = arith.constant 0 : index
    %c0_1 = arith.constant 0 : index
    %0 = vector.load %arg1[%c0, %c0_0, %c0_1] : memref<1x32x1024xbf16, #tpu.memory_space<vmem>>, vector<1x32x1024xbf16>
    %1 = vector.shape_cast %0 : vector<1x32x1024xbf16> to vector<32x1024xbf16>
    %cst = arith.constant 0.000000e+00 : f32
    %2 = vector.broadcast %cst : f32 to vector<32x768xf32>
    %c0_2 = arith.constant 0 : index
    %c0_3 = arith.constant 0 : index
    %c0_4 = arith.constant 0 : index
    %3 = vector.load %arg2[%c0_2, %c0_3, %c0_4] : memref<9x32x32xbf16, #tpu.memory_space<vmem>>, vector<1x32x32xbf16>
    %4 = vector.shape_cast %3 : vector<1x32x32xbf16> to vector<32x32xbf16>
    %5 = vector.extract_strided_slice %1 {offsets = [0, 109], sizes = [32, 768], strides = [1, 1]} : vector<32x1024xbf16> to vector<32x768xbf16>
    %cst_5 = arith.constant dense<0.000000e+00> : vector<32x768xf32>
    %6 = tpu.matmul %4, %5, %cst_5 {dimension_numbers = #tpu.dot_dimension_numbers<[1], [0], [0], [1], [0, 0, 1, 1], [], []>} : vector<32x32xbf16>, vector<32x768xbf16>, vector<32x768xf32> -> vector<32x768xf32>
    %7 = arith.addf %2, %6 : vector<32x768xf32>
    %c1 = arith.constant 1 : index
    %c0_6 = arith.constant 0 : index
    %c0_7 = arith.constant 0 : index
    %8 = vector.load %arg2[%c1, %c0_6, %c0_7] : memref<9x32x32xbf16, #tpu.memory_space<vmem>>, vector<1x32x32xbf16>
    %9 = vector.shape_cast %8 : vector<1x32x32xbf16> to vector<32x32xbf16>
    %10 = vector.extract_strided_slice %1 {offsets = [0, 110], sizes = [32, 768], strides = [1, 1]} : vector<32x1024xbf16> to vector<32x768xbf16>
    %cst_8 = arith.constant dense<0.000000e+00> : vector<32x768xf32>
    %11 = tpu.matmul %9, %10, %cst_8 {dimension_numbers = #tpu.dot_dimension_numbers<[1], [0], [0], [1], [0, 0, 1, 1], [], []>} : vector<32x32xbf16>, vector<32x768xbf16>, vector<32x768xf32> -> vector<32x768xf32>
    %12 = arith.addf %7, %11 : vector<32x768xf32>
    %c2 = arith.constant 2 : index
    %c0_9 = arith.constant 0 : index
    %c0_10 = arith.constant 0 : index
    %13 = vector.load %arg2[%c2, %c0_9, %c0_10] : memref<9x32x32xbf16, #tpu.memory_space<vmem>>, vector<1x32x32xbf16>
    %14 = vector.shape_cast %13 : vector<1x32x32xbf16> to vector<32x32xbf16>
    %15 = vector.extract_strided_slice %1 {offsets = [0, 111], sizes = [32, 768], strides = [1, 1]} : vector<32x1024xbf16> to vector<32x768xbf16>
    %cst_11 = arith.constant dense<0.000000e+00> : vector<32x768xf32>
    %16 = tpu.matmul %14, %15, %cst_11 {dimension_numbers = #tpu.dot_dimension_numbers<[1], [0], [0], [1], [0, 0, 1, 1], [], []>} : vector<32x32xbf16>, vector<32x768xbf16>, vector<32x768xf32> -> vector<32x768xf32>
    %17 = arith.addf %12, %16 : vector<32x768xf32>
    %c3 = arith.constant 3 : index
    %c0_12 = arith.constant 0 : index
    %c0_13 = arith.constant 0 : index
    %18 = vector.load %arg2[%c3, %c0_12, %c0_13] : memref<9x32x32xbf16, #tpu.memory_space<vmem>>, vector<1x32x32xbf16>
    %19 = vector.shape_cast %18 : vector<1x32x32xbf16> to vector<32x32xbf16>
    %20 = vector.extract_strided_slice %1 {offsets = [0, 127], sizes = [32, 768], strides = [1, 1]} : vector<32x1024xbf16> to vector<32x768xbf16>
    %cst_14 = arith.constant dense<0.000000e+00> : vector<32x768xf32>
    %21 = tpu.matmul %19, %20, %cst_14 {dimension_numbers = #tpu.dot_dimension_numbers<[1], [0], [0], [1], [0, 0, 1, 1], [], []>} : vector<32x32xbf16>, vector<32x768xbf16>, vector<32x768xf32> -> vector<32x768xf32>
    %22 = arith.addf %17, %21 : vector<32x768xf32>
    %c4 = arith.constant 4 : index
    %c0_15 = arith.constant 0 : index
    %c0_16 = arith.constant 0 : index
    %23 = vector.load %arg2[%c4, %c0_15, %c0_16] : memref<9x32x32xbf16, #tpu.memory_space<vmem>>, vector<1x32x32xbf16>
    %24 = vector.shape_cast %23 : vector<1x32x32xbf16> to vector<32x32xbf16>
    %25 = vector.extract_strided_slice %1 {offsets = [0, 128], sizes = [32, 768], strides = [1, 1]} : vector<32x1024xbf16> to vector<32x768xbf16>
    %cst_17 = arith.constant dense<0.000000e+00> : vector<32x768xf32>
    %26 = tpu.matmul %24, %25, %cst_17 {dimension_numbers = #tpu.dot_dimension_numbers<[1], [0], [0], [1], [0, 0, 1, 1], [], []>} : vector<32x32xbf16>, vector<32x768xbf16>, vector<32x768xf32> -> vector<32x768xf32>
    %27 = arith.addf %22, %26 : vector<32x768xf32>
    %c5 = arith.constant 5 : index
    %c0_18 = arith.constant 0 : index
    %c0_19 = arith.constant 0 : index
    %28 = vector.load %arg2[%c5, %c0_18, %c0_19] : memref<9x32x32xbf16, #tpu.memory_space<vmem>>, vector<1x32x32xbf16>
    %29 = vector.shape_cast %28 : vector<1x32x32xbf16> to vector<32x32xbf16>
    %30 = vector.extract_strided_slice %1 {offsets = [0, 129], sizes = [32, 768], strides = [1, 1]} : vector<32x1024xbf16> to vector<32x768xbf16>
    %cst_20 = arith.constant dense<0.000000e+00> : vector<32x768xf32>
    %31 = tpu.matmul %29, %30, %cst_20 {dimension_numbers = #tpu.dot_dimension_numbers<[1], [0], [0], [1], [0, 0, 1, 1], [], []>} : vector<32x32xbf16>, vector<32x768xbf16>, vector<32x768xf32> -> vector<32x768xf32>
    %32 = arith.addf %27, %31 : vector<32x768xf32>
    %c6 = arith.constant 6 : index
    %c0_21 = arith.constant 0 : index
    %c0_22 = arith.constant 0 : index
    %33 = vector.load %arg2[%c6, %c0_21, %c0_22] : memref<9x32x32xbf16, #tpu.memory_space<vmem>>, vector<1x32x32xbf16>
    %34 = vector.shape_cast %33 : vector<1x32x32xbf16> to vector<32x32xbf16>
    %35 = vector.extract_strided_slice %1 {offsets = [0, 145], sizes = [32, 768], strides = [1, 1]} : vector<32x1024xbf16> to vector<32x768xbf16>
    %cst_23 = arith.constant dense<0.000000e+00> : vector<32x768xf32>
    %36 = tpu.matmul %34, %35, %cst_23 {dimension_numbers = #tpu.dot_dimension_numbers<[1], [0], [0], [1], [0, 0, 1, 1], [], []>} : vector<32x32xbf16>, vector<32x768xbf16>, vector<32x768xf32> -> vector<32x768xf32>
    %37 = arith.addf %32, %36 : vector<32x768xf32>
    %c7 = arith.constant 7 : index
    %c0_24 = arith.constant 0 : index
    %c0_25 = arith.constant 0 : index
    %38 = vector.load %arg2[%c7, %c0_24, %c0_25] : memref<9x32x32xbf16, #tpu.memory_space<vmem>>, vector<1x32x32xbf16>
    %39 = vector.shape_cast %38 : vector<1x32x32xbf16> to vector<32x32xbf16>
    %40 = vector.extract_strided_slice %1 {offsets = [0, 146], sizes = [32, 768], strides = [1, 1]} : vector<32x1024xbf16> to vector<32x768xbf16>
    %cst_26 = arith.constant dense<0.000000e+00> : vector<32x768xf32>
    %41 = tpu.matmul %39, %40, %cst_26 {dimension_numbers = #tpu.dot_dimension_numbers<[1], [0], [0], [1], [0, 0, 1, 1], [], []>} : vector<32x32xbf16>, vector<32x768xbf16>, vector<32x768xf32> -> vector<32x768xf32>
    %42 = arith.addf %37, %41 : vector<32x768xf32>
    %c8 = arith.constant 8 : index
    %c0_27 = arith.constant 0 : index
    %c0_28 = arith.constant 0 : index
    %43 = vector.load %arg2[%c8, %c0_27, %c0_28] : memref<9x32x32xbf16, #tpu.memory_space<vmem>>, vector<1x32x32xbf16>
    %44 = vector.shape_cast %43 : vector<1x32x32xbf16> to vector<32x32xbf16>
    %45 = vector.extract_strided_slice %1 {offsets = [0, 147], sizes = [32, 768], strides = [1, 1]} : vector<32x1024xbf16> to vector<32x768xbf16>
    %cst_29 = arith.constant dense<0.000000e+00> : vector<32x768xf32>
    %46 = tpu.matmul %44, %45, %cst_29 {dimension_numbers = #tpu.dot_dimension_numbers<[1], [0], [0], [1], [0, 0, 1, 1], [], []>} : vector<32x32xbf16>, vector<32x768xbf16>, vector<32x768xf32> -> vector<32x768xf32>
    %47 = arith.addf %42, %46 : vector<32x768xf32>
    %c0_30 = arith.constant 0 : index
    %c0_31 = arith.constant 0 : index
    %48 = vector.load %arg3[%c0_30, %c0_31] : memref<32x1xf32, #tpu.memory_space<vmem>>, vector<32x1xf32>
    %49 = vector.broadcast %48 : vector<32x1xf32> to vector<32x768xf32>
    %50 = arith.addf %47, %49 : vector<32x768xf32>
    %51 = arith.truncf %50 : vector<32x768xf32> to vector<32x768xbf16>
    %c0_32 = arith.constant 0 : index
    %c0_33 = arith.constant 0 : index
    %c0_34 = arith.constant 0 : index
    %52 = vector.load %arg4[%c0_32, %c0_33, %c0_34] : memref<1x32x768xbf16, #tpu.memory_space<vmem>>, vector<1x32x768xbf16>
    %53 = vector.shape_cast %52 : vector<1x32x768xbf16> to vector<32x768xbf16>
    %54 = vector.shape_cast %51 : vector<32x768xbf16> to vector<1x32x768xbf16>
    tpu.vector_store %arg4[%c0_32, %c0_33, %c0_34], %54 {strides = array<i32>} : memref<1x32x768xbf16, #tpu.memory_space<vmem>>, vector<1x32x768xbf16>,
    return
  }
  func.func @transform_0(%arg0: i32) -> (i32, i32, i32) {
    %c0_i32 = arith.constant 0 : i32
    %c0_i32_0 = arith.constant 0 : i32
    %c0_i32_1 = arith.constant 0 : i32
    return %arg0, %c0_i32, %c0_i32_0 : i32, i32, i32
  }
  func.func @transform_1(%arg0: i32) -> (i32, i32, i32) {
    %c0_i32 = arith.constant 0 : i32
    %c0_i32_0 = arith.constant 0 : i32
    %c0_i32_1 = arith.constant 0 : i32
    %c0_i32_2 = arith.constant 0 : i32
    return %c0_i32, %c0_i32_0, %c0_i32_1 : i32, i32, i32
  }
  func.func @transform_2(%arg0: i32) -> (i32, i32) {
    %c0_i32 = arith.constant 0 : i32
    %c0_i32_0 = arith.constant 0 : i32
    %c0_i32_1 = arith.constant 0 : i32
    return %c0_i32, %c0_i32_0 : i32, i32
  }
  func.func @transform_3(%arg0: i32) -> (i32, i32, i32) {
    %c0_i32 = arith.constant 0 : i32
    %c0_i32_0 = arith.constant 0 : i32
    %c0_i32_1 = arith.constant 0 : i32
    return %arg0, %c0_i32, %c0_i32_0 : i32, i32, i32
  }
}

module attributes {stable_mosaic.version = 11 : i64} {
  func.func @_recurrent_kernel(%arg0: i32, %arg1: memref<1x32x768xbf16, #tpu.memory_space<vmem>>, %arg2: memref<32x72xbf16, #tpu.memory_space<vmem>>, %arg3: memref<1x768xf32, #tpu.memory_space<vmem>>, %arg4: memref<1x8x1024xbf16, #tpu.memory_space<vmem>>, %arg5: memref<8x768xf32, #tpu.memory_space<vmem>>, %arg6: memref<8x1024xf32, #tpu.memory_space<vmem>>) attributes {dimension_semantics = [#tpu.dimension_semantics<arbitrary>], iteration_bounds = array<i64: 8>, scalar_prefetch = 0 : i64, scratch_operands = 1 : i64, tpu.core_type = #tpu.core_type<tc>, window_params = [{transform_indices = @transform_0, window_bounds = array<i64: 1, 32, 768>}, {pipeline_mode = #tpu.pipeline_mode<synchronous>, transform_indices = @transform_1, window_bounds = array<i64: 32, 72>}, {pipeline_mode = #tpu.pipeline_mode<synchronous>, transform_indices = @transform_2, window_bounds = array<i64: 1, 768>}, {transform_indices = @transform_3, window_bounds = array<i64: 1, 8, 1024>}, {pipeline_mode = #tpu.pipeline_mode<synchronous>, transform_indices = @transform_4, window_bounds = array<i64: 8, 768>}]} {
    %c0_i32 = arith.constant 0 : i32
    %0 = arith.cmpi eq, %arg0, %c0_i32 : i32
    %1 = arith.extui %0 : i1 to i32
    %c0_i32_0 = arith.constant 0 : i32
    %2 = arith.cmpi ne, %1, %c0_i32_0 : i32
    scf.if %2 {
      %cst_22 = arith.constant 0.000000e+00 : f32
      %57 = vector.broadcast %cst_22 : f32 to vector<8x1024xf32>
      %c0_23 = arith.constant 0 : index
      %c0_24 = arith.constant 0 : index
      %58 = vector.load %arg6[%c0_23, %c0_24] : memref<8x1024xf32, #tpu.memory_space<vmem>>, vector<8x1024xf32>
      tpu.vector_store %arg6[%c0_23, %c0_24], %57 {strides = array<i32>} : memref<8x1024xf32, #tpu.memory_space<vmem>>, vector<8x1024xf32>,
      %cst_25 = arith.constant 0.000000e+00 : f32
      %59 = vector.broadcast %cst_25 : f32 to vector<8x768xf32>
      %c0_26 = arith.constant 0 : index
      %c0_27 = arith.constant 0 : index
      %60 = vector.load %arg5[%c0_26, %c0_27] : memref<8x768xf32, #tpu.memory_space<vmem>>, vector<8x768xf32>
      tpu.vector_store %arg5[%c0_26, %c0_27], %59 {strides = array<i32>} : memref<8x768xf32, #tpu.memory_space<vmem>>, vector<8x768xf32>,
    } else {
    }
    %c0 = arith.constant 0 : index
    %c0_1 = arith.constant 0 : index
    %3 = vector.load %arg6[%c0, %c0_1] : memref<8x1024xf32, #tpu.memory_space<vmem>>, vector<8x1024xf32>
    %4 = arith.truncf %3 : vector<8x1024xf32> to vector<8x1024xbf16>
    %c0_2 = arith.constant 0 : index
    %c0_3 = arith.constant 0 : index
    %c0_4 = arith.constant 0 : index
    %5 = vector.load %arg1[%c0_2, %c0_3, %c0_4] : memref<1x32x768xbf16, #tpu.memory_space<vmem>>, vector<1x32x768xbf16>
    %6 = vector.shape_cast %5 : vector<1x32x768xbf16> to vector<32x768xbf16>
    %7 = arith.extf %6 : vector<32x768xbf16> to vector<32x768xf32>
    %8 = vector.extract_strided_slice %4 {offsets = [0, 109], sizes = [8, 768], strides = [1, 1]} : vector<8x1024xbf16> to vector<8x768xbf16>
    %9 = vector.extract_strided_slice %4 {offsets = [0, 110], sizes = [8, 768], strides = [1, 1]} : vector<8x1024xbf16> to vector<8x768xbf16>
    %10 = vector.extract_strided_slice %4 {offsets = [0, 111], sizes = [8, 768], strides = [1, 1]} : vector<8x1024xbf16> to vector<8x768xbf16>
    %11 = vector.extract_strided_slice %4 {offsets = [0, 127], sizes = [8, 768], strides = [1, 1]} : vector<8x1024xbf16> to vector<8x768xbf16>
    %12 = vector.extract_strided_slice %4 {offsets = [0, 128], sizes = [8, 768], strides = [1, 1]} : vector<8x1024xbf16> to vector<8x768xbf16>
    %13 = vector.extract_strided_slice %4 {offsets = [0, 129], sizes = [8, 768], strides = [1, 1]} : vector<8x1024xbf16> to vector<8x768xbf16>
    %14 = vector.extract_strided_slice %4 {offsets = [0, 145], sizes = [8, 768], strides = [1, 1]} : vector<8x1024xbf16> to vector<8x768xbf16>
    %15 = vector.extract_strided_slice %4 {offsets = [0, 146], sizes = [8, 768], strides = [1, 1]} : vector<8x1024xbf16> to vector<8x768xbf16>
    %16 = vector.extract_strided_slice %4 {offsets = [0, 147], sizes = [8, 768], strides = [1, 1]} : vector<8x1024xbf16> to vector<8x768xbf16>
    %17 = tpu.concatenate %8, %9, %10, %11, %12, %13, %14, %15, %16 in 0 : vector<8x768xbf16>, vector<8x768xbf16>, vector<8x768xbf16>, vector<8x768xbf16>, vector<8x768xbf16>, vector<8x768xbf16>, vector<8x768xbf16>, vector<8x768xbf16>, vector<8x768xbf16> -> vector<72x768xbf16>
    %c0_5 = arith.constant 0 : index
    %c0_6 = arith.constant 0 : index
    %18 = vector.load %arg2[%c0_5, %c0_6] : memref<32x72xbf16, #tpu.memory_space<vmem>>, vector<32x72xbf16>
    %cst = arith.constant dense<0.000000e+00> : vector<32x768xf32>
    %19 = tpu.matmul %18, %17, %cst {dimension_numbers = #tpu.dot_dimension_numbers<[1], [0], [0], [1], [0, 0, 1, 1], [], []>} : vector<32x72xbf16>, vector<72x768xbf16>, vector<32x768xf32> -> vector<32x768xf32>
    %20 = arith.addf %7, %19 : vector<32x768xf32>
    %21 = vector.extract_strided_slice %20 {offsets = [0, 0], sizes = [8, 768], strides = [1, 1]} : vector<32x768xf32> to vector<8x768xf32>
    %22 = arith.negf %21 : vector<8x768xf32>
    %23 = math.exp %22 : vector<8x768xf32>
    %cst_7 = arith.constant 1.000000e+00 : f32
    %24 = vector.broadcast %cst_7 : f32 to vector<8x768xf32>
    %25 = arith.addf %24, %23 : vector<8x768xf32>
    %26 = arith.divf %24, %25 : vector<8x768xf32>
    %27 = vector.extract_strided_slice %20 {offsets = [8, 0], sizes = [8, 768], strides = [1, 1]} : vector<32x768xf32> to vector<8x768xf32>
    %28 = arith.negf %27 : vector<8x768xf32>
    %29 = math.exp %28 : vector<8x768xf32>
    %cst_8 = arith.constant 1.000000e+00 : f32
    %30 = vector.broadcast %cst_8 : f32 to vector<8x768xf32>
    %31 = arith.addf %30, %29 : vector<8x768xf32>
    %32 = arith.divf %30, %31 : vector<8x768xf32>
    %33 = vector.extract_strided_slice %20 {offsets = [16, 0], sizes = [8, 768], strides = [1, 1]} : vector<32x768xf32> to vector<8x768xf32>
    %34 = arith.negf %33 : vector<8x768xf32>
    %35 = math.exp %34 : vector<8x768xf32>
    %cst_9 = arith.constant 1.000000e+00 : f32
    %36 = vector.broadcast %cst_9 : f32 to vector<8x768xf32>
    %37 = arith.addf %36, %35 : vector<8x768xf32>
    %38 = arith.divf %36, %37 : vector<8x768xf32>
    %39 = vector.extract_strided_slice %20 {offsets = [24, 0], sizes = [8, 768], strides = [1, 1]} : vector<32x768xf32> to vector<8x768xf32>
    %40 = math.tanh %39 : vector<8x768xf32>
    %c0_10 = arith.constant 0 : index
    %c0_11 = arith.constant 0 : index
    %41 = vector.load %arg5[%c0_10, %c0_11] : memref<8x768xf32, #tpu.memory_space<vmem>>, vector<8x768xf32>
    %42 = arith.mulf %32, %41 : vector<8x768xf32>
    %43 = arith.mulf %26, %40 : vector<8x768xf32>
    %44 = arith.addf %42, %43 : vector<8x768xf32>
    %45 = math.tanh %44 : vector<8x768xf32>
    %46 = arith.mulf %38, %45 : vector<8x768xf32>
    %c0_12 = arith.constant 0 : index
    %c0_13 = arith.constant 0 : index
    %47 = vector.load %arg3[%c0_12, %c0_13] : memref<1x768xf32, #tpu.memory_space<vmem>>, vector<1x768xf32>
    %48 = vector.broadcast %47 : vector<1x768xf32> to vector<8x768xf32>
    %49 = arith.mulf %46, %48 : vector<8x768xf32>
    %c0_14 = arith.constant 0 : index
    %c0_15 = arith.constant 0 : index
    %50 = vector.load %arg5[%c0_14, %c0_15] : memref<8x768xf32, #tpu.memory_space<vmem>>, vector<8x768xf32>
    tpu.vector_store %arg5[%c0_14, %c0_15], %44 {strides = array<i32>} : memref<8x768xf32, #tpu.memory_space<vmem>>, vector<8x768xf32>,
    %c0_16 = arith.constant 0 : index
    %c128 = arith.constant 128 : index
    %51 = vector.load %arg6[%c0_16, %c128] : memref<8x1024xf32, #tpu.memory_space<vmem>>, vector<8x768xf32>
    tpu.vector_store %arg6[%c0_16, %c128], %49 {strides = array<i32>} : memref<8x1024xf32, #tpu.memory_space<vmem>>, vector<8x768xf32>,
    %c0_17 = arith.constant 0 : index
    %c0_18 = arith.constant 0 : index
    %52 = vector.load %arg6[%c0_17, %c0_18] : memref<8x1024xf32, #tpu.memory_space<vmem>>, vector<8x1024xf32>
    %53 = arith.truncf %52 : vector<8x1024xf32> to vector<8x1024xbf16>
    %c0_19 = arith.constant 0 : index
    %c0_20 = arith.constant 0 : index
    %c0_21 = arith.constant 0 : index
    %54 = vector.load %arg4[%c0_19, %c0_20, %c0_21] : memref<1x8x1024xbf16, #tpu.memory_space<vmem>>, vector<1x8x1024xbf16>
    %55 = vector.shape_cast %54 : vector<1x8x1024xbf16> to vector<8x1024xbf16>
    %56 = vector.shape_cast %53 : vector<8x1024xbf16> to vector<1x8x1024xbf16>
    tpu.vector_store %arg4[%c0_19, %c0_20, %c0_21], %56 {strides = array<i32>} : memref<1x8x1024xbf16, #tpu.memory_space<vmem>>, vector<1x8x1024xbf16>,
    return
  }
  func.func @transform_0(%arg0: i32) -> (i32, i32, i32) {
    %c0_i32 = arith.constant 0 : i32
    %c0_i32_0 = arith.constant 0 : i32
    %c0_i32_1 = arith.constant 0 : i32
    return %arg0, %c0_i32, %c0_i32_0 : i32, i32, i32
  }
  func.func @transform_1(%arg0: i32) -> (i32, i32) {
    %c0_i32 = arith.constant 0 : i32
    %c0_i32_0 = arith.constant 0 : i32
    %c0_i32_1 = arith.constant 0 : i32
    return %c0_i32, %c0_i32_0 : i32, i32
  }
  func.func @transform_2(%arg0: i32) -> (i32, i32) {
    %c0_i32 = arith.constant 0 : i32
    %c0_i32_0 = arith.constant 0 : i32
    %c0_i32_1 = arith.constant 0 : i32
    return %c0_i32, %c0_i32_0 : i32, i32
  }
  func.func @transform_3(%arg0: i32) -> (i32, i32, i32) {
    %c0_i32 = arith.constant 0 : i32
    %c0_i32_0 = arith.constant 0 : i32
    %c0_i32_1 = arith.constant 0 : i32
    return %arg0, %c0_i32, %c0_i32_0 : i32, i32, i32
  }
  func.func @transform_4(%arg0: i32) -> (i32, i32) {
    %c0_i32 = arith.constant 0 : i32
    %c0_i32_0 = arith.constant 0 : i32
    %c0_i32_1 = arith.constant 0 : i32
    return %c0_i32, %c0_i32_0 : i32, i32
  }
}

</mosaic_0001>

<bundles_post_ra>
// kernel: convlstm_forward.4
= control target key start
LH: loop header
LB: loop body
LE: loop exit
PB: predicated region body
PF: predicated region fallthrough
CT: control target
= control target key end

     0   :  { %s1759_s12 = smov 0   ;;  %s2442_s0 = inlined_call_operand.vmem [shape: bf16[8,8,1024], index: 0, kind: input, shape index: {}]   ;;  %s2443_s1 = inlined_call_operand.vmem [shape: bf16[128,72], index: 1, kind: input, shape index: {}]   ;;  %s2444_s2 = inlined_call_operand.vmem [shape: f32[128,1], index: 2, kind: input, shape index: {}]   ;;  %s2445_s3 = inlined_call_operand.vmem [shape: bf16[8,128,768], index: 3, kind: output, shape index: {}]  }
   0x1 LB: > { %s1524_s13 = sadd.s32 4294967295, %s1727_s12   ;;  %p1528_p0 = scmp.ge.s32.totalorder %s1727_s12, 1  ;;  %s1727_s12 = sphi %s1759_s12, %s13_s12  }
   0x2   : > { %p137_p1 = scmp.lt.s32.totalorder %s1727_s12, 9 }
   0x4   : > { %p138_p2 = pnand %p1528_p0, %p137_p1 }
   0x5   : > { %p161_p3 = scmp.lt.s32.totalorder (!%p138_p2), %s1524_s13, 7  ;;  %s1729_s18 = smov (!%p138_p2), 127   ;;  %vm208_vm0 = vcmask (!%p138_p2), 1039360   ;;  %vm361_vm1 = vcmask (!%p138_p2), 1043456   ;;  %vm229_vm2 = vcmask (!%p138_p2), 1031168   ;;  %vm250_vm3 = vcmask (!%p138_p2), 900096  }
   0x6   : > { %141 = sbr.rel (%p138_p2) target bundleno = 640 (0x280), region = 32  ;;  %s1730_s19 = smov (!%p138_p2), 126   ;;  %vm291_vm4 = vcmask (!%p138_p2), 883712   ;;  %vm269_vm5 = vcmask (!%p138_p2), 891904   ;;  %vm312_vm6 = vcmask (!%p138_p2), 752640   ;;  %vm333_vm7 = vcmask (!%p138_p2), 744448  }
   0x7   : > { %s1731_s20 = smov (!%p138_p2), 110   ;;  %s1732_s21 = smov (!%p138_p2), 109   ;;  %vm354_vm8 = vcmask (!%p138_p2), 736256   ;;  %vm696_vm9 = vcmask (!%p138_p2), 154624   ;;  %vm751_vm10 = vcmask (!%p138_p2), 588800  }
   0x8   : > { %s1733_s22 = smov (!%p138_p2), 108   ;;  %s1734_s23 = smov (!%p138_p2), 92  }
   0x9   : > { %s1735_s24 = smov (!%p138_p2), 91   ;;  %s1736_s25 = smov (!%p138_p2), 90  }
   0xa   : > { %s1737_s26 = smov (!%p138_p2), 19  }
   0xd   : > { %s2447_s13 = smov (!%p161_p3, %s1524_s13), 7 }
   0xe   : > { %s1625_s14 = sshll.u32 %s2447_s13, 5 }
   0xf   : > { %s1773_s17 = scalar_lea.vmem %s2442_s0, %s1625_s14 }
  0x10   : > { %v173_v0 = vld [vmem:[%s1773_s17 + $0x8] sm:$0xff]  ;;  %v172_v1 = vld [vmem:[%s1773_s17] sm:$0xff]  ;;  %v174_v6 = vld [vmem:[%s1773_s17 + $0x10] sm:$0xff] }
  0x11   : > { %v1777_v2 = vcombine.high %v173_v0, %v173_v0  ;;  %v1779_v3 = vcombine.high %v172_v1, %v172_v1  ;;  %v1785_v4 = vcombine.low %v173_v0, %v173_v0  ;;  %v1787_v5 = vcombine.low %v172_v1, %v172_v1  ;;  %v175_v8 = vld [vmem:[%s1773_s17 + $0x18] sm:$0xff] }
  0x12   : > { %v1838_v7 = vcombine.low %v174_v6, %v174_v6  ;;  %v1845_v9 = vcombine.high %v174_v6, %v174_v6  ;;  %v1847_v10 = vcombine.low %v175_v8, %v175_v8  ;;  %v1539_v11 = vcombine.high %v175_v8, %v175_v8 }
  0x13   : > { %200 = vrot.lane.b32.xlu1 %v1777_v2, %s1729_s18  ;;  %196 = vrot.lane.b32.xlu0 %v1779_v3, %s1729_s18 }
  0x17   : > { %198 = vrot.lane.b32.xlu0 %v1785_v4, %s1729_s18  ;;  %194 = vrot.lane.b32.xlu1 %v1787_v5, %s1729_s18 }
  0x1b   : > { %217 = vrot.lane.b32.xlu0 %v1779_v3, %s1730_s19  ;;  %219 = vrot.lane.b32.xlu1 %v1785_v4, %s1730_s19 }
  0x1f   : > { %221 = vrot.lane.b32.xlu0 %v1777_v2, %s1730_s19  ;;  %238 = vrot.lane.b32.xlu1 %v1779_v3, %s1731_s20 }
  0x23   : > { %240 = vrot.lane.b32.xlu0 %v1785_v4, %s1731_s20  ;;  %242 = vrot.lane.b32.xlu1 %v1777_v2, %s1731_s20 }
  0x27   : > { %215 = vrot.lane.b32.xlu0 %v1787_v5, %s1730_s19  ;;  %236 = vrot.lane.b32.xlu1 %v1787_v5, %s1731_s20 }
  0x2b   : > { %257 = vrot.lane.b32.xlu0 %v1779_v3, %s1732_s21  ;;  %259 = vrot.lane.b32.xlu1 %v1785_v4, %s1732_s21 }
  0x2f   : > { %261 = vrot.lane.b32.xlu0 %v1777_v2, %s1732_s21  ;;  %277 = vrot.lane.b32.xlu1 %v1779_v3, %s1733_s22 }
  0x33   : > { %279 = vrot.lane.b32.xlu0 %v1785_v4, %s1733_s22  ;;  %281 = vrot.lane.b32.xlu1 %v1777_v2, %s1733_s22 }
  0x37   : > { %298 = vrot.lane.b32.xlu0 %v1779_v3, %s1734_s23  ;;  %300 = vrot.lane.b32.xlu1 %v1785_v4, %s1734_s23 }
  0x3b   : > { %302 = vrot.lane.b32.xlu0 %v1777_v2, %s1734_s23  ;;  %319 = vrot.lane.b32.xlu1 %v1779_v3, %s1735_s24 }
  0x3f   : > { %321 = vrot.lane.b32.xlu0 %v1785_v4, %s1735_s24  ;;  %323 = vrot.lane.b32.xlu1 %v1777_v2, %s1735_s24 }
  0x43   : > { %340 = vrot.lane.b32.xlu0 %v1779_v3, %s1736_s25  ;;  %342 = vrot.lane.b32.xlu1 %v1785_v4, %s1736_s25 }
  0x47   : > { %344 = vrot.lane.b32.xlu0 %v1777_v2, %s1736_s25  ;;  %202 = vrot.lane.b32.xlu1 %v1838_v7, %s1729_s18 }
  0x4b   : > { %204 = vrot.lane.b32.xlu0 %v1845_v9, %s1729_s18  ;;  %206 = vrot.lane.b32.xlu1 %v1847_v10, %s1729_s18 }
  0x4f   : > { %223 = vrot.lane.b32.xlu0 %v1838_v7, %s1730_s19  ;;  %225 = vrot.lane.b32.xlu1 %v1845_v9, %s1730_s19 }
  0x53   : > { %227 = vrot.lane.b32.xlu0 %v1847_v10, %s1730_s19  ;;  %244 = vrot.lane.b32.xlu1 %v1838_v7, %s1731_s20 }
  0x57   : > { %246 = vrot.lane.b32.xlu0 %v1845_v9, %s1731_s20  ;;  %248 = vrot.lane.b32.xlu1 %v1847_v10, %s1731_s20 }
  0x5b   : > { %263 = vrot.lane.b32.xlu0 %v1838_v7, %s1732_s21  ;;  %265 = vrot.lane.b32.xlu1 %v1845_v9, %s1732_s21 }
  0x5f   : > { %267 = vrot.lane.b32.xlu0 %v1847_v10, %s1732_s21  ;;  %283 = vrot.lane.b32.xlu1 %v1838_v7, %s1733_s22 }
  0x63   : > { %285 = vrot.lane.b32.xlu0 %v1845_v9, %s1733_s22  ;;  %287 = vrot.lane.b32.xlu1 %v1847_v10, %s1733_s22 }
  0x67   : > { %289 = vrot.lane.b32.xlu0 %v1539_v11, %s1733_s22  ;;  %304 = vrot.lane.b32.xlu1 %v1838_v7, %s1734_s23 }
  0x6b   : > { %306 = vrot.lane.b32.xlu0 %v1845_v9, %s1734_s23  ;;  %308 = vrot.lane.b32.xlu1 %v1847_v10, %s1734_s23 }
  0x6f   : > { %310 = vrot.lane.b32.xlu0 %v1539_v11, %s1734_s23  ;;  %325 = vrot.lane.b32.xlu1 %v1838_v7, %s1735_s24 }
  0x73   : > { %327 = vrot.lane.b32.xlu0 %v1845_v9, %s1735_s24  ;;  %329 = vrot.lane.b32.xlu1 %v1847_v10, %s1735_s24 }
  0x77   : > { %331 = vrot.lane.b32.xlu0 %v1539_v11, %s1735_s24  ;;  %346 = vrot.lane.b32.xlu1 %v1838_v7, %s1736_s25 }
  0x7b   : > { %348 = vrot.lane.b32.xlu0 %v1845_v9, %s1736_s25  ;;  %350 = vrot.lane.b32.xlu1 %v1847_v10, %s1736_s25 }
  0x7f   : > { %352 = vrot.lane.b32.xlu0 %v1539_v11, %s1736_s25  ;;  %s1684_s25 = smul.u32 384, %s2447_s13 }
  0x81   : > { %s2284_s28 = scalar_lea.vmem %s2445_s3, %s1684_s25 }
  0x85   : > { %v1899_v12 = vpop.permute.xlu1 %200  ;;  %v197_v13 = vpop.permute.xlu0 %196 }
  0x89   : > { %v199_v14 = vpop.permute.xlu0 %198  ;;  %v195_v15 = vpop.permute.xlu1 %194 }
  0x8a   : > { %v211_v16 = vsel %vm208_vm0, %v199_v14, %v1899_v12  ;;  %v210_v37 = vsel %vm208_vm0, %v197_v13, %v199_v14  ;;  %v209_v43 = vsel %vm208_vm0, %v195_v15, %v197_v13 }
  0x8b   : > { %v370_v17 = vsel %vm361_vm1, %v1785_v4, %v211_v16  ;;  %v367_v42 = vsel %vm361_vm1, %v1779_v3, %v210_v37  ;;  %v364_v47 = vsel %vm361_vm1, %v1787_v5, %v209_v43  ;;  %v1738_v4 = vmov 0  }
  0x8c   : > { %630 = vrot.lane.b32.xlu0 %v370_v17, %s1737_s26  ;;  %866 = vmatprep.mubr.bf16.mxu1 %v1738_v4 }
  0x8d   : > { %v218_v18 = vpop.permute.xlu0 %217  ;;  %v220_v19 = vpop.permute.xlu1 %219  ;;  %826 = vmatprep.mubr.bf16.mxu0 %v1738_v4  ;;  %1704 = vset.pattern.permute.xlu1 %v1738_v4 }
  0x8e   : > { %v231_v24 = vsel %vm229_vm2, %v218_v18, %v220_v19  ;;  %1703 = vset.pattern.permute.xlu0 %v1738_v4 }
  0x91   : > { %v1906_v20 = vpop.permute.xlu0 %221  ;;  %v239_v21 = vpop.permute.xlu1 %238 }
  0x92   : > { %v232_v49 = vsel %vm229_vm2, %v220_v19, %v1906_v20 }
  0x95   : > { %v241_v22 = vpop.permute.xlu0 %240  ;;  %v1908_v23 = vpop.permute.xlu1 %242 }
  0x96   : > { %v252_v25 = vsel %vm250_vm3, %v239_v21, %v241_v22  ;;  %v253_v48 = vsel %vm250_vm3, %v241_v22, %v1908_v23 }
  0x97   : > { %v388_v26 = vsel %vm361_vm1, %v231_v24, %v252_v25  ;;  %v391_v52 = vsel %vm361_vm1, %v232_v49, %v253_v48 }
  0x98   : > { %642 = vrot.lane.b32.xlu0 %v388_v26, %s1737_s26 }
  0x99   : > { %v216_v27 = vpop.permute.xlu0 %215  ;;  %v237_v28 = vpop.permute.xlu1 %236 }
  0x9a   : > { %v230_v29 = vsel %vm229_vm2, %v216_v27, %v218_v18  ;;  %v251_v30 = vsel %vm250_vm3, %v237_v28, %v239_v21 }
  0x9b   : > { %v385_v31 = vsel %vm361_vm1, %v230_v29, %v251_v30 }
  0x9c   : > { %640 = vrot.lane.b32.xlu0 %v385_v31, %s1737_s26 }
  0x9d   : > { %v258_v32 = vpop.permute.xlu0 %257  ;;  %v260_v33 = vpop.permute.xlu1 %259 }
  0x9e   : > { %v270_v54 = vsel %vm269_vm5, %v258_v32, %v260_v33 }
  0xa1   : > { %v1918_v34 = vpop.permute.xlu0 %261  ;;  %v278_v35 = vpop.permute.xlu1 %277 }
  0xa2   : > { %v406_v36 = vsel %vm361_vm1, %v258_v32, %v278_v35  ;;  %v271_v40 = vsel %vm269_vm5, %v260_v33, %v1918_v34 }
  0xa3   : > { %654 = vrot.lane.b32.xlu1 %v406_v36, %s1737_s26 }
  0xa5   : > { %v280_v38 = vpop.permute.xlu0 %279  ;;  %v1923_v39 = vpop.permute.xlu1 %281 }
  0xa6   : > { %v293_v41 = vsel %vm291_vm4, %v280_v38, %v1923_v39  ;;  %v292_v53 = vsel %vm291_vm4, %v278_v35, %v280_v38 }
  0xa7   : > { %628 = vrot.lane.b32.xlu1 %v367_v42, %s1737_s26  ;;  %v412_v44 = vsel %vm361_vm1, %v271_v40, %v293_v41  ;;  %v409_v59 = vsel %vm361_vm1, %v270_v54, %v292_v53 }
  0xa8   : > { %658 = vrot.lane.b32.xlu0 %v412_v44, %s1737_s26 }
  0xa9   : > { %v299_v45 = vpop.permute.xlu0 %298  ;;  %v301_v46 = vpop.permute.xlu1 %300 }
  0xaa   : > { %v313_v57 = vsel %vm312_vm6, %v299_v45, %v301_v46 }
  0xab   : > { %626 = vrot.lane.b32.xlu1 %v364_v47, %s1737_s26 }
  0xad   : > { %v1942_v50 = vpop.permute.xlu0 %302  ;;  %v320_v51 = vpop.permute.xlu1 %319 }
  0xae   : > { %v314_v62 = vsel %vm312_vm6, %v301_v46, %v1942_v50  ;;  %v427_v3 = vsel %vm361_vm1, %v299_v45, %v320_v51 }
  0xaf   : > { %644 = vrot.lane.b32.xlu1 %v391_v52, %s1737_s26 }
  0xb1   : > { %v322_v55 = vpop.permute.xlu0 %321  ;;  %v1948_v56 = vpop.permute.xlu1 %323 }
  0xb2   : > { %v334_v58 = vsel %vm333_vm7, %v320_v51, %v322_v55  ;;  %v335_v60 = vsel %vm333_vm7, %v322_v55, %v1948_v56 }
  0xb3   : > { %656 = vrot.lane.b32.xlu1 %v409_v59, %s1737_s26  ;;  %v430_v61 = vsel %vm361_vm1, %v313_v57, %v334_v58  ;;  %v433_v1 = vsel %vm361_vm1, %v314_v62, %v335_v60 }
  0xb4   : > { %670 = vrot.lane.b32.xlu0 %v430_v61, %s1737_s26 }
  0xb5   : > { %v341_v63 = vpop.permute.xlu0 %340  ;;  %v343_v0 = vpop.permute.xlu1 %342 }
  0xb6   : > { %v355_v8 = vsel %vm354_vm8, %v341_v63, %v343_v0 }
  0xb7   : > { %672 = vrot.lane.b32.xlu1 %v433_v1, %s1737_s26 }
  0xb8   : > { %668 = vrot.lane.b32.xlu0 %v427_v3, %s1737_s26 }
  0xb9   : > { %v1966_v5 = vpop.permute.xlu0 %344  ;;  %v203_v6 = vpop.permute.xlu1 %202 }
  0xba   : > { %v212_v11 = vsel %vm208_vm0, %v1899_v12, %v203_v6  ;;  %v356_v15 = vsel %vm354_vm8, %v343_v0, %v1966_v5 }
  0xbb   : > { %682 = vrot.lane.b32.xlu1 %v341_v63, %s1737_s26  ;;  %v373_v17 = vsel %vm361_vm1, %v1777_v2, %v212_v11 }
  0xbc   : > { %684 = vrot.lane.b32.xlu0 %v355_v8, %s1737_s26 }
  0xbd   : > { %v205_v13 = vpop.permute.xlu0 %204  ;;  %v207_v14 = vpop.permute.xlu1 %206 }
  0xbe   : > { %v213_v16 = vsel %vm208_vm0, %v203_v6, %v205_v13  ;;  %v214_v18 = vsel %vm208_vm0, %v205_v13, %v207_v14  ;;  %v382_v27 = vsel %vm361_vm1, %v1847_v10, %v207_v14 }
  0xbf   : > { %686 = vrot.lane.b32.xlu1 %v356_v15, %s1737_s26  ;;  %v376_v21 = vsel %vm361_vm1, %v1838_v7, %v213_v16  ;;  %v379_v22 = vsel %vm361_vm1, %v1845_v9, %v214_v18 }
  0xc0   : > { %632 = vrot.lane.b32.xlu0 %v373_v17, %s1737_s26 }
  0xc1   : > { %v224_v19 = vpop.permute.xlu0 %223  ;;  %v226_v12 = vpop.permute.xlu1 %225 }
  0xc2   : > { %v233_v2 = vsel %vm229_vm2, %v1906_v20, %v224_v19  ;;  %v234_v29 = vsel %vm229_vm2, %v224_v19, %v226_v12 }
  0xc3   : > { %634 = vrot.lane.b32.xlu1 %v376_v21, %s1737_s26 }
  0xc4   : > { %636 = vrot.lane.b32.xlu0 %v379_v22, %s1737_s26  ;;  %v462_v22 = vld [vmem:[%s2444_s2] sm:$0xff] }
  0xc5   : > { %v228_v24 = vpop.permute.xlu0 %227  ;;  %v245_v25 = vpop.permute.xlu1 %244 }
  0xc6   : > { %v254_v26 = vsel %vm250_vm3, %v1908_v23, %v245_v25  ;;  %v235_v30 = vsel %vm229_vm2, %v226_v12, %v228_v24 }
  0xc7   : > { %638 = vrot.lane.b32.xlu1 %v382_v27, %s1737_s26  ;;  %v394_v7 = vsel %vm361_vm1, %v233_v2, %v254_v26  ;;  %v466_v27 = vld [vmem:[%s2444_s2 + $0x20] sm:$0xff] }
  0xc8   : > { %646 = vrot.lane.b32.xlu0 %v394_v7, %s1737_s26  ;;  %v467_v7 = vld [vmem:[%s2444_s2 + $0x28] sm:$0xff] }
  0xc9   : > { %v247_v9 = vpop.permute.xlu0 %246  ;;  %v249_v28 = vpop.permute.xlu1 %248 }
  0xca   : > { %v255_v20 = vsel %vm250_vm3, %v245_v25, %v247_v9  ;;  %v256_v31 = vsel %vm250_vm3, %v247_v9, %v249_v28  ;;  %v403_v35 = vsel %vm361_vm1, %v228_v24, %v249_v28  ;;  %v464_v24 = vld [vmem:[%s2444_s2 + $0x10] sm:$0xff]  ;;  %v465_v25 = vld [vmem:[%s2444_s2 + $0x18] sm:$0xff] }
  0xcb   : > { %v397_v23 = vsel %vm361_vm1, %v234_v29, %v255_v20  ;;  %v400_v10 = vsel %vm361_vm1, %v235_v30, %v256_v31  ;;  %v468_v30 = vld [vmem:[%s2444_s2 + $0x30] sm:$0xff]  ;;  %v469_v20 = vld [vmem:[%s2444_s2 + $0x38] sm:$0xff] }
  0xcc   : > { %648 = vrot.lane.b32.xlu1 %v397_v23, %s1737_s26  ;;  %650 = vrot.lane.b32.xlu0 %v400_v10, %s1737_s26 }
  0xcd   : > { %v264_v32 = vpop.permute.xlu0 %263  ;;  %v266_v33 = vpop.permute.xlu1 %265 }
  0xce   : > { %v272_v38 = vsel %vm269_vm5, %v1918_v34, %v264_v32  ;;  %v273_v44 = vsel %vm269_vm5, %v264_v32, %v266_v33  ;;  %v470_v32 = vld [vmem:[%s2444_s2 + $0x40] sm:$0xff] }
  0xd0   : > { %652 = vrot.lane.b32.xlu1 %v403_v35, %s1737_s26 }
  0xd1   : > { %v268_v36 = vpop.permute.xlu0 %267  ;;  %v284_v37 = vpop.permute.xlu1 %283 }
  0xd2   : > { %v294_v40 = vsel %vm291_vm4, %v1923_v39, %v284_v37  ;;  %v274_v45 = vsel %vm269_vm5, %v266_v33, %v268_v36  ;;  %v471_v33 = vld [vmem:[%s2444_s2 + $0x48] sm:$0xff] }
  0xd3   : > { %v415_v41 = vsel %vm361_vm1, %v272_v38, %v294_v40  ;;  %v472_v40 = vld [vmem:[%s2444_s2 + $0x50] sm:$0xff] }
  0xd4   : > { %660 = vrot.lane.b32.xlu0 %v415_v41, %s1737_s26  ;;  %v473_v41 = vld [vmem:[%s2444_s2 + $0x58] sm:$0xff] }
  0xd5   : > { %v286_v42 = vpop.permute.xlu0 %285  ;;  %v288_v43 = vpop.permute.xlu1 %287 }
  0xd6   : > { %v295_v46 = vsel %vm291_vm4, %v284_v37, %v286_v42  ;;  %v296_v47 = vsel %vm291_vm4, %v286_v42, %v288_v43 }
  0xd7   : > { %v418_v48 = vsel %vm361_vm1, %v273_v44, %v295_v46  ;;  %v421_v34 = vsel %vm361_vm1, %v274_v45, %v296_v47  ;;  %v474_v46 = vld [vmem:[%s2444_s2 + $0x60] sm:$0xff]  ;;  %v475_v47 = vld [vmem:[%s2444_s2 + $0x68] sm:$0xff] }
  0xd8   : > { %662 = vrot.lane.b32.xlu1 %v418_v48, %s1737_s26  ;;  %664 = vrot.lane.b32.xlu0 %v421_v34, %s1737_s26 }
  0xd9   : > { %v290_v39 = vpop.permute.xlu0 %289  ;;  %v305_v49 = vpop.permute.xlu1 %304 }
  0xda   : > { %v297_v51 = vsel %vm291_vm4, %v288_v43, %v290_v39  ;;  %v315_v58 = vsel %vm312_vm6, %v1942_v50, %v305_v49 }
  0xdb   : > { %v424_v52 = vsel %vm361_vm1, %v268_v36, %v297_v51  ;;  %v477_v51 = vld [vmem:[%s2444_s2 + $0x78] sm:$0xff] }
  0xdc   : > { %666 = vrot.lane.b32.xlu1 %v424_v52, %s1737_s26 }
  0xdd   : > { %v307_v53 = vpop.permute.xlu0 %306  ;;  %v309_v54 = vpop.permute.xlu1 %308 }
  0xde   : > { %v316_v63 = vsel %vm312_vm6, %v305_v49, %v307_v53  ;;  %v317_v0 = vsel %vm312_vm6, %v307_v53, %v309_v54  ;;  %v476_v49 = vld [vmem:[%s2444_s2 + $0x70] sm:$0xff] }
  0xe1   : > { %v311_v55 = vpop.permute.xlu0 %310  ;;  %v326_v57 = vpop.permute.xlu1 %325 }
  0xe2   : > { %v336_v59 = vsel %vm333_vm7, %v1948_v56, %v326_v57  ;;  %v318_v11 = vsel %vm312_vm6, %v309_v54, %v311_v55 }
  0xe3   : > { %v436_v60 = vsel %vm361_vm1, %v315_v58, %v336_v59 }
  0xe4   : > { %674 = vrot.lane.b32.xlu0 %v436_v60, %s1737_s26 }
  0xe5   : > { %v328_v61 = vpop.permute.xlu0 %327  ;;  %v330_v62 = vpop.permute.xlu1 %329 }
  0xe6   : > { %v337_v1 = vsel %vm333_vm7, %v326_v57, %v328_v61  ;;  %v338_v3 = vsel %vm333_vm7, %v328_v61, %v330_v62  ;;  %v2131_v61 = vld [vmem:[%s2443_s1 + $0x20] sm:$0xff]  }
  0xe7   : > { %v439_v6 = vsel %vm361_vm1, %v316_v63, %v337_v1  ;;  %v442_v50 = vsel %vm361_vm1, %v317_v0, %v338_v3 }
  0xe8   : > { %676 = vrot.lane.b32.xlu1 %v439_v6, %s1737_s26  ;;  %678 = vrot.lane.b32.xlu0 %v442_v50, %s1737_s26 }
  0xe9   : > { %v332_v56 = vpop.permute.xlu0 %331  ;;  %v347_v8 = vpop.permute.xlu1 %346 }
  0xea   : > { %v339_v13 = vsel %vm333_vm7, %v330_v62, %v332_v56  ;;  %v357_v14 = vsel %vm354_vm8, %v1966_v5, %v347_v8  ;;  %v463_v5 = vld [vmem:[%s2444_s2 + $0x8] sm:$0xff]  ;;  %v2136_v62 = vld [vmem:[%s2443_s1] sm:$0xff]  }
  0xeb   : > { %v445_v15 = vsel %vm361_vm1, %v318_v11, %v339_v13  ;;  %v2152_v11 = vld [vmem:[%s2443_s1 + $0x28] sm:$0xff]  }
  0xec   : > { %680 = vrot.lane.b32.xlu1 %v445_v15, %s1737_s26  ;;  %688 = vrot.lane.b32.xlu0 %v357_v14, %s1737_s26  ;;  %v2157_v13 = vld [vmem:[%s2443_s1 + $0x8] sm:$0xff]  }
  0xed   : > { %v349_v16 = vpop.permute.xlu0 %348  ;;  %v351_v17 = vpop.permute.xlu1 %350 }
  0xee   : > { %v358_v18 = vsel %vm354_vm8, %v347_v8, %v349_v16  ;;  %v359_v19 = vsel %vm354_vm8, %v349_v16, %v351_v17 }
  0xf0   : > { %690 = vrot.lane.b32.xlu1 %v358_v18, %s1737_s26  ;;  %692 = vrot.lane.b32.xlu0 %v359_v19, %s1737_s26 }
  0xf1   : > { %v353_v12 = vpop.permute.xlu0 %352 }
  0xf2   : > { %v360_v21 = vsel %vm354_vm8, %v351_v17, %v353_v12  ;;  %v2172_v12 = vld [vmem:[%s2443_s1 + $0x30] sm:$0xff]  }
  0xf4   : > { %694 = vrot.lane.b32.xlu1 %v360_v21, %s1737_s26  ;;  %480 = vperm.xlu0 %1703, %v462_v22  }
  0xf8   : > { %485 = vperm.xlu1 %1704, %v463_v5   ;;  %495 = vperm.xlu0 %1703, %v465_v25   ;;  %v1718_v5 = vld [vmem:[%s2443_s1 + $0x10] sm:$0xff]  }
  0xfc   : > { %490 = vperm.xlu1 %1704, %v464_v24   ;;  %505 = vperm.xlu0 %1703, %v467_v7  }
  0xfe   : > { %v2064_v2 = vpop.permute.xlu0 %630 }
 0x100   : > { %500 = vperm.xlu1 %1704, %v466_v27   ;;  %515 = vperm.xlu0 %1703, %v469_v20   ;;  %v1720_v27 = vld [vmem:[%s2443_s1 + $0x18] sm:$0xff]  }
 0x104   : > { %510 = vperm.xlu1 %1704, %v468_v30   ;;  %525 = vperm.xlu0 %1703, %v471_v33  }
 0x108   : > { %520 = vperm.xlu1 %1704, %v470_v32   ;;  %535 = vperm.xlu0 %1703, %v473_v41  }
 0x10a   : > { %v643_v9 = vpop.permute.xlu0 %642 }
 0x10c   : > { %530 = vperm.xlu1 %1704, %v472_v40   ;;  %545 = vperm.xlu0 %1703, %v475_v47  }
 0x10e   : > { %v641_v23 = vpop.permute.xlu0 %640 }
 0x10f   : > { %v703_v38 = vsel %vm696_vm9, %v641_v23, %v643_v9 }
 0x110   : > { %540 = vperm.xlu1 %1704, %v474_v46   ;;  %555 = vperm.xlu0 %1703, %v477_v51  }
 0x114   : > { %550 = vperm.xlu1 %1704, %v476_v49  }
 0x115   : > { %v655_v26 = vpop.permute.xlu1 %654 }
 0x119   : > { %v629_v28 = vpop.permute.xlu1 %628 }
 0x11a   : > { %v698_v29 = vsel %vm696_vm9, %v629_v28, %v2064_v2  ;;  %v2089_v36 = vpop.permute.xlu0 %658 }
 0x11b   : > { %794 = vmatprep.subr.bf16.mxu0 %v698_v29  ;;  %1674 = vmatprep.subr.bf16.mxu1 %v698_v29 }
 0x11d   : > { %v627_v31 = vpop.permute.xlu1 %626 }
 0x11e   : > { %v697_v10 = vsel %vm696_vm9, %v627_v31, %v629_v28 }
 0x11f   : > { %795 = vmatpush1.bf16.msra.mxu0 %v697_v10  ;;  %1679 = vmatpush1.bf16.msra.mxu1 %v697_v10 }
 0x121   : > { %v2087_v35 = vpop.permute.xlu1 %644 }
 0x122   : > { %v704_v37 = vsel %vm696_vm9, %v643_v9, %v2087_v35 }
 0x123   : > { %796 = vmatprep.subr.bf16.mxu0 %v704_v37  ;;  %1675 = vmatprep.subr.bf16.mxu1 %v704_v37 }
 0x124   : > { %797 = vmatpush1.bf16.msra.mxu0 %v703_v38  ;;  %1680 = vmatpush1.bf16.msra.mxu1 %v703_v38 }
 0x125   : > { %v657_v42 = vpop.permute.xlu1 %656 }
 0x126   : > { %v671_v43 = vpop.permute.xlu0 %670  ;;  %v710_v44 = vsel %vm696_vm9, %v657_v42, %v2089_v36  ;;  %v709_v45 = vsel %vm696_vm9, %v655_v26, %v657_v42 }
 0x127   : > { %798 = vmatprep.subr.bf16.mxu0 %v710_v44  ;;  %1676 = vmatprep.subr.bf16.mxu1 %v710_v44 }
 0x128   : > { %799 = vmatpush1.bf16.msra.mxu0 %v709_v45  ;;  %1681 = vmatpush1.bf16.msra.mxu1 %v709_v45 }
 0x129   : > { %v2109_v48 = vpop.permute.xlu1 %672 }
 0x12a   : > { %v669_v34 = vpop.permute.xlu0 %668  ;;  %v716_v39 = vsel %vm696_vm9, %v671_v43, %v2109_v48 }
 0x12b   : > { %800 = vmatprep.subr.bf16.mxu0 %v716_v39  ;;  %1677 = vmatprep.subr.bf16.mxu1 %v716_v39  ;;  %v715_v52 = vsel %vm696_vm9, %v669_v34, %v671_v43 }
 0x12c   : > { %801 = vmatpush1.bf16.msra.mxu0 %v715_v52  ;;  %1682 = vmatpush1.bf16.msra.mxu1 %v715_v52 }
 0x12d   : > { %v683_v53 = vpop.permute.xlu1 %682 }
 0x12e   : > { %v685_v54 = vpop.permute.xlu0 %684 }
 0x12f   : > { %v721_v55 = vsel %vm696_vm9, %v683_v53, %v685_v54 }
 0x130   : > { %v777_v60 = vsel %vm361_vm1, %v721_v55, 0 }
 0x131   : > { %v2121_v57 = vpop.permute.xlu1 %686 }
 0x132   : > { %v722_v58 = vsel %vm696_vm9, %v685_v54, %v2121_v57  ;;  %v633_v59 = vpop.permute.xlu0 %632 }
 0x133   : > { %1548 = vmatprep.subr.msk.bf16.mxu0 %vm361_vm1, %v722_v58  ;;  %1678 = vmatprep.subr.msk.bf16.mxu1 %vm361_vm1, %v722_v58  ;;  %v699_v3 = vsel %vm696_vm9, %v2064_v2, %v633_v59  ;;  %v2187_v2 = vld [vmem:[%s2443_s1 + $0x38] sm:$0xff]  }
 0x134   : > { %803 = vmatpush1.bf16.msra.mxu0 %v777_v60  ;;  %1683 = vmatpush1.bf16.msra.mxu1 %v777_v60 }
 0x135   : > { %v635_v63 = vpop.permute.xlu1 %634 }
 0x136   : > { %v637_v0 = vpop.permute.xlu0 %636  ;;  %v700_v1 = vsel %vm696_vm9, %v633_v59, %v635_v63 }
 0x137   : > { %907 = vmatprep.subr.bf16.mxu1 %v700_v1  ;;  %1553 = vmatmul.mubr.msk.bf16.vlgmr.msra.gmra.mrb[0].mxu1 %vm751_vm10, %v2131_v61  ;;  %v701_v56 = vsel %vm696_vm9, %v635_v63, %v637_v0 }
 0x138   : > { %908 = vmatpush1.bf16.msra.mxu1 %v699_v3  ;;  %1549 = vmatmul.mubr.msk.bf16.vlgmr.msra.gmra.mrb[0].mxu0 %vm751_vm10, %v2136_v62 }
 0x139   : > { %v639_v6 = vpop.permute.xlu1 %638  ;;  %876 = vmatprep.mubr.bf16.mxu1 %v1738_v4  ;;  %836 = vmatprep.mubr.bf16.mxu0 %v1738_v4 }
 0x13a   : > { %v702_v50 = vsel %vm696_vm9, %v637_v0, %v639_v6  ;;  %v647_v8 = vpop.permute.xlu0 %646 }
 0x13b   : > { %1020 = vmatprep.subr.bf16.mxu0 %v702_v50  ;;  %v705_v16 = vsel %vm696_vm9, %v2087_v35, %v647_v8 }
 0x13c   : > { %1021 = vmatpush1.bf16.msra.mxu0 %v701_v56 }
 0x13e   : > { %v649_v14 = vpop.permute.xlu1 %648  ;;  %v651_v17 = vpop.permute.xlu0 %650 }
 0x13f   : > { %v706_v15 = vsel %vm696_vm9, %v647_v8, %v649_v14  ;;  %1554 = vmatmul.mubr.msk.bf16.gmra.mrb[4].mxu1 %vm751_vm10, %v2152_v11  ;;  %v707_v21 = vsel %vm696_vm9, %v649_v14, %v651_v17 }
 0x140   : > { %909 = vmatprep.subr.bf16.mxu1 %v706_v15  ;;  %1550 = vmatmul.mubr.msk.bf16.gmra.mrb[4].mxu0 %vm751_vm10, %v2157_v13 }
 0x141   : > { %910 = vmatpush1.bf16.msra.mxu1 %v705_v16  ;;  %886 = vmatprep.mubr.bf16.mxu1 %v1738_v4 }
 0x142   : > { %v653_v18 = vpop.permute.xlu1 %652  ;;  %846 = vmatprep.mubr.bf16.mxu0 %v1738_v4 }
 0x143   : > { %v708_v19 = vsel %vm696_vm9, %v651_v17, %v653_v18 }
 0x144   : > { %1022 = vmatprep.subr.bf16.mxu0 %v708_v19 }
 0x145   : > { %1023 = vmatpush1.bf16.msra.mxu0 %v707_v21 }
 0x146   : > { %v661_v22 = vpop.permute.xlu0 %660 }
 0x147   : > { %1555 = vmatmul.mubr.msk.bf16.gmra.mrb[8].mxu1 %vm751_vm10, %v2172_v12  ;;  %v711_v26 = vsel %vm696_vm9, %v2089_v36, %v661_v22 }
 0x148   : > { %1551 = vmatmul.mubr.msk.bf16.gmra.mrb[8].mxu0 %vm751_vm10, %v1718_v5  ;;  %896 = vmatprep.mubr.bf16.mxu1 %v1738_v4 }
 0x149   : > { %856 = vmatprep.mubr.bf16.mxu0 %v1738_v4 }
 0x14a   : > { %v663_v24 = vpop.permute.xlu1 %662  ;;  %v665_v7 = vpop.permute.xlu0 %664 }
 0x14b   : > { %v712_v25 = vsel %vm696_vm9, %v661_v22, %v663_v24  ;;  %v713_v29 = vsel %vm696_vm9, %v663_v24, %v665_v7 }
 0x14c   : > { %911 = vmatprep.subr.bf16.mxu1 %v712_v25 }
 0x14d   : > { %912 = vmatpush1.bf16.msra.mxu1 %v711_v26 }
 0x14e   : > { %v667_v9 = vpop.permute.xlu1 %666 }
 0x14f   : > { %v714_v28 = vsel %vm696_vm9, %v665_v7, %v667_v9  ;;  %1556 = vmatmul.mubr.msk.bf16.gmra.mrb[12].mxu1 %vm751_vm10, %v2187_v2 }
 0x150   : > { %1024 = vmatprep.subr.bf16.mxu0 %v714_v28  ;;  %1552 = vmatmul.mubr.msk.bf16.gmra.mrb[12].mxu0 %vm751_vm10, %v1720_v27 }
 0x151   : > { %1025 = vmatpush1.bf16.msra.mxu0 %v713_v29  ;;  %939 = vmatprep.mubr.bf16.mxu1 %v1738_v4 }
 0x152   : > { %1052 = vmatprep.mubr.bf16.mxu0 %v1738_v4 }
 0x156   : > { %v675_v30 = vpop.permute.xlu0 %674 }
 0x157   : > { %v717_v10 = vsel %vm696_vm9, %v2109_v48, %v675_v30 }
 0x15a   : > { %v679_v20 = vpop.permute.xlu0 %678  ;;  %v677_v31 = vpop.permute.xlu1 %676 }
 0x15b   : > { %v718_v23 = vsel %vm696_vm9, %v675_v30, %v677_v31  ;;  %v719_v36 = vsel %vm696_vm9, %v677_v31, %v679_v20 }
 0x15c   : > { %913 = vmatprep.subr.bf16.mxu1 %v718_v23 }
 0x15d   : > { %914 = vmatpush1.bf16.msra.mxu1 %v717_v10 }
 0x15e   : > { %v689_v32 = vpop.permute.xlu0 %688  ;;  %v681_v33 = vpop.permute.xlu1 %680 }
 0x15f   : > { %v720_v35 = vsel %vm696_vm9, %v679_v20, %v681_v33  ;;  %v723_v37 = vsel %vm696_vm9, %v2121_v57, %v689_v32 }
 0x160   : > { %1026 = vmatprep.subr.bf16.mxu0 %v720_v35  ;;  %v783_v42 = vsel %vm361_vm1, %v723_v37, 0 }
 0x161   : > { %1027 = vmatpush1.bf16.msra.mxu0 %v719_v36 }
 0x162   : > { %v693_v38 = vpop.permute.xlu0 %692  ;;  %v691_v40 = vpop.permute.xlu1 %690 }
 0x163   : > { %v724_v41 = vsel %vm696_vm9, %v689_v32, %v691_v40  ;;  %v725_v43 = vsel %vm696_vm9, %v691_v40, %v693_v38 }
 0x164   : > { %1557 = vmatprep.subr.msk.bf16.mxu1 %vm361_vm1, %v724_v41  ;;  %v789_v46 = vsel %vm361_vm1, %v725_v43, 0 }
 0x165   : > { %916 = vmatpush1.bf16.msra.mxu1 %v783_v42 }
 0x166   : > { %v695_v44 = vpop.permute.xlu1 %694 }
 0x167   : > { %v726_v45 = vsel %vm696_vm9, %v693_v38, %v695_v44 }
 0x168   : > { %1558 = vmatmul.mubr.msk.bf16.vlgmr.msra.gmra.mrb[16].mxu1 %vm751_vm10, %v2136_v62  ;;  %1566 = vmatprep.subr.msk.bf16.mxu0 %vm361_vm1, %v726_v45 }
 0x169   : > { %1029 = vmatpush1.bf16.msra.mxu0 %v789_v46  ;;  %949 = vmatprep.mubr.bf16.mxu1 %v1738_v4 }
 0x16c   : > { %1567 = vmatmul.mubr.msk.bf16.vlgmr.msra.gmra.mrb[16].mxu0 %vm751_vm10, %v2136_v62 }
 0x16d   : > { %1062 = vmatprep.mubr.bf16.mxu0 %v1738_v4 }
 0x170   : > { %1559 = vmatmul.mubr.msk.bf16.gmra.mrb[20].mxu1 %vm751_vm10, %v2157_v13 }
 0x171   : > { %959 = vmatprep.mubr.bf16.mxu1 %v1738_v4 }
 0x173   : > { %v2259_v48 = vpop.permute.xlu0 %480 }
 0x174   : > { %1568 = vmatmul.mubr.msk.bf16.gmra.mrb[20].mxu0 %vm751_vm10, %v2157_v13 }
 0x175   : > { %1072 = vmatprep.mubr.bf16.mxu0 %v1738_v4 }
 0x177   : > { %v2257_v47 = vpop.permute.xlu1 %485  ;;  %v2263_v39 = vpop.permute.xlu0 %495 }
 0x178   : > { %1560 = vmatmul.mubr.msk.bf16.gmra.mrb[24].mxu1 %vm751_vm10, %v1718_v5 }
 0x179   : > { %969 = vmatprep.mubr.bf16.mxu1 %v1738_v4 }
 0x17b   : > { %v2261_v34 = vpop.permute.xlu1 %490  ;;  %v2267_v51 = vpop.permute.xlu0 %505 }
 0x17c   : > { %1569 = vmatmul.mubr.msk.bf16.gmra.mrb[24].mxu0 %vm751_vm10, %v1718_v5 }
 0x17d   : > { %1082 = vmatprep.mubr.bf16.mxu0 %v1738_v4 }
 0x17f   : > { %v2265_v49 = vpop.permute.xlu1 %500 }
 0x180   : > { %1561 = vmatmul.mubr.msk.bf16.gmra.mrb[28].mxu1 %vm751_vm10, %v1720_v27 }
 0x181   : > { %979 = vmatprep.mubr.bf16.mxu1 %v1738_v4 }
 0x183   : > { %v2269_v52 = vpop.permute.xlu1 %510 }
 0x184   : > { %1570 = vmatmul.mubr.msk.bf16.gmra.mrb[28].mxu0 %vm751_vm10, %v1720_v27 }
 0x185   : > { %1092 = vmatprep.mubr.bf16.mxu0 %v1738_v4 }
 0x187   : > { %v2273_v53 = vpop.permute.xlu1 %520 }
 0x188   : > { %1562 = vmatmul.mubr.msk.bf16.gmra.mrb[32].mxu1 %vm751_vm10, %v2131_v61 }
 0x189   : > { %989 = vmatprep.mubr.bf16.mxu1 %v1738_v4 }
 0x18b   : > { %v2292_v16 = vpop.permute.xlu1 %530 }
 0x18c   : > { %1571 = vmatmul.mubr.msk.bf16.gmra.mrb[32].mxu0 %vm751_vm10, %v2131_v61 }
 0x18d   : > { %1102 = vmatprep.mubr.bf16.mxu0 %v1738_v4 }
 0x18f   : > { %v2308_v32 = vpop.permute.xlu1 %540 }
 0x190   : > { %1563 = vmatmul.mubr.msk.bf16.gmra.mrb[36].mxu1 %vm751_vm10, %v2152_v11 }
 0x191   : > { %999 = vmatprep.mubr.bf16.mxu1 %v1738_v4 }
 0x194   : > { %1572 = vmatmul.mubr.msk.bf16.gmra.mrb[36].mxu0 %vm751_vm10, %v2152_v11 }
 0x195   : > { %1112 = vmatprep.mubr.bf16.mxu0 %v1738_v4 }
 0x198   : > { %1564 = vmatmul.mubr.msk.bf16.gmra.mrb[40].mxu1 %vm751_vm10, %v2172_v12 }
 0x199   : > { %1009 = vmatprep.mubr.bf16.mxu1 %v1738_v4 }
 0x19c   : > { %1573 = vmatmul.mubr.msk.bf16.gmra.mrb[40].mxu0 %vm751_vm10, %v2172_v12 }
 0x19d   : > { %1122 = vmatprep.mubr.bf16.mxu0 %v1738_v4  ;;  %v2271_v4 = vpop.permute.xlu0 %515 }
 0x1a0   : > { %1565 = vmatmul.mubr.msk.bf16.gmra.mrb[44].mxu1 %vm751_vm10, %v2187_v2 }
 0x1a1   : > { %v2276_v55 = vpop.permute.xlu0 %525 }
 0x1a4   : > { %1574 = vmatmul.mubr.msk.bf16.gmra.mrb[44].mxu0 %vm751_vm10, %v2187_v2 }
 0x1a5   : > { %v2296_v19 = vpop.permute.xlu0 %535 }
 0x1a9   : > { %v2312_v36 = vpop.permute.xlu0 %545 }
 0x20a   : > { %v868_v54 = vpop.f32.mrb[0].mxu1 }
 0x20b   : > { %v828_v57 = vpop.f32.mrb[0].mxu0  ;;  %v870_v58 = vpop.f32.mrb[1].mxu1  ;;  %v869_v59 = vadd.f32 %v868_v54, %v2273_v53 }
 0x20c   : > { %v829_v60 = vadd.f32 %v828_v57, %v2259_v48  ;;  %v830_v61 = vpop.f32.mrb[1].mxu0  ;;  %v872_v62 = vpop.f32.mrb[2].mxu1  ;;  %v871_v63 = vadd.f32 %v870_v58, %v2273_v53 }
 0x20d   : > { %v831_v0 = vadd.f32 %v830_v61, %v2259_v48  ;;  %v832_v1 = vpop.f32.mrb[2].mxu0  ;;  %v873_v3 = vadd.f32 %v872_v62, %v2276_v55  ;;  %v874_v6 = vpop.f32.mrb[3].mxu1 }
 0x20e   : > { %v833_v50 = vadd.f32 %v832_v1, %v2257_v47  ;;  %v834_v56 = vpop.f32.mrb[3].mxu0  ;;  %v875_v8 = vadd.f32 %v874_v6, %v2276_v55  ;;  %v1650_v11 = vpack.c.bf16 %v871_v63, %v869_v59  ;;  %v2324_v1 = vpop.permute.xlu1 %550 }
 0x20f   : > { %v1626_v13 = vpack.c.bf16 %v831_v0, %v829_v60  ;;  %v835_v14 = vadd.f32 %v834_v56, %v2257_v47 }
 0x210   : > { %v1653_v15 = vpack.c.bf16 %v875_v8, %v873_v3  ;;  %1445 = vst [vmem:[%s2284_s28 + $0xc0] sm:$0xff] %v1650_v11 }
 0x211   : > { %1421 = vst [vmem:[%s2284_s28] sm:$0xff] %v1626_v13  ;;  %v1629_v17 = vpack.c.bf16 %v835_v14, %v833_v50  ;;  %v2328_v50 = vpop.permute.xlu0 %555 }
 0x212   : > { %1448 = vst [vmem:[%s2284_s28 + $0xd8] sm:$0xff] %v1653_v15  ;;  %v878_v18 = vpop.f32.mrb[4].mxu1 }
 0x213   : > { %1424 = vst [vmem:[%s2284_s28 + $0x18] sm:$0xff] %v1629_v17  ;;  %v838_v12 = vpop.f32.mrb[4].mxu0  ;;  %v880_v21 = vpop.f32.mrb[5].mxu1  ;;  %v879_v5 = vadd.f32 %v878_v18, %v2292_v16 }
 0x214   : > { %v839_v22 = vadd.f32 %v838_v12, %v2261_v34  ;;  %v840_v24 = vpop.f32.mrb[5].mxu0  ;;  %v882_v25 = vpop.f32.mrb[6].mxu1  ;;  %v881_v2 = vadd.f32 %v880_v21, %v2292_v16 }
 0x215   : > { %v841_v26 = vadd.f32 %v840_v24, %v2261_v34  ;;  %v842_v27 = vpop.f32.mrb[6].mxu0  ;;  %v883_v7 = vadd.f32 %v882_v25, %v2296_v19  ;;  %v884_v9 = vpop.f32.mrb[7].mxu1 }
 0x216   : > { %v843_v28 = vadd.f32 %v842_v27, %v2263_v39  ;;  %v844_v29 = vpop.f32.mrb[7].mxu0  ;;  %v885_v30 = vadd.f32 %v884_v9, %v2296_v19  ;;  %v1656_v20 = vpack.c.bf16 %v881_v2, %v879_v5 }
 0x217   : > { %v1632_v31 = vpack.c.bf16 %v841_v26, %v839_v22  ;;  %v845_v23 = vadd.f32 %v844_v29, %v2263_v39 }
 0x218   : > { %v1659_v10 = vpack.c.bf16 %v885_v30, %v883_v7  ;;  %1451 = vst [vmem:[%s2284_s28 + $0xf0] sm:$0xff] %v1656_v20 }
 0x219   : > { %1427 = vst [vmem:[%s2284_s28 + $0x30] sm:$0xff] %v1632_v31  ;;  %v1635_v33 = vpack.c.bf16 %v845_v23, %v843_v28 }
 0x21a   : > { %1454 = vst [vmem:[%s2284_s28 + $0x108] sm:$0xff] %v1659_v10  ;;  %v888_v35 = vpop.f32.mrb[8].mxu1 }
 0x21b   : > { %1430 = vst [vmem:[%s2284_s28 + $0x48] sm:$0xff] %v1635_v33  ;;  %v848_v37 = vpop.f32.mrb[8].mxu0  ;;  %v890_v38 = vpop.f32.mrb[9].mxu1  ;;  %v889_v40 = vadd.f32 %v888_v35, %v2308_v32 }
 0x21c   : > { %v849_v41 = vadd.f32 %v848_v37, %v2265_v49  ;;  %v850_v42 = vpop.f32.mrb[9].mxu0  ;;  %v892_v43 = vpop.f32.mrb[10].mxu1  ;;  %v891_v44 = vadd.f32 %v890_v38, %v2308_v32 }
 0x21d   : > { %v851_v45 = vadd.f32 %v850_v42, %v2265_v49  ;;  %v852_v46 = vpop.f32.mrb[10].mxu0  ;;  %v893_v54 = vadd.f32 %v892_v43, %v2312_v36  ;;  %v894_v57 = vpop.f32.mrb[11].mxu1 }
 0x21e   : > { %v853_v58 = vadd.f32 %v852_v46, %v2267_v51  ;;  %v854_v59 = vpop.f32.mrb[11].mxu0  ;;  %v895_v60 = vadd.f32 %v894_v57, %v2312_v36  ;;  %v1662_v61 = vpack.c.bf16 %v891_v44, %v889_v40 }
 0x21f   : > { %v1638_v62 = vpack.c.bf16 %v851_v45, %v849_v41  ;;  %v855_v63 = vadd.f32 %v854_v59, %v2267_v51 }
 0x220   : > { %v1665_v0 = vpack.c.bf16 %v895_v60, %v893_v54  ;;  %1457 = vst [vmem:[%s2284_s28 + $0x120] sm:$0xff] %v1662_v61 }
 0x221   : > { %1433 = vst [vmem:[%s2284_s28 + $0x60] sm:$0xff] %v1638_v62  ;;  %v1641_v3 = vpack.c.bf16 %v855_v63, %v853_v58 }
 0x222   : > { %1460 = vst [vmem:[%s2284_s28 + $0x138] sm:$0xff] %v1665_v0  ;;  %v898_v6 = vpop.f32.mrb[12].mxu1 }
 0x223   : > { %1436 = vst [vmem:[%s2284_s28 + $0x78] sm:$0xff] %v1641_v3  ;;  %v858_v56 = vpop.f32.mrb[12].mxu0  ;;  %v900_v8 = vpop.f32.mrb[13].mxu1  ;;  %v899_v11 = vadd.f32 %v898_v6, %v2324_v1 }
 0x224   : > { %v859_v13 = vadd.f32 %v858_v56, %v2269_v52  ;;  %v860_v14 = vpop.f32.mrb[13].mxu0  ;;  %v902_v15 = vpop.f32.mrb[14].mxu1  ;;  %v901_v17 = vadd.f32 %v900_v8, %v2324_v1 }
 0x225   : > { %v861_v18 = vadd.f32 %v860_v14, %v2269_v52  ;;  %v862_v12 = vpop.f32.mrb[14].mxu0  ;;  %v903_v21 = vadd.f32 %v902_v15, %v2328_v50  ;;  %v904_v5 = vpop.f32.mrb[15].mxu1 }
 0x226   : > { %v863_v22 = vadd.f32 %v862_v12, %v2271_v4  ;;  %v864_v24 = vpop.f32.mrb[15].mxu0  ;;  %v905_v25 = vadd.f32 %v904_v5, %v2328_v50  ;;  %v1668_v2 = vpack.c.bf16 %v901_v17, %v899_v11 }
 0x227   : > { %v1644_v26 = vpack.c.bf16 %v861_v18, %v859_v13  ;;  %v865_v27 = vadd.f32 %v864_v24, %v2271_v4 }
 0x228   : > { %v1671_v7 = vpack.c.bf16 %v905_v25, %v903_v21  ;;  %1463 = vst [vmem:[%s2284_s28 + $0x150] sm:$0xff] %v1668_v2 }
 0x229   : > { %1439 = vst [vmem:[%s2284_s28 + $0x90] sm:$0xff] %v1644_v26  ;;  %v1647_v9 = vpack.c.bf16 %v865_v27, %v863_v22 }
 0x22a   : > { %1466 = vst [vmem:[%s2284_s28 + $0x168] sm:$0xff] %v1671_v7 }
 0x22b   : > { %1442 = vst [vmem:[%s2284_s28 + $0xa8] sm:$0xff] %v1647_v9 }
 0x23b   : > { %v941_v28 = vpop.f32.mrb[16].mxu1 }
 0x23c   : > { %v942_v29 = vadd.f32 %v941_v28, %v2259_v48  ;;  %v943_v30 = vpop.f32.mrb[17].mxu1 }
 0x23d   : > { %v944_v20 = vadd.f32 %v943_v30, %v2259_v48  ;;  %v945_v31 = vpop.f32.mrb[18].mxu1 }
 0x23e   : > { %v946_v23 = vadd.f32 %v945_v31, %v2257_v47  ;;  %v947_v10 = vpop.f32.mrb[19].mxu1 }
 0x23f   : > { %v1054_v33 = vpop.f32.mrb[16].mxu0  ;;  %v1627_v35 = vpack.c.bf16 %v944_v20, %v942_v29  ;;  %v948_v37 = vadd.f32 %v947_v10, %v2257_v47 }
 0x240   : > { %v1055_v38 = vadd.f32 %v1054_v33, %v2259_v48  ;;  %v1056_v40 = vpop.f32.mrb[17].mxu0 }
 0x241   : > { %1422 = vst [vmem:[%s2284_s28 + $0x8] sm:$0xff] %v1627_v35  ;;  %v1057_v41 = vadd.f32 %v1056_v40, %v2259_v48  ;;  %v1058_v42 = vpop.f32.mrb[18].mxu0  ;;  %v1630_v43 = vpack.c.bf16 %v948_v37, %v946_v23 }
 0x242   : > { %v1059_v44 = vadd.f32 %v1058_v42, %v2257_v47  ;;  %v1060_v45 = vpop.f32.mrb[19].mxu0 }
 0x243   : > { %v1628_v46 = vpack.c.bf16 %v1057_v41, %v1055_v38  ;;  %1425 = vst [vmem:[%s2284_s28 + $0x20] sm:$0xff] %v1630_v43  ;;  %v1061_v54 = vadd.f32 %v1060_v45, %v2257_v47  ;;  %v951_v57 = vpop.f32.mrb[20].mxu1 }
 0x244   : > { %v952_v58 = vadd.f32 %v951_v57, %v2261_v34  ;;  %v953_v59 = vpop.f32.mrb[21].mxu1 }
 0x245   : > { %1423 = vst [vmem:[%s2284_s28 + $0x10] sm:$0xff] %v1628_v46  ;;  %v1631_v60 = vpack.c.bf16 %v1061_v54, %v1059_v44  ;;  %v954_v61 = vadd.f32 %v953_v59, %v2261_v34  ;;  %v955_v48 = vpop.f32.mrb[22].mxu1 }
 0x246   : > { %v956_v62 = vadd.f32 %v955_v48, %v2263_v39  ;;  %v957_v63 = vpop.f32.mrb[23].mxu1 }
 0x247   : > { %1426 = vst [vmem:[%s2284_s28 + $0x28] sm:$0xff] %v1631_v60  ;;  %v1064_v0 = vpop.f32.mrb[20].mxu0  ;;  %v1633_v3 = vpack.c.bf16 %v954_v61, %v952_v58  ;;  %v958_v47 = vadd.f32 %v957_v63, %v2263_v39 }
 0x248   : > { %v1065_v6 = vadd.f32 %v1064_v0, %v2261_v34  ;;  %v1066_v56 = vpop.f32.mrb[21].mxu0 }
 0x249   : > { %1428 = vst [vmem:[%s2284_s28 + $0x38] sm:$0xff] %v1633_v3  ;;  %v1067_v8 = vadd.f32 %v1066_v56, %v2261_v34  ;;  %v1068_v11 = vpop.f32.mrb[22].mxu0  ;;  %v1636_v13 = vpack.c.bf16 %v958_v47, %v956_v62 }
 0x24a   : > { %v1069_v14 = vadd.f32 %v1068_v11, %v2263_v39  ;;  %v1070_v15 = vpop.f32.mrb[23].mxu0 }
 0x24b   : > { %v1634_v17 = vpack.c.bf16 %v1067_v8, %v1065_v6  ;;  %1431 = vst [vmem:[%s2284_s28 + $0x50] sm:$0xff] %v1636_v13  ;;  %v1071_v18 = vadd.f32 %v1070_v15, %v2263_v39  ;;  %v961_v12 = vpop.f32.mrb[24].mxu1 }
 0x24c   : > { %v962_v21 = vadd.f32 %v961_v12, %v2265_v49  ;;  %v963_v5 = vpop.f32.mrb[25].mxu1 }
 0x24d   : > { %1429 = vst [vmem:[%s2284_s28 + $0x40] sm:$0xff] %v1634_v17  ;;  %v1637_v22 = vpack.c.bf16 %v1071_v18, %v1069_v14  ;;  %v964_v24 = vadd.f32 %v963_v5, %v2265_v49  ;;  %v965_v34 = vpop.f32.mrb[26].mxu1 }
 0x24e   : > { %v966_v25 = vadd.f32 %v965_v34, %v2267_v51  ;;  %v967_v2 = vpop.f32.mrb[27].mxu1 }
 0x24f   : > { %1432 = vst [vmem:[%s2284_s28 + $0x58] sm:$0xff] %v1637_v22  ;;  %v1074_v26 = vpop.f32.mrb[24].mxu0  ;;  %v1639_v27 = vpack.c.bf16 %v964_v24, %v962_v21  ;;  %v968_v39 = vadd.f32 %v967_v2, %v2267_v51 }
 0x250   : > { %v1075_v7 = vadd.f32 %v1074_v26, %v2265_v49  ;;  %v1076_v9 = vpop.f32.mrb[25].mxu0 }
 0x251   : > { %1434 = vst [vmem:[%s2284_s28 + $0x68] sm:$0xff] %v1639_v27  ;;  %v1077_v28 = vadd.f32 %v1076_v9, %v2265_v49  ;;  %v1078_v29 = vpop.f32.mrb[26].mxu0  ;;  %v1642_v30 = vpack.c.bf16 %v968_v39, %v966_v25 }
 0x252   : > { %v1079_v20 = vadd.f32 %v1078_v29, %v2267_v51  ;;  %v1080_v31 = vpop.f32.mrb[27].mxu0 }
 0x253   : > { %v1640_v23 = vpack.c.bf16 %v1077_v28, %v1075_v7  ;;  %1437 = vst [vmem:[%s2284_s28 + $0x80] sm:$0xff] %v1642_v30  ;;  %v1081_v10 = vadd.f32 %v1080_v31, %v2267_v51  ;;  %v971_v33 = vpop.f32.mrb[28].mxu1 }
 0x254   : > { %v972_v35 = vadd.f32 %v971_v33, %v2269_v52  ;;  %v973_v37 = vpop.f32.mrb[29].mxu1 }
 0x255   : > { %1435 = vst [vmem:[%s2284_s28 + $0x70] sm:$0xff] %v1640_v23  ;;  %v1643_v38 = vpack.c.bf16 %v1081_v10, %v1079_v20  ;;  %v974_v40 = vadd.f32 %v973_v37, %v2269_v52  ;;  %v975_v49 = vpop.f32.mrb[30].mxu1 }
 0x256   : > { %v976_v41 = vadd.f32 %v975_v49, %v2271_v4  ;;  %v977_v42 = vpop.f32.mrb[31].mxu1 }
 0x257   : > { %1438 = vst [vmem:[%s2284_s28 + $0x88] sm:$0xff] %v1643_v38  ;;  %v1084_v43 = vpop.f32.mrb[28].mxu0  ;;  %v1645_v44 = vpack.c.bf16 %v974_v40, %v972_v35  ;;  %v978_v51 = vadd.f32 %v977_v42, %v2271_v4 }
 0x258   : > { %v1085_v45 = vadd.f32 %v1084_v43, %v2269_v52  ;;  %v1086_v46 = vpop.f32.mrb[29].mxu0 }
 0x259   : > { %1440 = vst [vmem:[%s2284_s28 + $0x98] sm:$0xff] %v1645_v44  ;;  %v1087_v54 = vadd.f32 %v1086_v46, %v2269_v52  ;;  %v1088_v57 = vpop.f32.mrb[30].mxu0  ;;  %v1648_v58 = vpack.c.bf16 %v978_v51, %v976_v41 }
 0x25a   : > { %v1089_v59 = vadd.f32 %v1088_v57, %v2271_v4  ;;  %v1090_v60 = vpop.f32.mrb[31].mxu0 }
 0x25b   : > { %v1646_v61 = vpack.c.bf16 %v1087_v54, %v1085_v45  ;;  %1443 = vst [vmem:[%s2284_s28 + $0xb0] sm:$0xff] %v1648_v58  ;;  %v1091_v48 = vadd.f32 %v1090_v60, %v2271_v4  ;;  %v981_v62 = vpop.f32.mrb[32].mxu1 }
 0x25c   : > { %v982_v63 = vadd.f32 %v981_v62, %v2273_v53  ;;  %v983_v0 = vpop.f32.mrb[33].mxu1 }
 0x25d   : > { %1441 = vst [vmem:[%s2284_s28 + $0xa0] sm:$0xff] %v1646_v61  ;;  %v1649_v3 = vpack.c.bf16 %v1091_v48, %v1089_v59  ;;  %v984_v47 = vadd.f32 %v983_v0, %v2273_v53  ;;  %v985_v52 = vpop.f32.mrb[34].mxu1 }
 0x25e   : > { %v986_v6 = vadd.f32 %v985_v52, %v2276_v55  ;;  %v987_v56 = vpop.f32.mrb[35].mxu1 }
 0x25f   : > { %1444 = vst [vmem:[%s2284_s28 + $0xb8] sm:$0xff] %v1649_v3  ;;  %v1651_v8 = vpack.c.bf16 %v984_v47, %v982_v63  ;;  %v1094_v11 = vpop.f32.mrb[32].mxu0  ;;  %v988_v4 = vadd.f32 %v987_v56, %v2276_v55 }
 0x260   : > { %v1095_v13 = vadd.f32 %v1094_v11, %v2273_v53  ;;  %v1096_v14 = vpop.f32.mrb[33].mxu0 }
 0x261   : > { %1446 = vst [vmem:[%s2284_s28 + $0xc8] sm:$0xff] %v1651_v8  ;;  %v1097_v15 = vadd.f32 %v1096_v14, %v2273_v53  ;;  %v1654_v17 = vpack.c.bf16 %v988_v4, %v986_v6  ;;  %v1098_v18 = vpop.f32.mrb[34].mxu0 }
 0x262   : > { %v1099_v12 = vadd.f32 %v1098_v18, %v2276_v55  ;;  %v1100_v21 = vpop.f32.mrb[35].mxu0 }
 0x263   : > { %v1652_v5 = vpack.c.bf16 %v1097_v15, %v1095_v13  ;;  %1449 = vst [vmem:[%s2284_s28 + $0xe0] sm:$0xff] %v1654_v17  ;;  %v1101_v22 = vadd.f32 %v1100_v21, %v2276_v55  ;;  %v991_v24 = vpop.f32.mrb[36].mxu1 }
 0x264   : > { %v992_v34 = vadd.f32 %v991_v24, %v2292_v16  ;;  %v993_v25 = vpop.f32.mrb[37].mxu1 }
 0x265   : > { %1447 = vst [vmem:[%s2284_s28 + $0xd0] sm:$0xff] %v1652_v5  ;;  %v1655_v2 = vpack.c.bf16 %v1101_v22, %v1099_v12  ;;  %v994_v26 = vadd.f32 %v993_v25, %v2292_v16  ;;  %v995_v53 = vpop.f32.mrb[38].mxu1 }
 0x266   : > { %v996_v27 = vadd.f32 %v995_v53, %v2296_v19  ;;  %v997_v39 = vpop.f32.mrb[39].mxu1 }
 0x267   : > { %1450 = vst [vmem:[%s2284_s28 + $0xe8] sm:$0xff] %v1655_v2  ;;  %v1657_v7 = vpack.c.bf16 %v994_v26, %v992_v34  ;;  %v998_v9 = vadd.f32 %v997_v39, %v2296_v19  ;;  %v1104_v55 = vpop.f32.mrb[36].mxu0 }
 0x268   : > { %v1105_v28 = vadd.f32 %v1104_v55, %v2292_v16  ;;  %v1106_v29 = vpop.f32.mrb[37].mxu0 }
 0x269   : > { %1452 = vst [vmem:[%s2284_s28 + $0xf8] sm:$0xff] %v1657_v7  ;;  %v1660_v30 = vpack.c.bf16 %v998_v9, %v996_v27  ;;  %v1107_v20 = vadd.f32 %v1106_v29, %v2292_v16  ;;  %v1108_v31 = vpop.f32.mrb[38].mxu0 }
 0x26a   : > { %v1109_v23 = vadd.f32 %v1108_v31, %v2296_v19  ;;  %v1110_v10 = vpop.f32.mrb[39].mxu0 }
 0x26b   : > { %1455 = vst [vmem:[%s2284_s28 + $0x110] sm:$0xff] %v1660_v30  ;;  %v1658_v33 = vpack.c.bf16 %v1107_v20, %v1105_v28  ;;  %v1111_v35 = vadd.f32 %v1110_v10, %v2296_v19  ;;  %v1001_v37 = vpop.f32.mrb[40].mxu1 }
 0x26c   : > { %v1002_v38 = vadd.f32 %v1001_v37, %v2308_v32  ;;  %v1003_v40 = vpop.f32.mrb[41].mxu1 }
 0x26d   : > { %1453 = vst [vmem:[%s2284_s28 + $0x100] sm:$0xff] %v1658_v33  ;;  %v1661_v49 = vpack.c.bf16 %v1111_v35, %v1109_v23  ;;  %v1004_v41 = vadd.f32 %v1003_v40, %v2308_v32  ;;  %v1005_v16 = vpop.f32.mrb[42].mxu1 }
 0x26e   : > { %v1006_v42 = vadd.f32 %v1005_v16, %v2312_v36  ;;  %v1007_v43 = vpop.f32.mrb[43].mxu1 }
 0x26f   : > { %1456 = vst [vmem:[%s2284_s28 + $0x118] sm:$0xff] %v1661_v49  ;;  %v1663_v44 = vpack.c.bf16 %v1004_v41, %v1002_v38  ;;  %v1008_v51 = vadd.f32 %v1007_v43, %v2312_v36  ;;  %v1114_v19 = vpop.f32.mrb[40].mxu0 }
 0x270   : > { %v1115_v45 = vadd.f32 %v1114_v19, %v2308_v32  ;;  %v1116_v46 = vpop.f32.mrb[41].mxu0 }
 0x271   : > { %1458 = vst [vmem:[%s2284_s28 + $0x128] sm:$0xff] %v1663_v44  ;;  %v1666_v54 = vpack.c.bf16 %v1008_v51, %v1006_v42  ;;  %v1117_v57 = vadd.f32 %v1116_v46, %v2308_v32  ;;  %v1118_v58 = vpop.f32.mrb[42].mxu0 }
 0x272   : > { %v1119_v59 = vadd.f32 %v1118_v58, %v2312_v36  ;;  %v1120_v60 = vpop.f32.mrb[43].mxu0 }
 0x273   : > { %1461 = vst [vmem:[%s2284_s28 + $0x140] sm:$0xff] %v1666_v54  ;;  %v1664_v61 = vpack.c.bf16 %v1117_v57, %v1115_v45  ;;  %v1121_v48 = vadd.f32 %v1120_v60, %v2312_v36  ;;  %v1011_v62 = vpop.f32.mrb[44].mxu1 }
 0x274   : > { %v1012_v63 = vadd.f32 %v1011_v62, %v2324_v1  ;;  %v1013_v0 = vpop.f32.mrb[45].mxu1 }
 0x275   : > { %1459 = vst [vmem:[%s2284_s28 + $0x130] sm:$0xff] %v1664_v61  ;;  %v1667_v3 = vpack.c.bf16 %v1121_v48, %v1119_v59  ;;  %v1014_v47 = vadd.f32 %v1013_v0, %v2324_v1  ;;  %v1015_v32 = vpop.f32.mrb[46].mxu1 }
 0x276   : > { %v1016_v52 = vadd.f32 %v1015_v32, %v2328_v50  ;;  %v1017_v6 = vpop.f32.mrb[47].mxu1 }
 0x277   : > { %1462 = vst [vmem:[%s2284_s28 + $0x148] sm:$0xff] %v1667_v3  ;;  %v1669_v56 = vpack.c.bf16 %v1014_v47, %v1012_v63  ;;  %v1018_v36 = vadd.f32 %v1017_v6, %v2328_v50  ;;  %v1124_v8 = vpop.f32.mrb[44].mxu0 }
 0x278   : > { %v1125_v11 = vadd.f32 %v1124_v8, %v2324_v1  ;;  %v1126_v4 = vpop.f32.mrb[45].mxu0 }
 0x279   : > { %1464 = vst [vmem:[%s2284_s28 + $0x158] sm:$0xff] %v1669_v56  ;;  %v1672_v13 = vpack.c.bf16 %v1018_v36, %v1016_v52  ;;  %v1127_v14 = vadd.f32 %v1126_v4, %v2324_v1  ;;  %v1128_v15 = vpop.f32.mrb[46].mxu0 }
 0x27a   : > { %v1129_v17 = vadd.f32 %v1128_v15, %v2328_v50  ;;  %v1130_v18 = vpop.f32.mrb[47].mxu0 }
 0x27b   : > { %1467 = vst [vmem:[%s2284_s28 + $0x170] sm:$0xff] %v1672_v13  ;;  %v1670_v12 = vpack.c.bf16 %v1127_v14, %v1125_v11  ;;  %v1131_v21 = vadd.f32 %v1130_v18, %v2328_v50 }
 0x27d   : > { %1465 = vst [vmem:[%s2284_s28 + $0x160] sm:$0xff] %v1670_v12  ;;  %v1673_v5 = vpack.c.bf16 %v1131_v21, %v1129_v17 }
 0x27f   : > { %1468 = vst [vmem:[%s2284_s28 + $0x178] sm:$0xff] %v1673_v5 }
 0x280 PF: > { %s13_s12 = sadd.s32 1, %s1727_s12  }
 0x281   : > { %p10_p4 = scmp.ge.s32.totalorder %s13_s12, 10  }
 0x283   :  { %12 = sbr.rel (!%p10_p4) target bundleno = 1 (0x1), region = 62 }

// kernel: convlstm_forward.6
= control target key start
LH: loop header
LB: loop body
LE: loop exit
PB: predicated region body
PF: predicated region fallthrough
CT: control target
= control target key end

     0   :  { %s3089_s12 = smov 0   ;;  %s3846_s0 = inlined_call_operand.vmem [shape: bf16[8,32,1024], index: 0, kind: input, shape index: {}]   ;;  %s3847_s1 = inlined_call_operand.vmem [shape: bf16[9,32,32], index: 1, kind: input, shape index: {}]   ;;  %s3848_s2 = inlined_call_operand.vmem [shape: f32[32,1], index: 2, kind: input, shape index: {}]   ;;  %s3849_s3 = inlined_call_operand.vmem [shape: bf16[8,32,768], index: 3, kind: output, shape index: {}]  }
   0x1 LB: > { %s2663_s13 = sadd.s32 4294967295, %s3058_s12   ;;  %p2667_p0 = scmp.ge.s32.totalorder %s3058_s12, 1  ;;  %s3058_s12 = sphi %s3089_s12, %s13_s12  }
   0x2   : > { %p137_p1 = scmp.lt.s32.totalorder %s3058_s12, 9 }
   0x4   : > { %p138_p2 = pnand %p2667_p0, %p137_p1 }
   0x5   : > { %p161_p3 = scmp.lt.s32.totalorder (!%p138_p2), %s2663_s13, 7  ;;  %s3060_s18 = smov (!%p138_p2), 17   ;;  %v3062_v20 = vmov (!%p138_p2), 0   ;;  %vm755_vm0 = vcmask (!%p138_p2), 138240   ;;  %vm293_vm1 = vcmask (!%p138_p2), 146432   ;;  %v3295_v49 = vld [vmem:[%s3847_s1 + $0x20] sm:$0xff] (!%p138_p2)  }
   0x6   : > { %141 = sbr.rel (%p138_p2) target bundleno = 604 (0x25c), region = 32  ;;  %s3061_s19 = smov (!%p138_p2), 18   ;;  %818 = vmatprep.mubr.bf16.mxu0 (!%p138_p2), %v3062_v20  ;;  %357 = vmatprep.mubr.bf16.mxu1 (!%p138_p2), %v3062_v20  ;;  %vm318_vm2 = vcmask (!%p138_p2), 261120   ;;  %v3313_v54 = vld [vmem:[%s3847_s1 + $0x10] sm:$0xff] (!%p138_p2)   ;;  %v3337_v63 = vld [vmem:[%s3847_s1 + $0x18] sm:$0xff] (!%p138_p2)   ;;  %vm1012_vm3 = vcmask (!%p138_p2), 7168  }
   0x7   : > { %3032 = vset.pattern.permute.xlu0 (!%p138_p2), %v3062_v20  ;;  %3033 = vset.pattern.permute.xlu1 (!%p138_p2), %v3062_v20  ;;  %s3063_s20 = smov (!%p138_p2), 1   ;;  %s3064_s21 = smov (!%p138_p2), 19   ;;  %vm522_vm4 = vcmask (!%p138_p2), 154624   ;;  %vm1491_vm5 = vcmask (!%p138_p2), 1039360   ;;  %vm1748_vm6 = vcmask (!%p138_p2), 908288   ;;  %vm2005_vm7 = vcmask (!%p138_p2), 900096  }
   0x8   : > { %s3065_s22 = smov (!%p138_p2), 127   ;;  %s3066_s25 = smov (!%p138_p2), 111   ;;  %vm2262_vm8 = vcmask (!%p138_p2), 891904  }
   0x9   : > { %s3067_s5 = smov (!%p138_p2), 110   ;;  %s3068_s10 = smov (!%p138_p2), 109  }
   0xd   : > { %s3851_s13 = smov (!%p161_p3, %s2663_s13), 7 }
   0xe   : > { %s2805_s14 = sshll.u32 %s3851_s13, 7 }
   0xf   : > { %s3103_s17 = scalar_lea.vmem %s3846_s0, %s2805_s14 }
  0x10   : > { %v172_v0 = vld [vmem:[%s3103_s17] sm:$0xff]  ;;  %v173_v2 = vld [vmem:[%s3103_s17 + $0x8] sm:$0xff]  ;;  %v175_v7 = vld [vmem:[%s3103_s17 + $0x18] sm:$0xff] }
  0x11   : > { %v176_v1 = vld [vmem:[%s3103_s17 + $0x20] sm:$0xff]  ;;  %v177_v5 = vld [vmem:[%s3103_s17 + $0x28] sm:$0xff]  ;;  %v179_v8 = vld [vmem:[%s3103_s17 + $0x38] sm:$0xff] }
  0x12   : > { %v3108_v3 = vcombine.high %v172_v0, %v176_v1  ;;  %v3110_v4 = vcombine.low %v172_v0, %v176_v1  ;;  %v3117_v6 = vcombine.low %v173_v2, %v177_v5  ;;  %v183_v9 = vld [vmem:[%s3103_s17 + $0x58] sm:$0xff]  ;;  %v3123_v11 = vcombine.high %v175_v7, %v179_v8  ;;  %v180_v12 = vld [vmem:[%s3103_s17 + $0x40] sm:$0xff]  ;;  %v181_v14 = vld [vmem:[%s3103_s17 + $0x48] sm:$0xff] }
  0x13   : > { %v187_v10 = vld [vmem:[%s3103_s17 + $0x78] sm:$0xff]  ;;  %v184_v13 = vld [vmem:[%s3103_s17 + $0x60] sm:$0xff]  ;;  %v185_v15 = vld [vmem:[%s3103_s17 + $0x68] sm:$0xff]  ;;  %v3161_v24 = vcombine.low %v175_v7, %v179_v8  ;;  %v3185_v31 = vcombine.high %v173_v2, %v177_v5 }
  0x14   : > { %729 = vrot.lane.b32.xlu0 %v3108_v3, %s3060_s18  ;;  %727 = vrot.lane.b32.xlu1 %v3110_v4, %s3060_s18  ;;  %v3129_v16 = vcombine.high %v183_v9, %v187_v10  ;;  %v3139_v17 = vcombine.high %v180_v12, %v184_v13  ;;  %v3141_v18 = vcombine.low %v181_v14, %v185_v15  ;;  %v174_v21 = vld [vmem:[%s3103_s17 + $0x10] sm:$0xff] }
  0x15   : > { %v2684_v19 = vcombine.low %v180_v12, %v184_v13  ;;  %v178_v22 = vld [vmem:[%s3103_s17 + $0x30] sm:$0xff]  ;;  %v3177_v29 = vcombine.low %v183_v9, %v187_v10  ;;  %v3191_v32 = vcombine.high %v181_v14, %v185_v15  ;;  %v3369_v15 = vld [vmem:[%s3847_s1 + $0x28] sm:$0xff]  }
  0x16   : > { %v3159_v23 = vcombine.high %v174_v21, %v178_v22  ;;  %v182_v25 = vld [vmem:[%s3103_s17 + $0x50] sm:$0xff]  ;;  %v3169_v27 = vcombine.low %v174_v21, %v178_v22 }
  0x17   : > { %v186_v26 = vld [vmem:[%s3103_s17 + $0x70] sm:$0xff] }
  0x18   : > { %731 = vrot.lane.b32.xlu0 %v3117_v6, %s3060_s18  ;;  %267 = vrot.lane.b32.xlu1 %v3108_v3, %s3061_s19  ;;  %v3171_v28 = vcombine.high %v182_v25, %v186_v26  ;;  %v3179_v30 = vcombine.low %v182_v25, %v186_v26 }
  0x1c   : > { %269 = vrot.lane.b32.xlu0 %v3117_v6, %s3061_s19  ;;  %265 = vrot.lane.b32.xlu1 %v3110_v4, %s3061_s19 }
  0x20   : > { %743 = vrot.lane.b32.xlu0 %v3139_v17, %s3060_s18  ;;  %745 = vrot.lane.b32.xlu1 %v3141_v18, %s3060_s18 }
  0x24   : > { %741 = vrot.lane.b32.xlu0 %v2684_v19, %s3060_s18  ;;  %281 = vrot.lane.b32.xlu1 %v3139_v17, %s3061_s19 }
  0x28   : > { %283 = vrot.lane.b32.xlu0 %v3141_v18, %s3061_s19  ;;  %279 = vrot.lane.b32.xlu1 %v2684_v19, %s3061_s19 }
  0x2c   : > { %737 = vrot.lane.b32.xlu0 %v3159_v23, %s3060_s18  ;;  %739 = vrot.lane.b32.xlu1 %v3161_v24, %s3060_s18 }
  0x30   : > { %735 = vrot.lane.b32.xlu0 %v3169_v27, %s3060_s18  ;;  %751 = vrot.lane.b32.xlu1 %v3171_v28, %s3060_s18 }
  0x34   : > { %753 = vrot.lane.b32.xlu0 %v3177_v29, %s3060_s18  ;;  %749 = vrot.lane.b32.xlu1 %v3179_v30, %s3060_s18 }
  0x38   : > { %271 = vrot.lane.b32.xlu0 %v3185_v31, %s3061_s19  ;;  %273 = vrot.lane.b32.xlu1 %v3169_v27, %s3061_s19 }
  0x3c   : > { %285 = vrot.lane.b32.xlu0 %v3191_v32, %s3061_s19  ;;  %287 = vrot.lane.b32.xlu1 %v3179_v30, %s3061_s19 }
  0x40   : > { %986 = vrot.lane.b32.xlu0 %v3108_v3, %s3063_s20  ;;  %988 = vrot.lane.b32.xlu1 %v3117_v6, %s3063_s20 }
  0x44   : > { %984 = vrot.lane.b32.xlu0 %v3110_v4, %s3063_s20  ;;  %1000 = vrot.lane.b32.xlu1 %v3139_v17, %s3063_s20 }
  0x48   : > { %1002 = vrot.lane.b32.xlu0 %v3141_v18, %s3063_s20  ;;  %998 = vrot.lane.b32.xlu1 %v2684_v19, %s3063_s20 }
  0x4c   : > { %275 = vrot.lane.b32.xlu0 %v3159_v23, %s3061_s19  ;;  %277 = vrot.lane.b32.xlu1 %v3161_v24, %s3061_s19 }
  0x50   : > { %289 = vrot.lane.b32.xlu0 %v3171_v28, %s3061_s19  ;;  %291 = vrot.lane.b32.xlu1 %v3177_v29, %s3061_s19 }
  0x54   : > { %994 = vrot.lane.b32.xlu0 %v3159_v23, %s3063_s20  ;;  %996 = vrot.lane.b32.xlu1 %v3161_v24, %s3063_s20 }
  0x58   : > { %992 = vrot.lane.b32.xlu0 %v3169_v27, %s3063_s20  ;;  %1008 = vrot.lane.b32.xlu1 %v3171_v28, %s3063_s20 }
  0x5c   : > { %1010 = vrot.lane.b32.xlu0 %v3177_v29, %s3063_s20  ;;  %1006 = vrot.lane.b32.xlu1 %v3179_v30, %s3063_s20 }
  0x60   : > { %496 = vrot.lane.b32.xlu0 %v3108_v3, %s3064_s21  ;;  %498 = vrot.lane.b32.xlu1 %v3117_v6, %s3064_s21 }
  0x64   : > { %494 = vrot.lane.b32.xlu0 %v3110_v4, %s3064_s21  ;;  %510 = vrot.lane.b32.xlu1 %v3139_v17, %s3064_s21 }
  0x68   : > { %512 = vrot.lane.b32.xlu0 %v3141_v18, %s3064_s21  ;;  %508 = vrot.lane.b32.xlu1 %v2684_v19, %s3064_s21 }
  0x6c   : > { %500 = vrot.lane.b32.xlu0 %v3185_v31, %s3064_s21  ;;  %502 = vrot.lane.b32.xlu1 %v3169_v27, %s3064_s21 }
  0x70   : > { %514 = vrot.lane.b32.xlu0 %v3191_v32, %s3064_s21  ;;  %516 = vrot.lane.b32.xlu1 %v3179_v30, %s3064_s21 }
  0x74   : > { %504 = vrot.lane.b32.xlu0 %v3159_v23, %s3064_s21  ;;  %506 = vrot.lane.b32.xlu1 %v3161_v24, %s3064_s21 }
  0x78   : > { %520 = vrot.lane.b32.xlu1 %v3177_v29, %s3064_s21  ;;  %518 = vrot.lane.b32.xlu0 %v3171_v28, %s3064_s21 }
  0x7c   : > { %1467 = vrot.lane.b32.xlu1 %v3185_v31, %s3065_s22  ;;  %1465 = vrot.lane.b32.xlu0 %v3117_v6, %s3065_s22 }
  0x80   : > { %1479 = vrot.lane.b32.xlu1 %v3141_v18, %s3065_s22  ;;  %1463 = vrot.lane.b32.xlu0 %v3108_v3, %s3065_s22 }
  0x84   : > { %1477 = vrot.lane.b32.xlu1 %v3139_v17, %s3065_s22  ;;  %1481 = vrot.lane.b32.xlu0 %v3191_v32, %s3065_s22 }
  0x86   : > { %v730_v33 = vpop.permute.xlu0 %729  ;;  %v728_v34 = vpop.permute.xlu1 %727 }
  0x87   : > { %v3267_v38 = vsel %vm755_vm0, %v728_v34, %v730_v33 }
  0x88   : > { %1475 = vrot.lane.b32.xlu1 %v3123_v11, %s3065_s22  ;;  %1473 = vrot.lane.b32.xlu0 %v3161_v24, %s3065_s22 }
  0x8a   : > { %v3257_v35 = vpop.permute.xlu0 %731  ;;  %v268_v36 = vpop.permute.xlu1 %267 }
  0x8b   : > { %v3261_v37 = vsel %vm755_vm0, %v730_v33, %v3257_v35 }
  0x8c   : > { %786 = vmatprep.subr.bf16.mxu0 %v3261_v37  ;;  %733 = vrot.lane.b32.xlu1 %v3185_v31, %s3060_s18 }
  0x8d   : > { %787 = vmatpush1.bf16.msra.mxu0 %v3267_v38  ;;  %1471 = vrot.lane.b32.xlu0 %v3159_v23, %s3065_s22 }
  0x8e   : > { %v270_v39 = vpop.permute.xlu0 %269  ;;  %v266_v40 = vpop.permute.xlu1 %265 }
  0x8f   : > { %v295_v41 = vsel %vm293_vm1, %v268_v36, %v270_v39  ;;  %v294_v42 = vsel %vm293_vm1, %v266_v40, %v268_v36 }
  0x90   : > { %1489 = vrot.lane.b32.xlu1 %v3129_v16, %s3065_s22  ;;  %325 = vmatprep.subr.bf16.mxu1 %v295_v41 }
  0x91   : > { %326 = vmatpush1.bf16.msra.mxu1 %v294_v42  ;;  %1487 = vrot.lane.b32.xlu0 %v3177_v29, %s3065_s22 }
  0x92   : > { %v744_v43 = vpop.permute.xlu0 %743  ;;  %v3278_v44 = vpop.permute.xlu1 %745 }
  0x93   : > { %v3282_v45 = vsel %vm755_vm0, %v744_v43, %v3278_v44 }
  0x94   : > { %747 = vrot.lane.b32.xlu1 %v3191_v32, %s3060_s18  ;;  %788 = vmatprep.subr.bf16.mxu0 %v3282_v45 }
  0x95   : > { %1485 = vrot.lane.b32.xlu0 %v3171_v28, %s3065_s22 }
  0x96   : > { %v742_v46 = vpop.permute.xlu0 %741  ;;  %v282_v47 = vpop.permute.xlu1 %281 }
  0x97   : > { %v3290_v48 = vsel %vm755_vm0, %v742_v46, %v744_v43 }
  0x98   : > { %1724 = vrot.lane.b32.xlu1 %v3185_v31, %s3066_s25  ;;  %789 = vmatpush1.bf16.msra.mxu0 %v3290_v48 }
  0x99   : > { %1722 = vrot.lane.b32.xlu0 %v3117_v6, %s3066_s25 }
  0x9a   : > { %v284_v50 = vpop.permute.xlu0 %283  ;;  %v280_v51 = vpop.permute.xlu1 %279 }
  0x9b   : > { %v301_v52 = vsel %vm293_vm1, %v282_v47, %v284_v50  ;;  %v300_v53 = vsel %vm293_vm1, %v280_v51, %v282_v47  ;;  %2711 = vmatmul.mubr.msk.bf16.vlgmr.msra.gmra.mrb[0].mxu0 %vm318_vm2, %v3295_v49 }
  0x9c   : > { %990 = vrot.lane.b32.xlu1 %v3185_v31, %s3063_s20  ;;  %327 = vmatprep.subr.bf16.mxu1 %v301_v52  ;;  %v3421_v52 = vld [vmem:[%s3847_s1 + $0x38] sm:$0xff]  }
  0x9d   : > { %328 = vmatpush1.bf16.msra.mxu1 %v300_v53  ;;  %1720 = vrot.lane.b32.xlu0 %v3108_v3, %s3066_s25 }
  0x9e   : > { %v738_v55 = vpop.permute.xlu0 %737  ;;  %v740_v56 = vpop.permute.xlu1 %739  ;;  %924 = vmatprep.mubr.bf16.mxu0 %v3062_v20 }
  0x9f   : > { %v761_v57 = vsel %vm755_vm0, %v738_v55, %v740_v56 }
  0xa0   : > { %1738 = vrot.lane.b32.xlu1 %v3191_v32, %s3066_s25  ;;  %892 = vmatprep.subr.bf16.mxu0 %v761_v57 }
  0xa1   : > { %1736 = vrot.lane.b32.xlu0 %v3141_v18, %s3066_s25  ;;  %2691 = vmatmul.mubr.msk.bf16.vlgmr.msra.gmra.mrb[0].mxu1 %vm318_vm2, %v3313_v54 }
  0xa2   : > { %v3323_v58 = vpop.permute.xlu0 %735  ;;  %v752_v59 = vpop.permute.xlu1 %751  ;;  %367 = vmatprep.mubr.bf16.mxu1 %v3062_v20 }
  0xa3   : > { %v760_v60 = vsel %vm755_vm0, %v3323_v58, %v738_v55 }
  0xa4   : > { %1004 = vrot.lane.b32.xlu1 %v3191_v32, %s3063_s20  ;;  %893 = vmatpush1.bf16.msra.mxu0 %v760_v60  ;;  %s3014_s20 = smul.u32 96, %s3851_s13 }
  0xa5   : > { %1734 = vrot.lane.b32.xlu0 %v3139_v17, %s3066_s25 }
  0xa6   : > { %v754_v61 = vpop.permute.xlu0 %753  ;;  %v3332_v62 = vpop.permute.xlu1 %749  ;;  %s3825_s23 = scalar_lea.vmem %s3849_s3, %s3014_s20 }
  0xa7   : > { %v767_v0 = vsel %vm755_vm0, %v752_v59, %v754_v61  ;;  %v766_v1 = vsel %vm755_vm0, %v3332_v62, %v752_v59 }
  0xa8   : > { %1732 = vrot.lane.b32.xlu1 %v3123_v11, %s3066_s25  ;;  %894 = vmatprep.subr.bf16.mxu0 %v767_v0 }
  0xa9   : > { %895 = vmatpush1.bf16.msra.mxu0 %v766_v1  ;;  %1730 = vrot.lane.b32.xlu0 %v3161_v24, %s3066_s25 }
  0xaa   : > { %v272_v2 = vpop.permute.xlu0 %271  ;;  %v274_v4 = vpop.permute.xlu1 %273  ;;  %2692 = vmatmul.mubr.msk.bf16.gmra.mrb[4].mxu1 %vm318_vm2, %v3337_v63 }
  0xab   : > { %v296_v5 = vsel %vm293_vm1, %v270_v39, %v272_v2  ;;  %v297_v7 = vsel %vm293_vm1, %v272_v2, %v274_v4  ;;  %410 = vmatprep.mubr.bf16.mxu1 %v3062_v20  ;;  %v3400_v39 = vld [vmem:[%s3847_s1 + $0x30] sm:$0xff]  }
  0xac   : > { %1744 = vrot.lane.b32.xlu1 %v3177_v29, %s3066_s25  ;;  %378 = vmatprep.subr.bf16.mxu1 %v297_v7 }
  0xad   : > { %379 = vmatpush1.bf16.msra.mxu1 %v296_v5  ;;  %1728 = vrot.lane.b32.xlu0 %v3159_v23, %s3066_s25 }
  0xae   : > { %v286_v8 = vpop.permute.xlu0 %285  ;;  %v288_v9 = vpop.permute.xlu1 %287  ;;  %2715 = vmatmul.mubr.msk.bf16.vlgmr.msra.gmra.mrb[4].mxu0 %vm318_vm2, %v3295_v49 }
  0xaf   : > { %v302_v10 = vsel %vm293_vm1, %v284_v50, %v286_v8  ;;  %v303_v12 = vsel %vm293_vm1, %v286_v8, %v288_v9  ;;  %934 = vmatprep.mubr.bf16.mxu0 %v3062_v20 }
  0xb0   : > { %1742 = vrot.lane.b32.xlu1 %v3171_v28, %s3066_s25  ;;  %380 = vmatprep.subr.bf16.mxu1 %v303_v12 }
  0xb1   : > { %381 = vmatpush1.bf16.msra.mxu1 %v302_v10  ;;  %1746 = vrot.lane.b32.xlu0 %v3129_v16, %s3066_s25 }
  0xb2   : > { %v987_v13 = vpop.permute.xlu0 %986  ;;  %v3364_v14 = vpop.permute.xlu1 %988 }
  0xb3   : > { %v1014_v19 = vsel %vm1012_vm3, %v987_v13, %v3364_v14 }
  0xb4   : > { %1981 = vrot.lane.b32.xlu1 %v3185_v31, %s3067_s5  ;;  %1043 = vmatprep.subr.bf16.mxu0 %v1014_v19 }
  0xb5   : > { %1979 = vrot.lane.b32.xlu0 %v3117_v6, %s3067_s5  ;;  %2693 = vmatmul.mubr.msk.bf16.vlgmr.msra.gmra.mrb[8].mxu1 %vm318_vm2, %v3313_v54 }
  0xb6   : > { %v985_v21 = vpop.permute.xlu0 %984  ;;  %v1001_v22 = vpop.permute.xlu1 %1000  ;;  %2716 = vmatmul.mubr.msk.bf16.gmra.mrb[8].mxu0 %vm318_vm2, %v3369_v15  ;;  %420 = vmatprep.mubr.bf16.mxu1 %v3062_v20 }
  0xb7   : > { %v1013_v25 = vsel %vm1012_vm3, %v985_v21, %v987_v13  ;;  %1075 = vmatprep.mubr.bf16.mxu0 %v3062_v20  ;;  %v3480_v13 = vld [vmem:[%s3847_s1] sm:$0xff]  }
  0xb8   : > { %1469 = vrot.lane.b32.xlu1 %v3169_v27, %s3065_s22  ;;  %1044 = vmatpush1.bf16.msra.mxu0 %v1013_v25  ;;  %v3497_v25 = vld [vmem:[%s3847_s1 + $0x40] sm:$0xff]  }
  0xb9   : > { %1977 = vrot.lane.b32.xlu0 %v3108_v3, %s3067_s5 }
  0xba   : > { %v3388_v26 = vpop.permute.xlu0 %1002  ;;  %v999_v33 = vpop.permute.xlu1 %998 }
  0xbb   : > { %v1019_v34 = vsel %vm1012_vm3, %v999_v33, %v1001_v22  ;;  %v1020_v36 = vsel %vm1012_vm3, %v1001_v22, %v3388_v26 }
  0xbc   : > { %1995 = vrot.lane.b32.xlu1 %v3191_v32, %s3067_s5  ;;  %1045 = vmatprep.subr.bf16.mxu0 %v1020_v36 }
  0xbd   : > { %1046 = vmatpush1.bf16.msra.mxu0 %v1019_v34  ;;  %1993 = vrot.lane.b32.xlu0 %v3141_v18, %s3067_s5 }
  0xbe   : > { %v276_v40 = vpop.permute.xlu0 %275  ;;  %v278_v41 = vpop.permute.xlu1 %277  ;;  %2694 = vmatmul.mubr.msk.bf16.gmra.mrb[12].mxu1 %vm318_vm2, %v3337_v63 }
  0xbf   : > { %v298_v42 = vsel %vm293_vm1, %v274_v4, %v276_v40  ;;  %v299_v43 = vsel %vm293_vm1, %v276_v40, %v278_v41  ;;  %463 = vmatprep.mubr.bf16.mxu1 %v3062_v20  ;;  %v3509_v40 = vld [vmem:[%s3847_s1 + $0x8] sm:$0xff]  }
  0xc0   : > { %1483 = vrot.lane.b32.xlu1 %v3179_v30, %s3065_s22  ;;  %431 = vmatprep.subr.bf16.mxu1 %v299_v43 }
  0xc1   : > { %432 = vmatpush1.bf16.msra.mxu1 %v298_v42  ;;  %2723 = vmatmul.mubr.msk.bf16.vlgmr.msra.gmra.mrb[0].mxu0 %vm318_vm2, %v3400_v39 }
  0xc2   : > { %v290_v46 = vpop.permute.xlu0 %289  ;;  %v292_v47 = vpop.permute.xlu1 %291  ;;  %1991 = vrot.lane.b32.xlu0 %v3139_v17, %s3067_s5  ;;  %1085 = vmatprep.mubr.bf16.mxu0 %v3062_v20 }
  0xc3   : > { %v304_v50 = vsel %vm293_vm1, %v288_v9, %v290_v46  ;;  %v305_v51 = vsel %vm293_vm1, %v290_v46, %v292_v47 }
  0xc4   : > { %1989 = vrot.lane.b32.xlu1 %v3123_v11, %s3067_s5  ;;  %433 = vmatprep.subr.bf16.mxu1 %v305_v51 }
  0xc5   : > { %434 = vmatpush1.bf16.msra.mxu1 %v304_v50 }
  0xc6   : > { %v995_v53 = vpop.permute.xlu0 %994  ;;  %v997_v55 = vpop.permute.xlu1 %996  ;;  %1987 = vrot.lane.b32.xlu0 %v3161_v24, %s3067_s5 }
  0xc7   : > { %v1018_v56 = vsel %vm1012_vm3, %v995_v53, %v997_v55 }
  0xc8   : > { %1726 = vrot.lane.b32.xlu1 %v3169_v27, %s3066_s25  ;;  %1149 = vmatprep.subr.bf16.mxu0 %v1018_v56 }
  0xc9   : > { %2724 = vmatmul.mubr.msk.bf16.gmra.mrb[12].mxu0 %vm318_vm2, %v3421_v52  ;;  %2695 = vmatmul.mubr.msk.bf16.vlgmr.msra.gmra.mrb[16].mxu1 %vm318_vm2, %v3313_v54 }
  0xca   : > { %v3432_v57 = vpop.permute.xlu0 %992  ;;  %v1009_v59 = vpop.permute.xlu1 %1008  ;;  %1985 = vrot.lane.b32.xlu0 %v3159_v23, %s3067_s5  ;;  %1181 = vmatprep.mubr.bf16.mxu0 %v3062_v20 }
  0xcb   : > { %v1017_v60 = vsel %vm1012_vm3, %v3432_v57, %v995_v53  ;;  %473 = vmatprep.mubr.bf16.mxu1 %v3062_v20 }
  0xcc   : > { %2003 = vrot.lane.b32.xlu1 %v3129_v16, %s3067_s5  ;;  %1150 = vmatpush1.bf16.msra.mxu0 %v1017_v60 }
  0xce   : > { %v1011_v61 = vpop.permute.xlu0 %1010  ;;  %v3442_v0 = vpop.permute.xlu1 %1006  ;;  %2001 = vrot.lane.b32.xlu0 %v3177_v29, %s3067_s5 }
  0xcf   : > { %v1023_v54 = vsel %vm1012_vm3, %v3442_v0, %v1009_v59  ;;  %v1024_v1 = vsel %vm1012_vm3, %v1009_v59, %v1011_v61 }
  0xd0   : > { %1740 = vrot.lane.b32.xlu1 %v3179_v30, %s3066_s25  ;;  %1151 = vmatprep.subr.bf16.mxu0 %v1024_v1 }
  0xd1   : > { %1152 = vmatpush1.bf16.msra.mxu0 %v1023_v54  ;;  %2696 = vmatmul.mubr.msk.bf16.gmra.mrb[20].mxu1 %vm318_vm2, %v3337_v63 }
  0xd2   : > { %v497_v2 = vpop.permute.xlu0 %496  ;;  %v499_v4 = vpop.permute.xlu1 %498  ;;  %1999 = vrot.lane.b32.xlu0 %v3171_v28, %s3067_s5  ;;  %1259 = vmatprep.subr.bf16.mxu0 %v3117_v6 }
  0xd3   : > { %v524_v5 = vsel %vm522_vm4, %v497_v2, %v499_v4  ;;  %585 = vmatprep.mubr.bf16.mxu1 %v3062_v20 }
  0xd4   : > { %2238 = vrot.lane.b32.xlu1 %v3185_v31, %s3068_s10  ;;  %553 = vmatprep.subr.bf16.mxu1 %v524_v5 }
  0xd5   : > { %2727 = vmatmul.mubr.msk.bf16.vlgmr.msra.gmra.mrb[4].mxu0 %vm318_vm2, %v3400_v39 }
  0xd6   : > { %v495_v63 = vpop.permute.xlu0 %494  ;;  %v511_v7 = vpop.permute.xlu1 %510  ;;  %2236 = vrot.lane.b32.xlu0 %v3117_v6, %s3068_s10  ;;  %1191 = vmatprep.mubr.bf16.mxu0 %v3062_v20 }
  0xd7   : > { %v523_v8 = vsel %vm522_vm4, %v495_v63, %v497_v2  ;;  %1260 = vmatpush1.bf16.msra.mxu0 %v3108_v3 }
  0xd8   : > { %1983 = vrot.lane.b32.xlu1 %v3169_v27, %s3067_s5  ;;  %554 = vmatpush1.bf16.msra.mxu1 %v523_v8 }
  0xd9   : > { %1261 = vmatprep.subr.bf16.mxu0 %v3141_v18 }
  0xda   : > { %v513_v9 = vpop.permute.xlu0 %512  ;;  %v509_v10 = vpop.permute.xlu1 %508  ;;  %2234 = vrot.lane.b32.xlu0 %v3108_v3, %s3068_s10 }
  0xdb   : > { %v529_v12 = vsel %vm522_vm4, %v509_v10, %v511_v7  ;;  %v530_v6 = vsel %vm522_vm4, %v511_v7, %v513_v9  ;;  %1262 = vmatpush1.bf16.msra.mxu0 %v3139_v17  ;;  %v3600_v10 = vld [vmem:[%s3847_s1 + $0x58] sm:$0xff]  }
  0xdc   : > { %2252 = vrot.lane.b32.xlu1 %v3191_v32, %s3068_s10  ;;  %555 = vmatprep.subr.bf16.mxu1 %v530_v6 }
  0xdd   : > { %2728 = vmatmul.mubr.msk.bf16.gmra.mrb[8].mxu0 %vm318_vm2, %v3421_v52  ;;  %556 = vmatpush1.bf16.msra.mxu1 %v529_v12 }
  0xde   : > { %v501_v3 = vpop.permute.xlu0 %500  ;;  %v503_v19 = vpop.permute.xlu1 %502  ;;  %2250 = vrot.lane.b32.xlu0 %v3141_v18, %s3068_s10  ;;  %1291 = vmatprep.mubr.bf16.mxu0 %v3062_v20 }
  0xdf   : > { %v525_v21 = vsel %vm522_vm4, %v499_v4, %v501_v3  ;;  %v526_v22 = vsel %vm522_vm4, %v501_v3, %v503_v19  ;;  %1365 = vmatprep.subr.bf16.mxu0 %v3161_v24  ;;  %v3578_v4 = vld [vmem:[%s3847_s1 + $0x50] sm:$0xff]  }
  0xe0   : > { %1997 = vrot.lane.b32.xlu1 %v3179_v30, %s3067_s5  ;;  %2699 = vmatmul.mubr.msk.bf16.vlgmr.msra.gmra.mrb[0].mxu1 %vm318_vm2, %v3480_v13 }
  0xe1   : > { %606 = vmatprep.subr.bf16.mxu1 %v526_v22  ;;  %595 = vmatprep.mubr.bf16.mxu1 %v3062_v20 }
  0xe2   : > { %607 = vmatpush1.bf16.msra.mxu1 %v525_v21  ;;  %v515_v18 = vpop.permute.xlu0 %514  ;;  %v517_v33 = vpop.permute.xlu1 %516  ;;  %2248 = vrot.lane.b32.xlu0 %v3139_v17, %s3068_s10  ;;  %v3525_v17 = vld [vmem:[%s3847_s1 + $0x48] sm:$0xff]  }
  0xe3   : > { %v531_v34 = vsel %vm522_vm4, %v513_v9, %v515_v18  ;;  %v532_v36 = vsel %vm522_vm4, %v515_v18, %v517_v33 }
  0xe4   : > { %2246 = vrot.lane.b32.xlu1 %v3123_v11, %s3068_s10  ;;  %608 = vmatprep.subr.bf16.mxu1 %v532_v36 }
  0xe5   : > { %2735 = vmatmul.mubr.msk.bf16.vlgmr.msra.gmra.mrb[0].mxu0 %vm318_vm2, %v3497_v25 }
  0xe6   : > { %609 = vmatpush1.bf16.msra.mxu1 %v531_v34  ;;  %v505_v41 = vpop.permute.xlu0 %504  ;;  %v507_v42 = vpop.permute.xlu1 %506  ;;  %2244 = vrot.lane.b32.xlu0 %v3161_v24, %s3068_s10 }
  0xe7   : > { %1301 = vmatprep.mubr.bf16.mxu0 %v3062_v20  ;;  %1366 = vmatpush1.bf16.msra.mxu0 %v3159_v23  ;;  %v528_v11 = vsel %vm522_vm4, %v505_v41, %v507_v42  ;;  %v527_v50 = vsel %vm522_vm4, %v503_v19, %v505_v41 }
  0xe8   : > { %2240 = vrot.lane.b32.xlu1 %v3169_v27, %s3068_s10  ;;  %2700 = vmatmul.mubr.msk.bf16.gmra.mrb[4].mxu1 %vm318_vm2, %v3509_v40 }
  0xe9   : > { %638 = vmatprep.mubr.bf16.mxu1 %v3062_v20  ;;  %659 = vmatprep.subr.bf16.mxu1 %v528_v11 }
  0xea   : > { %v521_v24 = vpop.permute.xlu1 %520  ;;  %v519_v43 = vpop.permute.xlu0 %518  ;;  %2242 = vrot.lane.b32.xlu0 %v3159_v23, %s3068_s10  ;;  %1367 = vmatprep.subr.bf16.mxu0 %v3177_v29 }
  0xeb   : > { %1368 = vmatpush1.bf16.msra.mxu0 %v3171_v28  ;;  %v534_v23 = vsel %vm522_vm4, %v519_v43, %v521_v24  ;;  %v533_v55 = vsel %vm522_vm4, %v517_v33, %v519_v43 }
  0xec   : > { %2260 = vrot.lane.b32.xlu1 %v3129_v16, %s3068_s10 }
  0xed   : > { %2736 = vmatmul.mubr.msk.bf16.gmra.mrb[12].mxu0 %vm318_vm2, %v3525_v17 }
  0xee   : > { %v3536_v46 = vpop.permute.xlu1 %1467  ;;  %2258 = vrot.lane.b32.xlu0 %v3177_v29, %s3068_s10  ;;  %1397 = vmatprep.mubr.bf16.mxu0 %v3062_v20  ;;  %v1466_v47 = vpop.permute.xlu0 %1465 }
  0xef   : > { %v1493_v16 = vsel %vm1491_vm5, %v1466_v47, %v3536_v46 }
  0xf0   : > { %2254 = vrot.lane.b32.xlu1 %v3179_v30, %s3068_s10  ;;  %2701 = vmatmul.mubr.msk.bf16.vlgmr.msra.gmra.mrb[8].mxu1 %vm318_vm2, %v3480_v13 }
  0xf1   : > { %660 = vmatpush1.bf16.msra.mxu1 %v527_v50  ;;  %648 = vmatprep.mubr.bf16.mxu1 %v3062_v20 }
  0xf2   : > { %v1480_v29 = vpop.permute.xlu1 %1479  ;;  %661 = vmatprep.subr.bf16.mxu1 %v534_v23  ;;  %2256 = vrot.lane.b32.xlu0 %v3171_v28, %s3068_s10  ;;  %v1464_v51 = vpop.permute.xlu0 %1463 }
  0xf3   : > { %v1492_v53 = vsel %vm1491_vm5, %v1464_v51, %v1466_v47  ;;  %1522 = vmatprep.subr.bf16.mxu0 %v1493_v16  ;;  %v3674_v51 = vld [vmem:[%s3847_s1 + $0x68] sm:$0xff]  }
  0xf5   : > { %662 = vmatpush1.bf16.msra.mxu1 %v533_v55  ;;  %2739 = vmatmul.mubr.msk.bf16.vlgmr.msra.gmra.mrb[4].mxu0 %vm318_vm2, %v3497_v25 }
  0xf6   : > { %2818 = vmatprep.subr.bf16.mxu1 %v3261_v37  ;;  %v1478_v56 = vpop.permute.xlu1 %1477  ;;  %1523 = vmatpush1.bf16.msra.mxu0 %v1492_v53  ;;  %v3557_v59 = vpop.permute.xlu0 %1481 }
  0xf7   : > { %v1498_v60 = vsel %vm1491_vm5, %v1478_v56, %v1480_v29  ;;  %1407 = vmatprep.mubr.bf16.mxu0 %v3062_v20  ;;  %v1499_v28 = vsel %vm1491_vm5, %v1480_v29, %v3557_v59 }
  0xf8   : > { %2702 = vmatmul.mubr.msk.bf16.gmra.mrb[12].mxu1 %vm318_vm2, %v3509_v40  ;;  %1524 = vmatprep.subr.bf16.mxu0 %v1499_v28 }
  0xf9   : > { %691 = vmatprep.mubr.bf16.mxu1 %v3062_v20 }
  0xfa   : > { %v1476_v61 = vpop.permute.xlu1 %1475  ;;  %v1474_v54 = vpop.permute.xlu0 %1473  ;;  %1525 = vmatpush1.bf16.msra.mxu0 %v1498_v60 }
  0xfb   : > { %v1497_v37 = vsel %vm1491_vm5, %v1474_v54, %v1476_v61 }
  0xfc   : > { %1628 = vmatprep.subr.bf16.mxu0 %v1497_v37 }
  0xfd   : > { %2740 = vmatmul.mubr.msk.bf16.gmra.mrb[8].mxu0 %vm318_vm2, %v3525_v17 }
  0xfe   : > { %v734_v1 = vpop.permute.xlu1 %733  ;;  %1554 = vmatprep.mubr.bf16.mxu0 %v3062_v20 }
  0xff   : > { %v3570_v2 = vpop.permute.xlu0 %1471  ;;  %v758_v19 = vsel %vm755_vm0, %v3257_v35, %v734_v1 }
 0x100   : > { %2703 = vmatmul.mubr.msk.bf16.vlgmr.msra.gmra.mrb[16].mxu1 %vm318_vm2, %v3480_v13  ;;  %v1496_v63 = vsel %vm1491_vm5, %v3570_v2, %v1474_v54  ;;  %v2477_v54 = vld [vmem:[%s3848_s2 + $0x8] sm:$0xff] }
 0x101   : > { %2820 = vmatpush1.bf16.msra.mxu1 %v3267_v38  ;;  %701 = vmatprep.mubr.bf16.mxu1 %v3062_v20  ;;  %v759_v38 = vsel %vm755_vm0, %v734_v1, %v3323_v58 }
 0x102   : > { %2819 = vmatprep.subr.bf16.mxu1 %v3282_v45  ;;  %v1490_v5 = vpop.permute.xlu1 %1489  ;;  %2487 = vperm.xlu1 %3033, %v2477_v54  }
 0x103   : > { %v1488_v7 = vpop.permute.xlu0 %1487 }
 0x104   : > { %v1503_v8 = vsel %vm1491_vm5, %v1488_v7, %v1490_v5  ;;  %v2479_v5 = vld [vmem:[%s3848_s2 + $0x18] sm:$0xff] }
 0x105   : > { %2821 = vmatpush1.bf16.msra.mxu1 %v3290_v48  ;;  %2749 = vmatmul.mubr.msk.bf16.vlgmr.msra.gmra.mrb[0].mxu0 %vm318_vm2, %v3578_v4 }
 0x106   : > { %839 = vmatprep.subr.bf16.mxu1 %v759_v38  ;;  %v748_v9 = vpop.permute.xlu1 %747  ;;  %1629 = vmatpush1.bf16.msra.mxu0 %v1496_v63 }
 0x107   : > { %1564 = vmatprep.mubr.bf16.mxu0 %v3062_v20  ;;  %v3591_v45 = vpop.permute.xlu0 %1485  ;;  %1630 = vmatprep.subr.bf16.mxu0 %v1503_v8  ;;  %v765_v21 = vsel %vm755_vm0, %v748_v9, %v3332_v62  ;;  %v764_v34 = vsel %vm755_vm0, %v3278_v44, %v748_v9 }
 0x108   : > { %2704 = vmatmul.mubr.msk.bf16.gmra.mrb[20].mxu1 %vm318_vm2, %v3509_v40  ;;  %v1502_v48 = vsel %vm1491_vm5, %v3591_v45, %v1488_v7 }
 0x109   : > { %828 = vmatprep.mubr.bf16.mxu1 %v3062_v20 }
 0x10a   : > { %v3603_v58 = vpop.permute.xlu1 %1724  ;;  %1631 = vmatpush1.bf16.msra.mxu0 %v1502_v48 }
 0x10b   : > { %v1723_v12 = vpop.permute.xlu0 %1722 }
 0x10c   : > { %v1750_v6 = vsel %vm1748_vm6, %v1723_v12, %v3603_v58 }
 0x10d   : > { %2750 = vmatmul.mubr.msk.bf16.gmra.mrb[12].mxu0 %vm318_vm2, %v3600_v10  ;;  %1779 = vmatprep.subr.bf16.mxu0 %v1750_v6 }
 0x10e   : > { %v991_v13 = vpop.permute.xlu1 %990  ;;  %1660 = vmatprep.mubr.bf16.mxu0 %v3062_v20 }
 0x10f   : > { %v1721_v3 = vpop.permute.xlu0 %1720  ;;  %v1016_v62 = vsel %vm1012_vm3, %v991_v13, %v3432_v57  ;;  %v1015_v44 = vsel %vm1012_vm3, %v3364_v14, %v991_v13 }
 0x110   : > { %2712 = vmatmul.mubr.msk.bf16.vlgmr.msra.gmra.mrb[4].mxu1 %vm318_vm2, %v3369_v15  ;;  %v1749_v18 = vsel %vm1748_vm6, %v1721_v3, %v1723_v12  ;;  %v3728_v12 = vld [vmem:[%s3847_s1 + $0x70] sm:$0xff]  }
 0x111   : > { %840 = vmatpush1.bf16.msra.mxu1 %v758_v19  ;;  %871 = vmatprep.mubr.bf16.mxu1 %v3062_v20 }
 0x112   : > { %841 = vmatprep.subr.bf16.mxu1 %v765_v21  ;;  %v3617_v22 = vpop.permute.xlu1 %1738 }
 0x113   : > { %v1737_v33 = vpop.permute.xlu0 %1736 }
 0x114   : > { %v1756_v35 = vsel %vm1748_vm6, %v1737_v33, %v3617_v22 }
 0x115   : > { %842 = vmatpush1.bf16.msra.mxu1 %v764_v34  ;;  %2753 = vmatmul.mubr.msk.bf16.vlgmr.msra.gmra.mrb[4].mxu0 %vm318_vm2, %v3578_v4  ;;  %v3748_v34 = vld [vmem:[%s3847_s1 + $0x78] sm:$0xff]  }
 0x116   : > { %1096 = vmatprep.subr.bf16.mxu1 %v1016_v62  ;;  %v1005_v36 = vpop.permute.xlu1 %1004  ;;  %1780 = vmatpush1.bf16.msra.mxu0 %v1749_v18 }
 0x117   : > { %v1022_v40 = vsel %vm1012_vm3, %v1005_v36, %v3442_v0  ;;  %1670 = vmatprep.mubr.bf16.mxu0 %v3062_v20  ;;  %v1735_v41 = vpop.permute.xlu0 %1734  ;;  %1781 = vmatprep.subr.bf16.mxu0 %v1756_v35  ;;  %v1021_v0 = vsel %vm1012_vm3, %v3388_v26, %v1005_v36  ;;  %v3651_v26 = vld [vmem:[%s3847_s1 + $0x60] sm:$0xff]  }
 0x118   : > { %2713 = vmatmul.mubr.msk.bf16.vlgmr.msra.gmra.mrb[8].mxu1 %vm318_vm2, %v3295_v49  ;;  %v1755_v42 = vsel %vm1748_vm6, %v1735_v41, %v1737_v33 }
 0x119   : > { %1097 = vmatpush1.bf16.msra.mxu1 %v1015_v44  ;;  %881 = vmatprep.mubr.bf16.mxu1 %v3062_v20 }
 0x11a   : > { %1098 = vmatprep.subr.bf16.mxu1 %v1022_v40  ;;  %v1733_v57 = vpop.permute.xlu1 %1732  ;;  %1782 = vmatpush1.bf16.msra.mxu0 %v1755_v42 }
 0x11b   : > { %v1731_v11 = vpop.permute.xlu0 %1730 }
 0x11c   : > { %v1754_v24 = vsel %vm1748_vm6, %v1731_v11, %v1733_v57 }
 0x11d   : > { %1099 = vmatpush1.bf16.msra.mxu1 %v1021_v0  ;;  %2754 = vmatmul.mubr.msk.bf16.gmra.mrb[8].mxu0 %vm318_vm2, %v3600_v10 }
 0x11e   : > { %v1745_v14 = vpop.permute.xlu1 %1744  ;;  %1811 = vmatprep.mubr.bf16.mxu0 %v3062_v20  ;;  %1312 = vmatprep.subr.bf16.mxu1 %v3169_v27 }
 0x11f   : > { %v3644_v49 = vpop.permute.xlu0 %1728  ;;  %1885 = vmatprep.subr.bf16.mxu0 %v1754_v24 }
 0x120   : > { %2714 = vmatmul.mubr.msk.bf16.gmra.mrb[12].mxu1 %vm318_vm2, %v3369_v15  ;;  %v1753_v47 = vsel %vm1748_vm6, %v3644_v49, %v1731_v11 }
 0x121   : > { %1128 = vmatprep.mubr.bf16.mxu1 %v3062_v20 }
 0x122   : > { %v3654_v43 = vpop.permute.xlu1 %1742 }
 0x123   : > { %v1747_v23 = vpop.permute.xlu0 %1746  ;;  %v1759_v50 = vsel %vm1748_vm6, %v3654_v43, %v1745_v14 }
 0x124   : > { %v1760_v27 = vsel %vm1748_vm6, %v1745_v14, %v1747_v23 }
 0x125   : > { %2761 = vmatmul.mubr.msk.bf16.vlgmr.msra.gmra.mrb[0].mxu0 %vm318_vm2, %v3651_v26 }
 0x126   : > { %v3661_v15 = vpop.permute.xlu1 %1981  ;;  %1886 = vmatpush1.bf16.msra.mxu0 %v1753_v47  ;;  %1821 = vmatprep.mubr.bf16.mxu0 %v3062_v20 }
 0x127   : > { %v1980_v16 = vpop.permute.xlu0 %1979  ;;  %1887 = vmatprep.subr.bf16.mxu0 %v1760_v27 }
 0x128   : > { %2725 = vmatmul.mubr.msk.bf16.vlgmr.msra.gmra.mrb[8].mxu1 %vm318_vm2, %v3400_v39  ;;  %v2007_v29 = vsel %vm2005_vm7, %v1980_v16, %v3661_v15 }
 0x129   : > { %1313 = vmatpush1.bf16.msra.mxu1 %v3185_v31  ;;  %1138 = vmatprep.mubr.bf16.mxu1 %v3062_v20 }
 0x12a   : > { %v1470_v53 = vpop.permute.xlu1 %1469  ;;  %1314 = vmatprep.subr.bf16.mxu1 %v3179_v30  ;;  %1888 = vmatpush1.bf16.msra.mxu0 %v1759_v50  ;;  %v3050_v50 = vld [vmem:[%s3847_s1 + $0x80] sm:$0xff]  }
 0x12b   : > { %v1495_v55 = vsel %vm1491_vm5, %v1470_v53, %v3570_v2  ;;  %v1978_v39 = vpop.permute.xlu0 %1977  ;;  %2036 = vmatprep.subr.bf16.mxu0 %v2007_v29  ;;  %v1494_v1 = vsel %vm1491_vm5, %v3536_v46, %v1470_v53  ;;  %v2478_v46 = vld [vmem:[%s3848_s2 + $0x10] sm:$0xff] }
 0x12c   : > { %v2006_v60 = vsel %vm2005_vm7, %v1978_v39, %v1980_v16  ;;  %2492 = vperm.xlu1 %3033, %v2478_v46  }
 0x12d   : > { %1315 = vmatpush1.bf16.msra.mxu1 %v3191_v32  ;;  %2762 = vmatmul.mubr.msk.bf16.gmra.mrb[12].mxu0 %vm318_vm2, %v3674_v51 }
 0x12e   : > { %1575 = vmatprep.subr.bf16.mxu1 %v1495_v55  ;;  %v3683_v31 = vpop.permute.xlu1 %1995  ;;  %1917 = vmatprep.mubr.bf16.mxu0 %v3062_v20 }
 0x12f   : > { %v1994_v56 = vpop.permute.xlu0 %1993 }
 0x130   : > { %2726 = vmatmul.mubr.msk.bf16.gmra.mrb[12].mxu1 %vm318_vm2, %v3421_v52  ;;  %v2013_v32 = vsel %vm2005_vm7, %v1994_v56, %v3683_v31  ;;  %v2476_v52 = vld [vmem:[%s3848_s2] sm:$0xff] }
 0x131   : > { %1344 = vmatprep.mubr.bf16.mxu1 %v3062_v20  ;;  %2482 = vperm.xlu0 %3032, %v2476_v52  }
 0x132   : > { %v1484_v30 = vpop.permute.xlu1 %1483 }
 0x133   : > { %v1501_v63 = vsel %vm1491_vm5, %v1484_v30, %v3591_v45  ;;  %v1500_v38 = vsel %vm1491_vm5, %v3557_v59, %v1484_v30 }
 0x134   : > { %v1992_v28 = vpop.permute.xlu0 %1991 }
 0x135   : > { %2765 = vmatmul.mubr.msk.bf16.vlgmr.msra.gmra.mrb[4].mxu0 %vm318_vm2, %v3651_v26  ;;  %v2012_v37 = vsel %vm2005_vm7, %v1992_v28, %v1994_v56  ;;  %2497 = vperm.xlu0 %3032, %v2479_v5   ;;  %v3051_v56 = vld [vmem:[%s3847_s1 + $0x88] sm:$0xff]  }
 0x136   : > { %v1990_v61 = vpop.permute.xlu1 %1989  ;;  %2037 = vmatpush1.bf16.msra.mxu0 %v2006_v60  ;;  %1927 = vmatprep.mubr.bf16.mxu0 %v3062_v20 }
 0x137   : > { %2038 = vmatprep.subr.bf16.mxu0 %v2013_v32 }
 0x138   : > { %2737 = vmatmul.mubr.msk.bf16.vlgmr.msra.gmra.mrb[8].mxu1 %vm318_vm2, %v3497_v25  ;;  %v1988_v2 = vpop.permute.xlu0 %1987 }
 0x139   : > { %1576 = vmatpush1.bf16.msra.mxu1 %v1494_v1  ;;  %1354 = vmatprep.mubr.bf16.mxu1 %v3062_v20  ;;  %v2011_v7 = vsel %vm2005_vm7, %v1988_v2, %v1990_v61 }
 0x13a   : > { %1577 = vmatprep.subr.bf16.mxu1 %v1501_v63  ;;  %v1727_v25 = vpop.permute.xlu1 %1726  ;;  %2039 = vmatpush1.bf16.msra.mxu0 %v2012_v37 }
 0x13b   : > { %v1752_v8 = vsel %vm1748_vm6, %v1727_v25, %v3644_v49  ;;  %2142 = vmatprep.subr.bf16.mxu0 %v2011_v7  ;;  %v1751_v21 = vsel %vm1748_vm6, %v3603_v58, %v1727_v25 }
 0x13c   : > { %v1986_v9 = vpop.permute.xlu0 %1985 }
 0x13d   : > { %1578 = vmatpush1.bf16.msra.mxu1 %v1500_v38  ;;  %2766 = vmatmul.mubr.msk.bf16.gmra.mrb[8].mxu0 %vm318_vm2, %v3674_v51  ;;  %v2010_v6 = vsel %vm2005_vm7, %v1986_v9, %v1988_v2 }
 0x13e   : > { %1832 = vmatprep.subr.bf16.mxu1 %v1752_v8  ;;  %v2004_v45 = vpop.permute.xlu1 %2003  ;;  %2068 = vmatprep.mubr.bf16.mxu0 %v3062_v20 }
 0x140   : > { %2738 = vmatmul.mubr.msk.bf16.gmra.mrb[12].mxu1 %vm318_vm2, %v3525_v17  ;;  %v2002_v48 = vpop.permute.xlu0 %2001 }
 0x141   : > { %1607 = vmatprep.mubr.bf16.mxu1 %v3062_v20  ;;  %v2017_v3 = vsel %vm2005_vm7, %v2002_v48, %v2004_v45 }
 0x142   : > { %v1741_v59 = vpop.permute.xlu1 %1740 }
 0x143   : > { %v1758_v33 = vsel %vm1748_vm6, %v1741_v59, %v3654_v43  ;;  %v1757_v62 = vsel %vm1748_vm6, %v3617_v22, %v1741_v59 }
 0x144   : > { %v2000_v13 = vpop.permute.xlu0 %1999 }
 0x145   : > { %2773 = vmatmul.mubr.msk.bf16.vlgmr.msra.gmra.mrb[0].mxu0 %vm318_vm2, %v3728_v12  ;;  %v2016_v17 = vsel %vm2005_vm7, %v2000_v13, %v2002_v48 }
 0x146   : > { %v3735_v19 = vpop.permute.xlu1 %2238  ;;  %2143 = vmatpush1.bf16.msra.mxu0 %v2010_v6  ;;  %2078 = vmatprep.mubr.bf16.mxu0 %v3062_v20 }
 0x147   : > { %2144 = vmatprep.subr.bf16.mxu0 %v2017_v3 }
 0x148   : > { %2751 = vmatmul.mubr.msk.bf16.vlgmr.msra.gmra.mrb[8].mxu1 %vm318_vm2, %v3578_v4  ;;  %v2237_v18 = vpop.permute.xlu0 %2236 }
 0x149   : > { %1833 = vmatpush1.bf16.msra.mxu1 %v1751_v21  ;;  %1617 = vmatprep.mubr.bf16.mxu1 %v3062_v20  ;;  %v2264_v35 = vsel %vm2262_vm8, %v2237_v18, %v3735_v19 }
 0x14a   : > { %1834 = vmatprep.subr.bf16.mxu1 %v1758_v33  ;;  %v1984_v58 = vpop.permute.xlu1 %1983  ;;  %2145 = vmatpush1.bf16.msra.mxu0 %v2016_v17 }
 0x14b   : > { %v2009_v4 = vsel %vm2005_vm7, %v1984_v58, %v1986_v9  ;;  %2293 = vmatprep.subr.bf16.mxu0 %v2264_v35 }
 0x14c   : > { %v2235_v36 = vpop.permute.xlu0 %2234 }
 0x14d   : > { %1835 = vmatpush1.bf16.msra.mxu1 %v1757_v62  ;;  %2774 = vmatmul.mubr.msk.bf16.gmra.mrb[12].mxu0 %vm318_vm2, %v3748_v34  ;;  %v2263_v42 = vsel %vm2262_vm8, %v2235_v36, %v2237_v18 }
 0x14e   : > { %2089 = vmatprep.subr.bf16.mxu1 %v2009_v4  ;;  %v2253_v40 = vpop.permute.xlu1 %2252  ;;  %2174 = vmatprep.mubr.bf16.mxu0 %v3062_v20 }
 0x150   : > { %2752 = vmatmul.mubr.msk.bf16.gmra.mrb[12].mxu1 %vm318_vm2, %v3600_v10  ;;  %v2251_v41 = vpop.permute.xlu0 %2250  ;;  %v2008_v10 = vsel %vm2005_vm7, %v3661_v15, %v1984_v58 }
 0x151   : > { %1864 = vmatprep.mubr.bf16.mxu1 %v3062_v20  ;;  %v2270_v22 = vsel %vm2262_vm8, %v2251_v41, %v2253_v40 }
 0x152   : > { %v1998_v44 = vpop.permute.xlu1 %1997 }
 0x153   : > { %v2015_v14 = vsel %vm2005_vm7, %v1998_v44, %v2000_v13  ;;  %v2014_v47 = vsel %vm2005_vm7, %v3683_v31, %v1998_v44 }
 0x154   : > { %v2249_v57 = vpop.permute.xlu0 %2248 }
 0x155   : > { %2777 = vmatmul.mubr.msk.bf16.vlgmr.msra.gmra.mrb[4].mxu0 %vm318_vm2, %v3728_v12  ;;  %v2269_v0 = vsel %vm2262_vm8, %v2249_v57, %v2251_v41 }
 0x156   : > { %v2247_v11 = vpop.permute.xlu1 %2246  ;;  %2294 = vmatpush1.bf16.msra.mxu0 %v2263_v42  ;;  %2184 = vmatprep.mubr.bf16.mxu0 %v3062_v20 }
 0x157   : > { %2295 = vmatprep.subr.bf16.mxu0 %v2270_v22 }
 0x158   : > { %2763 = vmatmul.mubr.msk.bf16.vlgmr.msra.gmra.mrb[8].mxu1 %vm318_vm2, %v3651_v26  ;;  %v2245_v24 = vpop.permute.xlu0 %2244 }
 0x159   : > { %2090 = vmatpush1.bf16.msra.mxu1 %v2008_v10  ;;  %1874 = vmatprep.mubr.bf16.mxu1 %v3062_v20  ;;  %v2268_v49 = vsel %vm2262_vm8, %v2245_v24, %v2247_v11 }
 0x15a   : > { %2091 = vmatprep.subr.bf16.mxu1 %v2015_v14  ;;  %v2241_v43 = vpop.permute.xlu1 %2240  ;;  %2296 = vmatpush1.bf16.msra.mxu0 %v2269_v0 }
 0x15b   : > { %2399 = vmatprep.subr.bf16.mxu0 %v2268_v49  ;;  %v2265_v31 = vsel %vm2262_vm8, %v3735_v19, %v2241_v43 }
 0x15c   : > { %v2243_v23 = vpop.permute.xlu0 %2242 }
 0x15d   : > { %2092 = vmatpush1.bf16.msra.mxu1 %v2014_v47  ;;  %2778 = vmatmul.mubr.msk.bf16.gmra.mrb[8].mxu0 %vm318_vm2, %v3748_v34  ;;  %v2266_v26 = vsel %vm2262_vm8, %v2241_v43, %v2243_v23  ;;  %v2267_v16 = vsel %vm2262_vm8, %v2243_v23, %v2245_v24 }
 0x15e   : > { %2325 = vmatprep.mubr.bf16.mxu0 %v3062_v20  ;;  %2346 = vmatprep.subr.bf16.mxu1 %v2266_v26  ;;  %v2261_v27 = vpop.permute.xlu1 %2260 }
 0x160   : > { %2764 = vmatmul.mubr.msk.bf16.gmra.mrb[12].mxu1 %vm318_vm2, %v3674_v51  ;;  %v2259_v15 = vpop.permute.xlu0 %2258 }
 0x161   : > { %2121 = vmatprep.mubr.bf16.mxu1 %v3062_v20  ;;  %v2274_v53 = vsel %vm2262_vm8, %v2259_v15, %v2261_v27 }
 0x162   : > { %v2255_v55 = vpop.permute.xlu1 %2254 }
 0x163   : > { %v2271_v30 = vsel %vm2262_vm8, %v2253_v40, %v2255_v55 }
 0x164   : > { %v2257_v29 = vpop.permute.xlu0 %2256 }
 0x165   : > { %2785 = vmatmul.mubr.msk.bf16.vlgmr.msra.gmra.mrb[0].mxu0 %vm318_vm2, %v3050_v50  ;;  %v2273_v51 = vsel %vm2262_vm8, %v2257_v29, %v2259_v15  ;;  %v2272_v39 = vsel %vm2262_vm8, %v2255_v55, %v2257_v29 }
 0x166   : > { %2400 = vmatpush1.bf16.msra.mxu0 %v2267_v16  ;;  %2335 = vmatprep.mubr.bf16.mxu0 %v3062_v20 }
 0x167   : > { %2401 = vmatprep.subr.bf16.mxu0 %v2274_v53 }
 0x168   : > { %2775 = vmatmul.mubr.msk.bf16.vlgmr.msra.gmra.mrb[8].mxu1 %vm318_vm2, %v3728_v12 }
 0x169   : > { %2347 = vmatpush1.bf16.msra.mxu1 %v2265_v31  ;;  %2131 = vmatprep.mubr.bf16.mxu1 %v3062_v20 }
 0x16a   : > { %2348 = vmatprep.subr.bf16.mxu1 %v2272_v39  ;;  %2402 = vmatpush1.bf16.msra.mxu0 %v2273_v51 }
 0x16d   : > { %2786 = vmatmul.mubr.msk.bf16.gmra.mrb[12].mxu0 %vm318_vm2, %v3051_v56  ;;  %2349 = vmatpush1.bf16.msra.mxu1 %v2271_v30 }
 0x16e   : > { %2431 = vmatprep.mubr.bf16.mxu0 %v3062_v20 }
 0x170   : > { %2776 = vmatmul.mubr.msk.bf16.gmra.mrb[12].mxu1 %vm318_vm2, %v3748_v34 }
 0x171   : > { %2378 = vmatprep.mubr.bf16.mxu1 %v3062_v20 }
 0x175   : > { %2789 = vmatmul.mubr.msk.bf16.vlgmr.msra.gmra.mrb[4].mxu0 %vm318_vm2, %v3050_v50 }
 0x176   : > { %2441 = vmatprep.mubr.bf16.mxu0 %v3062_v20 }
 0x178   : > { %2787 = vmatmul.mubr.msk.bf16.vlgmr.msra.gmra.mrb[8].mxu1 %vm318_vm2, %v3050_v50 }
 0x179   : > { %2388 = vmatprep.mubr.bf16.mxu1 %v3062_v20 }
 0x17d   : > { %2790 = vmatmul.mubr.msk.bf16.gmra.mrb[8].mxu0 %vm318_vm2, %v3051_v56 }
 0x180   : > { %2788 = vmatmul.mubr.msk.bf16.gmra.mrb[12].mxu1 %vm318_vm2, %v3051_v56 }
 0x181   : > { %v2488_v6 = vpop.permute.xlu1 %2487 }
 0x1ab   : > { %v2493_v4 = vpop.permute.xlu1 %2492 }
 0x1b0   : > { %v2483_v9 = vpop.permute.xlu0 %2482 }
 0x1b3   : > { %v587_v60 = vpop.f32.mrb[0].mxu1 }
 0x1b4   : > { %v589_v28 = vpop.f32.mrb[1].mxu1  ;;  %v2498_v44 = vpop.permute.xlu0 %2497 }
 0x1b5   : > { %v591_v32 = vpop.f32.mrb[2].mxu1 }
 0x1b6   : > { %v593_v61 = vpop.f32.mrb[3].mxu1 }
 0x1d3   : > { %v693_v52 = vpop.f32.mrb[16].mxu1 }
 0x1d4   : > { %v695_v54 = vpop.f32.mrb[17].mxu1 }
 0x1d5   : > { %v697_v37 = vpop.f32.mrb[18].mxu1 }
 0x1d6   : > { %v699_v1 = vpop.f32.mrb[19].mxu1 }
 0x1db   : > { %v3813_v2 = vpop.f32.mrb[20].mxu1 }
 0x1dc   : > { %v3815_v5 = vpop.f32.mrb[21].mxu1 }
 0x1dd   : > { %v3817_v63 = vpop.f32.mrb[22].mxu1 }
 0x1de   : > { %v3819_v20 = vpop.f32.mrb[23].mxu1 }
 0x1e3   : > { %v830_v7 = vpop.f32.mrb[4].mxu1 }
 0x1e4   : > { %v832_v46 = vpop.f32.mrb[5].mxu1 }
 0x1e5   : > { %v834_v25 = vpop.f32.mrb[6].mxu1 }
 0x1e6   : > { %v836_v8 = vpop.f32.mrb[7].mxu1 }
 0x238   : > { %v2327_v38 = vpop.f32.mrb[0].mxu0 }
 0x239   : > { %v2822_v45 = vadd.f32 %v2327_v38, %v587_v60  ;;  %v2329_v48 = vpop.f32.mrb[1].mxu0 }
 0x23a   : > { %v2823_v12 = vadd.f32 %v2329_v48, %v589_v28  ;;  %v2331_v59 = vpop.f32.mrb[2].mxu0 }
 0x23b   : > { %v2500_v13 = vadd.f32 %v2822_v45, %v2483_v9  ;;  %v2824_v3 = vadd.f32 %v2331_v59, %v591_v32  ;;  %v2333_v19 = vpop.f32.mrb[3].mxu0 }
 0x23c   : > { %v2501_v17 = vadd.f32 %v2823_v12, %v2483_v9  ;;  %v2825_v21 = vadd.f32 %v2333_v19, %v593_v61 }
 0x23d   : > { %v2506_v18 = vadd.f32 %v2824_v3, %v2488_v6 }
 0x23e   : > { %v2806_v33 = vpack.c.bf16 %v2501_v17, %v2500_v13  ;;  %v2507_v34 = vadd.f32 %v2825_v21, %v2488_v6 }
 0x240   : > { %2596 = vst [vmem:[%s3825_s23] sm:$0xff] %v2806_v33  ;;  %v2809_v35 = vpack.c.bf16 %v2507_v34, %v2506_v18  ;;  %v2337_v58 = vpop.f32.mrb[12].mxu0 }
 0x241   : > { %v2826_v62 = vadd.f32 %v2337_v58, %v830_v7  ;;  %v2339_v36 = vpop.f32.mrb[13].mxu0 }
 0x242   : > { %2599 = vst [vmem:[%s3825_s23 + $0x18] sm:$0xff] %v2809_v35  ;;  %v2827_v40 = vadd.f32 %v2339_v36, %v832_v46  ;;  %v2341_v41 = vpop.f32.mrb[14].mxu0 }
 0x243   : > { %v2828_v42 = vadd.f32 %v2341_v41, %v834_v25  ;;  %v2512_v57 = vadd.f32 %v2826_v62, %v2493_v4  ;;  %v2343_v22 = vpop.f32.mrb[15].mxu0 }
 0x244   : > { %v2513_v11 = vadd.f32 %v2827_v40, %v2493_v4  ;;  %v2829_v0 = vadd.f32 %v2343_v22, %v836_v8 }
 0x245   : > { %v2518_v10 = vadd.f32 %v2828_v42, %v2498_v44 }
 0x246   : > { %v2812_v24 = vpack.c.bf16 %v2513_v11, %v2512_v57  ;;  %v2519_v14 = vadd.f32 %v2829_v0, %v2498_v44 }
 0x248   : > { %2602 = vst [vmem:[%s3825_s23 + $0x30] sm:$0xff] %v2812_v24  ;;  %v2815_v49 = vpack.c.bf16 %v2519_v14, %v2518_v10  ;;  %v2433_v43 = vpop.f32.mrb[4].mxu0 }
 0x249   : > { %v2830_v47 = vadd.f32 %v2433_v43, %v693_v52  ;;  %v2435_v23 = vpop.f32.mrb[5].mxu0 }
 0x24a   : > { %2605 = vst [vmem:[%s3825_s23 + $0x48] sm:$0xff] %v2815_v49  ;;  %v2831_v26 = vadd.f32 %v2435_v23, %v695_v54  ;;  %v2437_v27 = vpop.f32.mrb[6].mxu0 }
 0x24b   : > { %v2504_v15 = vadd.f32 %v2830_v47, %v2483_v9  ;;  %v2832_v50 = vadd.f32 %v2437_v27, %v697_v37  ;;  %v2439_v16 = vpop.f32.mrb[7].mxu0  ;;  %v2380_v29 = vpop.f32.mrb[8].mxu1 }
 0x24c   : > { %v2505_v53 = vadd.f32 %v2831_v26, %v2483_v9  ;;  %v2833_v55 = vadd.f32 %v2439_v16, %v699_v1  ;;  %v2502_v51 = vadd.f32 %v2483_v9, %v2380_v29  ;;  %v2382_v39 = vpop.f32.mrb[9].mxu1 }
 0x24d   : > { %v2510_v31 = vadd.f32 %v2832_v50, %v2488_v6  ;;  %v2503_v56 = vadd.f32 %v2483_v9, %v2382_v39  ;;  %v2384_v30 = vpop.f32.mrb[10].mxu1 }
 0x24e   : > { %v2808_v60 = vpack.c.bf16 %v2505_v53, %v2504_v15  ;;  %v2511_v28 = vadd.f32 %v2833_v55, %v2488_v6  ;;  %v2508_v32 = vadd.f32 %v2488_v6, %v2384_v30  ;;  %v2386_v61 = vpop.f32.mrb[11].mxu1 }
 0x24f   : > { %v2807_v52 = vpack.c.bf16 %v2503_v56, %v2502_v51  ;;  %v2509_v54 = vadd.f32 %v2488_v6, %v2386_v61 }
 0x250   : > { %2598 = vst [vmem:[%s3825_s23 + $0x10] sm:$0xff] %v2808_v60  ;;  %v2811_v37 = vpack.c.bf16 %v2511_v28, %v2510_v31  ;;  %v2443_v7 = vpop.f32.mrb[8].mxu0 }
 0x251   : > { %2597 = vst [vmem:[%s3825_s23 + $0x8] sm:$0xff] %v2807_v52  ;;  %v2810_v46 = vpack.c.bf16 %v2509_v54, %v2508_v32  ;;  %v2834_v1 = vadd.f32 %v2443_v7, %v3813_v2  ;;  %v2445_v25 = vpop.f32.mrb[9].mxu0 }
 0x252   : > { %2601 = vst [vmem:[%s3825_s23 + $0x28] sm:$0xff] %v2811_v37  ;;  %v2835_v8 = vadd.f32 %v2445_v25, %v3815_v5  ;;  %v2447_v38 = vpop.f32.mrb[10].mxu0 }
 0x253   : > { %2600 = vst [vmem:[%s3825_s23 + $0x20] sm:$0xff] %v2810_v46  ;;  %v2516_v9 = vadd.f32 %v2834_v1, %v2493_v4  ;;  %v2836_v45 = vadd.f32 %v2447_v38, %v3817_v63  ;;  %v2449_v48 = vpop.f32.mrb[11].mxu0  ;;  %v2390_v12 = vpop.f32.mrb[12].mxu1 }
 0x254   : > { %v2517_v59 = vadd.f32 %v2835_v8, %v2493_v4  ;;  %v2837_v6 = vadd.f32 %v2449_v48, %v3819_v20  ;;  %v2514_v13 = vadd.f32 %v2493_v4, %v2390_v12  ;;  %v2392_v2 = vpop.f32.mrb[13].mxu1 }
 0x255   : > { %v2522_v3 = vadd.f32 %v2836_v45, %v2498_v44  ;;  %v2515_v19 = vadd.f32 %v2493_v4, %v2392_v2  ;;  %v2394_v17 = vpop.f32.mrb[14].mxu1 }
 0x256   : > { %v2814_v5 = vpack.c.bf16 %v2517_v59, %v2516_v9  ;;  %v2523_v21 = vadd.f32 %v2837_v6, %v2498_v44  ;;  %v2520_v18 = vadd.f32 %v2498_v44, %v2394_v17  ;;  %v2396_v33 = vpop.f32.mrb[15].mxu1 }
 0x257   : > { %v2813_v34 = vpack.c.bf16 %v2515_v19, %v2514_v13  ;;  %v2521_v63 = vadd.f32 %v2498_v44, %v2396_v33 }
 0x258   : > { %2604 = vst [vmem:[%s3825_s23 + $0x40] sm:$0xff] %v2814_v5  ;;  %v2817_v35 = vpack.c.bf16 %v2523_v21, %v2522_v3 }
 0x259   : > { %2603 = vst [vmem:[%s3825_s23 + $0x38] sm:$0xff] %v2813_v34  ;;  %v2816_v58 = vpack.c.bf16 %v2521_v63, %v2520_v18 }
 0x25a   : > { %2607 = vst [vmem:[%s3825_s23 + $0x58] sm:$0xff] %v2817_v35 }
 0x25b   : > { %2606 = vst [vmem:[%s3825_s23 + $0x50] sm:$0xff] %v2816_v58 }
 0x25c PF: > { %s13_s12 = sadd.s32 1, %s3058_s12  }
 0x25d   : > { %p10_p4 = scmp.ge.s32.totalorder %s13_s12, 10  }
 0x25f   :  { %12 = sbr.rel (!%p10_p4) target bundleno = 1 (0x1), region = 70 }

// kernel: convlstm_forward.5
= control target key start
LH: loop header
LB: loop body
LE: loop exit
PB: predicated region body
PF: predicated region fallthrough
CT: control target
= control target key end

     0   :  { %s8365_s15 = smov 0   ;;  %s11001_s0 = inlined_call_operand.vmem [shape: bf16[8,128,768], index: 0, kind: input, shape index: {}]   ;;  %s11002_s1 = inlined_call_operand.vmem [shape: bf16[9,128,32], index: 1, kind: input, shape index: {}]   ;;  %s11003_s2 = inlined_call_operand.vmem [shape: f32[1,768], index: 2, kind: input, shape index: {}]   ;;  %s11004_s3 = inlined_call_operand.vmem [shape: bf16[8,32,1024], index: 3, kind: output, shape index: {0}]   ;;  %s11005_s4 = inlined_call_operand.vmem [shape: f32[32,768], index: 4, kind: output, shape index: {1}]  }
   0x1 LB: > { %s6442_s16 = sadd.s32 4294967295, %s8328_s15   ;;  %p6446_p0 = scmp.ge.s32.totalorder %s8328_s15, 1  ;;  %s8328_s15 = sphi %s8365_s15, %s15_s15  }
   0x2   : > { %p160_p1 = scmp.lt.s32.totalorder %s8328_s15, 9 }
   0x4   : > { %p161_p2 = pnand %p6446_p0, %p160_p1 }
   0x6   : > { %164 = sbr.rel (%p161_p2) target bundleno = 1370 (0x55a), region = 32 }
   0xd   : > { %p186_p3 = scmp.lt.s32.totalorder %s6442_s16, 7  ;;  %p6450_p4 = scmp.ne.s32.totalorder %s6442_s16, 0 }
   0xe   : > { %v8330_v0 = vmov (!%p6450_p4), 0.0  }
   0xf   : > { %s187_s17 = scalar_select %p186_p3, %s6442_s16, 7 }
  0x10   : > { %200 = sbr.rel (%p6450_p4) target bundleno = 44 (0x2c), region = 36  ;;  %201 = vst [vmem:[#allocation2] sm:$0xff] (!%p6450_p4), %v8330_v0  ;;  %202 = vst [vmem:[#allocation2 + $0x8] sm:$0xff] (!%p6450_p4), %v8330_v0 }
  0x11   : > { %s7842_s18 = smul.u32 384, %s187_s17  ;;  %s6957_s19 = sshll.u32 %s187_s17, 7  ;;  %203 = vst [vmem:[#allocation2 + $0x10] sm:$0xff] (!%p6450_p4), %v8330_v0  ;;  %204 = vst [vmem:[#allocation2 + $0x18] sm:$0xff] (!%p6450_p4), %v8330_v0 }
  0x12   : > { %s8376_s22 = scalar_lea.vmem %s11004_s3, %s6957_s19  ;;  %205 = vst [vmem:[#allocation2 + $0x20] sm:$0xff] (!%p6450_p4), %v8330_v0  ;;  %206 = vst [vmem:[#allocation2 + $0x28] sm:$0xff] (!%p6450_p4), %v8330_v0 }
  0x13   : > { %s8381_s25 = scalar_lea.vmem %s11001_s0, %s7842_s18  ;;  %207 = vst [vmem:[#allocation2 + $0x30] sm:$0xff] (!%p6450_p4), %v8330_v0  ;;  %208 = vst [vmem:[#allocation2 + $0x38] sm:$0xff] (!%p6450_p4), %v8330_v0 }
  0x14   : > { %209 = vst [vmem:[#allocation2 + $0x40] sm:$0xff] (!%p6450_p4), %v8330_v0  ;;  %210 = vst [vmem:[#allocation2 + $0x48] sm:$0xff] (!%p6450_p4), %v8330_v0 }
  0x15   : > { %211 = vst [vmem:[#allocation2 + $0x50] sm:$0xff] (!%p6450_p4), %v8330_v0  ;;  %212 = vst [vmem:[#allocation2 + $0x58] sm:$0xff] (!%p6450_p4), %v8330_v0 }
  0x16   : > { %213 = vst [vmem:[#allocation2 + $0x60] sm:$0xff] (!%p6450_p4), %v8330_v0  ;;  %214 = vst [vmem:[#allocation2 + $0x68] sm:$0xff] (!%p6450_p4), %v8330_v0 }
  0x17   : > { %215 = vst [vmem:[#allocation2 + $0x70] sm:$0xff] %v8330_v0  ;;  %216 = vst [vmem:[#allocation2 + $0x78] sm:$0xff] %v8330_v0 }
  0x18   : > { %217 = vst [vmem:[#allocation2 + $0x80] sm:$0xff] %v8330_v0  ;;  %218 = vst [vmem:[#allocation2 + $0x88] sm:$0xff] %v8330_v0 }
  0x19   : > { %219 = vst [vmem:[#allocation2 + $0x90] sm:$0xff] %v8330_v0  ;;  %220 = vst [vmem:[#allocation2 + $0x98] sm:$0xff] %v8330_v0 }
  0x1a   : > { %221 = vst [vmem:[#allocation2 + $0xa0] sm:$0xff] %v8330_v0  ;;  %222 = vst [vmem:[#allocation2 + $0xa8] sm:$0xff] %v8330_v0 }
  0x1b   : > { %223 = vst [vmem:[#allocation2 + $0xb0] sm:$0xff] %v8330_v0  ;;  %224 = vst [vmem:[#allocation2 + $0xb8] sm:$0xff] %v8330_v0 }
  0x1c   : > { %225 = vst [vmem:[#allocation2 + $0xc0] sm:$0xff] %v8330_v0  ;;  %226 = vst [vmem:[#allocation2 + $0xc8] sm:$0xff] %v8330_v0 }
  0x1d   : > { %227 = vst [vmem:[#allocation2 + $0xd0] sm:$0xff] %v8330_v0  ;;  %228 = vst [vmem:[#allocation2 + $0xd8] sm:$0xff] %v8330_v0 }
  0x1e   : > { %229 = vst [vmem:[#allocation2 + $0xe0] sm:$0xff] %v8330_v0  ;;  %230 = vst [vmem:[#allocation2 + $0xe8] sm:$0xff] %v8330_v0 }
  0x1f   : > { %231 = vst [vmem:[#allocation2 + $0xf0] sm:$0xff] %v8330_v0  ;;  %232 = vst [vmem:[#allocation2 + $0xf8] sm:$0xff] %v8330_v0 }
  0x20   : > { %233 = vst [vmem:[%s11005_s4] sm:$0xff] %v8330_v0  ;;  %234 = vst [vmem:[%s11005_s4 + $0x8] sm:$0xff] %v8330_v0 }
  0x21   : > { %235 = vst [vmem:[%s11005_s4 + $0x10] sm:$0xff] %v8330_v0  ;;  %236 = vst [vmem:[%s11005_s4 + $0x18] sm:$0xff] %v8330_v0 }
  0x22   : > { %237 = vst [vmem:[%s11005_s4 + $0x20] sm:$0xff] %v8330_v0  ;;  %238 = vst [vmem:[%s11005_s4 + $0x28] sm:$0xff] %v8330_v0 }
  0x23   : > { %239 = vst [vmem:[%s11005_s4 + $0x30] sm:$0xff] %v8330_v0  ;;  %240 = vst [vmem:[%s11005_s4 + $0x38] sm:$0xff] %v8330_v0 }
  0x24   : > { %241 = vst [vmem:[%s11005_s4 + $0x40] sm:$0xff] %v8330_v0  ;;  %242 = vst [vmem:[%s11005_s4 + $0x48] sm:$0xff] %v8330_v0 }
  0x25   : > { %243 = vst [vmem:[%s11005_s4 + $0x50] sm:$0xff] %v8330_v0  ;;  %244 = vst [vmem:[%s11005_s4 + $0x58] sm:$0xff] %v8330_v0 }
  0x26   : > { %245 = vst [vmem:[%s11005_s4 + $0x60] sm:$0xff] %v8330_v0  ;;  %246 = vst [vmem:[%s11005_s4 + $0x68] sm:$0xff] %v8330_v0 }
  0x27   : > { %247 = vst [vmem:[%s11005_s4 + $0x70] sm:$0xff] %v8330_v0  ;;  %248 = vst [vmem:[%s11005_s4 + $0x78] sm:$0xff] %v8330_v0 }
  0x28   : > { %249 = vst [vmem:[%s11005_s4 + $0x80] sm:$0xff] %v8330_v0  ;;  %250 = vst [vmem:[%s11005_s4 + $0x88] sm:$0xff] %v8330_v0 }
  0x29   : > { %251 = vst [vmem:[%s11005_s4 + $0x90] sm:$0xff] %v8330_v0  ;;  %252 = vst [vmem:[%s11005_s4 + $0x98] sm:$0xff] %v8330_v0 }
  0x2a   : > { %253 = vst [vmem:[%s11005_s4 + $0xa0] sm:$0xff] %v8330_v0  ;;  %254 = vst [vmem:[%s11005_s4 + $0xa8] sm:$0xff] %v8330_v0 }
  0x2b   : > { %255 = vst [vmem:[%s11005_s4 + $0xb0] sm:$0xff] %v8330_v0  ;;  %256 = vst [vmem:[%s11005_s4 + $0xb8] sm:$0xff] %v8330_v0 }
  0x2c PF: > { %v258_v1 = vld [vmem:[#allocation2 + $0x8] sm:$0xff]  ;;  %s8331_s28 = smov 17   ;;  %s8332_s29 = smov 19   ;;  %v257_v7 = vld [vmem:[#allocation2] sm:$0xff]  ;;  %v275_v10 = vld [vmem:[#allocation2 + $0x90] sm:$0xff]  ;;  %v11011_v16 = vmov 0  }
  0x2d   : > { %v259_v3 = vld [vmem:[#allocation2 + $0x10] sm:$0xff]  ;;  %v274_v12 = vld [vmem:[#allocation2 + $0x88] sm:$0xff]  ;;  %629 = vmatprep.mubr.bf16.mxu1 %v11011_v16  ;;  %1767 = vmatprep.mubr.bf16.mxu0 %v11011_v16  ;;  %v273_v17 = vld [vmem:[#allocation2 + $0x80] sm:$0xff]  ;;  %s8334_s30 = smov 1   ;;  %s8335_s5 = smov 18   ;;  %vm547_vm0 = vcmask 154624  }
  0x2e   : > { %v283_v11 = vld [vmem:[#allocation2 + $0xd0] sm:$0xff]  ;;  %v282_v13 = vld [vmem:[#allocation2 + $0xc8] sm:$0xff]  ;;  %v281_v18 = vld [vmem:[#allocation2 + $0xc0] sm:$0xff]  ;;  %s8336_s6 = smov 127   ;;  %vm1686_vm1 = vcmask 138240   ;;  %s8337_s7 = smov 111  }
  0x2f   : > { %v8473_v14 = vpack.c.bf16 %v283_v11, %v275_v10  ;;  %v8475_v15 = vpack.c.bf16 %v282_v13, %v274_v12  ;;  %v263_v19 = vld [vmem:[#allocation2 + $0x30] sm:$0xff]  ;;  %v262_v21 = vld [vmem:[#allocation2 + $0x28] sm:$0xff]  ;;  %v297_v22 = vpack.c.bf16 %v281_v18, %v273_v17  ;;  %v261_v26 = vld [vmem:[#allocation2 + $0x20] sm:$0xff]  ;;  %vm572_vm2 = vcmask 261120   ;;  %s8338_s18 = smov 110  }
  0x30   : > { %v266_v2 = vld [vmem:[#allocation2 + $0x48] sm:$0xff]  ;;  %v265_v8 = vld [vmem:[#allocation2 + $0x40] sm:$0xff]  ;;  %v279_v32 = vld [vmem:[#allocation2 + $0xb0] sm:$0xff]  ;;  %vm2255_vm3 = vcmask 7168   ;;  %vm1117_vm4 = vcmask 146432   ;;  %vm3342_vm5 = vcmask 1039360  }
  0x31   : > { %v8455_v4 = vpack.c.bf16 %v266_v2, %v258_v1  ;;  %v267_v5 = vld [vmem:[#allocation2 + $0x50] sm:$0xff]  ;;  %v8467_v9 = vpack.c.bf16 %v265_v8, %v257_v7  ;;  %v278_v24 = vld [vmem:[#allocation2 + $0xa8] sm:$0xff]  ;;  %v277_v30 = vld [vmem:[#allocation2 + $0xa0] sm:$0xff]  ;;  %vm3911_vm6 = vcmask 908288   ;;  %vm4480_vm7 = vcmask 900096  }
  0x32   : > { %v8461_v6 = vpack.c.bf16 %v267_v5, %v259_v3  ;;  %v270_v23 = vld [vmem:[#allocation2 + $0x68] sm:$0xff]  ;;  %v269_v29 = vld [vmem:[#allocation2 + $0x60] sm:$0xff]  ;;  %v287_v35 = vld [vmem:[#allocation2 + $0xf0] sm:$0xff]  ;;  %vm5049_vm8 = vcmask 891904  }
  0x33   : > { %1660 = vrot.lane.b32.xlu1 %v8455_v4, %s8331_s28  ;;  %521 = vrot.lane.b32.xlu0 %v8455_v4, %s8332_s29  ;;  %v271_v20 = vld [vmem:[#allocation2 + $0x70] sm:$0xff]  ;;  %v286_v25 = vld [vmem:[#allocation2 + $0xe8] sm:$0xff]  ;;  %v8491_v28 = vpack.c.bf16 %v270_v23, %v262_v21  ;;  %v285_v31 = vld [vmem:[#allocation2 + $0xe0] sm:$0xff]  ;;  %v8499_v34 = vpack.c.bf16 %v269_v29, %v261_v26  ;;  %v8507_v38 = vpack.c.bf16 %v287_v35, %v279_v32 }
  0x34   : > { %v8489_v27 = vpack.c.bf16 %v271_v20, %v263_v19  ;;  %v8497_v33 = vpack.c.bf16 %v286_v25, %v278_v24  ;;  %v260_v36 = vld [vmem:[#allocation2 + $0x18] sm:$0xff]  ;;  %v8505_v37 = vpack.c.bf16 %v285_v31, %v277_v30  ;;  %v8639_v8 = vld [vmem:[%s11002_s1] sm:$0xff]   ;;  %v8669_v19 = vld [vmem:[%s11002_s1 + $0x8] sm:$0xff]  }
  0x35   : > { %v268_v39 = vld [vmem:[#allocation2 + $0x58] sm:$0xff]  ;;  %v8674_v20 = vld [vmem:[%s11002_s1 + $0x88] sm:$0xff]   ;;  %v8704_v31 = vld [vmem:[%s11002_s1 + $0x10] sm:$0xff]  }
  0x36   : > { %v276_v40 = vld [vmem:[#allocation2 + $0x98] sm:$0xff]  ;;  %v8513_v41 = vpack.c.bf16 %v268_v39, %v260_v36  ;;  %v8709_v32 = vld [vmem:[%s11002_s1 + $0x90] sm:$0xff]  }
  0x37   : > { %1662 = vrot.lane.b32.xlu1 %v8461_v6, %s8331_s28  ;;  %523 = vrot.lane.b32.xlu0 %v8461_v6, %s8332_s29  ;;  %v284_v42 = vld [vmem:[#allocation2 + $0xd8] sm:$0xff] }
  0x38   : > { %v8519_v43 = vpack.c.bf16 %v284_v42, %v276_v40  ;;  %v264_v46 = vld [vmem:[#allocation2 + $0x38] sm:$0xff] }
  0x39   : > { %v272_v47 = vld [vmem:[#allocation2 + $0x78] sm:$0xff] }
  0x3a   : > { %v8585_v48 = vpack.c.bf16 %v272_v47, %v264_v46  ;;  %v280_v55 = vld [vmem:[#allocation2 + $0xb8] sm:$0xff] }
  0x3b   : > { %1658 = vrot.lane.b32.xlu1 %v8467_v9, %s8331_s28  ;;  %519 = vrot.lane.b32.xlu0 %v8467_v9, %s8332_s29  ;;  %v288_v56 = vld [vmem:[#allocation2 + $0xf8] sm:$0xff] }
  0x3c   : > { %v8609_v59 = vpack.c.bf16 %v288_v56, %v280_v55  ;;  %v8741_v46 = vld [vmem:[%s11002_s1 + $0x98] sm:$0xff]   ;;  %v8758_v55 = vld [vmem:[%s11002_s1 + $0x20] sm:$0xff]  }
  0x3f   : > { %537 = vrot.lane.b32.xlu1 %v8473_v14, %s8332_s29  ;;  %535 = vrot.lane.b32.xlu0 %v8475_v15, %s8332_s29 }
  0x43   : > { %1676 = vrot.lane.b32.xlu1 %v8473_v14, %s8331_s28  ;;  %1674 = vrot.lane.b32.xlu0 %v8475_v15, %s8331_s28 }
  0x47   : > { %1672 = vrot.lane.b32.xlu1 %v297_v22, %s8331_s28  ;;  %533 = vrot.lane.b32.xlu0 %v297_v22, %s8332_s29 }
  0x4b   : > { %1670 = vrot.lane.b32.xlu1 %v8489_v27, %s8331_s28  ;;  %1668 = vrot.lane.b32.xlu0 %v8491_v28, %s8331_s28 }
  0x4f   : > { %1682 = vrot.lane.b32.xlu1 %v8497_v33, %s8331_s28  ;;  %1666 = vrot.lane.b32.xlu0 %v8499_v34, %s8331_s28 }
  0x53   : > { %1680 = vrot.lane.b32.xlu1 %v8505_v37, %s8331_s28  ;;  %1684 = vrot.lane.b32.xlu0 %v8507_v38, %s8331_s28 }
  0x57   : > { %527 = vrot.lane.b32.xlu1 %v8499_v34, %s8332_s29  ;;  %525 = vrot.lane.b32.xlu0 %v8513_v41, %s8332_s29 }
  0x5b   : > { %541 = vrot.lane.b32.xlu1 %v8505_v37, %s8332_s29  ;;  %539 = vrot.lane.b32.xlu0 %v8519_v43, %s8332_s29 }
  0x5f   : > { %2229 = vrot.lane.b32.xlu0 %v8455_v4, %s8334_s30  ;;  %2231 = vrot.lane.b32.xlu1 %v8461_v6, %s8334_s30 }
  0x63   : > { %2227 = vrot.lane.b32.xlu0 %v8467_v9, %s8334_s30  ;;  %2243 = vrot.lane.b32.xlu1 %v8475_v15, %s8334_s30 }
  0x67   : > { %2245 = vrot.lane.b32.xlu0 %v8473_v14, %s8334_s30  ;;  %2241 = vrot.lane.b32.xlu1 %v297_v22, %s8334_s30 }
  0x6b   : > { %529 = vrot.lane.b32.xlu0 %v8491_v28, %s8332_s29  ;;  %531 = vrot.lane.b32.xlu1 %v8489_v27, %s8332_s29 }
  0x6f   : > { %543 = vrot.lane.b32.xlu0 %v8497_v33, %s8332_s29  ;;  %545 = vrot.lane.b32.xlu1 %v8507_v38, %s8332_s29 }
  0x73   : > { %2237 = vrot.lane.b32.xlu0 %v8491_v28, %s8334_s30  ;;  %2239 = vrot.lane.b32.xlu1 %v8489_v27, %s8334_s30 }
  0x77   : > { %2235 = vrot.lane.b32.xlu0 %v8499_v34, %s8334_s30  ;;  %2251 = vrot.lane.b32.xlu1 %v8497_v33, %s8334_s30 }
  0x7b   : > { %2253 = vrot.lane.b32.xlu0 %v8507_v38, %s8334_s30  ;;  %2249 = vrot.lane.b32.xlu1 %v8505_v37, %s8334_s30 }
  0x7f   : > { %1091 = vrot.lane.b32.xlu0 %v8455_v4, %s8335_s5  ;;  %1093 = vrot.lane.b32.xlu1 %v8461_v6, %s8335_s5 }
  0x83   : > { %1089 = vrot.lane.b32.xlu0 %v8467_v9, %s8335_s5  ;;  %1105 = vrot.lane.b32.xlu1 %v8475_v15, %s8335_s5  ;;  %v8644_v9 = vld [vmem:[%s11002_s1 + $0x80] sm:$0xff]  }
  0x87   : > { %1107 = vrot.lane.b32.xlu0 %v8473_v14, %s8335_s5  ;;  %1103 = vrot.lane.b32.xlu1 %v297_v22, %s8335_s5 }
  0x8b   : > { %1095 = vrot.lane.b32.xlu0 %v8513_v41, %s8335_s5  ;;  %1097 = vrot.lane.b32.xlu1 %v8499_v34, %s8335_s5 }
  0x8f   : > { %1109 = vrot.lane.b32.xlu0 %v8519_v43, %s8335_s5  ;;  %1111 = vrot.lane.b32.xlu1 %v8505_v37, %s8335_s5 }
  0x93   : > { %1099 = vrot.lane.b32.xlu0 %v8491_v28, %s8335_s5  ;;  %1101 = vrot.lane.b32.xlu1 %v8489_v27, %s8335_s5 }
  0x97   : > { %1113 = vrot.lane.b32.xlu0 %v8497_v33, %s8335_s5  ;;  %1115 = vrot.lane.b32.xlu1 %v8507_v38, %s8335_s5 }
  0x9b   : > { %3316 = vrot.lane.b32.xlu0 %v8461_v6, %s8336_s6  ;;  %3318 = vrot.lane.b32.xlu1 %v8513_v41, %s8336_s6 }
  0x9f   : > { %3314 = vrot.lane.b32.xlu0 %v8455_v4, %s8336_s6  ;;  %3330 = vrot.lane.b32.xlu1 %v8473_v14, %s8336_s6 }
  0xa3   : > { %3332 = vrot.lane.b32.xlu0 %v8519_v43, %s8336_s6  ;;  %3328 = vrot.lane.b32.xlu1 %v8475_v15, %s8336_s6 }
  0xa5   : > { %v1661_v44 = vpop.permute.xlu1 %1660  ;;  %v522_v45 = vpop.permute.xlu0 %521 }
  0xa7   : > { %1664 = vrot.lane.b32.xlu0 %v8513_v41, %s8331_s28  ;;  %3324 = vrot.lane.b32.xlu1 %v8489_v27, %s8336_s6 }
  0xa9   : > { %v8587_v49 = vpop.permute.xlu1 %1662  ;;  %v8589_v50 = vpop.permute.xlu0 %523 }
  0xaa   : > { %v549_v51 = vsel %vm547_vm0, %v522_v45, %v8589_v50  ;;  %v8595_v52 = vsel %vm1686_vm1, %v1661_v44, %v8587_v49 }
  0xab   : > { %597 = vmatprep.subr.bf16.mxu1 %v549_v51  ;;  %1735 = vmatprep.subr.bf16.mxu0 %v8595_v52 }
  0xac   : > { %3326 = vrot.lane.b32.xlu0 %v8585_v48, %s8336_s6  ;;  %3322 = vrot.lane.b32.xlu1 %v8491_v28, %s8336_s6 }
  0xad   : > { %v1659_v53 = vpop.permute.xlu1 %1658  ;;  %v520_v54 = vpop.permute.xlu0 %519 }
  0xae   : > { %v8603_v57 = vsel %vm1686_vm1, %v1659_v53, %v1661_v44  ;;  %v548_v58 = vsel %vm547_vm0, %v520_v54, %v522_v45  ;;  %v8736_v45 = vld [vmem:[%s11002_s1 + $0x18] sm:$0xff]  }
  0xaf   : > { %1736 = vmatpush1.bf16.msra.mxu0 %v8603_v57  ;;  %598 = vmatpush1.bf16.msra.mxu1 %v548_v58 }
  0xb0   : > { %1678 = vrot.lane.b32.xlu0 %v8519_v43, %s8331_s28  ;;  %3338 = vrot.lane.b32.xlu1 %v8507_v38, %s8336_s6 }
  0xb1   : > { %v8613_v60 = vpop.permute.xlu1 %537  ;;  %v536_v61 = vpop.permute.xlu0 %535 }
  0xb2   : > { %v555_v62 = vsel %vm547_vm0, %v536_v61, %v8613_v60 }
  0xb3   : > { %599 = vmatprep.subr.bf16.mxu1 %v555_v62 }
  0xb4   : > { %3340 = vrot.lane.b32.xlu0 %v8609_v59, %s8336_s6  ;;  %3336 = vrot.lane.b32.xlu1 %v8497_v33, %s8336_s6 }
  0xb5   : > { %v8621_v63 = vpop.permute.xlu1 %1676  ;;  %v1675_v0 = vpop.permute.xlu0 %1674 }
  0xb6   : > { %v8625_v1 = vsel %vm1686_vm1, %v1675_v0, %v8621_v63 }
  0xb7   : > { %1737 = vmatprep.subr.bf16.mxu0 %v8625_v1 }
  0xb8   : > { %2233 = vrot.lane.b32.xlu0 %v8513_v41, %s8334_s30  ;;  %3885 = vrot.lane.b32.xlu1 %v8461_v6, %s8337_s7 }
  0xb9   : > { %v1673_v2 = vpop.permute.xlu1 %1672  ;;  %v534_v3 = vpop.permute.xlu0 %533 }
  0xba   : > { %v554_v5 = vsel %vm547_vm0, %v534_v3, %v536_v61  ;;  %v8634_v7 = vsel %vm1686_vm1, %v1673_v2, %v1675_v0 }
  0xbb   : > { %600 = vmatpush1.bf16.msra.mxu1 %v554_v5  ;;  %1738 = vmatpush1.bf16.msra.mxu0 %v8634_v7  ;;  %v8774_v5 = vld [vmem:[%s11002_s1 + $0x28] sm:$0xff]  }
  0xbc   : > { %3887 = vrot.lane.b32.xlu0 %v8513_v41, %s8337_s7  ;;  %3883 = vrot.lane.b32.xlu1 %v8455_v4, %s8337_s7 }
  0xbd   : > { %v1671_v10 = vpop.permute.xlu1 %1670  ;;  %v1669_v11 = vpop.permute.xlu0 %1668 }
  0xbe   : > { %6459 = vmatmul.mubr.msk.bf16.vlgmr.msra.gmra.mrb[0].mxu1 %vm572_vm2, %v8639_v8  ;;  %6555 = vmatmul.mubr.msk.bf16.vlgmr.msra.gmra.mrb[0].mxu0 %vm572_vm2, %v8644_v9  ;;  %v1692_v12 = vsel %vm1686_vm1, %v1669_v11, %v1671_v10 }
  0xbf   : > { %1961 = vmatprep.subr.bf16.mxu0 %v1692_v12  ;;  %639 = vmatprep.mubr.bf16.mxu1 %v11011_v16 }
  0xc0   : > { %2247 = vrot.lane.b32.xlu0 %v8519_v43, %s8334_s30  ;;  %1777 = vmatprep.mubr.bf16.mxu0 %v11011_v16 }
  0xc1   : > { %v1683_v13 = vpop.permute.xlu1 %1682  ;;  %v8660_v17 = vpop.permute.xlu0 %1666  ;;  %3899 = vrot.lane.b32.xlu1 %v8473_v14, %s8337_s7 }
  0xc2   : > { %v1691_v18 = vsel %vm1686_vm1, %v8660_v17, %v1669_v11 }
  0xc3   : > { %1962 = vmatpush1.bf16.msra.mxu0 %v1691_v18  ;;  %v8800_v18 = vld [vmem:[%s11002_s1 + $0x38] sm:$0xff]  }
  0xc4   : > { %3901 = vrot.lane.b32.xlu0 %v8519_v43, %s8337_s7 }
  0xc5   : > { %v8678_v21 = vpop.permute.xlu1 %1680  ;;  %v1685_v22 = vpop.permute.xlu0 %1684  ;;  %3897 = vrot.lane.b32.xlu1 %v8475_v15, %s8337_s7 }
  0xc6   : > { %v1697_v23 = vsel %vm1686_vm1, %v8678_v21, %v1683_v13  ;;  %6460 = vmatmul.mubr.msk.bf16.gmra.mrb[4].mxu1 %vm572_vm2, %v8669_v19  ;;  %6556 = vmatmul.mubr.msk.bf16.gmra.mrb[4].mxu0 %vm572_vm2, %v8674_v20  ;;  %v1698_v24 = vsel %vm1686_vm1, %v1683_v13, %v1685_v22  ;;  %v8789_v13 = vld [vmem:[%s11002_s1 + $0x30] sm:$0xff]  }
  0xc7   : > { %1963 = vmatprep.subr.bf16.mxu0 %v1698_v24  ;;  %649 = vmatprep.mubr.bf16.mxu1 %v11011_v16 }
  0xc8   : > { %1964 = vmatpush1.bf16.msra.mxu0 %v1697_v23  ;;  %1787 = vmatprep.mubr.bf16.mxu0 %v11011_v16 }
  0xc9   : > { %v8691_v25 = vpop.permute.xlu1 %527  ;;  %v526_v26 = vpop.permute.xlu0 %525  ;;  %3893 = vrot.lane.b32.xlu0 %v8489_v27, %s8337_s7  ;;  %3895 = vrot.lane.b32.xlu1 %v8585_v48, %s8337_s7 }
  0xca   : > { %v550_v29 = vsel %vm547_vm0, %v8589_v50, %v526_v26  ;;  %v551_v30 = vsel %vm547_vm0, %v526_v26, %v8691_v25  ;;  %v8813_v26 = vld [vmem:[%s11002_s1 + $0xa0] sm:$0xff]  }
  0xcb   : > { %710 = vmatprep.subr.bf16.mxu1 %v551_v30 }
  0xcc   : > { %711 = vmatpush1.bf16.msra.mxu1 %v550_v29 }
  0xcd   : > { %v8711_v35 = vpop.permute.xlu1 %541  ;;  %v540_v36 = vpop.permute.xlu0 %539  ;;  %3891 = vrot.lane.b32.xlu0 %v8491_v28, %s8337_s7  ;;  %3907 = vrot.lane.b32.xlu1 %v8507_v38, %s8337_s7 }
  0xce   : > { %v556_v39 = vsel %vm547_vm0, %v8613_v60, %v540_v36  ;;  %6461 = vmatmul.mubr.msk.bf16.gmra.mrb[8].mxu1 %vm572_vm2, %v8704_v31  ;;  %6557 = vmatmul.mubr.msk.bf16.gmra.mrb[8].mxu0 %vm572_vm2, %v8709_v32  ;;  %v557_v40 = vsel %vm547_vm0, %v540_v36, %v8711_v35 }
  0xcf   : > { %712 = vmatprep.subr.bf16.mxu1 %v557_v40  ;;  %659 = vmatprep.mubr.bf16.mxu1 %v11011_v16 }
  0xd0   : > { %713 = vmatpush1.bf16.msra.mxu1 %v556_v39  ;;  %1797 = vmatprep.mubr.bf16.mxu0 %v11011_v16 }
  0xd1   : > { %v2230_v42 = vpop.permute.xlu0 %2229  ;;  %v8727_v44 = vpop.permute.xlu1 %2231  ;;  %3909 = vrot.lane.b32.xlu0 %v8609_v59, %s8337_s7  ;;  %3905 = vrot.lane.b32.xlu1 %v8497_v33, %s8337_s7 }
  0xd2   : > { %v2257_v47 = vsel %vm2255_vm3, %v2230_v42, %v8727_v44 }
  0xd3   : > { %2304 = vmatprep.subr.bf16.mxu0 %v2257_v47  ;;  %v8838_v47 = vld [vmem:[%s11002_s1 + $0xa8] sm:$0xff]  }
  0xd5   : > { %v2228_v50 = vpop.permute.xlu0 %2227  ;;  %v2244_v51 = vpop.permute.xlu1 %2243  ;;  %3320 = vrot.lane.b32.xlu0 %v8499_v34, %s8336_s6  ;;  %4454 = vrot.lane.b32.xlu1 %v8461_v6, %s8338_s18 }
  0xd6   : > { %6462 = vmatmul.mubr.msk.bf16.gmra.mrb[12].mxu1 %vm572_vm2, %v8736_v45  ;;  %6558 = vmatmul.mubr.msk.bf16.gmra.mrb[12].mxu0 %vm572_vm2, %v8741_v46  ;;  %v2256_v56 = vsel %vm2255_vm3, %v2228_v50, %v2230_v42  ;;  %v8864_v50 = vld [vmem:[%s11002_s1 + $0xb8] sm:$0xff]  }
  0xd7   : > { %669 = vmatprep.mubr.bf16.mxu1 %v11011_v16  ;;  %1993 = vmatprep.mubr.bf16.mxu0 %v11011_v16 }
  0xd9   : > { %v8753_v53 = vpop.permute.xlu0 %2245  ;;  %v2242_v54 = vpop.permute.xlu1 %2241  ;;  %4456 = vrot.lane.b32.xlu0 %v8513_v41, %s8338_s18  ;;  %4452 = vrot.lane.b32.xlu1 %v8455_v4, %s8338_s18 }
  0xda   : > { %v2263_v62 = vsel %vm2255_vm3, %v2244_v51, %v8753_v53  ;;  %v2262_v2 = vsel %vm2255_vm3, %v2242_v54, %v2244_v51  ;;  %v8883_v51 = vld [vmem:[%s11002_s1 + $0xc0] sm:$0xff]  }
  0xdd   : > { %v530_v58 = vpop.permute.xlu0 %529  ;;  %v532_v60 = vpop.permute.xlu1 %531  ;;  %3334 = vrot.lane.b32.xlu0 %v8505_v37, %s8336_s6  ;;  %4468 = vrot.lane.b32.xlu1 %v8473_v14, %s8338_s18 }
  0xde   : > { %6463 = vmatmul.mubr.msk.bf16.gmra.mrb[16].mxu1 %vm572_vm2, %v8758_v55  ;;  %6571 = vmatmul.mubr.msk.bf16.vlgmr.msra.gmra.mrb[16].mxu0 %vm572_vm2, %v8644_v9  ;;  %v553_v61 = vsel %vm547_vm0, %v530_v58, %v532_v60  ;;  %v552_v36 = vsel %vm547_vm0, %v8691_v25, %v530_v58  ;;  %v8908_v60 = vld [vmem:[%s11002_s1 + $0xc8] sm:$0xff]  }
  0xdf   : > { %679 = vmatprep.mubr.bf16.mxu1 %v11011_v16  ;;  %2003 = vmatprep.mubr.bf16.mxu0 %v11011_v16 }
  0xe0   : > { %2305 = vmatpush1.bf16.msra.mxu0 %v2256_v56  ;;  %823 = vmatprep.subr.bf16.mxu1 %v553_v61  ;;  %v8928_v61 = vld [vmem:[%s11002_s1 + $0xd0] sm:$0xff]  }
  0xe1   : > { %v544_v0 = vpop.permute.xlu0 %543  ;;  %v546_v3 = vpop.permute.xlu1 %545  ;;  %2306 = vmatprep.subr.bf16.mxu0 %v2263_v62  ;;  %4470 = vrot.lane.b32.xlu0 %v8519_v43, %s8338_s18  ;;  %v8943_v62 = vld [vmem:[%s11002_s1 + $0xd8] sm:$0xff]  }
  0xe2   : > { %v559_v30 = vsel %vm547_vm0, %v544_v0, %v546_v3  ;;  %v558_v42 = vsel %vm547_vm0, %v8711_v35, %v544_v0  ;;  %v8849_v35 = vld [vmem:[%s11002_s1 + $0xb0] sm:$0xff]   ;;  %4466 = vrot.lane.b32.xlu1 %v8475_v15, %s8338_s18  ;;  %v8954_v3 = vld [vmem:[%s11002_s1 + $0xe0] sm:$0xff]  }
  0xe3   : > { %11013 = vst [vmem:[#allocation3_spill] sm:$0xff] %v8954_v3 }
  0xe4   : > { %2307 = vmatpush1.bf16.msra.mxu0 %v2262_v2 }
  0xe5   : > { %v8776_v10 = vpop.permute.xlu0 %2237  ;;  %v2240_v11 = vpop.permute.xlu1 %2239  ;;  %3889 = vrot.lane.b32.xlu0 %v8499_v34, %s8337_s7 }
  0xe6   : > { %6464 = vmatmul.mubr.msk.bf16.gmra.mrb[20].mxu1 %vm572_vm2, %v8774_v5  ;;  %6572 = vmatmul.mubr.msk.bf16.gmra.mrb[20].mxu0 %vm572_vm2, %v8674_v20  ;;  %v2261_v12 = vsel %vm2255_vm3, %v8776_v10, %v2240_v11 }
  0xe7   : > { %689 = vmatprep.mubr.bf16.mxu1 %v11011_v16  ;;  %2013 = vmatprep.mubr.bf16.mxu0 %v11011_v16 }
  0xe8   : > { %2530 = vmatprep.subr.bf16.mxu0 %v2261_v12  ;;  %4462 = vrot.lane.b32.xlu1 %v8489_v27, %s8338_s18 }
  0xe9   : > { %v8802_v22 = vpop.permute.xlu0 %2235  ;;  %v2252_v23 = vpop.permute.xlu1 %2251  ;;  %4464 = vrot.lane.b32.xlu0 %v8585_v48, %s8338_s18 }
  0xea   : > { %v2260_v54 = vsel %vm2255_vm3, %v8802_v22, %v8776_v10 }
  0xec   : > { %4460 = vrot.lane.b32.xlu1 %v8491_v28, %s8338_s18 }
  0xed   : > { %v2254_v24 = vpop.permute.xlu0 %2253  ;;  %v8815_v29 = vpop.permute.xlu1 %2249  ;;  %3903 = vrot.lane.b32.xlu0 %v8505_v37, %s8337_s7  ;;  %s8339_s7 = smov 109  }
  0xee   : > { %6465 = vmatmul.mubr.msk.bf16.gmra.mrb[24].mxu1 %vm572_vm2, %v8789_v13  ;;  %6573 = vmatmul.mubr.msk.bf16.gmra.mrb[24].mxu0 %vm572_vm2, %v8709_v32  ;;  %v2267_v56 = vsel %vm2255_vm3, %v2252_v23, %v2254_v24  ;;  %v2266_v58 = vsel %vm2255_vm3, %v8815_v29, %v2252_v23 }
  0xef   : > { %699 = vmatprep.mubr.bf16.mxu1 %v11011_v16  ;;  %2023 = vmatprep.mubr.bf16.mxu0 %v11011_v16 }
  0xf0   : > { %4476 = vrot.lane.b32.xlu1 %v8507_v38, %s8338_s18 }
  0xf1   : > { %v8825_v39 = vpop.permute.xlu0 %1091  ;;  %v8828_v40 = vpop.permute.xlu1 %1093  ;;  %4478 = vrot.lane.b32.xlu0 %v8609_v59, %s8338_s18 }
  0xf2   : > { %v1119_v25 = vsel %vm1117_vm4, %v8825_v39, %v8828_v40 }
  0xf4   : > { %4474 = vrot.lane.b32.xlu1 %v8497_v33, %s8338_s18 }
  0xf5   : > { %4458 = vrot.lane.b32.xlu0 %v8499_v34, %s8338_s18  ;;  %v1090_v0 = vpop.permute.xlu0 %1089  ;;  %v1106_v2 = vpop.permute.xlu1 %1105 }
  0xf6   : > { %6466 = vmatmul.mubr.msk.bf16.gmra.mrb[28].mxu1 %vm572_vm2, %v8800_v18  ;;  %6574 = vmatmul.mubr.msk.bf16.gmra.mrb[28].mxu0 %vm572_vm2, %v8741_v46  ;;  %v1118_v12 = vsel %vm1117_vm4, %v1090_v0, %v8825_v39  ;;  %v9079_v0 = vld [vmem:[%s11002_s1 + $0x58] sm:$0xff]  }
  0xf7   : > { %742 = vmatprep.mubr.bf16.mxu1 %v11011_v16  ;;  %2033 = vmatprep.mubr.bf16.mxu0 %v11011_v16 }
  0xf8   : > { %5023 = vrot.lane.b32.xlu1 %v8461_v6, %s8339_s7 }
  0xf9   : > { %v8956_v10 = vpop.permute.xlu0 %1107  ;;  %v1104_v11 = vpop.permute.xlu1 %1103  ;;  %5025 = vrot.lane.b32.xlu0 %v8513_v41, %s8339_s7 }
  0xfa   : > { %v1125_v23 = vsel %vm1117_vm4, %v1106_v2, %v8956_v10 }
  0xfc   : > { %5021 = vrot.lane.b32.xlu1 %v8455_v4, %s8339_s7 }
  0xfd   : > { %v8968_v24 = vpop.permute.xlu1 %1097  ;;  %4472 = vrot.lane.b32.xlu0 %v8505_v37, %s8338_s18 }
  0xfe   : > { %6467 = vmatmul.mubr.msk.bf16.vlgmr.msra.gmra.mrb[32].mxu1 %vm572_vm2, %v8639_v8  ;;  %6575 = vmatmul.mubr.msk.bf16.gmra.mrb[32].mxu0 %vm572_vm2, %v8813_v26 }
  0xff   : > { %824 = vmatpush1.bf16.msra.mxu1 %v552_v36  ;;  %752 = vmatprep.mubr.bf16.mxu1 %v11011_v16  ;;  %v1124_v36 = vsel %vm1117_vm4, %v1104_v11, %v1106_v2  ;;  %v9090_v2 = vld [vmem:[%s11002_s1 + $0x60] sm:$0xff]  }
 0x100   : > { %825 = vmatprep.subr.bf16.mxu1 %v559_v30  ;;  %2043 = vmatprep.mubr.bf16.mxu0 %v11011_v16  ;;  %v1096_v30 = vpop.permute.xlu0 %1095 }
 0x101   : > { %v1121_v39 = vsel %vm1117_vm4, %v1096_v30, %v8968_v24  ;;  %5039 = vrot.lane.b32.xlu0 %v8519_v43, %s8339_s7  ;;  %5037 = vrot.lane.b32.xlu1 %v8473_v14, %s8339_s7 }
 0x103   : > { %826 = vmatpush1.bf16.msra.mxu1 %v558_v42 }
 0x104   : > { %1166 = vmatprep.subr.bf16.mxu1 %v1119_v25  ;;  %v8987_v25 = vld [vmem:[%s11002_s1 + $0xf0] sm:$0xff]  }
 0x105   : > { %11015 = vst [vmem:[#allocation5_spill] sm:$0xff] %v8987_v25  ;;  %5027 = vrot.lane.b32.xlu0 %v8499_v34, %s8339_s7  ;;  %5035 = vrot.lane.b32.xlu1 %v8475_v15, %s8339_s7 }
 0x106   : > { %6468 = vmatmul.mubr.msk.bf16.gmra.mrb[36].mxu1 %vm572_vm2, %v8669_v19  ;;  %6576 = vmatmul.mubr.msk.bf16.gmra.mrb[36].mxu0 %vm572_vm2, %v8838_v47 }
 0x107   : > { %762 = vmatprep.mubr.bf16.mxu1 %v11011_v16  ;;  %2053 = vmatprep.mubr.bf16.mxu0 %v11011_v16 }
 0x109   : > { %5031 = vrot.lane.b32.xlu0 %v8489_v27, %s8339_s7  ;;  %5029 = vrot.lane.b32.xlu1 %v8491_v28, %s8339_s7 }
 0x10d   : > { %5041 = vrot.lane.b32.xlu0 %v8505_v37, %s8339_s7  ;;  %5033 = vrot.lane.b32.xlu1 %v8585_v48, %s8339_s7 }
 0x10e   : > { %6469 = vmatmul.mubr.msk.bf16.gmra.mrb[40].mxu1 %vm572_vm2, %v8704_v31  ;;  %6577 = vmatmul.mubr.msk.bf16.gmra.mrb[40].mxu0 %vm572_vm2, %v8849_v35 }
 0x10f   : > { %772 = vmatprep.mubr.bf16.mxu1 %v11011_v16  ;;  %2063 = vmatprep.mubr.bf16.mxu0 %v11011_v16 }
 0x111   : > { %5045 = vrot.lane.b32.xlu0 %v8507_v38, %s8339_s7  ;;  %5043 = vrot.lane.b32.xlu1 %v8497_v33, %s8339_s7 }
 0x115   : > { %5047 = vrot.lane.b32.xlu1 %v8609_v59, %s8339_s7 }
 0x116   : > { %6470 = vmatmul.mubr.msk.bf16.gmra.mrb[44].mxu1 %vm572_vm2, %v8736_v45  ;;  %6578 = vmatmul.mubr.msk.bf16.gmra.mrb[44].mxu0 %vm572_vm2, %v8864_v50 }
 0x117   : > { %782 = vmatprep.mubr.bf16.mxu1 %v11011_v16  ;;  %2336 = vmatprep.mubr.bf16.mxu0 %v11011_v16 }
 0x11e   : > { %6471 = vmatmul.mubr.msk.bf16.gmra.mrb[48].mxu1 %vm572_vm2, %v8758_v55  ;;  %6603 = vmatmul.mubr.msk.bf16.vlgmr.msra.gmra.mrb[0].mxu0 %vm572_vm2, %v8883_v51 }
 0x11f   : > { %792 = vmatprep.mubr.bf16.mxu1 %v11011_v16  ;;  %2346 = vmatprep.mubr.bf16.mxu0 %v11011_v16 }
 0x120   : > { %2531 = vmatpush1.bf16.msra.mxu0 %v2260_v54 }
 0x121   : > { %2532 = vmatprep.subr.bf16.mxu0 %v2267_v56 }
 0x124   : > { %2533 = vmatpush1.bf16.msra.mxu0 %v2266_v58  ;;  %v9068_v58 = vld [vmem:[%s11002_s1 + $0x50] sm:$0xff]  }
 0x125   : > { %2820 = vmatprep.subr.bf16.mxu0 %v8461_v6 }
 0x126   : > { %6472 = vmatmul.mubr.msk.bf16.gmra.mrb[52].mxu1 %vm572_vm2, %v8774_v5  ;;  %6604 = vmatmul.mubr.msk.bf16.gmra.mrb[4].mxu0 %vm572_vm2, %v8908_v60 }
 0x127   : > { %802 = vmatprep.mubr.bf16.mxu1 %v11011_v16  ;;  %2356 = vmatprep.mubr.bf16.mxu0 %v11011_v16 }
 0x12e   : > { %6473 = vmatmul.mubr.msk.bf16.gmra.mrb[56].mxu1 %vm572_vm2, %v8789_v13  ;;  %6605 = vmatmul.mubr.msk.bf16.gmra.mrb[8].mxu0 %vm572_vm2, %v8928_v61 }
 0x12f   : > { %812 = vmatprep.mubr.bf16.mxu1 %v11011_v16  ;;  %2366 = vmatprep.mubr.bf16.mxu0 %v11011_v16 }
 0x136   : > { %6474 = vmatmul.mubr.msk.bf16.gmra.mrb[60].mxu1 %vm572_vm2, %v8800_v18  ;;  %6606 = vmatmul.mubr.msk.bf16.gmra.mrb[12].mxu0 %vm572_vm2, %v8943_v62 }
 0x137   : > { %855 = vmatprep.mubr.bf16.mxu1 %v11011_v16  ;;  %2376 = vmatprep.mubr.bf16.mxu0 %v11011_v16 }
 0x13e   : > { %6475 = vmatmul.mubr.msk.bf16.vlgmr.msra.gmra.mrb[64].mxu1 %vm572_vm2, %v8639_v8  ;;  %6607 = vmatmul.mubr.msk.bf16.gmra.mrb[48].mxu0 %vm572_vm2, %v8954_v3  ;;  %v8974_v8 = vld [vmem:[%s11002_s1 + $0xe8] sm:$0xff]  }
 0x13f   : > { %865 = vmatprep.mubr.bf16.mxu1 %v11011_v16  ;;  %2386 = vmatprep.mubr.bf16.mxu0 %v11011_v16  ;;  %11014 = vst [vmem:[#allocation4_spill] sm:$0xff] %v8974_v8 }
 0x140   : > { %1167 = vmatpush1.bf16.msra.mxu1 %v1118_v12 }
 0x141   : > { %1168 = vmatprep.subr.bf16.mxu1 %v1125_v23 }
 0x144   : > { %1169 = vmatpush1.bf16.msra.mxu1 %v1124_v36  ;;  %v9110_v36 = vld [vmem:[%s11002_s1 + $0x68] sm:$0xff]  }
 0x145   : > { %1279 = vmatprep.subr.bf16.mxu1 %v1121_v39  ;;  %v9115_v39 = vld [vmem:[%s11002_s1 + $0x108] sm:$0xff]  }
 0x146   : > { %6476 = vmatmul.mubr.msk.bf16.gmra.mrb[68].mxu1 %vm572_vm2, %v8669_v19  ;;  %6608 = vmatmul.mubr.msk.bf16.gmra.mrb[52].mxu0 %vm572_vm2, %v8974_v8  ;;  %v8998_v19 = vld [vmem:[%s11002_s1 + $0xf8] sm:$0xff]  }
 0x147   : > { %875 = vmatprep.mubr.bf16.mxu1 %v11011_v16  ;;  %2396 = vmatprep.mubr.bf16.mxu0 %v11011_v16  ;;  %11016 = vst [vmem:[#allocation6_spill] sm:$0xff] %v8998_v19 }
 0x14e   : > { %6477 = vmatmul.mubr.msk.bf16.gmra.mrb[72].mxu1 %vm572_vm2, %v8704_v31  ;;  %6609 = vmatmul.mubr.msk.bf16.gmra.mrb[56].mxu0 %vm572_vm2, %v8987_v25  ;;  %v1110_v31 = vpop.permute.xlu0 %1109 }
 0x14f   : > { %885 = vmatprep.mubr.bf16.mxu1 %v11011_v16  ;;  %2406 = vmatprep.mubr.bf16.mxu0 %v11011_v16  ;;  %v1126_v56 = vsel %vm1117_vm4, %v8956_v10, %v1110_v31  ;;  %v9095_v10 = vld [vmem:[%s11002_s1 + $0x100] sm:$0xff]  }
 0x152   : > { %v1100_v42 = vpop.permute.xlu0 %1099 }
 0x156   : > { %6478 = vmatmul.mubr.msk.bf16.gmra.mrb[76].mxu1 %vm572_vm2, %v8736_v45  ;;  %6610 = vmatmul.mubr.msk.bf16.gmra.mrb[60].mxu0 %vm572_vm2, %v8998_v19  ;;  %v9037_v45 = vld [vmem:[%s11002_s1 + $0x40] sm:$0xff]   ;;  %v1114_v11 = vpop.permute.xlu0 %1113 }
 0x157   : > { %895 = vmatprep.mubr.bf16.mxu1 %v11011_v16  ;;  %2562 = vmatprep.mubr.bf16.mxu0 %v11011_v16 }
 0x15a   : > { %v3317_v23 = vpop.permute.xlu0 %3316 }
 0x15e   : > { %6479 = vmatmul.mubr.msk.bf16.gmra.mrb[80].mxu1 %vm572_vm2, %v8758_v55  ;;  %6619 = vmatmul.mubr.msk.bf16.vlgmr.msra.gmra.mrb[16].mxu0 %vm572_vm2, %v8883_v51  ;;  %v9039_v55 = vpop.permute.xlu1 %1111 }
 0x15f   : > { %905 = vmatprep.mubr.bf16.mxu1 %v11011_v16  ;;  %2572 = vmatprep.mubr.bf16.mxu0 %v11011_v16 }
 0x160   : > { %2821 = vmatpush1.bf16.msra.mxu0 %v8455_v4  ;;  %v9290_v4 = vld [vmem:[%s11002_s1 + $0x140] sm:$0xff]  }
 0x161   : > { %2822 = vmatprep.subr.bf16.mxu0 %v8473_v14 }
 0x164   : > { %2823 = vmatpush1.bf16.msra.mxu0 %v8475_v15 }
 0x165   : > { %3046 = vmatprep.subr.bf16.mxu0 %v8489_v27 }
 0x166   : > { %6480 = vmatmul.mubr.msk.bf16.gmra.mrb[84].mxu1 %vm572_vm2, %v8774_v5  ;;  %6620 = vmatmul.mubr.msk.bf16.gmra.mrb[20].mxu0 %vm572_vm2, %v8908_v60  ;;  %v1127_v5 = vsel %vm1117_vm4, %v1110_v31, %v9039_v55 }
 0x167   : > { %915 = vmatprep.mubr.bf16.mxu1 %v11011_v16  ;;  %2582 = vmatprep.mubr.bf16.mxu0 %v11011_v16 }
 0x16e   : > { %6481 = vmatmul.mubr.msk.bf16.gmra.mrb[88].mxu1 %vm572_vm2, %v8789_v13  ;;  %6621 = vmatmul.mubr.msk.bf16.gmra.mrb[24].mxu0 %vm572_vm2, %v8928_v61  ;;  %v1120_v13 = vsel %vm1117_vm4, %v8828_v40, %v1096_v30  ;;  %v9057_v40 = vld [vmem:[%s11002_s1 + $0x48] sm:$0xff]  }
 0x16f   : > { %925 = vmatprep.mubr.bf16.mxu1 %v11011_v16  ;;  %2592 = vmatprep.mubr.bf16.mxu0 %v11011_v16 }
 0x176   : > { %6482 = vmatmul.mubr.msk.bf16.gmra.mrb[92].mxu1 %vm572_vm2, %v8800_v18  ;;  %6622 = vmatmul.mubr.msk.bf16.gmra.mrb[28].mxu0 %vm572_vm2, %v8943_v62  ;;  %v1102_v18 = vpop.permute.xlu1 %1101 }
 0x177   : > { %1198 = vmatprep.mubr.bf16.mxu1 %v11011_v16  ;;  %2602 = vmatprep.mubr.bf16.mxu0 %v11011_v16  ;;  %v1123_v54 = vsel %vm1117_vm4, %v1100_v42, %v1102_v18  ;;  %v9145_v18 = vld [vmem:[%s11002_s1 + $0x78] sm:$0xff]  }
 0x17a   : > { %v1116_v12 = vpop.permute.xlu1 %1115 }
 0x17e   : > { %6507 = vmatmul.mubr.msk.bf16.vlgmr.msra.gmra.mrb[0].mxu1 %vm572_vm2, %v9037_v45  ;;  %6623 = vmatmul.mubr.msk.bf16.gmra.mrb[32].mxu0 %vm572_vm2, %v8954_v3  ;;  %v9105_v30 = vpop.permute.xlu1 %3318 }
 0x17f   : > { %1280 = vmatpush1.bf16.msra.mxu1 %v1120_v13  ;;  %1208 = vmatprep.mubr.bf16.mxu1 %v11011_v16  ;;  %11017 = vst [vmem:[#allocation7_spill] sm:$0xff] %v9105_v30  ;;  %v3344_v31 = vsel %vm3342_vm5, %v3317_v23, %v9105_v30  ;;  %v9134_v13 = vld [vmem:[%s11002_s1 + $0x110] sm:$0xff]   ;;  %v1122_v30 = vsel %vm1117_vm4, %v8968_v24, %v1100_v42 }
 0x180   : > { %1281 = vmatprep.subr.bf16.mxu1 %v1127_v5  ;;  %2612 = vmatprep.mubr.bf16.mxu0 %v11011_v16  ;;  %v9129_v5 = vld [vmem:[%s11002_s1 + $0x70] sm:$0xff]  }
 0x181   : > { %v9189_v24 = vld [vmem:[%s11002_s1 + $0x130] sm:$0xff]  }
 0x182   : > { %v3331_v42 = vpop.permute.xlu1 %3330 }
 0x183   : > { %1282 = vmatpush1.bf16.msra.mxu1 %v1126_v56  ;;  %v9161_v56 = vld [vmem:[%s11002_s1 + $0x120] sm:$0xff]  }
 0x184   : > { %1392 = vmatprep.subr.bf16.mxu1 %v1123_v54  ;;  %v9150_v54 = vld [vmem:[%s11002_s1 + $0x118] sm:$0xff]  }
 0x186   : > { %6508 = vmatmul.mubr.msk.bf16.gmra.mrb[4].mxu1 %vm572_vm2, %v9057_v40  ;;  %6624 = vmatmul.mubr.msk.bf16.gmra.mrb[36].mxu0 %vm572_vm2, %v8974_v8 }
 0x187   : > { %1218 = vmatprep.mubr.bf16.mxu1 %v11011_v16  ;;  %2622 = vmatprep.mubr.bf16.mxu0 %v11011_v16 }
 0x18e   : > { %6509 = vmatmul.mubr.msk.bf16.gmra.mrb[8].mxu1 %vm572_vm2, %v9068_v58  ;;  %6625 = vmatmul.mubr.msk.bf16.gmra.mrb[40].mxu0 %vm572_vm2, %v8987_v25 }
 0x18f   : > { %1228 = vmatprep.mubr.bf16.mxu1 %v11011_v16  ;;  %2632 = vmatprep.mubr.bf16.mxu0 %v11011_v16 }
 0x196   : > { %6510 = vmatmul.mubr.msk.bf16.gmra.mrb[12].mxu1 %vm572_vm2, %v9079_v0  ;;  %6626 = vmatmul.mubr.msk.bf16.gmra.mrb[44].mxu0 %vm572_vm2, %v8998_v19  ;;  %v1128_v19 = vsel %vm1117_vm4, %v9039_v55, %v1114_v11 }
 0x197   : > { %1238 = vmatprep.mubr.bf16.mxu1 %v11011_v16  ;;  %2852 = vmatprep.mubr.bf16.mxu0 %v11011_v16 }
 0x19e   : > { %6511 = vmatmul.mubr.msk.bf16.gmra.mrb[16].mxu1 %vm572_vm2, %v9090_v2  ;;  %6651 = vmatmul.mubr.msk.bf16.vlgmr.msra.gmra.mrb[0].mxu0 %vm572_vm2, %v9095_v10 }
 0x19f   : > { %1248 = vmatprep.mubr.bf16.mxu1 %v11011_v16  ;;  %2862 = vmatprep.mubr.bf16.mxu0 %v11011_v16 }
 0x1a0   : > { %3047 = vmatpush1.bf16.msra.mxu0 %v8491_v28  ;;  %v9344_v28 = vld [vmem:[%s11002_s1 + $0x150] sm:$0xff]  }
 0x1a1   : > { %3048 = vmatprep.subr.bf16.mxu0 %v8507_v38  ;;  %v9368_v38 = vld [vmem:[%s11002_s1 + $0x160] sm:$0xff]  }
 0x1a4   : > { %3049 = vmatpush1.bf16.msra.mxu0 %v8497_v33  ;;  %v9357_v33 = vld [vmem:[%s11002_s1 + $0x158] sm:$0xff]  }
 0x1a5   : > { %3391 = vmatprep.subr.bf16.mxu0 %v3344_v31  ;;  %v1129_v31 = vsel %vm1117_vm4, %v1114_v11, %v1116_v12  ;;  %v9177_v12 = vld [vmem:[%s11002_s1 + $0x128] sm:$0xff]  }
 0x1a6   : > { %6512 = vmatmul.mubr.msk.bf16.gmra.mrb[20].mxu1 %vm572_vm2, %v9110_v36  ;;  %6652 = vmatmul.mubr.msk.bf16.gmra.mrb[4].mxu0 %vm572_vm2, %v9115_v39 }
 0x1a7   : > { %1258 = vmatprep.mubr.bf16.mxu1 %v11011_v16  ;;  %2872 = vmatprep.mubr.bf16.mxu0 %v11011_v16 }
 0x1ae   : > { %6513 = vmatmul.mubr.msk.bf16.gmra.mrb[24].mxu1 %vm572_vm2, %v9129_v5  ;;  %6653 = vmatmul.mubr.msk.bf16.gmra.mrb[8].mxu0 %vm572_vm2, %v9134_v13 }
 0x1af   : > { %1268 = vmatprep.mubr.bf16.mxu1 %v11011_v16  ;;  %2882 = vmatprep.mubr.bf16.mxu0 %v11011_v16 }
 0x1b6   : > { %6514 = vmatmul.mubr.msk.bf16.gmra.mrb[28].mxu1 %vm572_vm2, %v9145_v18  ;;  %6654 = vmatmul.mubr.msk.bf16.gmra.mrb[12].mxu0 %vm572_vm2, %v9150_v54 }
 0x1b7   : > { %1311 = vmatprep.mubr.bf16.mxu1 %v11011_v16  ;;  %2892 = vmatprep.mubr.bf16.mxu0 %v11011_v16 }
 0x1be   : > { %6515 = vmatmul.mubr.msk.bf16.vlgmr.msra.gmra.mrb[32].mxu1 %vm572_vm2, %v9037_v45  ;;  %6655 = vmatmul.mubr.msk.bf16.gmra.mrb[48].mxu0 %vm572_vm2, %v9161_v56 }
 0x1bf   : > { %1393 = vmatpush1.bf16.msra.mxu1 %v1122_v30  ;;  %1321 = vmatprep.mubr.bf16.mxu1 %v11011_v16 }
 0x1c0   : > { %1394 = vmatprep.subr.bf16.mxu1 %v1129_v31  ;;  %2902 = vmatprep.mubr.bf16.mxu0 %v11011_v16  ;;  %v3329_v31 = vpop.permute.xlu1 %3328 }
 0x1c1   : > { %v3349_v3 = vsel %vm3342_vm5, %v3329_v31, %v3331_v42 }
 0x1c3   : > { %1395 = vmatpush1.bf16.msra.mxu1 %v1128_v19  ;;  %v9200_v19 = vld [vmem:[%s11002_s1 + $0x138] sm:$0xff]  }
 0x1c4   : > { %6974 = vmatprep.subr.bf16.mxu1 %v8595_v52  ;;  %v3315_v52 = vpop.permute.xlu0 %3314 }
 0x1c5   : > { %v3343_v30 = vsel %vm3342_vm5, %v3315_v52, %v3317_v23  ;;  %v3325_v23 = vpop.permute.xlu1 %3324 }
 0x1c6   : > { %6516 = vmatmul.mubr.msk.bf16.gmra.mrb[36].mxu1 %vm572_vm2, %v9057_v40  ;;  %6656 = vmatmul.mubr.msk.bf16.gmra.mrb[52].mxu0 %vm572_vm2, %v9177_v12 }
 0x1c7   : > { %1331 = vmatprep.mubr.bf16.mxu1 %v11011_v16  ;;  %2912 = vmatprep.mubr.bf16.mxu0 %v11011_v16 }
 0x1c8   : > { %v9202_v55 = vpop.permute.xlu0 %3332 }
 0x1c9   : > { %v3350_v25 = vsel %vm3342_vm5, %v3331_v42, %v9202_v55 }
 0x1cc   : > { %v9210_v11 = vpop.permute.xlu0 %1664 }
 0x1cd   : > { %v1689_v48 = vsel %vm1686_vm1, %v8587_v49, %v9210_v11 }
 0x1ce   : > { %6517 = vmatmul.mubr.msk.bf16.gmra.mrb[40].mxu1 %vm572_vm2, %v9068_v58  ;;  %6657 = vmatmul.mubr.msk.bf16.gmra.mrb[56].mxu0 %vm572_vm2, %v9189_v24 }
 0x1cf   : > { %1341 = vmatprep.mubr.bf16.mxu1 %v11011_v16  ;;  %2922 = vmatprep.mubr.bf16.mxu0 %v11011_v16 }
 0x1d0   : > { %v3327_v8 = vpop.permute.xlu0 %3326 }
 0x1d1   : > { %v3348_v52 = vsel %vm3342_vm5, %v3325_v23, %v3327_v8 }
 0x1d6   : > { %6518 = vmatmul.mubr.msk.bf16.gmra.mrb[44].mxu1 %vm572_vm2, %v9079_v0  ;;  %6658 = vmatmul.mubr.msk.bf16.gmra.mrb[60].mxu0 %vm572_vm2, %v9200_v19 }
 0x1d7   : > { %1351 = vmatprep.mubr.bf16.mxu1 %v11011_v16  ;;  %3078 = vmatprep.mubr.bf16.mxu0 %v11011_v16 }
 0x1de   : > { %6519 = vmatmul.mubr.msk.bf16.gmra.mrb[48].mxu1 %vm572_vm2, %v9090_v2  ;;  %6667 = vmatmul.mubr.msk.bf16.vlgmr.msra.gmra.mrb[16].mxu0 %vm572_vm2, %v9095_v10 }
 0x1df   : > { %1361 = vmatprep.mubr.bf16.mxu1 %v11011_v16  ;;  %3088 = vmatprep.mubr.bf16.mxu0 %v11011_v16 }
 0x1e0   : > { %3392 = vmatpush1.bf16.msra.mxu0 %v3343_v30 }
 0x1e1   : > { %3393 = vmatprep.subr.bf16.mxu0 %v3350_v25 }
 0x1e4   : > { %3394 = vmatpush1.bf16.msra.mxu0 %v3349_v3  ;;  %v1690_v3 = vsel %vm1686_vm1, %v9210_v11, %v8660_v17 }
 0x1e5   : > { %3617 = vmatprep.subr.bf16.mxu0 %v3348_v52 }
 0x1e6   : > { %6520 = vmatmul.mubr.msk.bf16.gmra.mrb[52].mxu1 %vm572_vm2, %v9110_v36  ;;  %6668 = vmatmul.mubr.msk.bf16.gmra.mrb[20].mxu0 %vm572_vm2, %v9115_v39 }
 0x1e7   : > { %1371 = vmatprep.mubr.bf16.mxu1 %v11011_v16  ;;  %3098 = vmatprep.mubr.bf16.mxu0 %v11011_v16 }
 0x1ee   : > { %6521 = vmatmul.mubr.msk.bf16.gmra.mrb[56].mxu1 %vm572_vm2, %v9129_v5  ;;  %6669 = vmatmul.mubr.msk.bf16.gmra.mrb[24].mxu0 %vm572_vm2, %v9134_v13 }
 0x1ef   : > { %1381 = vmatprep.mubr.bf16.mxu1 %v11011_v16  ;;  %3108 = vmatprep.mubr.bf16.mxu0 %v11011_v16 }
 0x1f6   : > { %6522 = vmatmul.mubr.msk.bf16.gmra.mrb[60].mxu1 %vm572_vm2, %v9145_v18  ;;  %6670 = vmatmul.mubr.msk.bf16.gmra.mrb[28].mxu0 %vm572_vm2, %v9150_v54 }
 0x1f7   : > { %1424 = vmatprep.mubr.bf16.mxu1 %v11011_v16  ;;  %3118 = vmatprep.mubr.bf16.mxu0 %v11011_v16 }
 0x1fe   : > { %6523 = vmatmul.mubr.msk.bf16.vlgmr.msra.gmra.mrb[64].mxu1 %vm572_vm2, %v9037_v45  ;;  %6671 = vmatmul.mubr.msk.bf16.gmra.mrb[32].mxu0 %vm572_vm2, %v9161_v56 }
 0x1ff   : > { %6976 = vmatpush1.bf16.msra.mxu1 %v8603_v57  ;;  %1434 = vmatprep.mubr.bf16.mxu1 %v11011_v16  ;;  %v9263_v57 = vpop.permute.xlu0 %1678 }
 0x200   : > { %6975 = vmatprep.subr.bf16.mxu1 %v8625_v1  ;;  %3128 = vmatprep.mubr.bf16.mxu0 %v11011_v16  ;;  %v9271_v1 = vpop.permute.xlu1 %3322  ;;  %v1696_v59 = vsel %vm1686_vm1, %v9263_v57, %v8678_v21  ;;  %v1695_v49 = vsel %vm1686_vm1, %v8621_v63, %v9263_v57  ;;  %v9402_v63 = vld [vmem:[%s11002_s1 + $0x170] sm:$0xff]  }
 0x201   : > { %v3347_v8 = vsel %vm3342_vm5, %v9271_v1, %v3325_v23 }
 0x203   : > { %6977 = vmatpush1.bf16.msra.mxu1 %v8634_v7  ;;  %v3341_v7 = vpop.permute.xlu0 %3340 }
 0x204   : > { %1848 = vmatprep.subr.bf16.mxu1 %v1690_v3  ;;  %v3339_v6 = vpop.permute.xlu1 %3338 }
 0x205   : > { %v3354_v14 = vsel %vm3342_vm5, %v3339_v6, %v3341_v7 }
 0x206   : > { %6524 = vmatmul.mubr.msk.bf16.gmra.mrb[68].mxu1 %vm572_vm2, %v9057_v40  ;;  %6672 = vmatmul.mubr.msk.bf16.gmra.mrb[36].mxu0 %vm572_vm2, %v9177_v12 }
 0x207   : > { %1444 = vmatprep.mubr.bf16.mxu1 %v11011_v16  ;;  %3138 = vmatprep.mubr.bf16.mxu0 %v11011_v16  ;;  %v9292_v17 = vpop.permute.xlu0 %2233 }
 0x208   : > { %v9300_v25 = vpop.permute.xlu1 %3336  ;;  %v2258_v7 = vsel %vm2255_vm3, %v8727_v44, %v9292_v17 }
 0x209   : > { %v3353_v45 = vsel %vm3342_vm5, %v9300_v25, %v3339_v6 }
 0x20b   : > { %v9311_v15 = vpop.permute.xlu0 %3887 }
 0x20c   : > { %v9315_v40 = vpop.permute.xlu1 %3885 }
 0x20d   : > { %v3913_v27 = vsel %vm3911_vm6, %v9315_v40, %v9311_v15 }
 0x20e   : > { %6525 = vmatmul.mubr.msk.bf16.gmra.mrb[72].mxu1 %vm572_vm2, %v9068_v58  ;;  %6673 = vmatmul.mubr.msk.bf16.gmra.mrb[40].mxu0 %vm572_vm2, %v9189_v24  ;;  %v9322_v58 = vld [vmem:[%s11002_s1 + $0x148] sm:$0xff]  }
 0x20f   : > { %1454 = vmatprep.mubr.bf16.mxu1 %v11011_v16  ;;  %3148 = vmatprep.mubr.bf16.mxu0 %v11011_v16  ;;  %v2248_v11 = vpop.permute.xlu0 %2247 }
 0x210   : > { %v2264_v44 = vsel %vm2255_vm3, %v8753_v53, %v2248_v11 }
 0x213   : > { %v9437_v57 = vpop.permute.xlu0 %3901 }
 0x216   : > { %6526 = vmatmul.mubr.msk.bf16.gmra.mrb[76].mxu1 %vm572_vm2, %v9079_v0  ;;  %6674 = vmatmul.mubr.msk.bf16.gmra.mrb[44].mxu0 %vm572_vm2, %v9200_v19  ;;  %v9388_v0 = vld [vmem:[%s11002_s1 + $0x168] sm:$0xff]  }
 0x217   : > { %1464 = vmatprep.mubr.bf16.mxu1 %v11011_v16  ;;  %3423 = vmatprep.mubr.bf16.mxu0 %v11011_v16 }
 0x21e   : > { %6527 = vmatmul.mubr.msk.bf16.gmra.mrb[80].mxu1 %vm572_vm2, %v9090_v2  ;;  %6699 = vmatmul.mubr.msk.bf16.vlgmr.msra.gmra.mrb[0].mxu0 %vm572_vm2, %v9290_v4  ;;  %v2259_v2 = vsel %vm2255_vm3, %v9292_v17, %v8802_v22 }
 0x21f   : > { %1474 = vmatprep.mubr.bf16.mxu1 %v11011_v16  ;;  %3433 = vmatprep.mubr.bf16.mxu0 %v11011_v16 }
 0x220   : > { %3618 = vmatpush1.bf16.msra.mxu0 %v3347_v8  ;;  %v2265_v8 = vsel %vm2255_vm3, %v2248_v11, %v8815_v29  ;;  %v3894_v29 = vpop.permute.xlu0 %3893 }
 0x221   : > { %3619 = vmatprep.subr.bf16.mxu0 %v3354_v14 }
 0x224   : > { %3620 = vmatpush1.bf16.msra.mxu0 %v3353_v45 }
 0x225   : > { %3960 = vmatprep.subr.bf16.mxu0 %v3913_v27 }
 0x226   : > { %6528 = vmatmul.mubr.msk.bf16.gmra.mrb[84].mxu1 %vm572_vm2, %v9110_v36  ;;  %6700 = vmatmul.mubr.msk.bf16.gmra.mrb[4].mxu0 %vm572_vm2, %v9322_v58  ;;  %v9417_v36 = vld [vmem:[%s11002_s1 + $0x178] sm:$0xff]  }
 0x227   : > { %1484 = vmatprep.mubr.bf16.mxu1 %v11011_v16  ;;  %3443 = vmatprep.mubr.bf16.mxu0 %v11011_v16 }
 0x22e   : > { %6529 = vmatmul.mubr.msk.bf16.gmra.mrb[88].mxu1 %vm572_vm2, %v9129_v5  ;;  %6701 = vmatmul.mubr.msk.bf16.gmra.mrb[8].mxu0 %vm572_vm2, %v9344_v28 }
 0x22f   : > { %1494 = vmatprep.mubr.bf16.mxu1 %v11011_v16  ;;  %3453 = vmatprep.mubr.bf16.mxu0 %v11011_v16 }
 0x236   : > { %6530 = vmatmul.mubr.msk.bf16.gmra.mrb[92].mxu1 %vm572_vm2, %v9145_v18  ;;  %6702 = vmatmul.mubr.msk.bf16.gmra.mrb[12].mxu0 %vm572_vm2, %v9357_v33  ;;  %v3884_v18 = vpop.permute.xlu1 %3883 }
 0x237   : > { %1807 = vmatprep.mubr.bf16.mxu1 %v11011_v16  ;;  %3463 = vmatprep.mubr.bf16.mxu0 %v11011_v16  ;;  %v3912_v6 = vsel %vm3911_vm6, %v3884_v18, %v9315_v40 }
 0x23a   : > { %v3900_v31 = vpop.permute.xlu1 %3899 }
 0x23b   : > { %v3919_v45 = vsel %vm3911_vm6, %v3900_v31, %v9437_v57 }
 0x23e   : > { %6559 = vmatmul.mubr.msk.bf16.vlgmr.msra.gmra.mrb[16].mxu1 %vm572_vm2, %v8813_v26  ;;  %6703 = vmatmul.mubr.msk.bf16.gmra.mrb[48].mxu0 %vm572_vm2, %v9368_v38  ;;  %v3898_v14 = vpop.permute.xlu1 %3897 }
 0x23f   : > { %1849 = vmatpush1.bf16.msra.mxu1 %v1689_v48  ;;  %1817 = vmatprep.mubr.bf16.mxu1 %v11011_v16  ;;  %v3918_v40 = vsel %vm3911_vm6, %v3898_v14, %v3900_v31  ;;  %v9607_v14 = vld [vmem:[%s11002_s1 + $0x1b0] sm:$0xff]  }
 0x240   : > { %1850 = vmatprep.subr.bf16.mxu1 %v1696_v59  ;;  %3473 = vmatprep.mubr.bf16.mxu0 %v11011_v16 }
 0x242   : > { %v3896_v59 = vpop.permute.xlu1 %3895 }
 0x243   : > { %1851 = vmatpush1.bf16.msra.mxu1 %v1695_v49  ;;  %v3917_v49 = vsel %vm3911_vm6, %v3894_v29, %v3896_v59  ;;  %v9622_v59 = vld [vmem:[%s11002_s1 + $0x1b8] sm:$0xff]  }
 0x244   : > { %2417 = vmatprep.subr.bf16.mxu1 %v2259_v2 }
 0x246   : > { %6560 = vmatmul.mubr.msk.bf16.gmra.mrb[20].mxu1 %vm572_vm2, %v8838_v47  ;;  %6704 = vmatmul.mubr.msk.bf16.gmra.mrb[52].mxu0 %vm572_vm2, %v9388_v0 }
 0x247   : > { %1827 = vmatprep.mubr.bf16.mxu1 %v11011_v16  ;;  %3483 = vmatprep.mubr.bf16.mxu0 %v11011_v16 }
 0x24e   : > { %6561 = vmatmul.mubr.msk.bf16.gmra.mrb[24].mxu1 %vm572_vm2, %v8849_v35  ;;  %6705 = vmatmul.mubr.msk.bf16.gmra.mrb[56].mxu0 %vm572_vm2, %v9402_v63 }
 0x24f   : > { %1837 = vmatprep.mubr.bf16.mxu1 %v11011_v16  ;;  %3493 = vmatprep.mubr.bf16.mxu0 %v11011_v16 }
 0x251   : > { %v9410_v21 = vpop.f32.mrb[0].mxu1 }
 0x252   : > { %v9412_v22 = vpop.f32.mrb[1].mxu1 }
 0x253   : > { %v9419_v5 = vpop.f32.mrb[2].mxu1 }
 0x254   : > { %v9421_v42 = vpop.f32.mrb[3].mxu1 }
 0x256   : > { %6562 = vmatmul.mubr.msk.bf16.gmra.mrb[28].mxu1 %vm572_vm2, %v8864_v50  ;;  %6706 = vmatmul.mubr.msk.bf16.gmra.mrb[60].mxu0 %vm572_vm2, %v9417_v36 }
 0x257   : > { %1880 = vmatprep.mubr.bf16.mxu1 %v11011_v16  ;;  %3649 = vmatprep.mubr.bf16.mxu0 %v11011_v16 }
 0x259   : > { %v9429_v30 = vpop.f32.mrb[4].mxu1 }
 0x25a   : > { %v9431_v23 = vpop.f32.mrb[5].mxu1 }
 0x25b   : > { %v9433_v52 = vpop.f32.mrb[6].mxu1 }
 0x25c   : > { %v9435_v3 = vpop.f32.mrb[7].mxu1 }
 0x25e   : > { %6563 = vmatmul.mubr.msk.bf16.vlgmr.msra.gmra.mrb[32].mxu1 %vm572_vm2, %v8644_v9  ;;  %6715 = vmatmul.mubr.msk.bf16.vlgmr.msra.gmra.mrb[16].mxu0 %vm572_vm2, %v9290_v4 }
 0x25f   : > { %2418 = vmatpush1.bf16.msra.mxu1 %v2258_v7  ;;  %1890 = vmatprep.mubr.bf16.mxu1 %v11011_v16 }
 0x260   : > { %2419 = vmatprep.subr.bf16.mxu1 %v2265_v8  ;;  %3659 = vmatprep.mubr.bf16.mxu0 %v11011_v16  ;;  %v11019_v8 = vld [vmem:[#allocation4_spill] sm:$0xff] }
 0x261   : > { %v9454_v9 = vpop.f32.mrb[8].mxu1  ;;  %3961 = vmatpush1.bf16.msra.mxu0 %v3912_v6 }
 0x262   : > { %v9458_v17 = vpop.f32.mrb[9].mxu1  ;;  %3962 = vmatprep.subr.bf16.mxu0 %v3919_v45  ;;  %v11020_v45 = vld [vmem:[#allocation5_spill] sm:$0xff] }
 0x263   : > { %2420 = vmatpush1.bf16.msra.mxu1 %v2264_v44  ;;  %v9461_v27 = vpop.f32.mrb[10].mxu1 }
 0x264   : > { %v9463_v48 = vpop.f32.mrb[11].mxu1  ;;  %2933 = vmatprep.subr.bf16.mxu1 %v8499_v34 }
 0x265   : > { %3963 = vmatpush1.bf16.msra.mxu0 %v3918_v40 }
 0x266   : > { %6564 = vmatmul.mubr.msk.bf16.gmra.mrb[36].mxu1 %vm572_vm2, %v8674_v20  ;;  %6716 = vmatmul.mubr.msk.bf16.gmra.mrb[20].mxu0 %vm572_vm2, %v9322_v58  ;;  %v9511_v20 = vpop.permute.xlu0 %3891 }
 0x267   : > { %1900 = vmatprep.mubr.bf16.mxu1 %v11011_v16  ;;  %3669 = vmatprep.mubr.bf16.mxu0 %v11011_v16 }
 0x268   : > { %4186 = vmatprep.subr.bf16.mxu0 %v3917_v49 }
 0x269   : > { %v9473_v53 = vpop.f32.mrb[12].mxu1 }
 0x26a   : > { %v9475_v2 = vpop.f32.mrb[13].mxu1 }
 0x26b   : > { %v9477_v34 = vpop.f32.mrb[14].mxu1 }
 0x26c   : > { %v9479_v18 = vpop.f32.mrb[15].mxu1 }
 0x26e   : > { %6565 = vmatmul.mubr.msk.bf16.gmra.mrb[40].mxu1 %vm572_vm2, %v8709_v32  ;;  %6717 = vmatmul.mubr.msk.bf16.gmra.mrb[24].mxu0 %vm572_vm2, %v9344_v28  ;;  %v3910_v32 = vpop.permute.xlu0 %3909 }
 0x26f   : > { %1910 = vmatprep.mubr.bf16.mxu1 %v11011_v16  ;;  %3679 = vmatprep.mubr.bf16.mxu0 %v11011_v16 }
 0x276   : > { %6566 = vmatmul.mubr.msk.bf16.gmra.mrb[44].mxu1 %vm572_vm2, %v8741_v46  ;;  %6718 = vmatmul.mubr.msk.bf16.gmra.mrb[28].mxu0 %vm572_vm2, %v9357_v33  ;;  %v3908_v46 = vpop.permute.xlu1 %3907 }
 0x277   : > { %1920 = vmatprep.mubr.bf16.mxu1 %v11011_v16  ;;  %3689 = vmatprep.mubr.bf16.mxu0 %v11011_v16  ;;  %v3923_v11 = vsel %vm3911_vm6, %v3908_v46, %v3910_v32 }
 0x27e   : > { %6567 = vmatmul.mubr.msk.bf16.gmra.mrb[48].mxu1 %vm572_vm2, %v8813_v26  ;;  %6719 = vmatmul.mubr.msk.bf16.gmra.mrb[32].mxu0 %vm572_vm2, %v9368_v38  ;;  %v9522_v26 = vld [vmem:[%s11002_s1 + $0x180] sm:$0xff]  }
 0x27f   : > { %1930 = vmatprep.mubr.bf16.mxu1 %v11011_v16  ;;  %3699 = vmatprep.mubr.bf16.mxu0 %v11011_v16 }
 0x286   : > { %6568 = vmatmul.mubr.msk.bf16.gmra.mrb[52].mxu1 %vm572_vm2, %v8838_v47  ;;  %6720 = vmatmul.mubr.msk.bf16.gmra.mrb[36].mxu0 %vm572_vm2, %v9388_v0  ;;  %v3916_v47 = vsel %vm3911_vm6, %v9511_v20, %v3894_v29 }
 0x287   : > { %1940 = vmatprep.mubr.bf16.mxu1 %v11011_v16  ;;  %3709 = vmatprep.mubr.bf16.mxu0 %v11011_v16 }
 0x28e   : > { %6569 = vmatmul.mubr.msk.bf16.gmra.mrb[56].mxu1 %vm572_vm2, %v8849_v35  ;;  %6721 = vmatmul.mubr.msk.bf16.gmra.mrb[40].mxu0 %vm572_vm2, %v9402_v63  ;;  %v9526_v35 = vpop.permute.xlu0 %3320 }
 0x28f   : > { %1950 = vmatprep.mubr.bf16.mxu1 %v11011_v16  ;;  %3719 = vmatprep.mubr.bf16.mxu0 %v11011_v16 }
 0x296   : > { %6570 = vmatmul.mubr.msk.bf16.gmra.mrb[60].mxu1 %vm572_vm2, %v8864_v50  ;;  %6722 = vmatmul.mubr.msk.bf16.gmra.mrb[44].mxu0 %vm572_vm2, %v9417_v36  ;;  %v9534_v50 = vpop.permute.xlu1 %3905 }
 0x297   : > { %2449 = vmatprep.mubr.bf16.mxu1 %v11011_v16  ;;  %3992 = vmatprep.mubr.bf16.mxu0 %v11011_v16  ;;  %v3922_v31 = vsel %vm3911_vm6, %v9534_v50, %v3908_v46 }
 0x29a   : > { %v4455_v7 = vpop.permute.xlu1 %4454 }
 0x29e   : > { %6611 = vmatmul.mubr.msk.bf16.vlgmr.msra.gmra.mrb[32].mxu1 %vm572_vm2, %v8883_v51  ;;  %6747 = vmatmul.mubr.msk.bf16.vlgmr.msra.gmra.mrb[0].mxu0 %vm572_vm2, %v9522_v26  ;;  %v9542_v51 = vld [vmem:[%s11002_s1 + $0x188] sm:$0xff]   ;;  %v4453_v32 = vpop.permute.xlu1 %4452 }
 0x29f   : > { %2934 = vmatpush1.bf16.msra.mxu1 %v8513_v41  ;;  %2459 = vmatprep.mubr.bf16.mxu1 %v11011_v16  ;;  %v3346_v41 = vsel %vm3342_vm5, %v9526_v35, %v9271_v1  ;;  %v11018_v1 = vld [vmem:[#allocation3_spill] sm:$0xff] }
 0x2a0   : > { %2935 = vmatprep.subr.bf16.mxu1 %v8505_v37  ;;  %4002 = vmatprep.mubr.bf16.mxu0 %v11011_v16  ;;  %v9550_v37 = vpop.permute.xlu0 %4456 }
 0x2a1   : > { %4187 = vmatpush1.bf16.msra.mxu0 %v3916_v47  ;;  %v4482_v6 = vsel %vm4480_vm7, %v4455_v7, %v9550_v37  ;;  %v11023_v47 = vld [vmem:[#allocation6_spill] sm:$0xff] }
 0x2a2   : > { %4188 = vmatprep.subr.bf16.mxu0 %v3923_v11 }
 0x2a3   : > { %2936 = vmatpush1.bf16.msra.mxu1 %v8519_v43  ;;  %v9563_v43 = vld [vmem:[%s11002_s1 + $0x190] sm:$0xff]  }
 0x2a4   : > { %3504 = vmatprep.subr.bf16.mxu1 %v3346_v41  ;;  %v3335_v40 = vpop.permute.xlu0 %3334  ;;  %v4469_v41 = vpop.permute.xlu1 %4468 }
 0x2a5   : > { %4189 = vmatpush1.bf16.msra.mxu0 %v3922_v31 }
 0x2a6   : > { %6612 = vmatmul.mubr.msk.bf16.gmra.mrb[36].mxu1 %vm572_vm2, %v8908_v60  ;;  %6748 = vmatmul.mubr.msk.bf16.gmra.mrb[4].mxu0 %vm572_vm2, %v9542_v51  ;;  %v9574_v60 = vld [vmem:[%s11002_s1 + $0x198] sm:$0xff]  }
 0x2a7   : > { %2469 = vmatprep.mubr.bf16.mxu1 %v11011_v16  ;;  %4012 = vmatprep.mubr.bf16.mxu0 %v11011_v16 }
 0x2a8   : > { %4529 = vmatprep.subr.bf16.mxu0 %v4482_v6  ;;  %v9632_v11 = vpop.permute.xlu0 %4470 }
 0x2ae   : > { %6613 = vmatmul.mubr.msk.bf16.gmra.mrb[40].mxu1 %vm572_vm2, %v8928_v61  ;;  %6749 = vmatmul.mubr.msk.bf16.gmra.mrb[8].mxu0 %vm572_vm2, %v9563_v43  ;;  %v9585_v61 = vld [vmem:[%s11002_s1 + $0x1a0] sm:$0xff]  }
 0x2af   : > { %2479 = vmatprep.mubr.bf16.mxu1 %v11011_v16  ;;  %4022 = vmatprep.mubr.bf16.mxu0 %v11011_v16 }
 0x2b6   : > { %6614 = vmatmul.mubr.msk.bf16.gmra.mrb[44].mxu1 %vm572_vm2, %v8943_v62  ;;  %6750 = vmatmul.mubr.msk.bf16.gmra.mrb[12].mxu0 %vm572_vm2, %v9574_v60  ;;  %v9596_v62 = vld [vmem:[%s11002_s1 + $0x1a8] sm:$0xff]  }
 0x2b7   : > { %2489 = vmatprep.mubr.bf16.mxu1 %v11011_v16  ;;  %4032 = vmatprep.mubr.bf16.mxu0 %v11011_v16 }
 0x2be   : > { %6615 = vmatmul.mubr.msk.bf16.gmra.mrb[48].mxu1 %vm572_vm2, %v11018_v1  ;;  %6751 = vmatmul.mubr.msk.bf16.gmra.mrb[48].mxu0 %vm572_vm2, %v9585_v61 }
 0x2bf   : > { %2499 = vmatprep.mubr.bf16.mxu1 %v11011_v16  ;;  %4042 = vmatprep.mubr.bf16.mxu0 %v11011_v16 }
 0x2c6   : > { %6616 = vmatmul.mubr.msk.bf16.gmra.mrb[52].mxu1 %vm572_vm2, %v11019_v8  ;;  %6752 = vmatmul.mubr.msk.bf16.gmra.mrb[52].mxu0 %vm572_vm2, %v9596_v62 }
 0x2c7   : > { %2509 = vmatprep.mubr.bf16.mxu1 %v11011_v16  ;;  %4052 = vmatprep.mubr.bf16.mxu0 %v11011_v16 }
 0x2ce   : > { %6617 = vmatmul.mubr.msk.bf16.gmra.mrb[56].mxu1 %vm572_vm2, %v11020_v45  ;;  %6753 = vmatmul.mubr.msk.bf16.gmra.mrb[56].mxu0 %vm572_vm2, %v9607_v14  ;;  %v9644_v45 = vpop.permute.xlu0 %3889 }
 0x2cf   : > { %2519 = vmatprep.mubr.bf16.mxu1 %v11011_v16  ;;  %4062 = vmatprep.mubr.bf16.mxu0 %v11011_v16 }
 0x2d1   : > { %v9615_v44 = vpop.f32.mrb[64].mxu1 }
 0x2d2   : > { %v9617_v29 = vpop.f32.mrb[65].mxu1 }
 0x2d3   : > { %v9624_v49 = vpop.f32.mrb[66].mxu1 }
 0x2d4   : > { %11021 = vst [vmem:[#allocation3_spill] sm:$0xff] %v9624_v49  ;;  %v9626_v46 = vpop.f32.mrb[67].mxu1 }
 0x2d5   : > { %11022 = vst [vmem:[#allocation4_spill] sm:$0xff] %v9626_v46 }
 0x2d6   : > { %6618 = vmatmul.mubr.msk.bf16.gmra.mrb[60].mxu1 %vm572_vm2, %v11023_v47  ;;  %6754 = vmatmul.mubr.msk.bf16.gmra.mrb[60].mxu0 %vm572_vm2, %v9622_v59  ;;  %v11028_v47 = vld [vmem:[#allocation7_spill] sm:$0xff] }
 0x2d7   : > { %2965 = vmatprep.mubr.bf16.mxu1 %v11011_v16  ;;  %4218 = vmatprep.mubr.bf16.mxu0 %v11011_v16  ;;  %v3345_v46 = vsel %vm3342_vm5, %v11028_v47, %v9526_v35  ;;  %v4481_v16 = vsel %vm4480_vm7, %v4453_v32, %v4455_v7 }
 0x2d9   : > { %v9636_v31 = vpop.f32.mrb[68].mxu1 }
 0x2da   : > { %11024 = vst [vmem:[#allocation5_spill] sm:$0xff] %v9636_v31  ;;  %v9638_v6 = vpop.f32.mrb[69].mxu1  ;;  %v4488_v31 = vsel %vm4480_vm7, %v4469_v41, %v9632_v11 }
 0x2db   : > { %11025 = vst [vmem:[#allocation6_spill] sm:$0xff] %v9638_v6  ;;  %v9640_v1 = vpop.f32.mrb[70].mxu1  ;;  %v11029_v6 = vmov 0  }
 0x2dc   : > { %11026 = vst [vmem:[#allocation8_spill] sm:$0xff] %v9640_v1  ;;  %v9642_v8 = vpop.f32.mrb[71].mxu1  ;;  %v3352_v1 = vsel %vm3342_vm5, %v3335_v40, %v9300_v25  ;;  %v4465_v25 = vpop.permute.xlu0 %4464 }
 0x2dd   : > { %11027 = vst [vmem:[#allocation9_spill] sm:$0xff] %v9642_v8  ;;  %v4467_v8 = vpop.permute.xlu1 %4466 }
 0x2de   : > { %6659 = vmatmul.mubr.msk.bf16.vlgmr.msra.gmra.mrb[32].mxu1 %vm572_vm2, %v9095_v10  ;;  %6763 = vmatmul.mubr.msk.bf16.vlgmr.msra.gmra.mrb[16].mxu0 %vm572_vm2, %v9522_v26  ;;  %v3351_v10 = vsel %vm3342_vm5, %v9202_v55, %v3335_v40  ;;  %v4487_v32 = vsel %vm4480_vm7, %v4467_v8, %v4469_v41 }
 0x2df   : > { %3505 = vmatpush1.bf16.msra.mxu1 %v3345_v46  ;;  %2975 = vmatprep.mubr.bf16.mxu1 %v11029_v6 }
 0x2e0   : > { %3506 = vmatprep.subr.bf16.mxu1 %v3352_v1  ;;  %4228 = vmatprep.mubr.bf16.mxu0 %v11029_v6  ;;  %v3915_v1 = vsel %vm3911_vm6, %v9644_v45, %v9511_v20 }
 0x2e1   : > { %v9660_v35 = vpop.f32.mrb[72].mxu1  ;;  %4530 = vmatpush1.bf16.msra.mxu0 %v4481_v16  ;;  %v9674_v16 = vpop.permute.xlu1 %4462 }
 0x2e2   : > { %11030 = vst [vmem:[#allocation7_spill] sm:$0xff] %v9660_v35  ;;  %v9664_v7 = vpop.f32.mrb[73].mxu1  ;;  %4531 = vmatprep.subr.bf16.mxu0 %v4488_v31  ;;  %v4486_v55 = vsel %vm4480_vm7, %v9674_v16, %v4465_v25 }
 0x2e3   : > { %11031 = vst [vmem:[#allocation10_spill] sm:$0xff] %v9664_v7  ;;  %3507 = vmatpush1.bf16.msra.mxu1 %v3351_v10  ;;  %v9667_v46 = vpop.f32.mrb[74].mxu1 }
 0x2e4   : > { %11032 = vst [vmem:[#allocation11_spill] sm:$0xff] %v9667_v46  ;;  %4073 = vmatprep.subr.bf16.mxu1 %v3915_v1  ;;  %v9672_v47 = vpop.f32.mrb[75].mxu1 }
 0x2e5   : > { %11033 = vst [vmem:[#allocation12_spill] sm:$0xff] %v9672_v47  ;;  %4532 = vmatpush1.bf16.msra.mxu0 %v4487_v32 }
 0x2e6   : > { %6660 = vmatmul.mubr.msk.bf16.gmra.mrb[36].mxu1 %vm572_vm2, %v9115_v39  ;;  %6764 = vmatmul.mubr.msk.bf16.gmra.mrb[20].mxu0 %vm572_vm2, %v9542_v51 }
 0x2e7   : > { %2985 = vmatprep.mubr.bf16.mxu1 %v11029_v6  ;;  %4238 = vmatprep.mubr.bf16.mxu0 %v11029_v6 }
 0x2e8   : > { %4755 = vmatprep.subr.bf16.mxu0 %v4486_v55 }
 0x2e9   : > { %v9684_v20 = vpop.f32.mrb[76].mxu1 }
 0x2ea   : > { %11034 = vst [vmem:[#allocation13_spill] sm:$0xff] %v9684_v20  ;;  %v9686_v40 = vpop.f32.mrb[77].mxu1 }
 0x2eb   : > { %11035 = vst [vmem:[#allocation14_spill] sm:$0xff] %v9686_v40  ;;  %v9688_v31 = vpop.f32.mrb[78].mxu1 }
 0x2ec   : > { %11036 = vst [vmem:[#allocation15_spill] sm:$0xff] %v9688_v31  ;;  %v9690_v41 = vpop.f32.mrb[79].mxu1  ;;  %v3914_v31 = vsel %vm3911_vm6, %v9311_v15, %v9644_v45 }
 0x2ed   : > { %11037 = vst [vmem:[#allocation16_spill] sm:$0xff] %v9690_v41 }
 0x2ee   : > { %6661 = vmatmul.mubr.msk.bf16.gmra.mrb[40].mxu1 %vm572_vm2, %v9134_v13  ;;  %6765 = vmatmul.mubr.msk.bf16.gmra.mrb[24].mxu0 %vm572_vm2, %v9563_v43 }
 0x2ef   : > { %2995 = vmatprep.mubr.bf16.mxu1 %v11029_v6  ;;  %4248 = vmatprep.mubr.bf16.mxu0 %v11029_v6 }
 0x2f1   : > { %v9698_v39 = vpop.f32.mrb[80].mxu1 }
 0x2f2   : > { %11038 = vst [vmem:[#allocation17_spill] sm:$0xff] %v9698_v39  ;;  %v9700_v8 = vpop.f32.mrb[81].mxu1 }
 0x2f3   : > { %11039 = vst [vmem:[#allocation18_spill] sm:$0xff] %v9700_v8  ;;  %v9702_v10 = vpop.f32.mrb[82].mxu1  ;;  %v9775_v8 = vld [vmem:[%s11002_s1 + $0x1c0] sm:$0xff]  }
 0x2f4   : > { %11040 = vst [vmem:[#allocation19_spill] sm:$0xff] %v9702_v10  ;;  %v9704_v32 = vpop.f32.mrb[83].mxu1 }
 0x2f5   : > { %11041 = vst [vmem:[#allocation20_spill] sm:$0xff] %v9704_v32 }
 0x2f6   : > { %6662 = vmatmul.mubr.msk.bf16.gmra.mrb[44].mxu1 %vm572_vm2, %v9150_v54  ;;  %6766 = vmatmul.mubr.msk.bf16.gmra.mrb[28].mxu0 %vm572_vm2, %v9574_v60 }
 0x2f7   : > { %3005 = vmatprep.mubr.bf16.mxu1 %v11029_v6  ;;  %4258 = vmatprep.mubr.bf16.mxu0 %v11029_v6 }
 0x2f9   : > { %v9712_v13 = vpop.f32.mrb[84].mxu1 }
 0x2fa   : > { %11042 = vst [vmem:[#allocation21_spill] sm:$0xff] %v9712_v13  ;;  %v9714_v25 = vpop.f32.mrb[85].mxu1 }
 0x2fb   : > { %11043 = vst [vmem:[#allocation22_spill] sm:$0xff] %v9714_v25  ;;  %v9716_v1 = vpop.f32.mrb[86].mxu1 }
 0x2fc   : > { %11044 = vst [vmem:[#allocation23_spill] sm:$0xff] %v9716_v1  ;;  %v9718_v55 = vpop.f32.mrb[87].mxu1 }
 0x2fd   : > { %11045 = vst [vmem:[#allocation24_spill] sm:$0xff] %v9718_v55 }
 0x2fe   : > { %6663 = vmatmul.mubr.msk.bf16.gmra.mrb[48].mxu1 %vm572_vm2, %v9161_v56  ;;  %6767 = vmatmul.mubr.msk.bf16.gmra.mrb[32].mxu0 %vm572_vm2, %v9585_v61 }
 0x2ff   : > { %3015 = vmatprep.mubr.bf16.mxu1 %v11029_v6  ;;  %4268 = vmatprep.mubr.bf16.mxu0 %v11029_v6 }
 0x301   : > { %v9726_v54 = vpop.f32.mrb[88].mxu1 }
 0x302   : > { %11046 = vst [vmem:[#allocation25_spill] sm:$0xff] %v9726_v54  ;;  %v9728_v32 = vpop.f32.mrb[89].mxu1 }
 0x303   : > { %11047 = vst [vmem:[#allocation26_spill] sm:$0xff] %v9728_v32  ;;  %v9730_v13 = vpop.f32.mrb[90].mxu1 }
 0x304   : > { %11048 = vst [vmem:[#allocation27_spill] sm:$0xff] %v9730_v13  ;;  %v9732_v25 = vpop.f32.mrb[91].mxu1 }
 0x305   : > { %11049 = vst [vmem:[#allocation28_spill] sm:$0xff] %v9732_v25  ;;  %v3904_v25 = vpop.permute.xlu0 %3903 }
 0x306   : > { %6664 = vmatmul.mubr.msk.bf16.gmra.mrb[52].mxu1 %vm572_vm2, %v9177_v12  ;;  %6768 = vmatmul.mubr.msk.bf16.gmra.mrb[36].mxu0 %vm572_vm2, %v9596_v62  ;;  %v3921_v20 = vsel %vm3911_vm6, %v3904_v25, %v9534_v50  ;;  %v3920_v45 = vsel %vm3911_vm6, %v9437_v57, %v3904_v25  ;;  %v9810_v50 = vld [vmem:[%s11002_s1 + $0x1c8] sm:$0xff]  }
 0x307   : > { %3025 = vmatprep.mubr.bf16.mxu1 %v11029_v6  ;;  %4278 = vmatprep.mubr.bf16.mxu0 %v11029_v6 }
 0x309   : > { %v9740_v56 = vpop.f32.mrb[92].mxu1 }
 0x30a   : > { %11050 = vst [vmem:[#allocation29_spill] sm:$0xff] %v9740_v56  ;;  %v9742_v55 = vpop.f32.mrb[93].mxu1 }
 0x30b   : > { %11051 = vst [vmem:[#allocation30_spill] sm:$0xff] %v9742_v55  ;;  %v9744_v54 = vpop.f32.mrb[94].mxu1 }
 0x30c   : > { %11052 = vst [vmem:[#allocation31_spill] sm:$0xff] %v9744_v54  ;;  %v9746_v32 = vpop.f32.mrb[95].mxu1  ;;  %v4461_v54 = vpop.permute.xlu1 %4460 }
 0x30d   : > { %11053 = vst [vmem:[#allocation32_spill] sm:$0xff] %v9746_v32  ;;  %v4485_v40 = vsel %vm4480_vm7, %v4461_v54, %v9674_v16 }
 0x30e   : > { %6665 = vmatmul.mubr.msk.bf16.gmra.mrb[56].mxu1 %vm572_vm2, %v9189_v24  ;;  %6769 = vmatmul.mubr.msk.bf16.gmra.mrb[40].mxu0 %vm572_vm2, %v9607_v14  ;;  %v4479_v24 = vpop.permute.xlu0 %4478 }
 0x30f   : > { %3035 = vmatprep.mubr.bf16.mxu1 %v11029_v6  ;;  %4288 = vmatprep.mubr.bf16.mxu0 %v11029_v6 }
 0x310   : > { %v4477_v1 = vpop.permute.xlu1 %4476 }
 0x311   : > { %v9754_v12 = vpop.f32.mrb[16].mxu1  ;;  %v4492_v46 = vsel %vm4480_vm7, %v4477_v1, %v4479_v24  ;;  %v9835_v24 = vld [vmem:[%s11002_s1 + $0x1d0] sm:$0xff]  }
 0x312   : > { %v9756_v56 = vpop.f32.mrb[17].mxu1  ;;  %v9781_v41 = vpop.permute.xlu0 %4458 }
 0x313   : > { %v9758_v55 = vpop.f32.mrb[18].mxu1  ;;  %v4484_v15 = vsel %vm4480_vm7, %v9781_v41, %v4461_v54 }
 0x314   : > { %v9760_v13 = vpop.f32.mrb[19].mxu1  ;;  %v9795_v47 = vpop.permute.xlu1 %4474 }
 0x316   : > { %6666 = vmatmul.mubr.msk.bf16.gmra.mrb[60].mxu1 %vm572_vm2, %v9200_v19  ;;  %6770 = vmatmul.mubr.msk.bf16.gmra.mrb[44].mxu0 %vm572_vm2, %v9622_v59 }
 0x317   : > { %3536 = vmatprep.mubr.bf16.mxu1 %v11029_v6  ;;  %4561 = vmatprep.mubr.bf16.mxu0 %v11029_v6 }
 0x318   : > { %v5024_v57 = vpop.permute.xlu1 %5023 }
 0x319   : > { %v9768_v32 = vpop.f32.mrb[20].mxu1 }
 0x31a   : > { %v9770_v10 = vpop.f32.mrb[21].mxu1 }
 0x31b   : > { %v9777_v39 = vpop.f32.mrb[22].mxu1 }
 0x31c   : > { %v9779_v19 = vpop.f32.mrb[23].mxu1 }
 0x31e   : > { %6707 = vmatmul.mubr.msk.bf16.vlgmr.msra.gmra.mrb[32].mxu1 %vm572_vm2, %v9290_v4  ;;  %6795 = vmatmul.mubr.msk.bf16.vlgmr.msra.gmra.mrb[0].mxu0 %vm572_vm2, %v9775_v8 }
 0x31f   : > { %4074 = vmatpush1.bf16.msra.mxu1 %v3914_v31  ;;  %3546 = vmatprep.mubr.bf16.mxu1 %v11029_v6  ;;  %v9814_v31 = vpop.permute.xlu0 %5025 }
 0x320   : > { %4075 = vmatprep.subr.bf16.mxu1 %v3921_v20  ;;  %4571 = vmatprep.mubr.bf16.mxu0 %v11029_v6  ;;  %v4491_v20 = vsel %vm4480_vm7, %v9795_v47, %v4477_v1  ;;  %v5051_v25 = vsel %vm5049_vm8, %v5024_v57, %v9814_v31 }
 0x321   : > { %v9799_v4 = vpop.f32.mrb[24].mxu1  ;;  %4756 = vmatpush1.bf16.msra.mxu0 %v4485_v40 }
 0x322   : > { %v9805_v16 = vpop.f32.mrb[25].mxu1  ;;  %4757 = vmatprep.subr.bf16.mxu0 %v4492_v46 }
 0x323   : > { %4076 = vmatpush1.bf16.msra.mxu1 %v3920_v45  ;;  %v9816_v40 = vpop.f32.mrb[26].mxu1  ;;  %v9850_v45 = vld [vmem:[%s11002_s1 + $0x1d8] sm:$0xff]   ;;  %v4473_v7 = vpop.permute.xlu0 %4472 }
 0x324   : > { %v9818_v54 = vpop.f32.mrb[27].mxu1  ;;  %4642 = vmatprep.subr.bf16.mxu1 %v4484_v15 }
 0x325   : > { %4758 = vmatpush1.bf16.msra.mxu0 %v4491_v20  ;;  %v5022_v20 = vpop.permute.xlu1 %5021 }
 0x326   : > { %6708 = vmatmul.mubr.msk.bf16.gmra.mrb[36].mxu1 %vm572_vm2, %v9322_v58  ;;  %6796 = vmatmul.mubr.msk.bf16.gmra.mrb[4].mxu0 %vm572_vm2, %v9810_v50 }
 0x327   : > { %3556 = vmatprep.mubr.bf16.mxu1 %v11029_v6  ;;  %4581 = vmatprep.mubr.bf16.mxu0 %v11029_v6 }
 0x328   : > { %5098 = vmatprep.subr.bf16.mxu0 %v5051_v25 }
 0x329   : > { %v9828_v46 = vpop.f32.mrb[28].mxu1  ;;  %v5038_v25 = vpop.permute.xlu1 %5037 }
 0x32a   : > { %11054 = vst [vmem:[#allocation33_spill] sm:$0xff] %v9828_v46  ;;  %v9830_v1 = vpop.f32.mrb[29].mxu1  ;;  %v4490_v46 = vsel %vm4480_vm7, %v4473_v7, %v9795_v47 }
 0x32b   : > { %11055 = vst [vmem:[#allocation34_spill] sm:$0xff] %v9830_v1  ;;  %v9837_v15 = vpop.f32.mrb[30].mxu1 }
 0x32c   : > { %11056 = vst [vmem:[#allocation35_spill] sm:$0xff] %v9837_v15  ;;  %v9839_v58 = vpop.f32.mrb[31].mxu1 }
 0x32d   : > { %11057 = vst [vmem:[#allocation36_spill] sm:$0xff] %v9839_v58  ;;  %v5036_v35 = vpop.permute.xlu1 %5035  ;;  %v4483_v58 = vsel %vm4480_vm7, %v9550_v37, %v9781_v41  ;;  %v4489_v37 = vsel %vm4480_vm7, %v9632_v11, %v4473_v7  ;;  %v7926_v7 = vld [vmem:[%s11002_s1 + $0x208] sm:$0xff]  }
 0x32e   : > { %6709 = vmatmul.mubr.msk.bf16.gmra.mrb[40].mxu1 %vm572_vm2, %v9344_v28  ;;  %6797 = vmatmul.mubr.msk.bf16.gmra.mrb[8].mxu0 %vm572_vm2, %v9835_v24  ;;  %v9861_v28 = vld [vmem:[%s11002_s1 + $0x1e0] sm:$0xff]   ;;  %v5056_v41 = vsel %vm5049_vm8, %v5036_v35, %v5038_v25 }
 0x32f   : > { %3566 = vmatprep.mubr.bf16.mxu1 %v11029_v6  ;;  %4591 = vmatprep.mubr.bf16.mxu0 %v11029_v6 }
 0x331   : > { %v5030_v1 = vpop.permute.xlu1 %5029 }
 0x335   : > { %v5034_v47 = vpop.permute.xlu1 %5033 }
 0x336   : > { %6710 = vmatmul.mubr.msk.bf16.gmra.mrb[44].mxu1 %vm572_vm2, %v9357_v33  ;;  %6798 = vmatmul.mubr.msk.bf16.gmra.mrb[12].mxu0 %vm572_vm2, %v9850_v45  ;;  %v9872_v33 = vld [vmem:[%s11002_s1 + $0x1e8] sm:$0xff]  }
 0x337   : > { %3576 = vmatprep.mubr.bf16.mxu1 %v11029_v6  ;;  %4601 = vmatprep.mubr.bf16.mxu0 %v11029_v6 }
 0x33e   : > { %6711 = vmatmul.mubr.msk.bf16.gmra.mrb[48].mxu1 %vm572_vm2, %v9368_v38  ;;  %6799 = vmatmul.mubr.msk.bf16.gmra.mrb[48].mxu0 %vm572_vm2, %v9861_v28  ;;  %v9883_v38 = vld [vmem:[%s11002_s1 + $0x1f0] sm:$0xff]  }
 0x33f   : > { %3586 = vmatprep.mubr.bf16.mxu1 %v11029_v6  ;;  %4611 = vmatprep.mubr.bf16.mxu0 %v11029_v6 }
 0x346   : > { %6712 = vmatmul.mubr.msk.bf16.gmra.mrb[52].mxu1 %vm572_vm2, %v9388_v0  ;;  %6800 = vmatmul.mubr.msk.bf16.gmra.mrb[52].mxu0 %vm572_vm2, %v9872_v33  ;;  %v9894_v0 = vld [vmem:[%s11002_s1 + $0x1f8] sm:$0xff]  }
 0x347   : > { %3596 = vmatprep.mubr.bf16.mxu1 %v11029_v6  ;;  %4621 = vmatprep.mubr.bf16.mxu0 %v11029_v6 }
 0x34e   : > { %6713 = vmatmul.mubr.msk.bf16.gmra.mrb[56].mxu1 %vm572_vm2, %v9402_v63  ;;  %6801 = vmatmul.mubr.msk.bf16.gmra.mrb[56].mxu0 %vm572_vm2, %v9883_v38  ;;  %v9902_v63 = vpop.permute.xlu0 %5039 }
 0x34f   : > { %3606 = vmatprep.mubr.bf16.mxu1 %v11029_v6  ;;  %4631 = vmatprep.mubr.bf16.mxu0 %v11029_v6  ;;  %v5057_v49 = vsel %vm5049_vm8, %v5038_v25, %v9902_v63 }
 0x352   : > { %v5028_v15 = vpop.permute.xlu0 %5027 }
 0x356   : > { %6714 = vmatmul.mubr.msk.bf16.gmra.mrb[60].mxu1 %vm572_vm2, %v9417_v36  ;;  %6802 = vmatmul.mubr.msk.bf16.gmra.mrb[60].mxu0 %vm572_vm2, %v9894_v0  ;;  %v5050_v36 = vsel %vm5049_vm8, %v5022_v20, %v5024_v57  ;;  %v5032_v57 = vpop.permute.xlu0 %5031 }
 0x357   : > { %4105 = vmatprep.mubr.bf16.mxu1 %v11029_v6  ;;  %4787 = vmatprep.mubr.bf16.mxu0 %v11029_v6 }
 0x35e   : > { %6755 = vmatmul.mubr.msk.bf16.vlgmr.msra.gmra.mrb[32].mxu1 %vm572_vm2, %v9522_v26  ;;  %6811 = vmatmul.mubr.msk.bf16.vlgmr.msra.gmra.mrb[16].mxu0 %vm572_vm2, %v9775_v8  ;;  %v5053_v26 = vsel %vm5049_vm8, %v5028_v15, %v5030_v1 }
 0x35f   : > { %4643 = vmatpush1.bf16.msra.mxu1 %v4483_v58  ;;  %4115 = vmatprep.mubr.bf16.mxu1 %v11029_v6  ;;  %v5055_v58 = vsel %vm5049_vm8, %v5032_v57, %v5034_v47  ;;  %v314_v47 = vld [vmem:[%s8381_s25 + $0x48] sm:$0xff] }
 0x360   : > { %4644 = vmatprep.subr.bf16.mxu1 %v4490_v46  ;;  %4797 = vmatprep.mubr.bf16.mxu0 %v11029_v6  ;;  %v7929_v46 = vld [vmem:[%s11002_s1 + $0x220] sm:$0xff]  }
 0x361   : > { %5099 = vmatpush1.bf16.msra.mxu0 %v5050_v36  ;;  %v311_v36 = vld [vmem:[%s8381_s25 + $0x30] sm:$0xff] }
 0x362   : > { %5100 = vmatprep.subr.bf16.mxu0 %v5057_v49  ;;  %v5054_v49 = vsel %vm5049_vm8, %v5030_v1, %v5032_v57  ;;  %v7930_v1 = vld [vmem:[%s11002_s1 + $0x228] sm:$0xff]  }
 0x363   : > { %4645 = vmatpush1.bf16.msra.mxu1 %v4489_v37 }
 0x364   : > { %5211 = vmatprep.subr.bf16.mxu1 %v5053_v26 }
 0x365   : > { %5101 = vmatpush1.bf16.msra.mxu0 %v5056_v41 }
 0x366   : > { %6756 = vmatmul.mubr.msk.bf16.gmra.mrb[36].mxu1 %vm572_vm2, %v9542_v51  ;;  %6812 = vmatmul.mubr.msk.bf16.gmra.mrb[20].mxu0 %vm572_vm2, %v9810_v50  ;;  %v5042_v51 = vpop.permute.xlu0 %5041 }
 0x367   : > { %4125 = vmatprep.mubr.bf16.mxu1 %v11029_v6  ;;  %4807 = vmatprep.mubr.bf16.mxu0 %v11029_v6  ;;  %v5058_v35 = vsel %vm5049_vm8, %v9902_v63, %v5042_v51 }
 0x368   : > { %5324 = vmatprep.subr.bf16.mxu0 %v5055_v58 }
 0x36e   : > { %6757 = vmatmul.mubr.msk.bf16.gmra.mrb[40].mxu1 %vm572_vm2, %v9563_v43  ;;  %6813 = vmatmul.mubr.msk.bf16.gmra.mrb[24].mxu0 %vm572_vm2, %v9835_v24  ;;  %v5044_v43 = vpop.permute.xlu1 %5043 }
 0x36f   : > { %4135 = vmatprep.mubr.bf16.mxu1 %v11029_v6  ;;  %4817 = vmatprep.mubr.bf16.mxu0 %v11029_v6 }
 0x376   : > { %6758 = vmatmul.mubr.msk.bf16.gmra.mrb[44].mxu1 %vm572_vm2, %v9574_v60  ;;  %6814 = vmatmul.mubr.msk.bf16.gmra.mrb[28].mxu0 %vm572_vm2, %v9850_v45  ;;  %v7925_v60 = vld [vmem:[%s11002_s1 + $0x200] sm:$0xff]  }
 0x377   : > { %4145 = vmatprep.mubr.bf16.mxu1 %v11029_v6  ;;  %4827 = vmatprep.mubr.bf16.mxu0 %v11029_v6 }
 0x37e   : > { %6759 = vmatmul.mubr.msk.bf16.gmra.mrb[48].mxu1 %vm572_vm2, %v9585_v61  ;;  %6815 = vmatmul.mubr.msk.bf16.gmra.mrb[32].mxu0 %vm572_vm2, %v9861_v28  ;;  %v5048_v61 = vpop.permute.xlu1 %5047 }
 0x37f   : > { %4155 = vmatprep.mubr.bf16.mxu1 %v11029_v6  ;;  %4837 = vmatprep.mubr.bf16.mxu0 %v11029_v6 }
 0x386   : > { %6760 = vmatmul.mubr.msk.bf16.gmra.mrb[52].mxu1 %vm572_vm2, %v9596_v62  ;;  %6816 = vmatmul.mubr.msk.bf16.gmra.mrb[36].mxu0 %vm572_vm2, %v9872_v33  ;;  %v5046_v62 = vpop.permute.xlu0 %5045 }
 0x387   : > { %4165 = vmatprep.mubr.bf16.mxu1 %v11029_v6  ;;  %4847 = vmatprep.mubr.bf16.mxu0 %v11029_v6  ;;  %v5061_v11 = vsel %vm5049_vm8, %v5046_v62, %v5048_v61 }
 0x38e   : > { %6761 = vmatmul.mubr.msk.bf16.gmra.mrb[56].mxu1 %vm572_vm2, %v9607_v14  ;;  %6817 = vmatmul.mubr.msk.bf16.gmra.mrb[40].mxu0 %vm572_vm2, %v9883_v38  ;;  %v5059_v14 = vsel %vm5049_vm8, %v5042_v51, %v5044_v43 }
 0x38f   : > { %4175 = vmatprep.mubr.bf16.mxu1 %v11029_v6  ;;  %4857 = vmatprep.mubr.bf16.mxu0 %v11029_v6 }
 0x396   : > { %6762 = vmatmul.mubr.msk.bf16.gmra.mrb[60].mxu1 %vm572_vm2, %v9622_v59  ;;  %6818 = vmatmul.mubr.msk.bf16.gmra.mrb[44].mxu0 %vm572_vm2, %v9894_v0  ;;  %v5052_v59 = vsel %vm5049_vm8, %v9814_v31, %v5028_v15  ;;  %v7927_v31 = vld [vmem:[%s11002_s1 + $0x210] sm:$0xff]   ;;  %v7932_v15 = vld [vmem:[%s11002_s1 + $0x238] sm:$0xff]  }
 0x397   : > { %4674 = vmatprep.mubr.bf16.mxu1 %v11029_v6  ;;  %5130 = vmatprep.mubr.bf16.mxu0 %v11029_v6 }
 0x39e   : > { %6803 = vmatmul.mubr.msk.bf16.vlgmr.msra.gmra.mrb[32].mxu1 %vm572_vm2, %v9775_v8  ;;  %6843 = vmatmul.mubr.msk.bf16.vlgmr.msra.gmra.mrb[0].mxu0 %vm572_vm2, %v7925_v60  ;;  %v5060_v8 = vsel %vm5049_vm8, %v5044_v43, %v5046_v62  ;;  %v365_v43 = vunpack.c.l.bf16 %v311_v36 }
 0x39f   : > { %5212 = vmatpush1.bf16.msra.mxu1 %v5052_v59  ;;  %4684 = vmatprep.mubr.bf16.mxu1 %v11029_v6 }
 0x3a0   : > { %5213 = vmatprep.subr.bf16.mxu1 %v5059_v14  ;;  %5140 = vmatprep.mubr.bf16.mxu0 %v11029_v6  ;;  %v366_v14 = vunpack.c.h.bf16 %v311_v36 }
 0x3a1   : > { %5325 = vmatpush1.bf16.msra.mxu0 %v5054_v49  ;;  %v372_v49 = vunpack.c.h.bf16 %v314_v47 }
 0x3a2   : > { %5326 = vmatprep.subr.bf16.mxu0 %v5061_v11  ;;  %v6986_v11 = vadd.f32 %v9429_v30, %v365_v43  ;;  %v10082_v30 = vld [vmem:[%s8381_s25 + $0x90] sm:$0xff] }
 0x3a3   : > { %5214 = vmatpush1.bf16.msra.mxu1 %v5058_v35  ;;  %v6988_v35 = vadd.f32 %v9431_v23, %v366_v14 }
 0x3a5   : > { %5327 = vmatpush1.bf16.msra.mxu0 %v5060_v8 }
 0x3a6   : > { %6804 = vmatmul.mubr.msk.bf16.gmra.mrb[36].mxu1 %vm572_vm2, %v9810_v50  ;;  %6844 = vmatmul.mubr.msk.bf16.gmra.mrb[4].mxu0 %vm572_vm2, %v7926_v7  ;;  %v7928_v50 = vld [vmem:[%s11002_s1 + $0x218] sm:$0xff]  }
 0x3a7   : > { %4694 = vmatprep.mubr.bf16.mxu1 %v11029_v6  ;;  %5150 = vmatprep.mubr.bf16.mxu0 %v11029_v6 }
 0x3ae   : > { %6805 = vmatmul.mubr.msk.bf16.gmra.mrb[40].mxu1 %vm572_vm2, %v9835_v24  ;;  %6845 = vmatmul.mubr.msk.bf16.gmra.mrb[8].mxu0 %vm572_vm2, %v7927_v31  ;;  %v7931_v24 = vld [vmem:[%s11002_s1 + $0x230] sm:$0xff]  }
 0x3af   : > { %4704 = vmatprep.mubr.bf16.mxu1 %v11029_v6  ;;  %5160 = vmatprep.mubr.bf16.mxu0 %v11029_v6 }
 0x3b6   : > { %6806 = vmatmul.mubr.msk.bf16.gmra.mrb[44].mxu1 %vm572_vm2, %v9850_v45  ;;  %6846 = vmatmul.mubr.msk.bf16.gmra.mrb[12].mxu0 %vm572_vm2, %v7928_v50  ;;  %v305_v45 = vld [vmem:[%s8381_s25] sm:$0xff] }
 0x3b7   : > { %4714 = vmatprep.mubr.bf16.mxu1 %v11029_v6  ;;  %5170 = vmatprep.mubr.bf16.mxu0 %v11029_v6 }
 0x3be   : > { %6807 = vmatmul.mubr.msk.bf16.gmra.mrb[48].mxu1 %vm572_vm2, %v9861_v28  ;;  %6847 = vmatmul.mubr.msk.bf16.gmra.mrb[48].mxu0 %vm572_vm2, %v7929_v46  ;;  %v308_v28 = vld [vmem:[%s8381_s25 + $0x18] sm:$0xff] }
 0x3bf   : > { %4724 = vmatprep.mubr.bf16.mxu1 %v11029_v6  ;;  %5180 = vmatprep.mubr.bf16.mxu0 %v11029_v6  ;;  %v359_v20 = vunpack.c.l.bf16 %v308_v28 }
 0x3c1   : > { %v6982_v37 = vadd.f32 %v9419_v5, %v359_v20  ;;  %v10085_v20 = vld [vmem:[%s8381_s25 + $0xa8] sm:$0xff] }
 0x3c6   : > { %6808 = vmatmul.mubr.msk.bf16.gmra.mrb[52].mxu1 %vm572_vm2, %v9872_v33  ;;  %6848 = vmatmul.mubr.msk.bf16.gmra.mrb[52].mxu0 %vm572_vm2, %v7930_v1  ;;  %v353_v33 = vunpack.c.l.bf16 %v305_v45 }
 0x3c7   : > { %4734 = vmatprep.mubr.bf16.mxu1 %v11029_v6  ;;  %5190 = vmatprep.mubr.bf16.mxu0 %v11029_v6 }
 0x3c8   : > { %v6978_v25 = vadd.f32 %v9410_v21, %v353_v33 }
 0x3ce   : > { %6809 = vmatmul.mubr.msk.bf16.gmra.mrb[56].mxu1 %vm572_vm2, %v9883_v38  ;;  %6849 = vmatmul.mubr.msk.bf16.gmra.mrb[56].mxu0 %vm572_vm2, %v7931_v24  ;;  %v354_v38 = vunpack.c.h.bf16 %v305_v45 }
 0x3cf   : > { %4744 = vmatprep.mubr.bf16.mxu1 %v11029_v6  ;;  %5200 = vmatprep.mubr.bf16.mxu0 %v11029_v6 }
 0x3d0   : > { %v6980_v63 = vadd.f32 %v9412_v22, %v354_v38  ;;  %v371_v22 = vunpack.c.l.bf16 %v314_v47  ;;  %v395_v47 = vunpack.c.l.bf16 %v10085_v20 }
 0x3d6   : > { %6810 = vmatmul.mubr.msk.bf16.gmra.mrb[60].mxu1 %vm572_vm2, %v9894_v0  ;;  %6850 = vmatmul.mubr.msk.bf16.gmra.mrb[60].mxu0 %vm572_vm2, %v7932_v15  ;;  %v360_v0 = vunpack.c.h.bf16 %v308_v28 }
 0x3d7   : > { %5243 = vmatprep.mubr.bf16.mxu1 %v11029_v6  ;;  %5356 = vmatprep.mubr.bf16.mxu0 %v11029_v6 }
 0x3d8   : > { %v6984_v57 = vadd.f32 %v9421_v42, %v360_v0 }
 0x3de   : > { %6851 = vmatmul.mubr.msk.bf16.vlgmr.msra.gmra.mrb[32].mxu1 %vm572_vm2, %v7925_v60  ;;  %6859 = vmatmul.mubr.msk.bf16.vlgmr.msra.gmra.mrb[16].mxu0 %vm572_vm2, %v7925_v60 }
 0x3df   : > { %5253 = vmatprep.mubr.bf16.mxu1 %v11029_v6  ;;  %5366 = vmatprep.mubr.bf16.mxu0 %v11029_v6 }
 0x3e6   : > { %6852 = vmatmul.mubr.msk.bf16.gmra.mrb[36].mxu1 %vm572_vm2, %v7926_v7  ;;  %6860 = vmatmul.mubr.msk.bf16.gmra.mrb[20].mxu0 %vm572_vm2, %v7926_v7  ;;  %v317_v7 = vld [vmem:[%s8381_s25 + $0x60] sm:$0xff] }
 0x3e7   : > { %5263 = vmatprep.mubr.bf16.mxu1 %v11029_v6  ;;  %5376 = vmatprep.mubr.bf16.mxu0 %v11029_v6  ;;  %v377_v28 = vunpack.c.l.bf16 %v317_v7 }
 0x3ee   : > { %6853 = vmatmul.mubr.msk.bf16.gmra.mrb[40].mxu1 %vm572_vm2, %v7927_v31  ;;  %6861 = vmatmul.mubr.msk.bf16.gmra.mrb[24].mxu0 %vm572_vm2, %v7927_v31  ;;  %v6990_v31 = vadd.f32 %v9433_v52, %v371_v22  ;;  %v378_v52 = vunpack.c.h.bf16 %v317_v7 }
 0x3ef   : > { %5273 = vmatprep.mubr.bf16.mxu1 %v11029_v6  ;;  %5386 = vmatprep.mubr.bf16.mxu0 %v11029_v6 }
 0x3f0   : > { %v6996_v43 = vadd.f32 %v9458_v17, %v378_v52 }
 0x3f6   : > { %6854 = vmatmul.mubr.msk.bf16.gmra.mrb[44].mxu1 %vm572_vm2, %v7928_v50  ;;  %6862 = vmatmul.mubr.msk.bf16.gmra.mrb[28].mxu0 %vm572_vm2, %v7928_v50 }
 0x3f7   : > { %5283 = vmatprep.mubr.bf16.mxu1 %v11029_v6  ;;  %5396 = vmatprep.mubr.bf16.mxu0 %v11029_v6 }
 0x3fe   : > { %6855 = vmatmul.mubr.msk.bf16.gmra.mrb[48].mxu1 %vm572_vm2, %v7929_v46  ;;  %6863 = vmatmul.mubr.msk.bf16.gmra.mrb[32].mxu0 %vm572_vm2, %v7929_v46 }
 0x3ff   : > { %5293 = vmatprep.mubr.bf16.mxu1 %v11029_v6  ;;  %5406 = vmatprep.mubr.bf16.mxu0 %v11029_v6 }
 0x406   : > { %6856 = vmatmul.mubr.msk.bf16.gmra.mrb[52].mxu1 %vm572_vm2, %v7930_v1  ;;  %6864 = vmatmul.mubr.msk.bf16.gmra.mrb[36].mxu0 %vm572_vm2, %v7930_v1  ;;  %v6992_v1 = vadd.f32 %v9435_v3, %v372_v49  ;;  %v10088_v3 = vld [vmem:[%s8381_s25 + $0x10] sm:$0xff] }
 0x407   : > { %5303 = vmatprep.mubr.bf16.mxu1 %v11029_v6  ;;  %5416 = vmatprep.mubr.bf16.mxu0 %v11029_v6 }
 0x40e   : > { %6857 = vmatmul.mubr.msk.bf16.gmra.mrb[56].mxu1 %vm572_vm2, %v7931_v24  ;;  %6865 = vmatmul.mubr.msk.bf16.gmra.mrb[40].mxu0 %vm572_vm2, %v7931_v24  ;;  %v320_v24 = vld [vmem:[%s8381_s25 + $0x78] sm:$0xff] }
 0x40f   : > { %5313 = vmatprep.mubr.bf16.mxu1 %v11029_v6  ;;  %5426 = vmatprep.mubr.bf16.mxu0 %v11029_v6 }
 0x416   : > { %6858 = vmatmul.mubr.msk.bf16.gmra.mrb[60].mxu1 %vm572_vm2, %v7932_v15  ;;  %6866 = vmatmul.mubr.msk.bf16.gmra.mrb[44].mxu0 %vm572_vm2, %v7932_v15 }
 0x471   : > { %v5132_v26 = vpop.f32.mrb[0].mxu0 }
 0x472   : > { %v6979_v6 = vadd.f32 %v6978_v25, %v5132_v26  ;;  %v5134_v41 = vpop.f32.mrb[1].mxu0  ;;  %v384_v26 = vunpack.c.h.bf16 %v320_v24 }
 0x473   : > { %v6981_v58 = vadd.f32 %v6980_v63, %v5134_v41  ;;  %v5136_v51 = vpop.f32.mrb[2].mxu0  ;;  %v383_v63 = vunpack.c.l.bf16 %v320_v24  ;;  %v6994_v41 = vadd.f32 %v9454_v9, %v377_v28  ;;  %v10102_v9 = vld [vmem:[%s8381_s25 + $0x40] sm:$0xff] }
 0x474   : > { %v6867_v60 = vmul.f32 -1.442695, %v6979_v6  ;;  %v6983_v61 = vadd.f32 %v6982_v37, %v5136_v51  ;;  %v5138_v62 = vpop.f32.mrb[3].mxu0  ;;  %v389_v37 = vunpack.c.l.bf16 %v10082_v30  ;;  %v7000_v49 = vadd.f32 %v9463_v48, %v384_v26 }
 0x475   : > { %v6985_v21 = vadd.f32 %v6984_v57, %v5138_v62  ;;  %v6868_v59 = vmul.f32 -1.442695, %v6981_v58  ;;  %v390_v57 = vunpack.c.h.bf16 %v10082_v30  ;;  %v10095_v58 = vld [vmem:[%s8381_s25 + $0x28] sm:$0xff]  ;;  %v6998_v14 = vadd.f32 %v9461_v27, %v383_v63 }
 0x476   : > { %7933 = vpow2.f32 %v6867_v60  ;;  %v6873_v5 = vmul.f32 -1.442695, %v6983_v61  ;;  %v396_v60 = vunpack.c.h.bf16 %v10085_v20  ;;  %v357_v61 = vunpack.c.l.bf16 %v10088_v3 }
 0x477   : > { %v6874_v42 = vmul.f32 -1.442695, %v6985_v21  ;;  %7935 = vpow2.f32 %v6868_v59  ;;  %v363_v17 = vunpack.c.l.bf16 %v10095_v58  ;;  %v364_v27 = vunpack.c.h.bf16 %v10095_v58 }
 0x478   : > { %7937 = vpow2.f32 %v6873_v5  ;;  %v358_v5 = vunpack.c.h.bf16 %v10088_v3  ;;  %v369_v48 = vunpack.c.l.bf16 %v10102_v9  ;;  %v370_v24 = vunpack.c.h.bf16 %v10102_v9 }
 0x479   : > { %v5142_v8 = vpop.f32.mrb[4].mxu0  ;;  %7939 = vpow2.f32 %v6874_v42  ;;  %v7002_v63 = vadd.f32 %v9473_v53, %v389_v37 }
 0x47a   : > { %v6987_v50 = vadd.f32 %v6986_v11, %v5142_v8  ;;  %v5144_v46 = vpop.f32.mrb[5].mxu0  ;;  %v10108_v11 = vld [vmem:[%s8381_s25 + $0x58] sm:$0xff]  ;;  %v10112_v8 = vld [vmem:[%s8381_s25 + $0x70] sm:$0xff] }
 0x47b   : > { %v6989_v15 = vadd.f32 %v6988_v35, %v5144_v46  ;;  %v5146_v45 = vpop.f32.mrb[6].mxu0  ;;  %v375_v30 = vunpack.c.l.bf16 %v10108_v11  ;;  %v381_v52 = vunpack.c.l.bf16 %v10112_v8 }
 0x47c   : > { %v6879_v23 = vmul.f32 -1.442695, %v6987_v50  ;;  %v6991_v33 = vadd.f32 %v6990_v31, %v5146_v45  ;;  %v5148_v38 = vpop.f32.mrb[7].mxu0 }
 0x47d   : > { %v6880_v0 = vmul.f32 -1.442695, %v6989_v15  ;;  %v6993_v25 = vadd.f32 %v6992_v1, %v5148_v38 }
 0x47e   : > { %7941 = vpow2.f32 %v6879_v23  ;;  %v6885_v36 = vmul.f32 -1.442695, %v6991_v33  ;;  %v376_v23 = vunpack.c.h.bf16 %v10108_v11  ;;  %v10119_v33 = vld [vmem:[%s8381_s25 + $0x88] sm:$0xff] }
 0x47f   : > { %v6886_v51 = vmul.f32 -1.442695, %v6993_v25  ;;  %7943 = vpow2.f32 %v6880_v0 }
 0x480   : > { %v7934_v6 = vpop.eup %7933  ;;  %7945 = vpow2.f32 %v6885_v36  ;;  %v382_v36 = vunpack.c.h.bf16 %v10112_v8  ;;  %v5996_v8 = vld [vmem:[%s11005_s4 + $0x38] sm:$0xff] }
 0x481   : > { %v5152_v62 = vpop.f32.mrb[8].mxu0  ;;  %v5605_v21 = vadd.f32 1.0, %v7934_v6  ;;  %v7936_v7 = vpop.eup %7935  ;;  %7947 = vpow2.f32 %v6886_v51  ;;  %v7004_v6 = vadd.f32 %v9475_v2, %v390_v57  ;;  %v329_v51 = vld [vmem:[%s8381_s25 + $0xc0] sm:$0xff] }
 0x482   : > { %v6995_v22 = vadd.f32 %v6994_v41, %v5152_v62  ;;  %v5154_v59 = vpop.f32.mrb[9].mxu0  ;;  %v7938_v1 = vpop.eup %7937  ;;  %v5606_v20 = vadd.f32 1.0, %v7936_v7  ;;  %v387_v41 = vunpack.c.l.bf16 %v10119_v33  ;;  %v10132_v7 = vld [vmem:[%s8381_s25 + $0xa0] sm:$0xff] }
 0x483   : > { %v6997_v42 = vadd.f32 %v6996_v43, %v5154_v59  ;;  %v5156_v35 = vpop.f32.mrb[10].mxu0  ;;  %v7940_v28 = vpop.eup %7939  ;;  %7949 = vrcp.f32 %v5605_v21  ;;  %v5611_v26 = vadd.f32 1.0, %v7938_v1  ;;  %v7008_v59 = vadd.f32 %v9479_v18, %v396_v60  ;;  %v10135_v60 = vld [vmem:[%s8381_s25 + $0xb8] sm:$0xff] }
 0x484   : > { %v6891_v31 = vmul.f32 -1.442695, %v6995_v22  ;;  %v6999_v50 = vadd.f32 %v6998_v14, %v5156_v35  ;;  %v5158_v46 = vpop.f32.mrb[11].mxu0  ;;  %v5612_v43 = vadd.f32 1.0, %v7940_v28  ;;  %v7006_v14 = vadd.f32 %v9477_v34, %v395_v47 }
 0x485   : > { %v6892_v15 = vmul.f32 -1.442695, %v6997_v42  ;;  %v7001_v45 = vadd.f32 %v7000_v49, %v5158_v46  ;;  %v332_v42 = vld [vmem:[%s8381_s25 + $0xd8] sm:$0xff]  ;;  %v402_v46 = vunpack.c.h.bf16 %v329_v51 }
 0x486   : > { %v6897_v38 = vmul.f32 -1.442695, %v6999_v50  ;;  %7951 = vpow2.f32 %v6891_v31  ;;  %v401_v31 = vunpack.c.l.bf16 %v329_v51 }
 0x487   : > { %v6898_v0 = vmul.f32 -1.442695, %v7001_v45  ;;  %7953 = vpow2.f32 %v6892_v15  ;;  %v407_v45 = vunpack.c.l.bf16 %v332_v42 }
 0x488   : > { %v7942_v25 = vpop.eup %7941  ;;  %7955 = vpow2.f32 %v6897_v38 }
 0x489   : > { %v5162_v62 = vpop.f32.mrb[12].mxu0  ;;  %v5617_v21 = vadd.f32 1.0, %v7942_v25  ;;  %7957 = vpow2.f32 %v6898_v0  ;;  %v7944_v37 = vpop.eup %7943  ;;  %v408_v0 = vunpack.c.h.bf16 %v332_v42 }
 0x48a   : > { %v7003_v22 = vadd.f32 %v7002_v63, %v5162_v62  ;;  %v5164_v53 = vpop.f32.mrb[13].mxu0  ;;  %7959 = vrcp.f32 %v5606_v20  ;;  %v7946_v35 = vpop.eup %7945  ;;  %v5618_v28 = vadd.f32 1.0, %v7944_v37  ;;  %v350_v62 = vld [vmem:[%s8381_s25 + $0x168] sm:$0xff] }
 0x48b   : > { %v7005_v2 = vadd.f32 %v7004_v6, %v5164_v53  ;;  %v5166_v57 = vpop.f32.mrb[14].mxu0  ;;  %7961 = vrcp.f32 %v5611_v26  ;;  %v7948_v18 = vpop.eup %7947  ;;  %v5623_v25 = vadd.f32 1.0, %v7946_v35  ;;  %v7010_v6 = vadd.f32 %v9754_v12, %v401_v31  ;;  %v338_v31 = vld [vmem:[%s8381_s25 + $0x108] sm:$0xff] }
 0x48c   : > { %v6903_v34 = vmul.f32 -1.442695, %v7003_v22  ;;  %v7007_v47 = vadd.f32 %v7006_v14, %v5166_v57  ;;  %v5168_v50 = vpop.f32.mrb[15].mxu0  ;;  %7963 = vrcp.f32 %v5612_v43  ;;  %v7012_v14 = vadd.f32 %v9756_v56, %v402_v46  ;;  %v10149_v46 = vld [vmem:[%s8381_s25 + $0xd0] sm:$0xff] }
 0x48d   : > { %v6904_v1 = vmul.f32 -1.442695, %v7005_v2  ;;  %v7009_v15 = vadd.f32 %v7008_v59, %v5168_v50  ;;  %7965 = vrcp.f32 %v5617_v21  ;;  %v10138_v63 = vpop.eup %7949  ;;  %v335_v21 = vld [vmem:[%s8381_s25 + $0xf0] sm:$0xff]  ;;  %v5624_v22 = vadd.f32 1.0, %v7948_v18 }
 0x48e   : > { %v6909_v38 = vmul.f32 -1.442695, %v7007_v47  ;;  %7967 = vpow2.f32 %v6903_v34  ;;  %v7014_v59 = vadd.f32 %v9758_v55, %v407_v45  ;;  %v7016_v35 = vadd.f32 %v9760_v13, %v408_v0 }
 0x48f   : > { %7969 = vpow2.f32 %v6904_v1  ;;  %v6910_v51 = vmul.f32 -1.442695, %v7009_v15  ;;  %v413_v1 = vunpack.c.l.bf16 %v335_v21 }
 0x490   : > { %v7952_v43 = vpop.eup %7951  ;;  %7971 = vpow2.f32 %v6909_v38 }
 0x491   : > { %v5172_v53 = vpop.f32.mrb[48].mxu0  ;;  %v7954_v37 = vpop.eup %7953  ;;  %7973 = vrcp.f32 %v5618_v28  ;;  %v5749_v42 = vadd.f32 1.0, %v7952_v43  ;;  %v414_v28 = vunpack.c.h.bf16 %v335_v21  ;;  %v419_v43 = vunpack.c.l.bf16 %v338_v31 }
 0x492   : > { %v7011_v2 = vadd.f32 %v7010_v6, %v5172_v53  ;;  %v5174_v12 = vpop.f32.mrb[49].mxu0  ;;  %v7956_v57 = vpop.eup %7955  ;;  %7975 = vrcp.f32 %v5623_v25  ;;  %v5750_v34 = vadd.f32 1.0, %v7954_v37  ;;  %v10157_v6 = vld [vmem:[%s8381_s25 + $0xe8] sm:$0xff]  ;;  %v420_v37 = vunpack.c.h.bf16 %v338_v31 }
 0x493   : > { %v7013_v47 = vadd.f32 %v7012_v14, %v5174_v12  ;;  %v5176_v56 = vpop.f32.mrb[50].mxu0  ;;  %v7958_v50 = vpop.eup %7957  ;;  %7977 = vpow2.f32 %v6910_v51  ;;  %v5755_v14 = vadd.f32 1.0, %v7956_v57  ;;  %v7020_v57 = vadd.f32 %v9770_v10, %v414_v28 }
 0x494   : > { %v6915_v15 = vmul.f32 -1.442695, %v7011_v2  ;;  %v7015_v55 = vadd.f32 %v7014_v59, %v5176_v56  ;;  %v5178_v18 = vpop.f32.mrb[51].mxu0  ;;  %v10151_v45 = vpop.eup %7959  ;;  %7979 = vrcp.f32 %v5624_v22  ;;  %v5756_v21 = vadd.f32 1.0, %v7958_v50 }
 0x495   : > { %v6916_v38 = vmul.f32 -1.442695, %v7013_v47  ;;  %v7017_v13 = vadd.f32 %v7016_v35, %v5178_v18  ;;  %v10153_v0 = vpop.eup %7961  ;;  %7981 = vrcp.f32 %v5749_v42  ;;  %v7018_v2 = vadd.f32 %v9768_v32, %v413_v1  ;;  %v341_v47 = vld [vmem:[%s8381_s25 + $0x120] sm:$0xff] }
 0x496   : > { %v10159_v51 = vpop.eup %7963  ;;  %7983 = vrcp.f32 %v5750_v34  ;;  %v6921_v12 = vmul.f32 -1.442695, %v7015_v55  ;;  %v7022_v50 = vadd.f32 %v9777_v39, %v419_v43  ;;  %v344_v55 = vld [vmem:[%s8381_s25 + $0x138] sm:$0xff]  ;;  %v425_v53 = vunpack.c.l.bf16 %v341_v47 }
 0x497   : > { %v10162_v22 = vpop.eup %7965  ;;  %7985 = vpow2.f32 %v6915_v15  ;;  %v6922_v56 = vmul.f32 -1.442695, %v7017_v13  ;;  %v7024_v15 = vadd.f32 %v9779_v19, %v420_v37  ;;  %v10175_v13 = vld [vmem:[%s8381_s25 + $0x100] sm:$0xff] }
 0x498   : > { %v7968_v35 = vpop.eup %7967  ;;  %7987 = vpow2.f32 %v6916_v38 }
 0x499   : > { %v5182_v31 = vpop.f32.mrb[52].mxu0  ;;  %v7970_v34 = vpop.eup %7969  ;;  %7989 = vrcp.f32 %v5755_v14  ;;  %v5761_v18 = vadd.f32 1.0, %v7968_v35  ;;  %v10180_v35 = vld [vmem:[%s8381_s25 + $0x118] sm:$0xff] }
 0x49a   : > { %v7019_v59 = vadd.f32 %v7018_v2, %v5182_v31  ;;  %v5184_v32 = vpop.f32.mrb[53].mxu0  ;;  %v7972_v1 = vpop.eup %7971  ;;  %7991 = vrcp.f32 %v5756_v21  ;;  %v5762_v42 = vadd.f32 1.0, %v7970_v34  ;;  %v426_v31 = vunpack.c.h.bf16 %v341_v47 }
 0x49b   : > { %v7021_v10 = vadd.f32 %v7020_v57, %v5184_v32  ;;  %v5186_v28 = vpop.f32.mrb[54].mxu0  ;;  %v10172_v38 = vpop.eup %7973  ;;  %7993 = vpow2.f32 %v6921_v12  ;;  %v431_v34 = vunpack.c.l.bf16 %v344_v55  ;;  %v5767_v32 = vadd.f32 1.0, %v7972_v1 }
 0x49c   : > { %v6927_v39 = vmul.f32 -1.442695, %v7019_v59  ;;  %v7023_v43 = vadd.f32 %v7022_v50, %v5186_v28  ;;  %v5188_v14 = vpop.f32.mrb[55].mxu0  ;;  %v10177_v2 = vpop.eup %7975  ;;  %7995 = vpow2.f32 %v6922_v56  ;;  %v432_v12 = vunpack.c.h.bf16 %v344_v55  ;;  %v347_v55 = vld [vmem:[%s8381_s25 + $0x150] sm:$0xff] }
 0x49d   : > { %v6928_v19 = vmul.f32 -1.442695, %v7021_v10  ;;  %v7025_v37 = vadd.f32 %v7024_v15, %v5188_v14  ;;  %v7978_v21 = vpop.eup %7977  ;;  %7997 = vrcp.f32 %v5761_v18  ;;  %v7026_v15 = vadd.f32 %v9799_v4, %v425_v53  ;;  %v10197_v59 = vld [vmem:[%s8381_s25 + $0x130] sm:$0xff] }
 0x49e   : > { %v10183_v25 = vpop.eup %7979  ;;  %7999 = vrcp.f32 %v5762_v42  ;;  %v6933_v50 = vmul.f32 -1.442695, %v7023_v43  ;;  %v7028_v1 = vadd.f32 %v9805_v16, %v426_v31  ;;  %v5768_v14 = vadd.f32 1.0, %v7978_v21 }
 0x49f   : > { %v10186_v28 = vpop.eup %7981  ;;  %8001 = vpow2.f32 %v6927_v39  ;;  %v7030_v47 = vadd.f32 %v9816_v40, %v431_v34  ;;  %v6934_v56 = vmul.f32 -1.442695, %v7025_v37  ;;  %v7032_v57 = vadd.f32 %v9818_v54, %v432_v12 }
 0x4a0   : > { %v10191_v10 = vpop.eup %7983  ;;  %8003 = vpow2.f32 %v6928_v19  ;;  %v437_v19 = vunpack.c.l.bf16 %v347_v55  ;;  %v429_v37 = vunpack.c.l.bf16 %v10197_v59  ;;  %v438_v34 = vunpack.c.h.bf16 %v347_v55 }
 0x4a1   : > { %v5192_v42 = vpop.f32.mrb[56].mxu0  ;;  %v7986_v43 = vpop.eup %7985  ;;  %8005 = vrcp.f32 %v5767_v32 }
 0x4a2   : > { %v7027_v4 = vadd.f32 %v7026_v15, %v5192_v42  ;;  %v5194_v53 = vpop.f32.mrb[57].mxu0  ;;  %v7988_v39 = vpop.eup %7987  ;;  %v5893_v18 = vadd.f32 1.0, %v7986_v43  ;;  %8007 = vpow2.f32 %v6933_v50  ;;  %v443_v50 = vunpack.c.l.bf16 %v350_v62 }
 0x4a3   : > { %v7029_v16 = vadd.f32 %v7028_v1, %v5194_v53  ;;  %v5196_v31 = vpop.f32.mrb[58].mxu0  ;;  %v10202_v21 = vpop.eup %7989  ;;  %v5894_v26 = vadd.f32 1.0, %v7988_v39  ;;  %v444_v15 = vunpack.c.h.bf16 %v350_v62  ;;  %v10211_v42 = vadd.f32 %v9615_v44, %v357_v61  ;;  %v11059_v62 = vld [vmem:[#allocation4_spill] sm:$0xff]  ;;  %v11060_v44 = vld [vmem:[#allocation5_spill] sm:$0xff] }
 0x4a4   : > { %8009 = vtanh.f32 %v7027_v4  ;;  %v7031_v20 = vadd.f32 %v7030_v47, %v5196_v31  ;;  %v5198_v49 = vpop.f32.mrb[59].mxu0  ;;  %v10204_v40 = vpop.eup %7991  ;;  %v10216_v47 = vadd.f32 %v9617_v29, %v358_v5  ;;  %v10233_v3 = vadd.f32 %v11060_v44, %v369_v48  ;;  %v11061_v29 = vld [vmem:[#allocation33_spill] sm:$0xff] }
 0x4a5   : > { %8011 = vrcp.f32 %v5768_v14  ;;  %v7033_v32 = vadd.f32 %v7032_v57, %v5198_v49  ;;  %v7994_v54 = vpop.eup %7993  ;;  %v11058_v49 = vld [vmem:[#allocation3_spill] sm:$0xff]  ;;  %v7034_v61 = vadd.f32 %v11061_v29, %v437_v19  ;;  %v6135_v43 = vlaneseq }
 0x4a6   : > { %8013 = vpow2.f32 %v6934_v56  ;;  %v7996_v1 = vpop.eup %7995  ;;  %v10221_v57 = vadd.f32 %v11058_v49, %v363_v17  ;;  %v10228_v56 = vadd.f32 %v11059_v62, %v364_v27  ;;  %v11062_v17 = vld [vmem:[#allocation34_spill] sm:$0xff]  ;;  %v11063_v27 = vld [vmem:[#allocation35_spill] sm:$0xff]  ;;  %v11064_v62 = vld [vmem:[#allocation36_spill] sm:$0xff] }
 0x4a7   : > { %8015 = vrcp.f32 %v5893_v18  ;;  %v10223_v55 = vpop.eup %7997  ;;  %v7036_v14 = vadd.f32 %v11062_v17, %v438_v34  ;;  %v5899_v18 = vadd.f32 1.0, %v7994_v54  ;;  %v7038_v53 = vadd.f32 %v11063_v27, %v443_v50  ;;  %v10242_v54 = vld [vmem:[%s8381_s25 + $0x8] sm:$0xff]  ;;  %v11067_v27 = vld [vmem:[#allocation9_spill] sm:$0xff] }
 0x4a8   : > { %8017 = vrcp.f32 %v5894_v26  ;;  %v10236_v5 = vpop.eup %7999  ;;  %v5900_v39 = vadd.f32 1.0, %v7996_v1  ;;  %v7040_v19 = vadd.f32 %v11064_v62, %v444_v15  ;;  %v11066_v17 = vld [vmem:[#allocation8_spill] sm:$0xff] }
 0x4a9   : > { %8019 = vtanh.f32 %v7029_v16  ;;  %v5202_v58 = vpop.f32.mrb[60].mxu0  ;;  %v8002_v4 = vpop.eup %8001  ;;  %v11065_v16 = vld [vmem:[#allocation6_spill] sm:$0xff] }
 0x4aa   : > { %8021 = vtanh.f32 %v7031_v20  ;;  %v7035_v31 = vadd.f32 %v7034_v61, %v5202_v58  ;;  %v5204_v48 = vpop.f32.mrb[61].mxu0  ;;  %v8004_v49 = vpop.eup %8003  ;;  %v5905_v26 = vadd.f32 1.0, %v8002_v4  ;;  %v10249_v50 = vadd.f32 %v11065_v16, %v370_v24  ;;  %v5989_v20 = vld [vmem:[%s11005_s4] sm:$0xff] }
 0x4ab   : > { %8023 = vtanh.f32 %v7033_v32  ;;  %v7037_v44 = vadd.f32 %v7036_v14, %v5204_v48  ;;  %v5206_v34 = vpop.f32.mrb[62].mxu0  ;;  %v10244_v29 = vpop.eup %8005  ;;  %v5906_v1 = vadd.f32 1.0, %v8004_v49  ;;  %v10257_v14 = vadd.f32 %v11066_v17, %v375_v30  ;;  %v10262_v24 = vld [vmem:[%s8381_s25 + $0x20] sm:$0xff] }
 0x4ac   : > { %8025 = vtanh.f32 %v7035_v31  ;;  %v7039_v15 = vadd.f32 %v7038_v53, %v5206_v34  ;;  %v5208_v32 = vpop.f32.mrb[63].mxu0  ;;  %v8008_v61 = vpop.eup %8007  ;;  %v10259_v58 = vshrl.u32 %v6135_v43, 7  ;;  %v10267_v48 = vadd.f32 %v11067_v27, %v376_v23  ;;  %v11068_v53 = vld [vmem:[#allocation7_spill] sm:$0xff]  ;;  %v11069_v43 = vld [vmem:[#allocation10_spill] sm:$0xff]  ;;  %v5990_v23 = vld [vmem:[%s11005_s4 + $0x8] sm:$0xff] }
 0x4ad   : > { %8027 = vrcp.f32 %v5899_v18  ;;  %v7041_v9 = vadd.f32 %v7040_v19, %v5208_v32  ;;  %v10272_v31 = vadd.f32 %v11068_v53, %v381_v52  ;;  %v355_v30 = vunpack.c.l.bf16 %v10242_v54 }
 0x4ae   : > { %v8010_v4 = vpop.eup %8009  ;;  %8029 = vrcp.f32 %v5900_v39  ;;  %v10280_v49 = vadd.f32 %v11069_v43, %v382_v36  ;;  %v6013_v11 = vmul.f32 %v10186_v28, %v5989_v20  ;;  %v5995_v39 = vld [vmem:[%s11005_s4 + $0x30] sm:$0xff]  ;;  %v356_v36 = vunpack.c.h.bf16 %v10242_v54  ;;  %v6001_v54 = vld [vmem:[%s11005_s4 + $0x60] sm:$0xff] }
 0x4af   : > { %v10275_v18 = vpop.eup %8011  ;;  %8031 = vrcp.f32 %v5905_v26  ;;  %v6037_v52 = vmul.f32 %v8010_v4, %v10138_v63  ;;  %v361_v28 = vunpack.c.l.bf16 %v10262_v24  ;;  %v362_v19 = vunpack.c.h.bf16 %v10262_v24 }
 0x4b0   : > { %v8014_v62 = vpop.eup %8013  ;;  %8033 = vrcp.f32 %v5906_v1  ;;  %v5911_v26 = vadd.f32 1.0, %v8008_v61  ;;  %v6137_v16 = vsub.s32 0, %v10259_v58  ;;  %v6014_v4 = vmul.f32 %v10191_v10, %v5990_v23 }
 0x4b1   : > { %v10296_v34 = vpop.eup %8015  ;;  %v6061_v63 = vadd.f32 %v6037_v52, %v6013_v11  ;;  %8035 = vtanh.f32 %v7037_v44  ;;  %v5245_v20 = vpop.f32.mrb[32].mxu1  ;;  %v6019_v11 = vmul.f32 %v10202_v21, %v5995_v39  ;;  %v6020_v44 = vmul.f32 %v10204_v40, %v5996_v8  ;;  %v10319_v8 = vld [vmem:[%s11003_s2] sm:$0x3f] }
 0x4b2   : > { %v5358_v32 = vpop.f32.mrb[16].mxu0  ;;  %v10299_v17 = vpop.eup %8017  ;;  %8037 = vtanh.f32 %v7039_v15  ;;  %v7042_v1 = vadd.f32 %v5245_v20, %v355_v30  ;;  %v6025_v40 = vmul.f32 %v10223_v55, %v6001_v54  ;;  %v5912_v12 = vadd.f32 1.0, %v8014_v62  ;;  %v6007_v62 = vld [vmem:[%s11005_s4 + $0x90] sm:$0xff] }
 0x4b3   : > { %v7075_v27 = vadd.f32 %v10211_v42, %v5358_v32  ;;  %v5247_v53 = vpop.f32.mrb[33].mxu1  ;;  %v5360_v61 = vpop.f32.mrb[17].mxu0  ;;  %8039 = vtanh.f32 %v6061_v63  ;;  %6189 = vst [vmem:[%s11005_s4] sm:$0xff] %v6061_v63 }
 0x4b4   : > { %v8020_v43 = vpop.eup %8019  ;;  %v7077_v10 = vadd.f32 %v10216_v47, %v5360_v61  ;;  %v5249_v23 = vpop.f32.mrb[34].mxu1  ;;  %8041 = vtanh.f32 %v7041_v9  ;;  %v6869_v42 = vmul.f32 -1.442695, %v7042_v1  ;;  %v7043_v63 = vadd.f32 %v5247_v53, %v356_v36 }
 0x4b5   : > { %v5362_v52 = vpop.f32.mrb[18].mxu0  ;;  %v8022_v15 = vpop.eup %8021  ;;  %v6038_v30 = vmul.f32 %v8020_v43, %v10151_v45  ;;  %v6871_v20 = vmul.f32 -1.442695, %v7075_v27  ;;  %8043 = vrcp.f32 %v5911_v26  ;;  %v7044_v54 = vadd.f32 %v5249_v23, %v361_v28  ;;  %v6008_v23 = vld [vmem:[%s11005_s4 + $0x98] sm:$0xff] }
 0x4b6   : > { %v10313_v32 = vpop.f32.mrb[35].mxu1  ;;  %v5364_v21 = vpop.f32.mrb[19].mxu0  ;;  %v6043_v47 = vmul.f32 %v8022_v15, %v10153_v0  ;;  %8045 = vpow2.f32 %v6869_v42  ;;  %v7079_v1 = vadd.f32 %v10221_v57, %v5362_v52  ;;  %v10330_v0 = vrot.slane %v10319_v8, %v6137_v16  ;;  %v10336_v57 = vld [vmem:[%s8381_s25 + $0x38] sm:$0xff] }
 0x4b7   : > { %v8024_v39 = vpop.eup %8023  ;;  %v6062_v45 = vadd.f32 %v6038_v30, %v6014_v4  ;;  %8047 = vpow2.f32 %v6871_v20  ;;  %v6870_v16 = vmul.f32 -1.442695, %v7043_v63  ;;  %v10350_v4 = vadd.f32 %v10228_v56, %v5364_v21 }
 0x4b8   : > { %v8026_v61 = vpop.eup %8025  ;;  %v6044_v9 = vmul.f32 %v8024_v39, %v10159_v51  ;;  %v6067_v55 = vadd.f32 %v6043_v47, %v6019_v11  ;;  %v6141_v52 = vsub.s32 1, %v10259_v58  ;;  %v6872_v15 = vmul.f32 -1.442695, %v7077_v10 }
 0x4b9   : > { %v10324_v27 = vpop.eup %8027  ;;  %v6049_v26 = vmul.f32 %v8026_v61, %v10162_v22  ;;  %8049 = vtanh.f32 %v6062_v45  ;;  %6190 = vst [vmem:[%s11005_s4 + $0x8] sm:$0xff] %v6062_v45  ;;  %v6002_v22 = vld [vmem:[%s11005_s4 + $0x68] sm:$0xff]  ;;  %v10352_v53 = vpop.f32.mrb[36].mxu1  ;;  %v6875_v21 = vmul.f32 -1.442695, %v7044_v54  ;;  %v367_v39 = vunpack.c.l.bf16 %v10336_v57 }
 0x4ba   : > { %v10327_v43 = vpop.eup %8029  ;;  %v6068_v51 = vadd.f32 %v6044_v9, %v6020_v44  ;;  %8051 = vtanh.f32 %v6067_v55  ;;  %6195 = vst [vmem:[%s11005_s4 + $0x30] sm:$0xff] %v6067_v55  ;;  %v5368_v11 = vpop.f32.mrb[20].mxu0  ;;  %v6026_v63 = vmul.f32 %v10236_v5, %v6002_v22  ;;  %v6031_v61 = vmul.f32 %v10244_v29, %v6007_v62  ;;  %v6237_v62 = vld [vmem:[#allocation2] sm:$0xff] }
 0x4bb   : > { %v10338_v36 = vpop.eup %8031  ;;  %v6073_v28 = vadd.f32 %v6049_v26, %v6025_v40  ;;  %v10364_v56 = vadd.f32 %v10233_v3, %v5368_v11  ;;  %v10366_v30 = vpop.f32.mrb[37].mxu1  ;;  %v6032_v54 = vmul.f32 %v10275_v18, %v6008_v23  ;;  %v10392_v18 = vld [vmem:[%s8381_s25 + $0x50] sm:$0xff] }
 0x4bc   : > { %v10354_v44 = vpop.eup %8033  ;;  %8053 = vtanh.f32 %v6068_v51  ;;  %6196 = vst [vmem:[%s11005_s4 + $0x38] sm:$0xff] %v6068_v51  ;;  %v5370_v42 = vpop.f32.mrb[21].mxu0  ;;  %v7045_v51 = vadd.f32 %v10313_v32, %v362_v19  ;;  %v11070_v19 = vld [vmem:[#allocation11_spill] sm:$0xff] }
 0x4bd   : > { %v8036_v20 = vpop.eup %8035  ;;  %8055 = vtanh.f32 %v6073_v28  ;;  %6201 = vst [vmem:[%s11005_s4 + $0x60] sm:$0xff] %v6073_v28  ;;  %v10373_v40 = vadd.f32 %v10249_v50, %v5370_v42  ;;  %v10375_v47 = vpop.f32.mrb[38].mxu1 }
 0x4be   : > { %v5372_v10 = vpop.f32.mrb[22].mxu0  ;;  %v8038_v3 = vpop.eup %8037  ;;  %8057 = vrcp.f32 %v5912_v12  ;;  %v6050_v45 = vmul.f32 %v8036_v20, %v10172_v38  ;;  %v6877_v38 = vmul.f32 -1.442695, %v7079_v1  ;;  %v11071_v20 = vunpack.c.h.bf16 %v10119_v33 }
 0x4bf   : > { %v10380_v9 = vpop.f32.mrb[39].mxu1  ;;  %v5374_v55 = vpop.f32.mrb[23].mxu0  ;;  %v6055_v50 = vmul.f32 %v8038_v3, %v10177_v2  ;;  %8059 = vpow2.f32 %v6870_v16  ;;  %v10395_v2 = vadd.f32 %v10257_v14, %v5372_v10  ;;  %v10408_v16 = vrot.slane %v10319_v8, %v6141_v52 }
 0x4c0   : > { %v8040_v26 = vpop.eup %8039  ;;  %v6074_v12 = vadd.f32 %v6050_v45, %v6026_v63  ;;  %8061 = vpow2.f32 %v6872_v15  ;;  %v6876_v14 = vmul.f32 -1.442695, %v7045_v51  ;;  %v7046_v33 = vadd.f32 %v10352_v53, %v367_v39 }
 0x4c1   : > { %v8042_v5 = vpop.eup %8041  ;;  %v6109_v29 = vmul.f32 %v8040_v26, %v10296_v34  ;;  %v6079_v28 = vadd.f32 %v6055_v50, %v6031_v61  ;;  %8063 = vpow2.f32 %v6875_v21  ;;  %v10400_v34 = vadd.f32 %v11070_v19, %v387_v41  ;;  %v10413_v23 = vpop.f32.mrb[40].mxu1  ;;  %v11072_v21 = vld [vmem:[#allocation12_spill] sm:$0xff] }
 0x4c2   : > { %v10388_v22 = vpop.eup %8043  ;;  %v6056_v11 = vmul.f32 %v8042_v5, %v10183_v25  ;;  %8065 = vtanh.f32 %v6074_v12  ;;  %6202 = vst [vmem:[%s11005_s4 + $0x68] sm:$0xff] %v6074_v12  ;;  %v368_v25 = vunpack.c.h.bf16 %v10336_v57  ;;  %v5378_v15 = vpop.f32.mrb[24].mxu0  ;;  %v10418_v10 = vadd.f32 %v11072_v21, %v11071_v20 }
 0x4c3   : > { %v8046_v24 = vpop.eup %8045  ;;  %v6165_v32 = vmul.f32 %v10330_v0, %v6109_v29  ;;  %8067 = vtanh.f32 %v6079_v28  ;;  %6207 = vst [vmem:[%s11005_s4 + $0x90] sm:$0xff] %v6079_v28  ;;  %v373_v57 = vunpack.c.l.bf16 %v10392_v18  ;;  %v10421_v52 = vpop.f32.mrb[41].mxu1  ;;  %v10429_v45 = vadd.f32 %v10267_v48, %v5374_v55  ;;  %v6245_v55 = vld [vmem:[#allocation2 + $0x40] sm:$0xff]  ;;  %v11074_v28 = vld [vmem:[#allocation13_spill] sm:$0xff] }
 0x4c4   : > { %v8048_v1 = vpop.eup %8047  ;;  %v6080_v41 = vadd.f32 %v6056_v11, %v6032_v54  ;;  %8069 = vpow2.f32 %v6877_v38  ;;  %v5380_v3 = vpop.f32.mrb[25].mxu0  ;;  %v6878_v5 = vmul.f32 -1.442695, %v10350_v4  ;;  %v10438_v29 = vadd.f32 %v10272_v31, %v5378_v15 }
 0x4c5   : > { %v8050_v42 = vpop.eup %8049  ;;  %6213 = vst [vmem:[#allocation2 + $0x8] sm:$0xff] %v6165_v32  ;;  %v6958_v8 = vpack.c.bf16 %v6165_v32, %v6237_v62  ;;  %v10431_v26 = vpop.f32.mrb[42].mxu1  ;;  %v5607_v62 = vadd.f32 1.0, %v8046_v24  ;;  %v11073_v4 = vunpack.c.l.bf16 %v10132_v7  ;;  %v5609_v19 = vadd.f32 1.0, %v8048_v1  ;;  %v10454_v32 = vld [vmem:[%s8381_s25 + $0x68] sm:$0xff] }
 0x4c6   : > { %v8052_v63 = vpop.eup %8051  ;;  %v6110_v61 = vmul.f32 %v8050_v42, %v10299_v17  ;;  %8071 = vtanh.f32 %v6080_v41  ;;  %6208 = vst [vmem:[%s11005_s4 + $0x98] sm:$0xff] %v6080_v41  ;;  %v5382_v54 = vpop.f32.mrb[26].mxu0  ;;  %v7047_v17 = vadd.f32 %v10366_v30, %v368_v25  ;;  %v6881_v24 = vmul.f32 -1.442695, %v7046_v33 }
 0x4c7   : > { %v8054_v50 = vpop.eup %8053  ;;  %6365 = vst [vmem:[%s8376_s22] sm:$0xff] %v6958_v8  ;;  %v6115_v51 = vmul.f32 %v8052_v63, %v10324_v27  ;;  %v10440_v12 = vpop.f32.mrb[43].mxu1  ;;  %8073 = vpow2.f32 %v6876_v14  ;;  %v10449_v30 = vadd.f32 %v11074_v28, %v11073_v4  ;;  %v6883_v14 = vmul.f32 -1.442695, %v10364_v56 }
 0x4c8   : > { %v10442_v53 = vpop.f32.mrb[27].mxu0  ;;  %v8056_v48 = vpop.eup %8055  ;;  %v6166_v39 = vmul.f32 %v10408_v16, %v6110_v61  ;;  %v6116_v38 = vmul.f32 %v8054_v50, %v10327_v43  ;;  %v6253_v43 = vld [vmem:[#allocation2 + $0x80] sm:$0xff]  ;;  %v374_v15 = vunpack.c.h.bf16 %v10392_v18  ;;  %8075 = vpow2.f32 %v6878_v5 }
 0x4c9   : > { %v8058_v27 = vpop.eup %8057  ;;  %v6171_v31 = vmul.f32 %v10330_v0, %v6115_v51  ;;  %v6121_v11 = vmul.f32 %v8056_v48, %v10338_v36  ;;  %v7048_v36 = vadd.f32 %v10375_v47, %v373_v57  ;;  %8077 = vrcp.f32 %v5607_v62  ;;  %v10465_v56 = vpop.f32.mrb[44].mxu1 }
 0x4ca   : > { %v8060_v25 = vpop.eup %8059  ;;  %6214 = vst [vmem:[#allocation2 + $0x10] sm:$0xff] %v6166_v39  ;;  %v6172_v41 = vmul.f32 %v10408_v16, %v6116_v38  ;;  %v6882_v8 = vmul.f32 -1.442695, %v7047_v17  ;;  %v379_v63 = vunpack.c.l.bf16 %v10454_v32  ;;  %v10463_v61 = vadd.f32 %v10280_v49, %v5380_v3  ;;  %v5388_v18 = vpop.f32.mrb[28].mxu0 }
 0x4cb   : > { %v8062_v42 = vpop.eup %8061  ;;  %6219 = vst [vmem:[#allocation2 + $0x48] sm:$0xff] %v6171_v31  ;;  %v6962_v20 = vpack.c.bf16 %v6171_v31, %v6245_v55  ;;  %v6177_v21 = vmul.f32 %v10330_v0, %v6121_v11  ;;  %8079 = vrcp.f32 %v5609_v19  ;;  %v5608_v51 = vadd.f32 1.0, %v8060_v25  ;;  %v10469_v57 = vpop.f32.mrb[45].mxu1 }
 0x4cc   : > { %v8064_v1 = vpop.eup %8063  ;;  %6220 = vst [vmem:[#allocation2 + $0x50] sm:$0xff] %v6172_v41  ;;  %v380_v47 = vunpack.c.h.bf16 %v10454_v32  ;;  %v5390_v5 = vpop.f32.mrb[29].mxu0  ;;  %v5610_v49 = vadd.f32 1.0, %v8062_v42  ;;  %8081 = vpow2.f32 %v6881_v24  ;;  %v10473_v3 = vadd.f32 %v10400_v34, %v5382_v54  ;;  %v6261_v34 = vld [vmem:[#allocation2 + $0xc0] sm:$0xff]  ;;  %v11076_v42 = vld [vmem:[#allocation14_spill] sm:$0xff] }
 0x4cd   : > { %v8066_v33 = vpop.eup %8065  ;;  %6369 = vst [vmem:[%s8376_s22 + $0x20] sm:$0xff] %v6962_v20  ;;  %6225 = vst [vmem:[#allocation2 + $0x88] sm:$0xff] %v6177_v21  ;;  %v6966_v50 = vpack.c.bf16 %v6177_v21, %v6253_v43  ;;  %v10475_v39 = vpop.f32.mrb[46].mxu1  ;;  %8083 = vpow2.f32 %v6883_v14  ;;  %v6884_v4 = vmul.f32 -1.442695, %v10373_v40  ;;  %v5613_v54 = vadd.f32 1.0, %v8064_v1 }
 0x4ce   : > { %v8068_v17 = vpop.eup %8067  ;;  %v6122_v48 = vmul.f32 %v8066_v33, %v10354_v44  ;;  %v5392_v55 = vpop.f32.mrb[30].mxu0  ;;  %v6887_v28 = vmul.f32 -1.442695, %v7048_v36  ;;  %8085 = vpow2.f32 %v6882_v8  ;;  %v7049_v32 = vadd.f32 %v10380_v9, %v374_v15  ;;  %v10487_v24 = vld [vmem:[%s8381_s25 + $0x80] sm:$0xff]  ;;  %v10510_v33 = vld [vmem:[%s8381_s25 + $0x148] sm:$0xff] }
 0x4cf   : > { %v8070_v38 = vpop.eup %8069  ;;  %6373 = vst [vmem:[%s8376_s22 + $0x40] sm:$0xff] %v6966_v50  ;;  %v6127_v62 = vmul.f32 %v8068_v17, %v10388_v22  ;;  %v10480_v31 = vpop.f32.mrb[47].mxu1  ;;  %8087 = vrcp.f32 %v5608_v51  ;;  %v6889_v22 = vmul.f32 -1.442695, %v10395_v2  ;;  %v10491_v14 = vadd.f32 %v10418_v10, %v10442_v53  ;;  %v11078_v36 = vld [vmem:[#allocation15_spill] sm:$0xff] }
 0x4d0   : > { %v5394_v44 = vpop.f32.mrb[31].mxu0  ;;  %v8072_v11 = vpop.eup %8071  ;;  %v6178_v19 = vmul.f32 %v10408_v16, %v6122_v48  ;;  %8089 = vrcp.f32 %v5610_v49  ;;  %v5615_v43 = vadd.f32 1.0, %v8070_v38  ;;  %v10494_v9 = vadd.f32 %v10449_v30, %v5388_v18  ;;  %v11080_v18 = vld [vmem:[#allocation16_spill] sm:$0xff] }
 0x4d1   : > { %v6183_v25 = vmul.f32 %v10330_v0, %v6127_v62  ;;  %v6128_v41 = vmul.f32 %v8072_v11, %v8058_v27  ;;  %v8074_v40 = vpop.eup %8073  ;;  %8091 = vpow2.f32 %v6884_v4  ;;  %v7050_v2 = vadd.f32 %v10413_v23, %v379_v63  ;;  %v10504_v53 = vpop.f32.mrb[48].mxu1 }
 0x4d2   : > { %6226 = vst [vmem:[#allocation2 + $0x90] sm:$0xff] %v6178_v19  ;;  %v11075_v15 = vunpack.c.h.bf16 %v10132_v7  ;;  %v11077_v21 = vunpack.c.l.bf16 %v10135_v60  ;;  %8093 = vrcp.f32 %v5613_v54  ;;  %v6888_v10 = vmul.f32 -1.442695, %v7049_v32  ;;  %v8076_v30 = vpop.eup %8075  ;;  %v5398_v63 = vpop.f32.mrb[32].mxu0 }
 0x4d3   : > { %6231 = vst [vmem:[#allocation2 + $0xc8] sm:$0xff] %v6183_v25  ;;  %v6970_v0 = vpack.c.bf16 %v6183_v25, %v6261_v34  ;;  %v6184_v27 = vmul.f32 %v10408_v16, %v6128_v41  ;;  %v11079_v8 = vunpack.c.h.bf16 %v10135_v60  ;;  %v5614_v7 = vadd.f32 1.0, %v8074_v40  ;;  %v10514_v50 = vpop.eup %8077  ;;  %v10520_v60 = vpop.f32.mrb[49].mxu1  ;;  %v11084_v41 = vld [vmem:[#allocation18_spill] sm:$0xff] }
 0x4d4   : > { %v7100_v20 = vadd.f32 %v11076_v42, %v11075_v15  ;;  %v7102_v1 = vadd.f32 %v11078_v36, %v11077_v21  ;;  %8095 = vpow2.f32 %v6887_v28  ;;  %v385_v23 = vunpack.c.l.bf16 %v10487_v24  ;;  %v5400_v49 = vpop.f32.mrb[33].mxu0  ;;  %v10528_v11 = vpop.f32.mrb[50].mxu1  ;;  %v10544_v15 = vld [vmem:[%s8381_s25 + $0x160] sm:$0xff] }
 0x4d5   : > { %v7104_v16 = vadd.f32 %v11080_v18, %v11079_v8  ;;  %6377 = vst [vmem:[%s8376_s22 + $0x60] sm:$0xff] %v6970_v0  ;;  %6232 = vst [vmem:[#allocation2 + $0xd0] sm:$0xff] %v6184_v27  ;;  %8097 = vrcp.f32 %v5615_v43  ;;  %v6890_v51 = vmul.f32 -1.442695, %v10429_v45  ;;  %v7051_v17 = vadd.f32 %v10421_v52, %v380_v47  ;;  %v10522_v38 = vpop.eup %8079  ;;  %v5402_v19 = vpop.f32.mrb[34].mxu0  ;;  %v11082_v47 = vld [vmem:[#allocation17_spill] sm:$0xff] }
 0x4d6   : > { %v10518_v48 = vadd.f32 %v7100_v20, %v5390_v5  ;;  %8099 = vpow2.f32 %v6889_v22  ;;  %v6893_v62 = vmul.f32 -1.442695, %v7050_v2  ;;  %v10524_v4 = vadd.f32 %v7102_v1, %v5392_v55  ;;  %v8082_v45 = vpop.eup %8081  ;;  %v10534_v32 = vpop.f32.mrb[51].mxu1  ;;  %v11086_v43 = vld [vmem:[#allocation19_spill] sm:$0xff]  ;;  %v11088_v8 = vld [vmem:[#allocation20_spill] sm:$0xff] }
 0x4d7   : > { %v10526_v28 = vadd.f32 %v7104_v16, %v5394_v44  ;;  %v11081_v52 = vunpack.c.l.bf16 %v10149_v46  ;;  %v435_v34 = vunpack.c.l.bf16 %v10510_v33  ;;  %v5616_v54 = vadd.f32 1.0, %v8076_v30  ;;  %v5404_v25 = vpop.f32.mrb[35].mxu0  ;;  %v8084_v55 = vpop.eup %8083 }
 0x4d8   : > { %8101 = vpow2.f32 %v6888_v10  ;;  %v11083_v44 = vunpack.c.h.bf16 %v10149_v46  ;;  %v11085_v40 = vunpack.c.l.bf16 %v10157_v6  ;;  %v6895_v27 = vmul.f32 -1.442695, %v10438_v29  ;;  %v8086_v2 = vpop.eup %8085 }
 0x4d9   : > { %v7106_v5 = vadd.f32 %v11082_v47, %v11081_v52  ;;  %8103 = vrcp.f32 %v5614_v7  ;;  %v6894_v42 = vmul.f32 -1.442695, %v7051_v17  ;;  %v386_v20 = vunpack.c.h.bf16 %v10487_v24  ;;  %v10549_v36 = vpop.eup %8087  ;;  %v10560_v7 = vpop.f32.mrb[52].mxu1  ;;  %v10572_v52 = vld [vmem:[%s8381_s25 + $0x98] sm:$0xff] }
 0x4da   : > { %v7108_v22 = vadd.f32 %v11084_v41, %v11083_v44  ;;  %v7110_v0 = vadd.f32 %v11086_v43, %v11085_v40  ;;  %8105 = vpow2.f32 %v6890_v51  ;;  %v5619_v46 = vadd.f32 1.0, %v8082_v45  ;;  %v10554_v30 = vpop.eup %8089  ;;  %v11090_v44 = vld [vmem:[#allocation21_spill] sm:$0xff] }
 0x4db   : > { %v10547_v21 = vadd.f32 %v7106_v5, %v5398_v63  ;;  %8107 = vpow2.f32 %v6893_v62  ;;  %v7052_v1 = vadd.f32 %v10431_v26, %v385_v23  ;;  %v11087_v29 = vunpack.c.h.bf16 %v10157_v6  ;;  %v8092_v63 = vpop.eup %8091  ;;  %v5408_v23 = vpop.f32.mrb[36].mxu0 }
 0x4dc   : > { %v10552_v10 = vadd.f32 %v7108_v22, %v5400_v49  ;;  %8109 = vrcp.f32 %v5616_v54  ;;  %v5621_v24 = vadd.f32 1.0, %v8084_v55  ;;  %v5620_v17 = vadd.f32 1.0, %v8086_v2  ;;  %v10565_v49 = vpop.f32.mrb[53].mxu1  ;;  %v10567_v6 = vpop.eup %8093 }
 0x4dd   : > { %v7112_v18 = vadd.f32 %v11088_v8, %v11087_v29  ;;  %8111 = vpow2.f32 %v6895_v27  ;;  %v10563_v26 = vadd.f32 %v7110_v0, %v5402_v19  ;;  %v6896_v45 = vmul.f32 -1.442695, %v10463_v61  ;;  %v5410_v5 = vpop.f32.mrb[37].mxu0  ;;  %v10576_v54 = vpop.f32.mrb[54].mxu1  ;;  %v11092_v27 = vld [vmem:[#allocation22_spill] sm:$0xff]  ;;  %v11094_v29 = vld [vmem:[#allocation23_spill] sm:$0xff] }
 0x4de   : > { %8113 = vpow2.f32 %v6894_v42  ;;  %v8096_v19 = vpop.eup %8095  ;;  %v11089_v55 = vunpack.c.l.bf16 %v10175_v13  ;;  %v6899_v22 = vmul.f32 -1.442695, %v7052_v1  ;;  %v7053_v40 = vadd.f32 %v10440_v12, %v386_v20  ;;  %v5412_v43 = vpop.f32.mrb[38].mxu0 }
 0x4df   : > { %v10574_v47 = vadd.f32 %v7112_v18, %v5404_v25  ;;  %8115 = vrcp.f32 %v5619_v46  ;;  %v10582_v0 = vpop.f32.mrb[55].mxu1  ;;  %v10584_v61 = vpop.eup %8097  ;;  %v11091_v25 = vunpack.c.h.bf16 %v10175_v13  ;;  %v11093_v42 = vunpack.c.l.bf16 %v10180_v35  ;;  %v10593_v18 = vld [vmem:[%s8381_s25 + $0x178] sm:$0xff] }
 0x4e0   : > { %v7114_v41 = vadd.f32 %v11090_v44, %v11089_v55  ;;  %8117 = vrcp.f32 %v5621_v24  ;;  %v5622_v46 = vadd.f32 1.0, %v8092_v63  ;;  %v5414_v1 = vpop.f32.mrb[39].mxu0  ;;  %v8100_v55 = vpop.eup %8099  ;;  %v6901_v12 = vmul.f32 -1.442695, %v10473_v3  ;;  %v11097_v63 = vld [vmem:[#allocation24_spill] sm:$0xff] }
 0x4e1   : > { %v7116_v2 = vadd.f32 %v11092_v27, %v11091_v25  ;;  %v7118_v8 = vadd.f32 %v11094_v29, %v11093_v42  ;;  %8119 = vrcp.f32 %v5620_v17  ;;  %v391_v20 = vunpack.c.l.bf16 %v10572_v52 }
 0x4e2   : > { %v10597_v44 = vadd.f32 %v7114_v41, %v5408_v23  ;;  %v8102_v13 = vpop.eup %8101  ;;  %v5625_v62 = vadd.f32 1.0, %v8096_v19  ;;  %8121 = vpow2.f32 %v6896_v45  ;;  %v11096_v24 = vunpack.c.h.bf16 %v10180_v35  ;;  %v11098_v19 = vld [vmem:[#allocation25_spill] sm:$0xff]  ;;  %v11100_v41 = vld [vmem:[#allocation26_spill] sm:$0xff] }
 0x4e3   : > { %v10599_v25 = vadd.f32 %v7116_v2, %v5410_v5  ;;  %v10601_v27 = vadd.f32 %v7118_v8, %v5412_v43  ;;  %v10603_v42 = vpop.eup %8103  ;;  %v447_v3 = vunpack.c.l.bf16 %v10593_v18  ;;  %8123 = vpow2.f32 %v6899_v22  ;;  %v10615_v8 = vpop.f32.mrb[56].mxu1 }
 0x4e4   : > { %11095 = vst [vmem:[#allocation3_spill] sm:$0xff] %v10603_v42  ;;  %v7120_v17 = vadd.f32 %v11097_v63, %v11096_v24  ;;  %v6900_v29 = vmul.f32 -1.442695, %v7053_v40  ;;  %v8106_v23 = vpop.eup %8105  ;;  %v7122_v45 = vadd.f32 %v11098_v19, %v429_v37  ;;  %v11099_v5 = vunpack.c.h.bf16 %v10197_v59  ;;  %v10620_v40 = vld [vmem:[%s8381_s25 + $0xb0] sm:$0xff]  ;;  %v5418_v63 = vpop.f32.mrb[40].mxu0  ;;  %v11102_v59 = vld [vmem:[#allocation27_spill] sm:$0xff] }
 0x4e5   : > { %8125 = vrcp.f32 %v5622_v46  ;;  %v5627_v2 = vadd.f32 1.0, %v8100_v55  ;;  %v8108_v35 = vpop.eup %8107  ;;  %v5626_v51 = vadd.f32 1.0, %v8102_v13  ;;  %v7054_v24 = vadd.f32 %v10465_v56, %v391_v20  ;;  %v10630_v13 = vpop.f32.mrb[57].mxu1  ;;  %v11104_v20 = vld [vmem:[#allocation28_spill] sm:$0xff] }
 0x4e6   : > { %v7124_v43 = vadd.f32 %v11100_v41, %v11099_v5  ;;  %8127 = vpow2.f32 %v6901_v12  ;;  %v392_v22 = vunpack.c.h.bf16 %v10572_v52  ;;  %v10622_v16 = vpop.eup %8109  ;;  %v7126_v37 = vadd.f32 %v11102_v59, %v435_v34  ;;  %v5420_v12 = vpop.f32.mrb[41].mxu0 }
 0x4e7   : > { %11101 = vst [vmem:[#allocation4_spill] sm:$0xff] %v10622_v16  ;;  %8129 = vrcp.f32 %v5625_v62  ;;  %v6902_v46 = vmul.f32 -1.442695, %v10491_v14  ;;  %v10628_v55 = vadd.f32 %v7120_v17, %v5414_v1  ;;  %v8112_v56 = vpop.eup %8111  ;;  %v11103_v52 = vunpack.c.h.bf16 %v10510_v33  ;;  %v10637_v16 = vpop.f32.mrb[58].mxu1 }
 0x4e8   : > { %v5628_v5 = vadd.f32 1.0, %v8106_v23  ;;  %8131 = vpow2.f32 %v6900_v29  ;;  %v10635_v41 = vadd.f32 %v7122_v45, %v5418_v63  ;;  %v5422_v34 = vpop.f32.mrb[42].mxu0  ;;  %v8114_v62 = vpop.eup %8113  ;;  %v5751_v14 = vadd.f32 1.0, %v8108_v35  ;;  %v11108_v35 = vld [vmem:[#allocation29_spill] sm:$0xff] }
 0x4e9   : > { %v7128_v19 = vadd.f32 %v11104_v20, %v11103_v52  ;;  %8133 = vrcp.f32 %v5627_v2  ;;  %v397_v1 = vunpack.c.l.bf16 %v10620_v40  ;;  %v10640_v17 = vadd.f32 %v7124_v43, %v5420_v12  ;;  %v10642_v59 = vpop.f32.mrb[59].mxu1  ;;  %v5424_v42 = vpop.f32.mrb[43].mxu0 }
 0x4ea   : > { %v10644_v33 = vpop.eup %8115  ;;  %8135 = vrcp.f32 %v5626_v51  ;;  %v6905_v23 = vmul.f32 -1.442695, %v7054_v24  ;;  %v7055_v29 = vadd.f32 %v10469_v57, %v392_v22  ;;  %v10647_v45 = vadd.f32 %v7126_v37, %v5422_v34  ;;  %v11111_v51 = vld [vmem:[#allocation30_spill] sm:$0xff]  ;;  %v11112_v34 = vld [vmem:[#allocation31_spill] sm:$0xff] }
 0x4eb   : > { %11105 = vst [vmem:[#allocation5_spill] sm:$0xff] %v10644_v33  ;;  %v10649_v63 = vpop.eup %8117  ;;  %v11107_v2 = vunpack.c.l.bf16 %v10544_v15  ;;  %v448_v43 = vunpack.c.h.bf16 %v10593_v18  ;;  %v5753_v12 = vadd.f32 1.0, %v8112_v56  ;;  %8137 = vpow2.f32 %v6902_v46  ;;  %v10665_v46 = vpop.f32.mrb[60].mxu1 }
 0x4ec   : > { %11106 = vst [vmem:[#allocation33_spill] sm:$0xff] %v10649_v63  ;;  %v10655_v20 = vpop.eup %8119  ;;  %v11110_v33 = vunpack.c.h.bf16 %v10544_v15  ;;  %8139 = vrcp.f32 %v5628_v5  ;;  %v5752_v57 = vadd.f32 1.0, %v8114_v62  ;;  %v10660_v22 = vadd.f32 %v7128_v19, %v5424_v42  ;;  %v5428_v56 = vpop.f32.mrb[44].mxu0  ;;  %v330_v5 = vld [vmem:[%s8381_s25 + $0xc8] sm:$0xff] }
 0x4ed   : > { %v7130_v52 = vadd.f32 %v11108_v35, %v11107_v2  ;;  %11109 = vst [vmem:[#allocation34_spill] sm:$0xff] %v10655_v20  ;;  %v8122_v37 = vpop.eup %8121  ;;  %v7134_v63 = vadd.f32 %v11112_v34, %v447_v3  ;;  %8141 = vrcp.f32 %v5751_v14  ;;  %v6907_v2 = vmul.f32 -1.442695, %v10494_v9  ;;  %v10671_v42 = vpop.f32.mrb[61].mxu1  ;;  %v11114_v14 = vld [vmem:[#allocation32_spill] sm:$0xff] }
 0x4ee   : > { %v7132_v24 = vadd.f32 %v11111_v51, %v11110_v33  ;;  %v398_v18 = vunpack.c.h.bf16 %v10620_v40  ;;  %v8124_v35 = vpop.eup %8123  ;;  %8143 = vpow2.f32 %v6905_v23  ;;  %v6906_v15 = vmul.f32 -1.442695, %v7055_v29  ;;  %v5430_v19 = vpop.f32.mrb[45].mxu0 }
 0x4ef   : > { %v7056_v33 = vadd.f32 %v10475_v39, %v397_v1  ;;  %v10669_v62 = vadd.f32 %v7130_v52, %v5428_v56  ;;  %v10673_v3 = vpop.eup %8125  ;;  %v7136_v9 = vadd.f32 %v11114_v14, %v448_v43  ;;  %8145 = vrcp.f32 %v5753_v12  ;;  %v10679_v34 = vpop.f32.mrb[62].mxu1 }
 0x4f0   : > { %11113 = vst [vmem:[#allocation35_spill] sm:$0xff] %v10673_v3  ;;  %v6908_v40 = vmul.f32 -1.442695, %v10518_v48  ;;  %v10677_v51 = vadd.f32 %v7132_v24, %v5430_v19  ;;  %v5432_v23 = vpop.f32.mrb[46].mxu0  ;;  %v8128_v29 = vpop.eup %8127  ;;  %8147 = vrcp.f32 %v5752_v57  ;;  %v5754_v39 = vadd.f32 1.0, %v8122_v37 }
 0x4f1   : > { %v10681_v1 = vadd.f32 %v7134_v63, %v5432_v23  ;;  %v10683_v52 = vpop.f32.mrb[63].mxu1  ;;  %v5434_v56 = vpop.f32.mrb[47].mxu0  ;;  %v5757_v3 = vadd.f32 1.0, %v8124_v35  ;;  %8149 = vpow2.f32 %v6907_v2  ;;  %v403_v43 = vunpack.c.l.bf16 %v330_v5 }
 0x4f2   : > { %v10685_v20 = vpop.eup %8129  ;;  %v10687_v12 = vadd.f32 %v7136_v9, %v5434_v56  ;;  %8151 = vpow2.f32 %v6906_v15  ;;  %v6911_v24 = vmul.f32 -1.442695, %v7056_v33  ;;  %v7057_v19 = vadd.f32 %v10480_v31, %v398_v18  ;;  %v333_v31 = vld [vmem:[%s8381_s25 + $0xe0] sm:$0xff] }
 0x4f3   : > { %v8132_v48 = vpop.eup %8131  ;;  %v5759_v63 = vadd.f32 1.0, %v8128_v29  ;;  %8153 = vpow2.f32 %v6908_v40  ;;  %v6913_v14 = vmul.f32 -1.442695, %v10524_v4  ;;  %v404_v35 = vunpack.c.h.bf16 %v330_v5 }
 0x4f4   : > { %v10690_v57 = vpop.eup %8133  ;;  %8155 = vrcp.f32 %v5754_v39  ;;  %v5758_v9 = vadd.f32 1.0, %v8132_v48  ;;  %v7058_v23 = vadd.f32 %v10504_v53, %v403_v43  ;;  %v6912_v33 = vmul.f32 -1.442695, %v7057_v19 }
 0x4f5   : > { %v10692_v37 = vpop.eup %8135  ;;  %8157 = vrcp.f32 %v5757_v3  ;;  %v6914_v40 = vmul.f32 -1.442695, %v10526_v28  ;;  %v7059_v4 = vadd.f32 %v10520_v60, %v404_v35  ;;  %v409_v3 = vunpack.c.l.bf16 %v333_v31 }
 0x4f6   : > { %v8138_v2 = vpop.eup %8137  ;;  %8159 = vpow2.f32 %v6911_v24  ;;  %v6917_v53 = vmul.f32 -1.442695, %v7058_v23  ;;  %v6919_v43 = vmul.f32 -1.442695, %v10547_v21  ;;  %v6920_v60 = vmul.f32 -1.442695, %v10552_v10 }
 0x4f7   : > { %v10696_v15 = vpop.eup %8139  ;;  %8161 = vrcp.f32 %v5759_v63  ;;  %v5760_v39 = vadd.f32 1.0, %v8138_v2  ;;  %v6918_v19 = vmul.f32 -1.442695, %v7059_v4  ;;  %v410_v63 = vunpack.c.h.bf16 %v333_v31 }
 0x4f8   : > { %v10699_v18 = vpop.eup %8141  ;;  %8163 = vpow2.f32 %v6913_v14  ;;  %v336_v14 = vld [vmem:[%s8381_s25 + $0xf8] sm:$0xff]  ;;  %v7060_v35 = vadd.f32 %v10528_v11, %v409_v3  ;;  %v6925_v11 = vmul.f32 -1.442695, %v10563_v26 }
 0x4f9   : > { %v8144_v29 = vpop.eup %8143  ;;  %8165 = vrcp.f32 %v5758_v9  ;;  %v7061_v31 = vadd.f32 %v10534_v32, %v410_v63 }
 0x4fa   : > { %v10703_v5 = vpop.eup %8145  ;;  %8167 = vpow2.f32 %v6912_v33  ;;  %v5763_v24 = vadd.f32 1.0, %v8144_v29  ;;  %v6923_v10 = vmul.f32 -1.442695, %v7060_v35 }
 0x4fb   : > { %v10705_v56 = vpop.eup %8147  ;;  %8169 = vpow2.f32 %v6914_v40  ;;  %v415_v40 = vunpack.c.l.bf16 %v336_v14 }
 0x4fc   : > { %v8150_v48 = vpop.eup %8149  ;;  %8171 = vrcp.f32 %v5760_v39 }
 0x4fd   : > { %v8152_v28 = vpop.eup %8151  ;;  %8173 = vpow2.f32 %v6917_v53  ;;  %v5765_v23 = vadd.f32 1.0, %v8150_v48  ;;  %v7062_v48 = vadd.f32 %v10560_v7, %v415_v40 }
 0x4fe   : > { %v8154_v2 = vpop.eup %8153  ;;  %8175 = vpow2.f32 %v6919_v43  ;;  %v5764_v21 = vadd.f32 1.0, %v8152_v28  ;;  %v6924_v28 = vmul.f32 -1.442695, %v7061_v31 }
 0x4ff   : > { %v10711_v9 = vpop.eup %8155  ;;  %8177 = vrcp.f32 %v5763_v24  ;;  %v5766_v39 = vadd.f32 1.0, %v8154_v2  ;;  %v6926_v2 = vmul.f32 -1.442695, %v10574_v47  ;;  %v6929_v26 = vmul.f32 -1.442695, %v7062_v48 }
 0x500   : > { %v10713_v33 = vpop.eup %8157  ;;  %8179 = vpow2.f32 %v6918_v19 }
 0x501   : > { %v8160_v29 = vpop.eup %8159  ;;  %8181 = vpow2.f32 %v6920_v60  ;;  %v339_v60 = vld [vmem:[%s8381_s25 + $0x110] sm:$0xff] }
 0x502   : > { %v10716_v4 = vpop.eup %8161  ;;  %8183 = vrcp.f32 %v5765_v23  ;;  %v5769_v43 = vadd.f32 1.0, %v8160_v29  ;;  %v416_v23 = vunpack.c.h.bf16 %v336_v14  ;;  %v6931_v14 = vmul.f32 -1.442695, %v10597_v44 }
 0x503   : > { %v8164_v53 = vpop.eup %8163  ;;  %8185 = vrcp.f32 %v5764_v21 }
 0x504   : > { %v10719_v3 = vpop.eup %8165  ;;  %8187 = vrcp.f32 %v5766_v39  ;;  %v5771_v32 = vadd.f32 1.0, %v8164_v53  ;;  %v421_v39 = vunpack.c.l.bf16 %v339_v60  ;;  %v7063_v47 = vadd.f32 %v10565_v49, %v416_v23 }
 0x505   : > { %v8168_v24 = vpop.eup %8167  ;;  %8189 = vpow2.f32 %v6923_v10  ;;  %v6932_v23 = vmul.f32 -1.442695, %v10599_v25 }
 0x506   : > { %v8170_v19 = vpop.eup %8169  ;;  %8191 = vpow2.f32 %v6925_v11  ;;  %v5770_v29 = vadd.f32 1.0, %v8168_v24 }
 0x507   : > { %v10722_v63 = vpop.eup %8171  ;;  %8193 = vrcp.f32 %v5769_v43  ;;  %v5772_v40 = vadd.f32 1.0, %v8170_v19 }
 0x508   : > { %v8174_v35 = vpop.eup %8173  ;;  %8195 = vpow2.f32 %v6924_v28  ;;  %v7064_v28 = vadd.f32 %v10576_v54, %v421_v39 }
 0x509   : > { %v8176_v21 = vpop.eup %8175  ;;  %8197 = vrcp.f32 %v5771_v32  ;;  %v5895_v10 = vadd.f32 1.0, %v8174_v35  ;;  %v6930_v35 = vmul.f32 -1.442695, %v7063_v47 }
 0x50a   : > { %v10726_v7 = vpop.eup %8177  ;;  %8199 = vpow2.f32 %v6926_v2  ;;  %v5897_v11 = vadd.f32 1.0, %v8176_v21  ;;  %v6935_v44 = vmul.f32 -1.442695, %v7064_v28 }
 0x50b   : > { %v8180_v31 = vpop.eup %8179  ;;  %8201 = vpow2.f32 %v6929_v26  ;;  %v342_v26 = vld [vmem:[%s8381_s25 + $0x128] sm:$0xff] }
 0x50c   : > { %v8182_v53 = vpop.eup %8181  ;;  %8203 = vrcp.f32 %v5770_v29  ;;  %v5896_v24 = vadd.f32 1.0, %v8180_v31  ;;  %v422_v29 = vunpack.c.h.bf16 %v339_v60  ;;  %v427_v39 = vunpack.c.l.bf16 %v342_v26 }
 0x50d   : > { %v10729_v43 = vpop.eup %8183  ;;  %8205 = vrcp.f32 %v5772_v40  ;;  %v5898_v32 = vadd.f32 1.0, %v8182_v53 }
 0x50e   : > { %v10732_v48 = vpop.eup %8185  ;;  %8207 = vrcp.f32 %v5895_v10  ;;  %v7066_v60 = vadd.f32 %v10615_v8, %v427_v39 }
 0x50f   : > { %v10735_v19 = vpop.eup %8187  ;;  %8209 = vrcp.f32 %v5897_v11  ;;  %v6937_v11 = vmul.f32 -1.442695, %v10601_v27  ;;  %v345_v27 = vld [vmem:[%s8381_s25 + $0x140] sm:$0xff] }
 0x510   : > { %v8190_v2 = vpop.eup %8189  ;;  %8211 = vpow2.f32 %v6931_v14  ;;  %v7065_v14 = vadd.f32 %v10582_v0, %v422_v29  ;;  %v6938_v29 = vmul.f32 -1.442695, %v10628_v55 }
 0x511   : > { %v8192_v49 = vpop.eup %8191  ;;  %8213 = vrcp.f32 %v5896_v24  ;;  %v5901_v54 = vadd.f32 1.0, %v8190_v2 }
 0x512   : > { %v10739_v21 = vpop.eup %8193  ;;  %8215 = vrcp.f32 %v5898_v32  ;;  %v5903_v10 = vadd.f32 1.0, %v8192_v49  ;;  %v428_v49 = vunpack.c.h.bf16 %v342_v26 }
 0x513   : > { %v8196_v40 = vpop.eup %8195  ;;  %8217 = vpow2.f32 %v6930_v35 }
 0x514   : > { %v10741_v31 = vpop.eup %8197  ;;  %8219 = vpow2.f32 %v6932_v23  ;;  %v5902_v25 = vadd.f32 1.0, %v8196_v40  ;;  %v433_v40 = vunpack.c.l.bf16 %v345_v27  ;;  %v7067_v39 = vadd.f32 %v10630_v13, %v428_v49 }
 0x515   : > { %v8200_v53 = vpop.eup %8199  ;;  %8221 = vpow2.f32 %v6935_v44  ;;  %v6936_v44 = vmul.f32 -1.442695, %v7065_v14 }
 0x516   : > { %v8202_v47 = vpop.eup %8201  ;;  %8223 = vrcp.f32 %v5901_v54  ;;  %v5904_v32 = vadd.f32 1.0, %v8200_v53  ;;  %v7068_v55 = vadd.f32 %v10637_v16, %v433_v40 }
 0x517   : > { %v10745_v24 = vpop.eup %8203  ;;  %8225 = vrcp.f32 %v5903_v10  ;;  %v5907_v35 = vadd.f32 1.0, %v8202_v47  ;;  %v434_v47 = vunpack.c.h.bf16 %v345_v27 }
 0x518   : > { %v10748_v28 = vpop.eup %8205  ;;  %8227 = vpow2.f32 %v6937_v11 }
 0x519   : > { %v10750_v2 = vpop.eup %8207  ;;  %8229 = vrcp.f32 %v5902_v25  ;;  %v348_v25 = vld [vmem:[%s8381_s25 + $0x158] sm:$0xff]  ;;  %v7069_v27 = vadd.f32 %v10642_v59, %v434_v47  ;;  %v5993_v59 = vld [vmem:[%s11005_s4 + $0x20] sm:$0xff] }
 0x51a   : > { %v10753_v23 = vpop.eup %8209  ;;  %8231 = vtanh.f32 %v7066_v60  ;;  %v439_v16 = vunpack.c.l.bf16 %v348_v25 }
 0x51b   : > { %v8212_v0 = vpop.eup %8211  ;;  %8233 = vrcp.f32 %v5904_v32 }
 0x51c   : > { %v10756_v8 = vpop.eup %8213  ;;  %8235 = vrcp.f32 %v5907_v35  ;;  %v5909_v10 = vadd.f32 1.0, %v8212_v0  ;;  %v5991_v35 = vld [vmem:[%s11005_s4 + $0x10] sm:$0xff]  ;;  %v440_v0 = vunpack.c.h.bf16 %v348_v25 }
 0x51d   : > { %v10758_v54 = vpop.eup %8215  ;;  %8237 = vpow2.f32 %v6936_v44  ;;  %v6015_v40 = vmul.f32 %v10699_v18, %v5991_v35  ;;  %v5994_v35 = vld [vmem:[%s11005_s4 + $0x28] sm:$0xff] }
 0x51e   : > { %v8218_v26 = vpop.eup %8217  ;;  %8239 = vpow2.f32 %v6938_v29  ;;  %v7071_v18 = vadd.f32 %v10671_v42, %v440_v0 }
 0x51f   : > { %v8220_v53 = vpop.eup %8219  ;;  %8241 = vtanh.f32 %v10635_v41  ;;  %v5908_v13 = vadd.f32 1.0, %v8218_v26  ;;  %v10785_v26 = vld [vmem:[%s8381_s25 + $0x170] sm:$0xff] }
 0x520   : > { %v10761_v11 = vpop.eup %8221  ;;  %8243 = vtanh.f32 %v7067_v39  ;;  %v5910_v49 = vadd.f32 1.0, %v8220_v53 }
 0x521   : > { %v10766_v14 = vpop.eup %8223  ;;  %8245 = vrcp.f32 %v5909_v10  ;;  %v7070_v10 = vadd.f32 %v10665_v46, %v439_v16  ;;  %v445_v46 = vunpack.c.l.bf16 %v10785_v26 }
 0x522   : > { %v10768_v60 = vpop.eup %8225  ;;  %8247 = vtanh.f32 %v10640_v17 }
 0x523   : > { %v10770_v32 = vpop.eup %8227  ;;  %8249 = vtanh.f32 %v7068_v55 }
 0x524   : > { %v10776_v41 = vpop.eup %8229  ;;  %8251 = vtanh.f32 %v10647_v45 }
 0x525   : > { %v8232_v44 = vpop.eup %8231  ;;  %8253 = vrcp.f32 %v5908_v13  ;;  %v6017_v13 = vmul.f32 %v10703_v5, %v5993_v59 }
 0x526   : > { %v10780_v29 = vpop.eup %8233  ;;  %v6039_v39 = vmul.f32 %v8232_v44, %v10514_v50  ;;  %8255 = vrcp.f32 %v5910_v49  ;;  %v5992_v50 = vld [vmem:[%s11005_s4 + $0x18] sm:$0xff]  ;;  %v6145_v44 = vsub.s32 2, %v10259_v58 }
 0x527   : > { %v10787_v17 = vpop.eup %8235  ;;  %8257 = vtanh.f32 %v7069_v27  ;;  %v6016_v16 = vmul.f32 %v10705_v56, %v5992_v50  ;;  %v5997_v27 = vld [vmem:[%s11005_s4 + $0x40] sm:$0xff]  ;;  %v7072_v56 = vadd.f32 %v10679_v34, %v445_v46  ;;  %v6149_v50 = vsub.s32 3, %v10259_v58 }
 0x528   : > { %v10790_v53 = vpop.eup %8237  ;;  %v6063_v45 = vadd.f32 %v6039_v39, %v6015_v40  ;;  %8259 = vtanh.f32 %v10660_v22  ;;  %v446_v22 = vunpack.c.h.bf16 %v10785_v26  ;;  %v6153_v39 = vsub.s32 4, %v10259_v58 }
 0x529   : > { %v10795_v55 = vpop.eup %8239 }
 0x52a   : > { %v8242_v47 = vpop.eup %8241  ;;  %8261 = vtanh.f32 %v6063_v45  ;;  %6191 = vst [vmem:[%s11005_s4 + $0x10] sm:$0xff] %v6063_v45 }
 0x52b   : > { %v8244_v25 = vpop.eup %8243  ;;  %v6041_v49 = vmul.f32 %v8242_v47, %v10522_v38  ;;  %8263 = vtanh.f32 %v7070_v10  ;;  %v5999_v38 = vld [vmem:[%s11005_s4 + $0x50] sm:$0xff]  ;;  %v6018_v10 = vmul.f32 %v10711_v9, %v5994_v35 }
 0x52c   : > { %v10812_v42 = vpop.eup %8245  ;;  %v6040_v5 = vmul.f32 %v8244_v25, %v10549_v36  ;;  %8265 = vtanh.f32 %v10669_v62  ;;  %v6021_v62 = vmul.f32 %v10713_v33, %v5997_v27  ;;  %v6023_v9 = vmul.f32 %v10716_v4, %v5999_v38  ;;  %v10853_v4 = vld [vmem:[%s11003_s2] sm:$0x3f] }
 0x52d   : > { %v8248_v0 = vpop.eup %8247  ;;  %v6065_v40 = vadd.f32 %v6041_v49, %v6017_v13  ;;  %8267 = vtanh.f32 %v7071_v18  ;;  %v10856_v47 = vrot.slane %v10853_v4, %v6145_v44  ;;  %v10862_v35 = vrot.slane %v10853_v4, %v6153_v39  ;;  %v11115_v38 = vld [vmem:[#allocation3_spill] sm:$0xff] }
 0x52e   : > { %v8250_v26 = vpop.eup %8249  ;;  %v6064_v59 = vadd.f32 %v6040_v5, %v6016_v16  ;;  %v6042_v45 = vmul.f32 %v8248_v0, %v10554_v30  ;;  %8269 = vtanh.f32 %v10677_v51  ;;  %v5998_v30 = vld [vmem:[%s11005_s4 + $0x48] sm:$0xff]  ;;  %v7073_v16 = vadd.f32 %v10683_v52, %v446_v22  ;;  %v6005_v5 = vld [vmem:[%s11005_s4 + $0x80] sm:$0xff]  ;;  %v6004_v52 = vld [vmem:[%s11005_s4 + $0x78] sm:$0xff] }
 0x52f   : > { %v8252_v36 = vpop.eup %8251  ;;  %8271 = vtanh.f32 %v6065_v40  ;;  %6193 = vst [vmem:[%s11005_s4 + $0x20] sm:$0xff] %v6065_v40  ;;  %v6045_v34 = vmul.f32 %v8250_v26, %v10567_v6  ;;  %v6000_v6 = vld [vmem:[%s11005_s4 + $0x58] sm:$0xff]  ;;  %v6022_v44 = vmul.f32 %v10719_v3, %v5998_v30  ;;  %v6157_v0 = vsub.s32 5, %v10259_v58  ;;  %v11116_v58 = vld [vmem:[#allocation4_spill] sm:$0xff] }
 0x530   : > { %v10835_v18 = vpop.eup %8253  ;;  %8273 = vtanh.f32 %v6064_v59  ;;  %6192 = vst [vmem:[%s11005_s4 + $0x18] sm:$0xff] %v6064_v59  ;;  %v6066_v51 = vadd.f32 %v6042_v45, %v6018_v10  ;;  %v6047_v33 = vmul.f32 %v8252_v36, %v10584_v61  ;;  %v6003_v61 = vld [vmem:[%s11005_s4 + $0x70] sm:$0xff]  ;;  %v10882_v3 = vrot.slane %v10853_v4, %v6149_v50 }
 0x531   : > { %v10845_v46 = vpop.eup %8255  ;;  %v6069_v25 = vadd.f32 %v6045_v34, %v6021_v62  ;;  %8275 = vtanh.f32 %v7072_v56  ;;  %v6024_v56 = vmul.f32 %v10722_v63, %v6000_v6  ;;  %v6027_v10 = vmul.f32 %v10726_v7, %v6003_v61  ;;  %v6006_v63 = vld [vmem:[%s11005_s4 + $0x88] sm:$0xff]  ;;  %v11117_v34 = vld [vmem:[#allocation5_spill] sm:$0xff]  ;;  %v6009_v61 = vld [vmem:[%s11005_s4 + $0xa0] sm:$0xff] }
 0x532   : > { %v8258_v13 = vpop.eup %8257  ;;  %8277 = vtanh.f32 %v6066_v51  ;;  %6194 = vst [vmem:[%s11005_s4 + $0x28] sm:$0xff] %v6066_v51  ;;  %v6071_v49 = vadd.f32 %v6047_v33, %v6023_v9  ;;  %v6029_v62 = vmul.f32 %v10729_v43, %v6005_v5  ;;  %v6028_v51 = vmul.f32 %v10732_v48, %v6004_v52 }
 0x533   : > { %v8260_v27 = vpop.eup %8259  ;;  %8279 = vtanh.f32 %v6069_v25  ;;  %6197 = vst [vmem:[%s11005_s4 + $0x40] sm:$0xff] %v6069_v25  ;;  %v6046_v40 = vmul.f32 %v8258_v13, %v11115_v38  ;;  %v6030_v6 = vmul.f32 %v10735_v19, %v6006_v63  ;;  %v11119_v25 = vld [vmem:[#allocation34_spill] sm:$0xff]  ;;  %v5913_v38 = vadd.f32 1.0, %v10761_v11  ;;  %v6010_v63 = vld [vmem:[%s11005_s4 + $0xa8] sm:$0xff] }
 0x534   : > { %v8262_v39 = vpop.eup %8261  ;;  %8281 = vtanh.f32 %v6071_v49  ;;  %6199 = vst [vmem:[%s11005_s4 + $0x50] sm:$0xff] %v6071_v49  ;;  %v6048_v22 = vmul.f32 %v8260_v27, %v11116_v58  ;;  %v8318_v49 = vld [vmem:[#allocation2 + $0x10] sm:$0xff]  ;;  %v10920_v58 = vrot.slane %v10853_v4, %v6157_v0  ;;  %v6033_v11 = vmul.f32 %v10739_v21, %v6009_v61 }
 0x535   : > { %v8264_v26 = vpop.eup %8263  ;;  %v6111_v59 = vmul.f32 %v8262_v39, %v10750_v2  ;;  %v6070_v45 = vadd.f32 %v6046_v40, %v6022_v44  ;;  %8283 = vtanh.f32 %v10681_v1  ;;  %v11118_v2 = vld [vmem:[#allocation33_spill] sm:$0xff]  ;;  %v11120_v44 = vld [vmem:[#allocation35_spill] sm:$0xff] }
 0x536   : > { %v8266_v36 = vpop.eup %8265  ;;  %v6072_v50 = vadd.f32 %v6048_v22, %v6024_v56  ;;  %v6051_v9 = vmul.f32 %v8264_v26, %v11117_v34  ;;  %8285 = vtanh.f32 %v7073_v16  ;;  %v6011_v0 = vld [vmem:[%s11005_s4 + $0xb0] sm:$0xff] }
 0x537   : > { %v8268_v30 = vpop.eup %8267  ;;  %v6167_v7 = vmul.f32 %v10856_v47, %v6111_v59  ;;  %8287 = vtanh.f32 %v6070_v45  ;;  %6198 = vst [vmem:[%s11005_s4 + $0x48] sm:$0xff] %v6070_v45  ;;  %v6053_v33 = vmul.f32 %v8266_v36, %v11118_v2  ;;  %v6244_v59 = vld [vmem:[#allocation2 + $0x38] sm:$0xff] }
 0x538   : > { %v8270_v1 = vpop.eup %8269  ;;  %8289 = vtanh.f32 %v6072_v50  ;;  %6200 = vst [vmem:[%s11005_s4 + $0x58] sm:$0xff] %v6072_v50  ;;  %v6075_v43 = vadd.f32 %v6051_v9, %v6027_v10  ;;  %v6052_v48 = vmul.f32 %v8268_v30, %v11119_v25  ;;  %v6012_v2 = vld [vmem:[%s11005_s4 + $0xb8] sm:$0xff] }
 0x539   : > { %v8272_v13 = vpop.eup %8271  ;;  %6215 = vst [vmem:[#allocation2 + $0x18] sm:$0xff] %v6167_v7  ;;  %v6959_v16 = vpack.c.bf16 %v6167_v7, %v8318_v49  ;;  %v6077_v27 = vadd.f32 %v6053_v33, %v6029_v62  ;;  %v6054_v19 = vmul.f32 %v8270_v1, %v11120_v44  ;;  %8291 = vtanh.f32 %v10687_v12 }
 0x53a   : > { %v8274_v5 = vpop.eup %8273  ;;  %v6113_v40 = vmul.f32 %v8272_v13, %v10753_v23  ;;  %8293 = vtanh.f32 %v6075_v43  ;;  %6203 = vst [vmem:[%s11005_s4 + $0x70] sm:$0xff] %v6075_v43  ;;  %v6076_v39 = vadd.f32 %v6052_v48, %v6028_v51  ;;  %v5914_v62 = vadd.f32 1.0, %v10790_v53 }
 0x53b   : > { %v8276_v56 = vpop.eup %8275  ;;  %6366 = vst [vmem:[%s8376_s22 + $0x8] sm:$0xff] %v6959_v16  ;;  %v6112_v52 = vmul.f32 %v8274_v5, %v10756_v8  ;;  %8295 = vtanh.f32 %v6077_v27  ;;  %6205 = vst [vmem:[%s11005_s4 + $0x80] sm:$0xff] %v6077_v27  ;;  %v6078_v12 = vadd.f32 %v6054_v19, %v6030_v6  ;;  %v6035_v51 = vmul.f32 %v10741_v31, %v6011_v0  ;;  %v6252_v27 = vld [vmem:[#allocation2 + $0x78] sm:$0xff] }
 0x53c   : > { %v8278_v23 = vpop.eup %8277  ;;  %v6169_v22 = vmul.f32 %v10862_v35, %v6113_v40  ;;  %8297 = vtanh.f32 %v6076_v39  ;;  %6204 = vst [vmem:[%s11005_s4 + $0x78] sm:$0xff] %v6076_v39  ;;  %v6057_v8 = vmul.f32 %v8276_v56, %v10685_v20  ;;  %v5915_v20 = vadd.f32 1.0, %v10770_v32 }
 0x53d   : > { %v8280_v4 = vpop.eup %8279  ;;  %v6168_v26 = vmul.f32 %v10882_v3, %v6112_v52  ;;  %v6114_v10 = vmul.f32 %v8278_v23, %v10758_v54  ;;  %8299 = vtanh.f32 %v6078_v12  ;;  %6206 = vst [vmem:[%s11005_s4 + $0x88] sm:$0xff] %v6078_v12  ;;  %v6034_v53 = vmul.f32 %v10745_v24, %v6010_v63 }
 0x53e   : > { %v8282_v21 = vpop.eup %8281  ;;  %8301 = vrcp.f32 %v5913_v38  ;;  %6217 = vst [vmem:[#allocation2 + $0x28] sm:$0xff] %v6169_v22  ;;  %v6117_v45 = vmul.f32 %v8280_v4, %v10766_v14  ;;  %v6081_v36 = vadd.f32 %v6057_v8, %v6033_v11  ;;  %v5916_v48 = vadd.f32 1.0, %v10795_v55 }
 0x53f   : > { %v8284_v54 = vpop.eup %8283  ;;  %6216 = vst [vmem:[#allocation2 + $0x20] sm:$0xff] %v6168_v26  ;;  %v6960_v50 = vpack.c.bf16 %v6169_v22, %v6168_v26  ;;  %v6170_v34 = vmul.f32 %v10920_v58, %v6114_v10  ;;  %v6119_v9 = vmul.f32 %v8282_v21, %v10768_v60 }
 0x540   : > { %v8286_v30 = vpop.eup %8285  ;;  %v6173_v32 = vmul.f32 %v10856_v47, %v6117_v45  ;;  %8303 = vtanh.f32 %v6081_v36  ;;  %6209 = vst [vmem:[%s11005_s4 + $0xa0] sm:$0xff] %v6081_v36  ;;  %v6059_v14 = vmul.f32 %v8284_v54, %v10690_v57  ;;  %v8319_v57 = vld [vmem:[#allocation2 + $0x50] sm:$0xff] }
 0x541   : > { %v8288_v7 = vpop.eup %8287  ;;  %6367 = vst [vmem:[%s8376_s22 + $0x10] sm:$0xff] %v6960_v50  ;;  %6218 = vst [vmem:[#allocation2 + $0x30] sm:$0xff] %v6170_v34  ;;  %v6961_v31 = vpack.c.bf16 %v6244_v59, %v6170_v34  ;;  %v6175_v60 = vmul.f32 %v10862_v35, %v6119_v9  ;;  %v6058_v33 = vmul.f32 %v8286_v30, %v10692_v37  ;;  %8305 = vrcp.f32 %v5915_v20  ;;  %v8321_v59 = vld [vmem:[#allocation2 + $0xd0] sm:$0xff] }
 0x542   : > { %v8290_v1 = vpop.eup %8289  ;;  %6221 = vst [vmem:[#allocation2 + $0x58] sm:$0xff] %v6173_v32  ;;  %v6963_v6 = vpack.c.bf16 %v6173_v32, %v8319_v57  ;;  %v6118_v24 = vmul.f32 %v8288_v7, %v10776_v41  ;;  %v6083_v43 = vadd.f32 %v6059_v14, %v6035_v51  ;;  %8307 = vrcp.f32 %v5914_v62  ;;  %v6268_v51 = vld [vmem:[#allocation2 + $0xf8] sm:$0xff] }
 0x543   : > { %v8292_v25 = vpop.eup %8291  ;;  %6368 = vst [vmem:[%s8376_s22 + $0x18] sm:$0xff] %v6961_v31  ;;  %6223 = vst [vmem:[#allocation2 + $0x68] sm:$0xff] %v6175_v60  ;;  %v6120_v13 = vmul.f32 %v8290_v1, %v10780_v29  ;;  %v6082_v61 = vadd.f32 %v6058_v33, %v6034_v53  ;;  %v6036_v37 = vmul.f32 %v10748_v28, %v6012_v2 }
 0x544   : > { %v8294_v49 = vpop.eup %8293  ;;  %6370 = vst [vmem:[%s8376_s22 + $0x28] sm:$0xff] %v6963_v6  ;;  %v6174_v16 = vmul.f32 %v10882_v3, %v6118_v24  ;;  %8309 = vtanh.f32 %v6083_v43  ;;  %6211 = vst [vmem:[%s11005_s4 + $0xb0] sm:$0xff] %v6083_v43  ;;  %v6060_v41 = vmul.f32 %v8292_v25, %v10696_v15 }
 0x545   : > { %v8296_v55 = vpop.eup %8295  ;;  %v6176_v44 = vmul.f32 %v10920_v58, %v6120_v13  ;;  %v6123_v29 = vmul.f32 %v8294_v49, %v10787_v17  ;;  %8311 = vtanh.f32 %v6082_v61  ;;  %6210 = vst [vmem:[%s11005_s4 + $0xa8] sm:$0xff] %v6082_v61 }
 0x546   : > { %v8298_v28 = vpop.eup %8297  ;;  %6222 = vst [vmem:[#allocation2 + $0x60] sm:$0xff] %v6174_v16  ;;  %v6964_v19 = vpack.c.bf16 %v6175_v60, %v6174_v16  ;;  %v6125_v5 = vmul.f32 %v8296_v55, %v10812_v42  ;;  %v6084_v38 = vadd.f32 %v6060_v41, %v6036_v37  ;;  %8313 = vrcp.f32 %v5916_v48  ;;  %v8320_v42 = vld [vmem:[#allocation2 + $0x90] sm:$0xff] }
 0x547   : > { %v8300_v40 = vpop.eup %8299  ;;  %6224 = vst [vmem:[#allocation2 + $0x70] sm:$0xff] %v6176_v44  ;;  %v6965_v15 = vpack.c.bf16 %v6252_v27, %v6176_v44  ;;  %v6179_v39 = vmul.f32 %v10856_v47, %v6123_v29  ;;  %v6124_v17 = vmul.f32 %v8298_v28, %v10835_v18  ;;  %v6260_v18 = vld [vmem:[#allocation2 + $0xb8] sm:$0xff] }
 0x548   : > { %v8302_v56 = vpop.eup %8301  ;;  %6371 = vst [vmem:[%s8376_s22 + $0x30] sm:$0xff] %v6964_v19  ;;  %v6181_v52 = vmul.f32 %v10862_v35, %v6125_v5  ;;  %v6126_v12 = vmul.f32 %v8300_v40, %v10845_v46  ;;  %8315 = vtanh.f32 %v6084_v38  ;;  %6212 = vst [vmem:[%s11005_s4 + $0xb8] sm:$0xff] %v6084_v38 }
 0x549   : > { %6372 = vst [vmem:[%s8376_s22 + $0x38] sm:$0xff] %v6965_v15  ;;  %6227 = vst [vmem:[#allocation2 + $0x98] sm:$0xff] %v6179_v39  ;;  %v6967_v23 = vpack.c.bf16 %v6179_v39, %v8320_v42  ;;  %v6180_v11 = vmul.f32 %v10882_v3, %v6124_v17 }
 0x54a   : > { %v8304_v22 = vpop.eup %8303  ;;  %6229 = vst [vmem:[#allocation2 + $0xa8] sm:$0xff] %v6181_v52  ;;  %v6182_v8 = vmul.f32 %v10920_v58, %v6126_v12 }
 0x54b   : > { %6374 = vst [vmem:[%s8376_s22 + $0x48] sm:$0xff] %v6967_v23  ;;  %6228 = vst [vmem:[#allocation2 + $0xa0] sm:$0xff] %v6180_v11  ;;  %v6968_v46 = vpack.c.bf16 %v6181_v52, %v6180_v11  ;;  %v6129_v4 = vmul.f32 %v8304_v22, %v8302_v56  ;;  %v8306_v0 = vpop.eup %8305 }
 0x54c   : > { %6230 = vst [vmem:[#allocation2 + $0xb0] sm:$0xff] %v6182_v8  ;;  %v6969_v26 = vpack.c.bf16 %v6260_v18, %v6182_v8  ;;  %v8308_v10 = vpop.eup %8307 }
 0x54d   : > { %6375 = vst [vmem:[%s8376_s22 + $0x50] sm:$0xff] %v6968_v46  ;;  %v6185_v21 = vmul.f32 %v10856_v47, %v6129_v4 }
 0x54e   : > { %v8310_v63 = vpop.eup %8309  ;;  %6376 = vst [vmem:[%s8376_s22 + $0x58] sm:$0xff] %v6969_v26 }
 0x54f   : > { %v8312_v20 = vpop.eup %8311  ;;  %6233 = vst [vmem:[#allocation2 + $0xd8] sm:$0xff] %v6185_v21  ;;  %v6971_v45 = vpack.c.bf16 %v6185_v21, %v8321_v59  ;;  %v6131_v36 = vmul.f32 %v8310_v63, %v8306_v0 }
 0x550   : > { %v6130_v54 = vmul.f32 %v8312_v20, %v8308_v10  ;;  %v8314_v62 = vpop.eup %8313 }
 0x551   : > { %6378 = vst [vmem:[%s8376_s22 + $0x68] sm:$0xff] %v6971_v45  ;;  %v6187_v50 = vmul.f32 %v10862_v35, %v6131_v36 }
 0x552   : > { %v8316_v34 = vpop.eup %8315  ;;  %v6186_v9 = vmul.f32 %v10882_v3, %v6130_v54 }
 0x553   : > { %6235 = vst [vmem:[#allocation2 + $0xe8] sm:$0xff] %v6187_v50  ;;  %v6132_v30 = vmul.f32 %v8316_v34, %v8314_v62 }
 0x554   : > { %6234 = vst [vmem:[#allocation2 + $0xe0] sm:$0xff] %v6186_v9  ;;  %v6972_v47 = vpack.c.bf16 %v6187_v50, %v6186_v9 }
 0x555   : > { %v6188_v32 = vmul.f32 %v10920_v58, %v6132_v30 }
 0x556   : > { %6379 = vst [vmem:[%s8376_s22 + $0x70] sm:$0xff] %v6972_v47 }
 0x557   : > { %6236 = vst [vmem:[#allocation2 + $0xf0] sm:$0xff] %v6188_v32  ;;  %v6973_v14 = vpack.c.bf16 %v6268_v51, %v6188_v32 }
 0x559   : > { %6380 = vst [vmem:[%s8376_s22 + $0x78] sm:$0xff] %v6973_v14 }
 0x55a PF: > { %s15_s15 = sadd.s32 1, %s8328_s15  }
 0x55b   : > { %p12_p5 = scmp.ge.s32.totalorder %s15_s15, 10  }
 0x55d   :  { %14 = sbr.rel (!%p12_p5) target bundleno = 1 (0x1), region = 82 }

// kernel: convlstm_forward.7
= control target key start
LH: loop header
LB: loop body
LE: loop exit
PB: predicated region body
PF: predicated region fallthrough
CT: control target
= control target key end

     0   :  { %s1434_s15 = smov 0   ;;  %s1868_s0 = inlined_call_operand.vmem [shape: bf16[8,32,768], index: 0, kind: input, shape index: {}]   ;;  %s1869_s1 = inlined_call_operand.vmem [shape: bf16[32,72], index: 1, kind: input, shape index: {}]   ;;  %s1870_s2 = inlined_call_operand.vmem [shape: f32[1,768], index: 2, kind: input, shape index: {}]   ;;  %s1871_s3 = inlined_call_operand.vmem [shape: bf16[8,8,1024], index: 3, kind: output, shape index: {0}]   ;;  %s1872_s4 = inlined_call_operand.vmem [shape: f32[8,768], index: 4, kind: output, shape index: {1}]  }
   0x1 LB: > { %s1213_s16 = sadd.s32 4294967295, %s1396_s15   ;;  %p1217_p0 = scmp.ge.s32.totalorder %s1396_s15, 1  ;;  %s1396_s15 = sphi %s1434_s15, %s15_s15  }
   0x2   : > { %p160_p1 = scmp.lt.s32.totalorder %s1396_s15, 9 }
   0x4   : > { %p161_p2 = pnand %p1217_p0, %p160_p1 }
   0x5   : > { %p186_p3 = scmp.lt.s32.totalorder (!%p161_p2), %s1213_s16, 7  ;;  %p1221_p4 = scmp.ne.s32.totalorder (!%p161_p2), %s1213_s16, 0 }
   0x6   : > { %164 = sbr.rel (%p161_p2) target bundleno = 645 (0x285), region = 32 }
   0xd   : > { %s187_s17 = scalar_select %p186_p3, %s1213_s16, 7 }
   0xe   : > { %200 = sbr.rel (%p1221_p4) target bundleno = 22 (0x16), region = 36  ;;  %v1398_v0 = vmov (!%p1221_p4), 0.0  }
   0xf   : > { %s1272_s18 = smul.u32 96, %s187_s17  ;;  %s1257_s19 = sshll.u32 %s187_s17, 5  ;;  %201 = vst [vmem:[#allocation2] sm:$0xff] (!%p1221_p4), %v1398_v0  ;;  %202 = vst [vmem:[#allocation2 + $0x8] sm:$0xff] (!%p1221_p4), %v1398_v0 }
  0x10   : > { %s1445_s22 = scalar_lea.vmem %s1871_s3, %s1257_s19  ;;  %203 = vst [vmem:[#allocation2 + $0x10] sm:$0xff] (!%p1221_p4), %v1398_v0  ;;  %204 = vst [vmem:[#allocation2 + $0x18] sm:$0xff] (!%p1221_p4), %v1398_v0 }
  0x11   : > { %s1450_s25 = scalar_lea.vmem %s1868_s0, %s1272_s18  ;;  %205 = vst [vmem:[#allocation2 + $0x20] sm:$0xff] (!%p1221_p4), %v1398_v0  ;;  %206 = vst [vmem:[#allocation2 + $0x28] sm:$0xff] (!%p1221_p4), %v1398_v0 }
  0x12   : > { %207 = vst [vmem:[#allocation2 + $0x30] sm:$0xff] (!%p1221_p4), %v1398_v0  ;;  %208 = vst [vmem:[#allocation2 + $0x38] sm:$0xff] (!%p1221_p4), %v1398_v0 }
  0x13   : > { %209 = vst [vmem:[%s1872_s4] sm:$0xff] (!%p1221_p4), %v1398_v0  ;;  %210 = vst [vmem:[%s1872_s4 + $0x8] sm:$0xff] (!%p1221_p4), %v1398_v0 }
  0x14   : > { %211 = vst [vmem:[%s1872_s4 + $0x10] sm:$0xff] (!%p1221_p4), %v1398_v0  ;;  %212 = vst [vmem:[%s1872_s4 + $0x18] sm:$0xff] (!%p1221_p4), %v1398_v0 }
  0x15   : > { %213 = vst [vmem:[%s1872_s4 + $0x20] sm:$0xff] %v1398_v0  ;;  %214 = vst [vmem:[%s1872_s4 + $0x28] sm:$0xff] %v1398_v0 }
  0x16 PF: > { %s1399_s12 = smov 127   ;;  %s1400_s13 = smov 126   ;;  %vm295_vm0 = vcmask 1039360   ;;  %vm448_vm1 = vcmask 1043456   ;;  %vm316_vm2 = vcmask 1031168   ;;  %vm337_vm3 = vcmask 900096  }
  0x17   : > { %v216_v2 = vld [vmem:[#allocation2 + $0x8] sm:$0xff]  ;;  %v1476_v7 = vld [vmem:[#allocation2] sm:$0xff]  ;;  %s1401_s14 = smov 110   ;;  %s1402_s16 = smov 109   ;;  %vm356_vm4 = vcmask 891904   ;;  %vm378_vm5 = vcmask 883712  }
  0x18   : > { %v218_v1 = vld [vmem:[#allocation2 + $0x18] sm:$0xff]  ;;  %v217_v3 = vld [vmem:[#allocation2 + $0x10] sm:$0xff]  ;;  %v1472_v5 = vpack.c.bf16 %v216_v2, %v216_v2  ;;  %v1480_v8 = vpack.c.bf16 %v1476_v7, %v1476_v7  ;;  %s1403_s17 = smov 108   ;;  %s1404_s18 = smov 92   ;;  %vm399_vm6 = vcmask 752640   ;;  %vm420_vm7 = vcmask 744448  }
  0x19   : > { %v1470_v4 = vpack.c.bf16 %v218_v1, %v218_v1  ;;  %v1474_v6 = vpack.c.bf16 %v217_v3, %v217_v3  ;;  %v219_v13 = vld [vmem:[#allocation2 + $0x20] sm:$0xff]  ;;  %v220_v14 = vld [vmem:[#allocation2 + $0x28] sm:$0xff]  ;;  %s1405_s19 = smov 91   ;;  %s1406_s20 = smov 90   ;;  %vm441_vm8 = vcmask 736256   ;;  %vm645_vm9 = vcmask 154624  }
  0x1a   : > { %v275_v10 = vrot.slane %v1472_v5, 4  ;;  %v274_v12 = vrot.slane %v1480_v8, 4  ;;  %v1518_v15 = vpack.c.bf16 %v219_v13, %v219_v13  ;;  %v1520_v16 = vpack.c.bf16 %v220_v14, %v220_v14  ;;  %v221_v19 = vld [vmem:[#allocation2 + $0x30] sm:$0xff]  ;;  %v222_v22 = vld [vmem:[#allocation2 + $0x38] sm:$0xff]  ;;  %s1407_s21 = smov 19  }
  0x1b   : > { %v277_v9 = vrot.slane %v1470_v4, 4  ;;  %v276_v11 = vrot.slane %v1474_v6, 4  ;;  %v1536_v20 = vpack.c.bf16 %v221_v19, %v221_v19  ;;  %v230_v23 = vpack.c.bf16 %v222_v22, %v222_v22 }
  0x1c   : > { %283 = vrot.lane.b32.xlu0 %v275_v10, %s1399_s12  ;;  %v278_v17 = vrot.slane %v1518_v15, 4  ;;  %v279_v18 = vrot.slane %v1520_v16, 4  ;;  %vm700_vm10 = vcmask 588800  }
  0x1d   : > { %287 = vrot.lane.b32.xlu1 %v277_v9, %s1399_s12  ;;  %v280_v21 = vrot.slane %v1536_v20, 4  ;;  %v363_v24 = vrot.slane %v230_v23, 4 }
  0x20   : > { %285 = vrot.lane.b32.xlu0 %v276_v11, %s1399_s12 }
  0x21   : > { %281 = vrot.lane.b32.xlu1 %v274_v12, %s1399_s12 }
  0x24   : > { %304 = vrot.lane.b32.xlu0 %v1472_v5, %s1400_s13 }
  0x25   : > { %306 = vrot.lane.b32.xlu1 %v1474_v6, %s1400_s13 }
  0x28   : > { %308 = vrot.lane.b32.xlu0 %v1470_v4, %s1400_s13 }
  0x29   : > { %325 = vrot.lane.b32.xlu1 %v275_v10, %s1401_s14 }
  0x2c   : > { %327 = vrot.lane.b32.xlu0 %v276_v11, %s1401_s14 }
  0x2d   : > { %329 = vrot.lane.b32.xlu1 %v277_v9, %s1401_s14 }
  0x30   : > { %302 = vrot.lane.b32.xlu0 %v1480_v8, %s1400_s13 }
  0x31   : > { %323 = vrot.lane.b32.xlu1 %v274_v12, %s1401_s14 }
  0x34   : > { %344 = vrot.lane.b32.xlu0 %v1472_v5, %s1402_s16 }
  0x35   : > { %346 = vrot.lane.b32.xlu1 %v1474_v6, %s1402_s16 }
  0x38   : > { %348 = vrot.lane.b32.xlu0 %v1470_v4, %s1402_s16 }
  0x39   : > { %364 = vrot.lane.b32.xlu1 %v275_v10, %s1403_s17 }
  0x3c   : > { %366 = vrot.lane.b32.xlu0 %v276_v11, %s1403_s17 }
  0x3d   : > { %368 = vrot.lane.b32.xlu1 %v277_v9, %s1403_s17 }
  0x40   : > { %385 = vrot.lane.b32.xlu0 %v1472_v5, %s1404_s18 }
  0x41   : > { %387 = vrot.lane.b32.xlu1 %v1474_v6, %s1404_s18 }
  0x44   : > { %389 = vrot.lane.b32.xlu0 %v1470_v4, %s1404_s18 }
  0x45   : > { %406 = vrot.lane.b32.xlu1 %v275_v10, %s1405_s19 }
  0x48   : > { %408 = vrot.lane.b32.xlu0 %v276_v11, %s1405_s19 }
  0x49   : > { %410 = vrot.lane.b32.xlu1 %v277_v9, %s1405_s19 }
  0x4c   : > { %289 = vrot.lane.b32.xlu0 %v278_v17, %s1399_s12 }
  0x4d   : > { %291 = vrot.lane.b32.xlu1 %v279_v18, %s1399_s12 }
  0x50   : > { %427 = vrot.lane.b32.xlu0 %v1472_v5, %s1406_s20 }
  0x51   : > { %429 = vrot.lane.b32.xlu1 %v1474_v6, %s1406_s20 }
  0x54   : > { %431 = vrot.lane.b32.xlu0 %v1470_v4, %s1406_s20 }
  0x55   : > { %310 = vrot.lane.b32.xlu1 %v1518_v15, %s1400_s13 }
  0x58   : > { %312 = vrot.lane.b32.xlu0 %v1520_v16, %s1400_s13 }
  0x59   : > { %331 = vrot.lane.b32.xlu1 %v278_v17, %s1401_s14 }
  0x5c   : > { %333 = vrot.lane.b32.xlu0 %v279_v18, %s1401_s14 }
  0x5d   : > { %293 = vrot.lane.b32.xlu1 %v280_v21, %s1399_s12 }
  0x60   : > { %350 = vrot.lane.b32.xlu0 %v1518_v15, %s1402_s16 }
  0x61   : > { %352 = vrot.lane.b32.xlu1 %v1520_v16, %s1402_s16 }
  0x64   : > { %370 = vrot.lane.b32.xlu0 %v278_v17, %s1403_s17 }
  0x65   : > { %372 = vrot.lane.b32.xlu1 %v279_v18, %s1403_s17 }
  0x68   : > { %314 = vrot.lane.b32.xlu0 %v1536_v20, %s1400_s13 }
  0x69   : > { %335 = vrot.lane.b32.xlu1 %v280_v21, %s1401_s14 }
  0x6c   : > { %391 = vrot.lane.b32.xlu0 %v1518_v15, %s1404_s18 }
  0x6d   : > { %393 = vrot.lane.b32.xlu1 %v1520_v16, %s1404_s18 }
  0x70   : > { %412 = vrot.lane.b32.xlu0 %v278_v17, %s1405_s19 }
  0x71   : > { %414 = vrot.lane.b32.xlu1 %v279_v18, %s1405_s19 }
  0x74   : > { %354 = vrot.lane.b32.xlu0 %v1536_v20, %s1402_s16 }
  0x75   : > { %374 = vrot.lane.b32.xlu1 %v280_v21, %s1403_s17 }
  0x78   : > { %376 = vrot.lane.b32.xlu0 %v363_v24, %s1403_s17 }
  0x79   : > { %395 = vrot.lane.b32.xlu1 %v1536_v20, %s1404_s18 }
  0x7c   : > { %397 = vrot.lane.b32.xlu0 %v230_v23, %s1404_s18 }
  0x7d   : > { %416 = vrot.lane.b32.xlu1 %v280_v21, %s1405_s19 }
  0x80   : > { %418 = vrot.lane.b32.xlu0 %v363_v24, %s1405_s19 }
  0x81   : > { %433 = vrot.lane.b32.xlu1 %v1518_v15, %s1406_s20 }
  0x84   : > { %435 = vrot.lane.b32.xlu0 %v1520_v16, %s1406_s20 }
  0x85   : > { %437 = vrot.lane.b32.xlu1 %v1536_v20, %s1406_s20 }
  0x88   : > { %439 = vrot.lane.b32.xlu0 %v230_v23, %s1406_s20 }
  0x8e   : > { %v284_v26 = vpop.permute.xlu0 %283 }
  0x8f   : > { %v1575_v25 = vpop.permute.xlu1 %287 }
  0x92   : > { %v286_v27 = vpop.permute.xlu0 %285 }
  0x93   : > { %v282_v28 = vpop.permute.xlu1 %281  ;;  %v297_v29 = vsel %vm295_vm0, %v284_v26, %v286_v27  ;;  %v298_v30 = vsel %vm295_vm0, %v286_v27, %v1575_v25 }
  0x94   : > { %v457_v31 = vsel %vm448_vm1, %v1474_v6, %v298_v30  ;;  %v454_v32 = vsel %vm448_vm1, %v1472_v5, %v297_v29  ;;  %v296_v33 = vsel %vm295_vm0, %v282_v28, %v284_v26  ;;  %v1408_v30 = vmov 0  }
  0x95   : > { %579 = vrot.lane.b32.xlu0 %v457_v31, %s1407_s21  ;;  %577 = vrot.lane.b32.xlu1 %v454_v32, %s1407_s21  ;;  %v451_v36 = vsel %vm448_vm1, %v1480_v8, %v296_v33 }
  0x96   : > { %v305_v34 = vpop.permute.xlu0 %304  ;;  %757 = vmatprep.mubr.bf16.mxu0 %v1408_v30  ;;  %810 = vmatprep.mubr.bf16.mxu1 %v1408_v30 }
  0x97   : > { %v307_v35 = vpop.permute.xlu1 %306 }
  0x98   : > { %v318_v41 = vsel %vm316_vm2, %v305_v34, %v307_v35 }
  0x99   : > { %575 = vrot.lane.b32.xlu1 %v451_v36, %s1407_s21 }
  0x9a   : > { %v1590_v37 = vpop.permute.xlu0 %308 }
  0x9b   : > { %v326_v38 = vpop.permute.xlu1 %325  ;;  %v319_v42 = vsel %vm316_vm2, %v307_v35, %v1590_v37 }
  0x9e   : > { %v328_v39 = vpop.permute.xlu0 %327 }
  0x9f   : > { %v1592_v40 = vpop.permute.xlu1 %329  ;;  %v339_v43 = vsel %vm337_vm3, %v326_v38, %v328_v39 }
  0xa0   : > { %v340_v44 = vsel %vm337_vm3, %v328_v39, %v1592_v40  ;;  %v475_v45 = vsel %vm448_vm1, %v318_v41, %v339_v43 }
  0xa1   : > { %v478_v46 = vsel %vm448_vm1, %v319_v42, %v340_v44  ;;  %591 = vrot.lane.b32.xlu0 %v475_v45, %s1407_s21 }
  0xa2   : > { %593 = vrot.lane.b32.xlu1 %v478_v46, %s1407_s21  ;;  %v303_v47 = vpop.permute.xlu0 %302 }
  0xa3   : > { %v324_v48 = vpop.permute.xlu1 %323  ;;  %v317_v49 = vsel %vm316_vm2, %v303_v47, %v305_v34 }
  0xa4   : > { %v338_v50 = vsel %vm337_vm3, %v324_v48, %v326_v38 }
  0xa5   : > { %v472_v51 = vsel %vm448_vm1, %v317_v49, %v338_v50 }
  0xa6   : > { %589 = vrot.lane.b32.xlu0 %v472_v51, %s1407_s21  ;;  %v345_v52 = vpop.permute.xlu0 %344 }
  0xa7   : > { %v347_v53 = vpop.permute.xlu1 %346 }
  0xa8   : > { %v357_v58 = vsel %vm356_vm4, %v345_v52, %v347_v53 }
  0xaa   : > { %v1608_v54 = vpop.permute.xlu0 %348 }
  0xab   : > { %v365_v55 = vpop.permute.xlu1 %364  ;;  %v358_v59 = vsel %vm356_vm4, %v347_v53, %v1608_v54 }
  0xac   : > { %v493_v2 = vsel %vm448_vm1, %v345_v52, %v365_v55 }
  0xae   : > { %v367_v56 = vpop.permute.xlu0 %366 }
  0xaf   : > { %v1610_v57 = vpop.permute.xlu1 %368  ;;  %v379_v60 = vsel %vm378_vm5, %v365_v55, %v367_v56 }
  0xb0   : > { %v380_v61 = vsel %vm378_vm5, %v367_v56, %v1610_v57  ;;  %v496_v62 = vsel %vm448_vm1, %v357_v58, %v379_v60 }
  0xb1   : > { %v499_v63 = vsel %vm448_vm1, %v358_v59, %v380_v61  ;;  %605 = vrot.lane.b32.xlu1 %v496_v62, %s1407_s21 }
  0xb2   : > { %607 = vrot.lane.b32.xlu0 %v499_v63, %s1407_s21  ;;  %v386_v0 = vpop.permute.xlu0 %385 }
  0xb3   : > { %v388_v1 = vpop.permute.xlu1 %387 }
  0xb4   : > { %v400_v9 = vsel %vm399_vm6, %v386_v0, %v388_v1 }
  0xb5   : > { %603 = vrot.lane.b32.xlu1 %v493_v2, %s1407_s21 }
  0xb6   : > { %v1624_v3 = vpop.permute.xlu0 %389 }
  0xb7   : > { %v407_v5 = vpop.permute.xlu1 %406  ;;  %v401_v10 = vsel %vm399_vm6, %v388_v1, %v1624_v3 }
  0xb8   : > { %v514_v21 = vsel %vm448_vm1, %v386_v0, %v407_v5 }
  0xba   : > { %v409_v6 = vpop.permute.xlu0 %408 }
  0xbb   : > { %v1626_v8 = vpop.permute.xlu1 %410  ;;  %v421_v11 = vsel %vm420_vm7, %v407_v5, %v409_v6 }
  0xbc   : > { %v422_v12 = vsel %vm420_vm7, %v409_v6, %v1626_v8  ;;  %v517_v13 = vsel %vm448_vm1, %v400_v9, %v421_v11 }
  0xbd   : > { %v520_v14 = vsel %vm448_vm1, %v401_v10, %v422_v12  ;;  %619 = vrot.lane.b32.xlu0 %v517_v13, %s1407_s21 }
  0xbe   : > { %621 = vrot.lane.b32.xlu1 %v520_v14, %s1407_s21  ;;  %v290_v17 = vpop.permute.xlu0 %289 }
  0xbf   : > { %v292_v18 = vpop.permute.xlu1 %291  ;;  %v299_v19 = vsel %vm295_vm0, %v1575_v25, %v290_v17 }
  0xc0   : > { %v460_v22 = vsel %vm448_vm1, %v1470_v4, %v299_v19  ;;  %v300_v23 = vsel %vm295_vm0, %v290_v17, %v292_v18 }
  0xc1   : > { %617 = vrot.lane.b32.xlu0 %v514_v21, %s1407_s21  ;;  %v463_v27 = vsel %vm448_vm1, %v1518_v15, %v300_v23 }
  0xc2   : > { %581 = vrot.lane.b32.xlu1 %v460_v22, %s1407_s21  ;;  %v428_v24 = vpop.permute.xlu0 %427 }
  0xc3   : > { %v430_v26 = vpop.permute.xlu1 %429 }
  0xc4   : > { %v442_v29 = vsel %vm441_vm8, %v428_v24, %v430_v26 }
  0xc5   : > { %583 = vrot.lane.b32.xlu0 %v463_v27, %s1407_s21 }
  0xc6   : > { %631 = vrot.lane.b32.xlu1 %v428_v24, %s1407_s21  ;;  %v1650_v25 = vpop.permute.xlu0 %431 }
  0xc7   : > { %v311_v28 = vpop.permute.xlu1 %310  ;;  %v443_v4 = vsel %vm441_vm8, %v430_v26, %v1650_v25 }
  0xc8   : > { %v320_v32 = vsel %vm316_vm2, %v1590_v37, %v311_v28 }
  0xc9   : > { %633 = vrot.lane.b32.xlu0 %v442_v29, %s1407_s21 }
  0xca   : > { %635 = vrot.lane.b32.xlu1 %v443_v4, %s1407_s21  ;;  %v313_v15 = vpop.permute.xlu0 %312 }
  0xcb   : > { %v332_v31 = vpop.permute.xlu1 %331  ;;  %v321_v38 = vsel %vm316_vm2, %v311_v28, %v313_v15 }
  0xcc   : > { %v341_v33 = vsel %vm337_vm3, %v1592_v40, %v332_v31 }
  0xcd   : > { %v481_v34 = vsel %vm448_vm1, %v320_v32, %v341_v33 }
  0xce   : > { %595 = vrot.lane.b32.xlu0 %v481_v34, %s1407_s21  ;;  %v334_v35 = vpop.permute.xlu0 %333 }
  0xcf   : > { %v294_v36 = vpop.permute.xlu1 %293  ;;  %v342_v39 = vsel %vm337_vm3, %v332_v31, %v334_v35 }
  0xd0   : > { %v301_v41 = vsel %vm295_vm0, %v292_v18, %v294_v36  ;;  %v484_v42 = vsel %vm448_vm1, %v321_v38, %v342_v39  ;;  %v469_v44 = vsel %vm448_vm1, %v1536_v20, %v294_v36 }
  0xd1   : > { %v466_v37 = vsel %vm448_vm1, %v1520_v16, %v301_v41  ;;  %597 = vrot.lane.b32.xlu1 %v484_v42, %s1407_s21 }
  0xd2   : > { %585 = vrot.lane.b32.xlu0 %v466_v37, %s1407_s21  ;;  %v351_v40 = vpop.permute.xlu0 %350 }
  0xd3   : > { %v353_v43 = vpop.permute.xlu1 %352  ;;  %v359_v47 = vsel %vm356_vm4, %v1608_v54, %v351_v40 }
  0xd4   : > { %v360_v48 = vsel %vm356_vm4, %v351_v40, %v353_v43 }
  0xd5   : > { %587 = vrot.lane.b32.xlu1 %v469_v44, %s1407_s21 }
  0xd6   : > { %v371_v45 = vpop.permute.xlu0 %370 }
  0xd7   : > { %v373_v46 = vpop.permute.xlu1 %372  ;;  %v381_v16 = vsel %vm378_vm5, %v1610_v57, %v371_v45 }
  0xd8   : > { %v382_v49 = vsel %vm378_vm5, %v371_v45, %v373_v46  ;;  %v502_v50 = vsel %vm448_vm1, %v359_v47, %v381_v16 }
  0xd9   : > { %v505_v51 = vsel %vm448_vm1, %v360_v48, %v382_v49  ;;  %609 = vrot.lane.b32.xlu0 %v502_v50, %s1407_s21 }
  0xda   : > { %611 = vrot.lane.b32.xlu1 %v505_v51, %s1407_s21  ;;  %v315_v20 = vpop.permute.xlu0 %314 }
  0xdb   : > { %v336_v52 = vpop.permute.xlu1 %335  ;;  %v322_v53 = vsel %vm316_vm2, %v313_v15, %v315_v20 }
  0xdc   : > { %v343_v54 = vsel %vm337_vm3, %v334_v35, %v336_v52  ;;  %v490_v55 = vsel %vm448_vm1, %v315_v20, %v336_v52 }
  0xdd   : > { %v487_v56 = vsel %vm448_vm1, %v322_v53, %v343_v54 }
  0xde   : > { %601 = vrot.lane.b32.xlu1 %v490_v55, %s1407_s21  ;;  %599 = vrot.lane.b32.xlu0 %v487_v56, %s1407_s21  ;;  %v392_v57 = vpop.permute.xlu0 %391 }
  0xdf   : > { %v394_v58 = vpop.permute.xlu1 %393  ;;  %v402_v61 = vsel %vm399_vm6, %v1624_v3, %v392_v57 }
  0xe0   : > { %v403_v62 = vsel %vm399_vm6, %v392_v57, %v394_v58 }
  0xe2   : > { %v413_v59 = vpop.permute.xlu0 %412 }
  0xe3   : > { %v415_v60 = vpop.permute.xlu1 %414  ;;  %v423_v63 = vsel %vm420_vm7, %v1626_v8, %v413_v59 }
  0xe4   : > { %v424_v0 = vsel %vm420_vm7, %v413_v59, %v415_v60  ;;  %v523_v1 = vsel %vm448_vm1, %v402_v61, %v423_v63  ;;  %v1743_v61 = vld [vmem:[%s1869_s1] sm:$0xff]  }
  0xe5   : > { %v526_v2 = vsel %vm448_vm1, %v403_v62, %v424_v0  ;;  %623 = vrot.lane.b32.xlu0 %v523_v1, %s1407_s21 }
  0xe6   : > { %625 = vrot.lane.b32.xlu1 %v526_v2, %s1407_s21  ;;  %v355_v5 = vpop.permute.xlu0 %354  ;;  %v1753_v2 = vld [vmem:[%s1869_s1 + $0x8] sm:$0xff]  }
  0xe7   : > { %v375_v6 = vpop.permute.xlu1 %374  ;;  %v361_v9 = vsel %vm356_vm4, %v353_v43, %v355_v5 }
  0xe8   : > { %v383_v3 = vsel %vm378_vm5, %v373_v46, %v375_v6 }
  0xe9   : > { %v508_v10 = vsel %vm448_vm1, %v361_v9, %v383_v3 }
  0xea   : > { %613 = vrot.lane.b32.xlu0 %v508_v10, %s1407_s21  ;;  %v377_v8 = vpop.permute.xlu0 %376 }
  0xeb   : > { %v396_v11 = vpop.permute.xlu1 %395  ;;  %v384_v12 = vsel %vm378_vm5, %v375_v6, %v377_v8 }
  0xec   : > { %v511_v13 = vsel %vm448_vm1, %v355_v5, %v384_v12  ;;  %v404_v23 = vsel %vm399_vm6, %v394_v58, %v396_v11 }
  0xed   : > { %615 = vrot.lane.b32.xlu1 %v511_v13, %s1407_s21 }
  0xee   : > { %v398_v14 = vpop.permute.xlu0 %397 }
  0xef   : > { %v417_v17 = vpop.permute.xlu1 %416 }
  0xf0   : > { %v425_v22 = vsel %vm420_vm7, %v415_v60, %v417_v17 }
  0xf1   : > { %v529_v27 = vsel %vm448_vm1, %v404_v23, %v425_v22 }
  0xf2   : > { %v419_v18 = vpop.permute.xlu0 %418 }
  0xf3   : > { %v434_v19 = vpop.permute.xlu1 %433  ;;  %v426_v28 = vsel %vm420_vm7, %v417_v17, %v419_v18 }
  0xf4   : > { %v444_v21 = vsel %vm441_vm8, %v1650_v25, %v434_v19  ;;  %v405_v25 = vsel %vm399_vm6, %v396_v11, %v398_v14 }
  0xf5   : > { %637 = vrot.lane.b32.xlu0 %v444_v21, %s1407_s21  ;;  %v532_v15 = vsel %vm448_vm1, %v405_v25, %v426_v28 }
  0xf6   : > { %v436_v24 = vpop.permute.xlu0 %435 }
  0xf7   : > { %v445_v26 = vsel %vm441_vm8, %v434_v19, %v436_v24  ;;  %v438_v4 = vpop.permute.xlu1 %437 }
  0xf8   : > { %639 = vrot.lane.b32.xlu1 %v445_v26, %s1407_s21  ;;  %v446_v31 = vsel %vm441_vm8, %v436_v24, %v438_v4 }
  0xf9   : > { %627 = vrot.lane.b32.xlu0 %v529_v27, %s1407_s21 }
  0xfa   : > { %v440_v29 = vpop.permute.xlu0 %439 }
  0xfb   : > { %v447_v32 = vsel %vm441_vm8, %v438_v4, %v440_v29 }
  0xfc   : > { %629 = vrot.lane.b32.xlu1 %v532_v15, %s1407_s21 }
  0xfd   : > { %641 = vrot.lane.b32.xlu0 %v446_v31, %s1407_s21 }
 0x100   : > { %643 = vrot.lane.b32.xlu1 %v447_v32, %s1407_s21 }
 0x107   : > { %v580_v33 = vpop.permute.xlu0 %579  ;;  %v578_v34 = vpop.permute.xlu1 %577 }
 0x108   : > { %v647_v35 = vsel %vm645_vm9, %v578_v34, %v580_v33 }
 0x109   : > { %725 = vmatprep.subr.bf16.mxu0 %v647_v35 }
 0x10b   : > { %v576_v36 = vpop.permute.xlu1 %575 }
 0x10c   : > { %v646_v38 = vsel %vm645_vm9, %v576_v36, %v578_v34 }
 0x10d   : > { %726 = vmatpush1.bf16.msra.mxu0 %v646_v38 }
 0x113   : > { %v592_v39 = vpop.permute.xlu0 %591 }
 0x114   : > { %v594_v41 = vpop.permute.xlu1 %593 }
 0x115   : > { %v653_v42 = vsel %vm645_vm9, %v592_v39, %v594_v41 }
 0x116   : > { %727 = vmatprep.subr.bf16.mxu0 %v653_v42 }
 0x118   : > { %v590_v37 = vpop.permute.xlu0 %589 }
 0x119   : > { %v652_v40 = vsel %vm645_vm9, %v590_v37, %v592_v39  ;;  %v231_v37 = vld [vmem:[%s1450_s25] sm:$0xff] }
 0x11a   : > { %728 = vmatpush1.bf16.msra.mxu0 %v652_v40  ;;  %v234_v40 = vld [vmem:[%s1450_s25 + $0x18] sm:$0xff] }
 0x123   : > { %v606_v44 = vpop.permute.xlu1 %605 }
 0x124   : > { %v608_v43 = vpop.permute.xlu0 %607 }
 0x125   : > { %v659_v45 = vsel %vm645_vm9, %v606_v44, %v608_v43 }
 0x126   : > { %729 = vmatprep.subr.bf16.mxu0 %v659_v45  ;;  %v249_v45 = vunpack.c.l.bf16 %v234_v40 }
 0x127   : > { %v604_v46 = vpop.permute.xlu1 %603 }
 0x128   : > { %v658_v47 = vsel %vm645_vm9, %v604_v46, %v606_v44  ;;  %v244_v44 = vunpack.c.h.bf16 %v231_v37 }
 0x129   : > { %730 = vmatpush1.bf16.msra.mxu0 %v658_v47  ;;  %v250_v47 = vunpack.c.h.bf16 %v234_v40 }
 0x12f   : > { %v620_v48 = vpop.permute.xlu0 %619 }
 0x130   : > { %v622_v16 = vpop.permute.xlu1 %621 }
 0x131   : > { %v665_v49 = vsel %vm645_vm9, %v620_v48, %v622_v16 }
 0x132   : > { %731 = vmatprep.subr.bf16.mxu0 %v665_v49 }
 0x133   : > { %v618_v50 = vpop.permute.xlu0 %617 }
 0x134   : > { %v582_v51 = vpop.permute.xlu1 %581  ;;  %v664_v20 = vsel %vm645_vm9, %v618_v50, %v620_v48  ;;  %v237_v50 = vld [vmem:[%s1450_s25 + $0x30] sm:$0xff] }
 0x135   : > { %732 = vmatpush1.bf16.msra.mxu0 %v664_v20  ;;  %v648_v55 = vsel %vm645_vm9, %v580_v33, %v582_v51 }
 0x137   : > { %v584_v52 = vpop.permute.xlu0 %583 }
 0x138   : > { %v632_v53 = vpop.permute.xlu1 %631  ;;  %v649_v54 = vsel %vm645_vm9, %v582_v51, %v584_v52 }
 0x139   : > { %778 = vmatprep.subr.bf16.mxu1 %v649_v54 }
 0x13a   : > { %779 = vmatpush1.bf16.msra.mxu1 %v648_v55 }
 0x13b   : > { %v634_v56 = vpop.permute.xlu0 %633 }
 0x13c   : > { %v636_v57 = vpop.permute.xlu1 %635  ;;  %v670_v58 = vsel %vm645_vm9, %v632_v53, %v634_v56 }
 0x13d   : > { %v671_v59 = vsel %vm645_vm9, %v634_v56, %v636_v57  ;;  %v708_v60 = vsel %vm448_vm1, %v670_v58, 0  ;;  %v255_v56 = vunpack.c.l.bf16 %v237_v50 }
 0x13e   : > { %1224 = vmatprep.subr.msk.bf16.mxu0 %vm448_vm1, %v671_v59  ;;  %v256_v59 = vunpack.c.h.bf16 %v237_v50 }
 0x13f   : > { %734 = vmatpush1.bf16.msra.mxu0 %v708_v60 }
 0x140   : > { %v596_v62 = vpop.permute.xlu0 %595 }
 0x141   : > { %v654_v1 = vsel %vm645_vm9, %v594_v41, %v596_v62 }
 0x142   : > { %1225 = vmatmul.mubr.msk.bf16.vlgmr.msra.gmra.mrb[0].mxu0 %vm700_vm10, %v1743_v61 }
 0x143   : > { %767 = vmatprep.mubr.bf16.mxu0 %v1408_v30  ;;  %v598_v63 = vpop.permute.xlu1 %597 }
 0x144   : > { %v655_v0 = vsel %vm645_vm9, %v596_v62, %v598_v63  ;;  %v586_v5 = vpop.permute.xlu0 %585 }
 0x145   : > { %780 = vmatprep.subr.bf16.mxu1 %v655_v0  ;;  %v650_v3 = vsel %vm645_vm9, %v584_v52, %v586_v5 }
 0x146   : > { %781 = vmatpush1.bf16.msra.mxu1 %v654_v1 }
 0x147   : > { %v588_v6 = vpop.permute.xlu1 %587 }
 0x148   : > { %v651_v9 = vsel %vm645_vm9, %v586_v5, %v588_v6 }
 0x149   : > { %831 = vmatprep.subr.bf16.mxu0 %v651_v9 }
 0x14a   : > { %1226 = vmatmul.mubr.msk.bf16.gmra.mrb[4].mxu0 %vm700_vm10, %v1753_v2 }
 0x14b   : > { %832 = vmatpush1.bf16.msra.mxu0 %v650_v3  ;;  %863 = vmatprep.mubr.bf16.mxu0 %v1408_v30  ;;  %v610_v10 = vpop.permute.xlu0 %609 }
 0x14c   : > { %v612_v8 = vpop.permute.xlu1 %611  ;;  %v660_v12 = vsel %vm645_vm9, %v608_v43, %v610_v10  ;;  %v243_v43 = vunpack.c.l.bf16 %v231_v37  ;;  %v1811_v37 = vld [vmem:[%s1870_s2] sm:$0x3f] }
 0x14d   : > { %v661_v11 = vsel %vm645_vm9, %v610_v10, %v612_v8 }
 0x14e   : > { %782 = vmatprep.subr.bf16.mxu1 %v661_v11 }
 0x14f   : > { %783 = vmatpush1.bf16.msra.mxu1 %v660_v12 }
 0x150   : > { %v600_v13 = vpop.permute.xlu0 %599  ;;  %v602_v14 = vpop.permute.xlu1 %601 }
 0x151   : > { %v656_v17 = vsel %vm645_vm9, %v598_v63, %v600_v13  ;;  %v657_v18 = vsel %vm645_vm9, %v600_v13, %v602_v14 }
 0x152   : > { %833 = vmatprep.subr.bf16.mxu0 %v657_v18 }
 0x153   : > { %834 = vmatpush1.bf16.msra.mxu0 %v656_v17 }
 0x157   : > { %v624_v19 = vpop.permute.xlu0 %623 }
 0x158   : > { %v626_v21 = vpop.permute.xlu1 %625  ;;  %v666_v23 = vsel %vm645_vm9, %v622_v16, %v624_v19 }
 0x159   : > { %v667_v22 = vsel %vm645_vm9, %v624_v19, %v626_v21 }
 0x15a   : > { %784 = vmatprep.subr.bf16.mxu1 %v667_v22 }
 0x15b   : > { %785 = vmatpush1.bf16.msra.mxu1 %v666_v23 }
 0x15c   : > { %v614_v24 = vpop.permute.xlu0 %613 }
 0x15d   : > { %v662_v28 = vsel %vm645_vm9, %v612_v8, %v614_v24 }
 0x15f   : > { %v616_v26 = vpop.permute.xlu1 %615 }
 0x160   : > { %v663_v27 = vsel %vm645_vm9, %v614_v24, %v616_v26 }
 0x161   : > { %835 = vmatprep.subr.bf16.mxu0 %v663_v27 }
 0x162   : > { %836 = vmatpush1.bf16.msra.mxu0 %v662_v28 }
 0x167   : > { %v638_v4 = vpop.permute.xlu0 %637 }
 0x168   : > { %v672_v25 = vsel %vm645_vm9, %v636_v57, %v638_v4  ;;  %v240_v57 = vld [vmem:[%s1450_s25 + $0x48] sm:$0xff] }
 0x169   : > { %v714_v32 = vsel %vm448_vm1, %v672_v25, 0  ;;  %v262_v0 = vunpack.c.h.bf16 %v240_v57 }
 0x16a   : > { %v640_v15 = vpop.permute.xlu1 %639 }
 0x16b   : > { %v628_v29 = vpop.permute.xlu0 %627  ;;  %v673_v31 = vsel %vm645_vm9, %v638_v4, %v640_v15  ;;  %v1023_v4 = vld [vmem:[%s1872_s4 + $0x8] sm:$0xff] }
 0x16c   : > { %1227 = vmatprep.subr.msk.bf16.mxu1 %vm448_vm1, %v673_v31  ;;  %v668_v36 = vsel %vm645_vm9, %v626_v21, %v628_v29 }
 0x16d   : > { %787 = vmatpush1.bf16.msra.mxu1 %v714_v32 }
 0x16e   : > { %1262 = vmatprep.subr.bf16.mxu1 %v651_v9  ;;  %v630_v34 = vpop.permute.xlu1 %629 }
 0x16f   : > { %v642_v33 = vpop.permute.xlu0 %641  ;;  %v669_v35 = vsel %vm645_vm9, %v628_v29, %v630_v34 }
 0x170   : > { %1228 = vmatmul.mubr.msk.bf16.vlgmr.msra.gmra.mrb[0].mxu1 %vm700_vm10, %v1743_v61  ;;  %837 = vmatprep.subr.bf16.mxu0 %v669_v35  ;;  %v674_v38 = vsel %vm645_vm9, %v640_v15, %v642_v33 }
 0x171   : > { %1267 = vmatpush1.bf16.msra.mxu1 %v650_v3  ;;  %838 = vmatpush1.bf16.msra.mxu0 %v668_v36  ;;  %v720_v42 = vsel %vm448_vm1, %v674_v38, 0 }
 0x172   : > { %1263 = vmatprep.subr.bf16.mxu1 %v657_v18  ;;  %v644_v39 = vpop.permute.xlu1 %643  ;;  %820 = vmatprep.mubr.bf16.mxu1 %v1408_v30 }
 0x173   : > { %v675_v41 = vsel %vm645_vm9, %v642_v33, %v644_v39 }
 0x174   : > { %1230 = vmatprep.subr.msk.bf16.mxu0 %vm448_vm1, %v675_v41 }
 0x175   : > { %1268 = vmatpush1.bf16.msra.mxu1 %v656_v17  ;;  %840 = vmatpush1.bf16.msra.mxu0 %v720_v42 }
 0x176   : > { %1264 = vmatprep.subr.bf16.mxu1 %v663_v27  ;;  %v1022_v27 = vld [vmem:[%s1872_s4] sm:$0xff] }
 0x178   : > { %1231 = vmatmul.mubr.msk.bf16.vlgmr.msra.gmra.mrb[8].mxu0 %vm700_vm10, %v1743_v61  ;;  %1229 = vmatmul.mubr.msk.bf16.gmra.mrb[4].mxu1 %vm700_vm10, %v1753_v2  ;;  %v261_v61 = vunpack.c.l.bf16 %v240_v57 }
 0x179   : > { %1269 = vmatpush1.bf16.msra.mxu1 %v662_v28  ;;  %873 = vmatprep.mubr.bf16.mxu1 %v1408_v30 }
 0x17a   : > { %1265 = vmatprep.subr.bf16.mxu1 %v669_v35 }
 0x17d   : > { %1270 = vmatpush1.bf16.msra.mxu1 %v668_v36  ;;  %v1060_v36 = vlaneseq }
 0x17e   : > { %1266 = vmatprep.subr.msk.bf16.mxu1 %vm448_vm1, %v675_v41 }
 0x17f   : > { %v1802_v41 = vshrl.u32 %v1060_v36, 7 }
 0x181   : > { %1271 = vmatpush1.bf16.msra.mxu1 %v720_v42  ;;  %v1062_v42 = vsub.s32 0, %v1802_v41  ;;  %v1066_v40 = vsub.s32 1, %v1802_v41 }
 0x184   : > { %1232 = vmatmul.mubr.msk.bf16.vlgmr.msra.gmra.mrb[8].mxu1 %vm700_vm10, %v1753_v2 }
 0x215   : > { %v759_v46 = vpop.f32.mrb[0].mxu0 }
 0x216   : > { %v884_v48 = vadd.f32 %v759_v46, %v243_v43  ;;  %v761_v16 = vpop.f32.mrb[1].mxu0  ;;  %v232_v43 = vld [vmem:[%s1450_s25 + $0x8] sm:$0xff] }
 0x217   : > { %v885_v30 = vadd.f32 %v761_v16, %v244_v44  ;;  %v763_v49 = vpop.f32.mrb[2].mxu0 }
 0x218   : > { %v1233_v51 = vmul.f32 -1.442695, %v884_v48  ;;  %v890_v20 = vadd.f32 %v763_v49, %v249_v45  ;;  %v765_v52 = vpop.f32.mrb[3].mxu0  ;;  %v235_v45 = vld [vmem:[%s1450_s25 + $0x20] sm:$0xff]  ;;  %v245_v48 = vunpack.c.l.bf16 %v232_v43  ;;  %v246_v49 = vunpack.c.h.bf16 %v232_v43 }
 0x219   : > { %v1234_v53 = vmul.f32 -1.442695, %v885_v30  ;;  %v891_v54 = vadd.f32 %v765_v52, %v250_v47  ;;  %v1063_v47 = vrot.slane %v1811_v37, %v1062_v42  ;;  %v1067_v30 = vrot.slane %v1811_v37, %v1066_v40 }
 0x21a   : > { %1294 = vpow2.f32 %v1233_v51  ;;  %v1239_v55 = vmul.f32 -1.442695, %v890_v20  ;;  %v251_v20 = vunpack.c.l.bf16 %v235_v45 }
 0x21b   : > { %1296 = vpow2.f32 %v1234_v53  ;;  %v1240_v58 = vmul.f32 -1.442695, %v891_v54  ;;  %v252_v54 = vunpack.c.h.bf16 %v235_v45 }
 0x21c   : > { %1298 = vpow2.f32 %v1239_v55 }
 0x21d   : > { %1300 = vpow2.f32 %v1240_v58  ;;  %v769_v60 = vpop.f32.mrb[4].mxu0 }
 0x21e   : > { %v896_v62 = vadd.f32 %v769_v60, %v255_v56  ;;  %v771_v63 = vpop.f32.mrb[5].mxu0 }
 0x21f   : > { %v897_v1 = vadd.f32 %v771_v63, %v256_v59  ;;  %v773_v2 = vpop.f32.mrb[6].mxu0 }
 0x220   : > { %v1245_v5 = vmul.f32 -1.442695, %v896_v62  ;;  %v775_v6 = vpop.f32.mrb[7].mxu0  ;;  %v902_v3 = vadd.f32 %v773_v2, %v261_v61  ;;  %v233_v61 = vld [vmem:[%s1450_s25 + $0x10] sm:$0xff]  ;;  %v238_v62 = vld [vmem:[%s1450_s25 + $0x38] sm:$0xff] }
 0x221   : > { %v1246_v9 = vmul.f32 -1.442695, %v897_v1  ;;  %v903_v10 = vadd.f32 %v775_v6, %v262_v0 }
 0x222   : > { %1302 = vpow2.f32 %v1245_v5 }
 0x223   : > { %1304 = vpow2.f32 %v1246_v9  ;;  %v236_v9 = vld [vmem:[%s1450_s25 + $0x28] sm:$0xff] }
 0x224   : > { %v1295_v8 = vpop.eup %1294  ;;  %1306 = vtanh.f32 %v902_v3 }
 0x225   : > { %v1297_v11 = vpop.eup %1296  ;;  %v926_v12 = vadd.f32 1.0, %v1295_v8  ;;  %1308 = vtanh.f32 %v903_v10  ;;  %v247_v10 = vunpack.c.l.bf16 %v233_v61  ;;  %v257_v8 = vunpack.c.l.bf16 %v238_v62 }
 0x226   : > { %v1299_v13 = vpop.eup %1298  ;;  %v927_v14 = vadd.f32 1.0, %v1297_v11 }
 0x227   : > { %v1301_v17 = vpop.eup %1300  ;;  %1310 = vrcp.f32 %v926_v12  ;;  %v962_v18 = vadd.f32 1.0, %v1299_v13  ;;  %v248_v12 = vunpack.c.h.bf16 %v233_v61  ;;  %v253_v13 = vunpack.c.l.bf16 %v236_v9 }
 0x228   : > { %1312 = vrcp.f32 %v927_v14  ;;  %v963_v19 = vadd.f32 1.0, %v1301_v17  ;;  %v254_v14 = vunpack.c.h.bf16 %v236_v9 }
 0x229   : > { %1314 = vrcp.f32 %v962_v18 }
 0x22a   : > { %1316 = vrcp.f32 %v963_v19 }
 0x22c   : > { %v1303_v21 = vpop.eup %1302 }
 0x22d   : > { %v1305_v22 = vpop.eup %1304  ;;  %v998_v25 = vadd.f32 1.0, %v1303_v21 }
 0x22e   : > { %v1307_v23 = vpop.eup %1306  ;;  %v999_v31 = vadd.f32 1.0, %v1305_v22 }
 0x22f   : > { %v1309_v24 = vpop.eup %1308  ;;  %1318 = vrcp.f32 %v998_v25 }
 0x230   : > { %1320 = vrcp.f32 %v999_v31 }
 0x231   : > { %v1311_v26 = vpop.eup %1310 }
 0x232   : > { %v1313_v28 = vpop.eup %1312  ;;  %v1034_v29 = vmul.f32 %v1311_v26, %v1307_v23  ;;  %v258_v26 = vunpack.c.h.bf16 %v238_v62 }
 0x233   : > { %v1315_v15 = vpop.eup %1314  ;;  %v1035_v32 = vmul.f32 %v1313_v28, %v1309_v24 }
 0x234   : > { %v1317_v33 = vpop.eup %1316  ;;  %v1028_v34 = vmul.f32 %v1315_v15, %v1022_v27 }
 0x235   : > { %v1029_v35 = vmul.f32 %v1317_v33, %v1023_v4 }
 0x236   : > { %v1040_v38 = vadd.f32 %v1034_v29, %v1028_v34 }
 0x237   : > { %v1041_v39 = vadd.f32 %v1035_v32, %v1029_v35  ;;  %v241_v32 = vld [vmem:[%s1450_s25 + $0x50] sm:$0xff] }
 0x238   : > { %1322 = vtanh.f32 %v1040_v38  ;;  %1096 = vst [vmem:[%s1872_s4] sm:$0xff] %v1040_v38  ;;  %v239_v38 = vld [vmem:[%s1450_s25 + $0x40] sm:$0xff]  ;;  %v263_v42 = vunpack.c.l.bf16 %v241_v32 }
 0x239   : > { %1324 = vtanh.f32 %v1041_v39  ;;  %1097 = vst [vmem:[%s1872_s4 + $0x8] sm:$0xff] %v1041_v39  ;;  %v1319_v44 = vpop.eup %1318 }
 0x23a   : > { %v1321_v46 = vpop.eup %1320 }
 0x242   : > { %v1323_v16 = vpop.eup %1322 }
 0x243   : > { %v1325_v50 = vpop.eup %1324  ;;  %v1052_v51 = vmul.f32 %v1323_v16, %v1319_v44  ;;  %v812_v53 = vpop.f32.mrb[0].mxu1  ;;  %v264_v44 = vunpack.c.h.bf16 %v241_v32 }
 0x244   : > { %v1053_v52 = vmul.f32 %v1325_v50, %v1321_v46  ;;  %v886_v56 = vadd.f32 %v812_v53, %v245_v48  ;;  %v814_v57 = vpop.f32.mrb[1].mxu1 }
 0x245   : > { %v1090_v55 = vmul.f32 %v1063_v47, %v1052_v51  ;;  %v887_v59 = vadd.f32 %v814_v57, %v246_v49  ;;  %v816_v60 = vpop.f32.mrb[2].mxu1  ;;  %v259_v47 = vunpack.c.l.bf16 %v239_v38  ;;  %v260_v51 = vunpack.c.h.bf16 %v239_v38 }
 0x246   : > { %v1818_v58 = vmul.f32 %v1067_v30, %v1053_v52  ;;  %v1235_v0 = vmul.f32 -1.442695, %v886_v56  ;;  %v892_v1 = vadd.f32 %v816_v60, %v251_v20  ;;  %v818_v2 = vpop.f32.mrb[3].mxu1 }
 0x247   : > { %1102 = vst [vmem:[#allocation2 + $0x8] sm:$0xff] %v1090_v55  ;;  %v1258_v63 = vpack.c.bf16 %v1090_v55, %v1476_v7  ;;  %v1236_v5 = vmul.f32 -1.442695, %v887_v59  ;;  %v893_v6 = vadd.f32 %v818_v2, %v252_v54  ;;  %v242_v55 = vld [vmem:[%s1450_s25 + $0x58] sm:$0xff] }
 0x248   : > { %1103 = vst [vmem:[#allocation2 + $0x10] sm:$0xff] %v1818_v58  ;;  %1326 = vpow2.f32 %v1235_v0  ;;  %v1241_v3 = vmul.f32 -1.442695, %v892_v1  ;;  %v265_v0 = vunpack.c.l.bf16 %v242_v55  ;;  %v266_v2 = vunpack.c.h.bf16 %v242_v55 }
 0x249   : > { %1148 = vst [vmem:[%s1445_s22] sm:$0xff] %v1258_v63  ;;  %1328 = vpow2.f32 %v1236_v5  ;;  %v1242_v11 = vmul.f32 -1.442695, %v893_v6 }
 0x24a   : > { %1330 = vpow2.f32 %v1241_v3 }
 0x24b   : > { %1332 = vpow2.f32 %v1242_v11  ;;  %v865_v7 = vpop.f32.mrb[8].mxu0  ;;  %v822_v17 = vpop.f32.mrb[4].mxu1 }
 0x24c   : > { %v888_v18 = vadd.f32 %v865_v7, %v247_v10  ;;  %v867_v19 = vpop.f32.mrb[9].mxu0  ;;  %v898_v21 = vadd.f32 %v822_v17, %v257_v8  ;;  %v824_v22 = vpop.f32.mrb[5].mxu1  ;;  %v1024_v7 = vld [vmem:[%s1872_s4 + $0x10] sm:$0xff] }
 0x24d   : > { %v889_v23 = vadd.f32 %v867_v19, %v248_v12  ;;  %v869_v24 = vpop.f32.mrb[10].mxu0  ;;  %v826_v27 = vpop.f32.mrb[6].mxu1  ;;  %v899_v36 = vadd.f32 %v824_v22, %v258_v26 }
 0x24e   : > { %v1237_v28 = vmul.f32 -1.442695, %v888_v18  ;;  %v894_v4 = vadd.f32 %v869_v24, %v253_v13  ;;  %v871_v25 = vpop.f32.mrb[11].mxu0  ;;  %v828_v29 = vpop.f32.mrb[7].mxu1  ;;  %v1247_v34 = vmul.f32 -1.442695, %v898_v21  ;;  %v904_v50 = vadd.f32 %v826_v27, %v263_v42 }
 0x24f   : > { %v1238_v15 = vmul.f32 -1.442695, %v889_v23  ;;  %v895_v31 = vadd.f32 %v871_v25, %v254_v14  ;;  %v1248_v30 = vmul.f32 -1.442695, %v899_v36  ;;  %v905_v20 = vadd.f32 %v828_v29, %v264_v44  ;;  %v1025_v18 = vld [vmem:[%s1872_s4 + $0x18] sm:$0xff]  ;;  %v1027_v36 = vld [vmem:[%s1872_s4 + $0x28] sm:$0xff] }
 0x250   : > { %1334 = vpow2.f32 %v1237_v28  ;;  %v1243_v33 = vmul.f32 -1.442695, %v894_v4 }
 0x251   : > { %1336 = vpow2.f32 %v1238_v15  ;;  %v1244_v35 = vmul.f32 -1.442695, %v895_v31 }
 0x252   : > { %v1327_v39 = vpop.eup %1326  ;;  %1338 = vpow2.f32 %v1243_v33 }
 0x253   : > { %v1329_v40 = vpop.eup %1328  ;;  %v928_v43 = vadd.f32 1.0, %v1327_v39  ;;  %1340 = vpow2.f32 %v1244_v35 }
 0x254   : > { %v1331_v45 = vpop.eup %1330  ;;  %v929_v46 = vadd.f32 1.0, %v1329_v40  ;;  %1342 = vpow2.f32 %v1247_v34  ;;  %v1026_v34 = vld [vmem:[%s1872_s4 + $0x20] sm:$0xff] }
 0x255   : > { %v1333_v48 = vpop.eup %1332  ;;  %1344 = vrcp.f32 %v928_v43  ;;  %v964_v16 = vadd.f32 1.0, %v1331_v45 }
 0x256   : > { %1346 = vrcp.f32 %v929_v46  ;;  %v965_v49 = vadd.f32 1.0, %v1333_v48 }
 0x257   : > { %1348 = vrcp.f32 %v964_v16  ;;  %v875_v52 = vpop.f32.mrb[8].mxu1  ;;  %v1074_v16 = vsub.s32 3, %v1802_v41 }
 0x258   : > { %1350 = vrcp.f32 %v965_v49  ;;  %v900_v53 = vadd.f32 %v875_v52, %v259_v47  ;;  %v877_v54 = vpop.f32.mrb[9].mxu1  ;;  %v1070_v47 = vsub.s32 2, %v1802_v41 }
 0x259   : > { %1352 = vpow2.f32 %v1248_v30  ;;  %v879_v56 = vpop.f32.mrb[10].mxu1  ;;  %v901_v60 = vadd.f32 %v877_v54, %v260_v51  ;;  %v1075_v54 = vrot.slane %v1811_v37, %v1074_v16 }
 0x25a   : > { %v1335_v57 = vpop.eup %1334  ;;  %1354 = vtanh.f32 %v904_v50  ;;  %v1249_v59 = vmul.f32 -1.442695, %v900_v53  ;;  %v881_v61 = vpop.f32.mrb[11].mxu1  ;;  %v906_v12 = vadd.f32 %v879_v56, %v265_v0  ;;  %v1071_v52 = vrot.slane %v1811_v37, %v1070_v47 }
 0x25b   : > { %v1337_v62 = vpop.eup %1336  ;;  %v930_v63 = vadd.f32 1.0, %v1335_v57  ;;  %1356 = vtanh.f32 %v905_v20  ;;  %v1250_v8 = vmul.f32 -1.442695, %v901_v60  ;;  %v907_v14 = vadd.f32 %v881_v61, %v266_v2 }
 0x25c   : > { %v1339_v1 = vpop.eup %1338  ;;  %v931_v6 = vadd.f32 1.0, %v1337_v62  ;;  %1358 = vpow2.f32 %v1249_v59  ;;  %v1078_v61 = vsub.s32 4, %v1802_v41 }
 0x25d   : > { %v1341_v5 = vpop.eup %1340  ;;  %v966_v9 = vadd.f32 1.0, %v1339_v1  ;;  %1360 = vrcp.f32 %v930_v63  ;;  %v1082_v63 = vsub.s32 5, %v1802_v41 }
 0x25e   : > { %v1343_v3 = vpop.eup %1342  ;;  %v967_v10 = vadd.f32 1.0, %v1341_v5  ;;  %v1079_v2 = vrot.slane %v1811_v37, %v1078_v61 }
 0x25f   : > { %v1345_v11 = vpop.eup %1344  ;;  %1362 = vrcp.f32 %v966_v9  ;;  %v1000_v23 = vadd.f32 1.0, %v1343_v3 }
 0x260   : > { %v1347_v13 = vpop.eup %1346  ;;  %1364 = vrcp.f32 %v967_v10 }
 0x261   : > { %v1349_v17 = vpop.eup %1348  ;;  %1366 = vrcp.f32 %v931_v6  ;;  %v1083_v6 = vrot.slane %v1811_v37, %v1082_v63 }
 0x262   : > { %v1351_v19 = vpop.eup %1350  ;;  %1368 = vpow2.f32 %v1250_v8  ;;  %v1030_v22 = vmul.f32 %v1349_v17, %v1024_v7 }
 0x263   : > { %v1353_v21 = vpop.eup %1352  ;;  %1370 = vtanh.f32 %v906_v12  ;;  %v1031_v26 = vmul.f32 %v1351_v19, %v1025_v18 }
 0x264   : > { %v1355_v24 = vpop.eup %1354  ;;  %v1001_v27 = vadd.f32 1.0, %v1353_v21  ;;  %1372 = vtanh.f32 %v907_v14 }
 0x265   : > { %v1357_v28 = vpop.eup %1356  ;;  %v1036_v4 = vmul.f32 %v1355_v24, %v1345_v11  ;;  %1374 = vrcp.f32 %v1000_v23  ;;  %v1115_v11 = vld [vmem:[#allocation2 + $0x38] sm:$0xff] }
 0x266   : > { %v1037_v25 = vmul.f32 %v1357_v28, %v1347_v13  ;;  %v1359_v29 = vpop.eup %1358  ;;  %1376 = vrcp.f32 %v1001_v27 }
 0x267   : > { %v1042_v15 = vadd.f32 %v1036_v4, %v1030_v22  ;;  %v1361_v31 = vpop.eup %1360  ;;  %v1002_v40 = vadd.f32 1.0, %v1359_v29 }
 0x268   : > { %v1043_v32 = vadd.f32 %v1037_v25, %v1031_v26 }
 0x269   : > { %v1363_v33 = vpop.eup %1362  ;;  %1378 = vtanh.f32 %v1042_v15  ;;  %1098 = vst [vmem:[%s1872_s4 + $0x10] sm:$0xff] %v1042_v15 }
 0x26a   : > { %v1365_v35 = vpop.eup %1364  ;;  %1380 = vtanh.f32 %v1043_v32  ;;  %1099 = vst [vmem:[%s1872_s4 + $0x18] sm:$0xff] %v1043_v32  ;;  %v1032_v42 = vmul.f32 %v1363_v33, %v1026_v34 }
 0x26b   : > { %v1367_v38 = vpop.eup %1366  ;;  %v1033_v44 = vmul.f32 %v1365_v35, %v1027_v36  ;;  %1382 = vrcp.f32 %v1002_v40 }
 0x26c   : > { %v1369_v39 = vpop.eup %1368 }
 0x26d   : > { %v1371_v43 = vpop.eup %1370  ;;  %v1003_v45 = vadd.f32 1.0, %v1369_v39 }
 0x26e   : > { %v1373_v46 = vpop.eup %1372  ;;  %v1038_v48 = vmul.f32 %v1371_v43, %v1361_v31 }
 0x26f   : > { %v1039_v30 = vmul.f32 %v1373_v46, %v1367_v38  ;;  %v1375_v50 = vpop.eup %1374  ;;  %1384 = vrcp.f32 %v1003_v45 }
 0x270   : > { %v1044_v49 = vadd.f32 %v1038_v48, %v1032_v42  ;;  %v1377_v20 = vpop.eup %1376 }
 0x271   : > { %v1045_v51 = vadd.f32 %v1039_v30, %v1033_v44 }
 0x272   : > { %1386 = vtanh.f32 %v1044_v49  ;;  %1100 = vst [vmem:[%s1872_s4 + $0x20] sm:$0xff] %v1044_v49 }
 0x273   : > { %v1379_v53 = vpop.eup %1378  ;;  %1388 = vtanh.f32 %v1045_v51  ;;  %1101 = vst [vmem:[%s1872_s4 + $0x28] sm:$0xff] %v1045_v51 }
 0x274   : > { %v1381_v55 = vpop.eup %1380  ;;  %v1054_v56 = vmul.f32 %v1379_v53, %v1375_v50 }
 0x275   : > { %v1055_v57 = vmul.f32 %v1381_v55, %v1377_v20  ;;  %v1383_v0 = vpop.eup %1382 }
 0x276   : > { %v1092_v59 = vmul.f32 %v1071_v52, %v1054_v56 }
 0x277   : > { %v1093_v60 = vmul.f32 %v1075_v54, %v1055_v57 }
 0x278   : > { %1104 = vst [vmem:[#allocation2 + $0x18] sm:$0xff] %v1092_v59  ;;  %v1259_v62 = vpack.c.bf16 %v1092_v59, %v1818_v58 }
 0x279   : > { %1105 = vst [vmem:[#allocation2 + $0x20] sm:$0xff] %v1093_v60  ;;  %v1385_v1 = vpop.eup %1384 }
 0x27a   : > { %1149 = vst [vmem:[%s1445_s22 + $0x8] sm:$0xff] %v1259_v62 }
 0x27c   : > { %v1387_v5 = vpop.eup %1386 }
 0x27d   : > { %v1389_v9 = vpop.eup %1388  ;;  %v1056_v3 = vmul.f32 %v1387_v5, %v1383_v0 }
 0x27e   : > { %v1057_v10 = vmul.f32 %v1389_v9, %v1385_v1 }
 0x27f   : > { %v1094_v8 = vmul.f32 %v1079_v2, %v1056_v3 }
 0x280   : > { %v1095_v12 = vmul.f32 %v1083_v6, %v1057_v10 }
 0x281   : > { %1106 = vst [vmem:[#allocation2 + $0x28] sm:$0xff] %v1094_v8  ;;  %v1260_v58 = vpack.c.bf16 %v1094_v8, %v1093_v60 }
 0x282   : > { %1107 = vst [vmem:[#allocation2 + $0x30] sm:$0xff] %v1095_v12  ;;  %v1261_v41 = vpack.c.bf16 %v1115_v11, %v1095_v12 }
 0x283   : > { %1150 = vst [vmem:[%s1445_s22 + $0x10] sm:$0xff] %v1260_v58 }
 0x284   : > { %1151 = vst [vmem:[%s1445_s22 + $0x18] sm:$0xff] %v1261_v41 }
 0x285 PF: > { %s15_s15 = sadd.s32 1, %s1396_s15  }
 0x286   : > { %p12_p5 = scmp.ge.s32.totalorder %s15_s15, 10  }
 0x288   :  { %14 = sbr.rel (!%p12_p5) target bundleno = 1 (0x1), region = 74 }

</bundles_post_ra>
